<compile_context>
chip_gen: v7x
topology: tpu7x:2x2x1
jax: 0.10.0
libtpu: 0.0.40
codegen_flags: <defaults>
</compile_context>

<pallas_src>
import numpy as np
import jax
import jax.numpy as jnp
from jax.experimental import pallas as pl
from jax.experimental.pallas import tpu as pltpu

# ----------------------- small deterministic config -----------------------
NUM_NODES  = 8
NUM_HIS    = 8           # encoder history length
NUM_PRED   = 8           # prediction horizon
BATCH      = 2
INPUT_DIM  = 2
RNN_UNITS  = 32
LATENT_DIM = 4
GEN_UNITS  = 32          # config.num_units
GEN_LAYERS = 1           # hidden gconv layers in ode_func_net
GCN_STEP   = 2           # Chebyshev diffusion steps
N_TRAJ     = 3           # n_traj_samples
OUTPUT_DIM = 1
NUM_SUPPORTS = 2
NUM_MATRICES = NUM_SUPPORTS * GCN_STEP + 1
DT = 1.0 / NUM_PRED      # time grid arange(num_pred)/num_pred -> constant dt
GATE_PAD = 128           # per-gate lane padding for the GRU (H=32 -> 128)
Z0_HID_REF = 50          # hiddens_to_z0 hidden width in the reference
Z0_HID_PAD = 64          # padded width used by the kernel
assert GEN_LAYERS == 1, "kernel instantiates exactly one hidden gconv layer"


# ----------------------- graph preprocessing (host, numpy) -----------------------
def build_adj(n):
    adj = np.zeros((n, n), np.float32)
    for i in range(n):
        adj[i, (i + 1) % n] = 1.0
        adj[(i + 1) % n, i] = 1.0
    return adj


def graph_grad_np(adj):
    n = adj.shape[0]
    num_edges = int((adj > 0.0).sum())
    g = np.zeros((n, num_edges), np.float32)
    e = 0
    for i in range(n):
        for j in range(n):
            if adj[i, j] == 0:
                continue
            g[i, e] = 1.0
            g[j, e] = -1.0
            e += 1
    return g


def random_walk_np(adj):
    d = adj.sum(1)
    d_inv = np.where(d > 0, 1.0 / np.maximum(d, 1e-12), 0.0)
    return (np.diag(d_inv) @ adj).astype(np.float32)


# ----------------------- the single fused Pallas kernel -----------------------
def stden_kernel(x_ref, wih_ref, whh_ref, bih_ref, bhh_ref,
                 w1_ref, b1_ref, invT_ref, w2_ref, b2_ref,
                 noise_ref, sup_ref, wth_ref, bth_ref, wout_ref, bout_ref,
                 decl_ref, decr_ref, out_ref):
    f32 = jnp.float32
    Hp = GATE_PAD
    T = NUM_HIS
    NSEQ = x_ref.shape[0] // T           # batch * num_edges
    D = LATENT_DIM

    # ---------------- encoder: GRU over time (gate slabs padded to 128 lanes) ----------------
    x = x_ref[...]                        # (T*NSEQ, 2)
    x_a = x[:, 0:1]                       # hoisted lane extractions (once, not per step)
    x_b = x[:, 1:2]
    w_ih = wih_ref[...]                   # (2, 3*Hp)
    w_hh = whh_ref[...]                   # (Hp, 3*Hp)
    b_ih = bih_ref[...]                   # (1, 3*Hp)
    b_hh = bhh_ref[...]                   # (1, 3*Hp)

    h = jnp.zeros((NSEQ, Hp), f32)
    for t in range(T):                    # fully unrolled; only h @ W_hh is serial MXU work
        lo, hi = t * NSEQ, (t + 1) * NSEQ
        # input projection on the VPU (Din=2): two broadcast multiply-adds, no MXU push
        gi = x_a[lo:hi] * w_ih[0:1, :] + x_b[lo:hi] * w_ih[1:2, :] + b_ih      # (NSEQ, 3*Hp)
        gh = jnp.dot(h, w_hh, preferred_element_type=f32) + b_hh               # (NSEQ, 3*Hp)
        r = jax.nn.sigmoid(gi[:, 0 * Hp:1 * Hp] + gh[:, 0 * Hp:1 * Hp])        # 128-lane slabs
        z = jax.nn.sigmoid(gi[:, 1 * Hp:2 * Hp] + gh[:, 1 * Hp:2 * Hp])
        n = jnp.tanh(gi[:, 2 * Hp:3 * Hp] + r * gh[:, 2 * Hp:3 * Hp])
        h = (1.0 - z) * n + z * h         # padded lanes stay exactly 0

    # ---------------- z0 head: (P @ last) @ W1 == P_blockdiag @ (last @ W1) ----------------
    v = jnp.dot(h, w1_ref[...], preferred_element_type=f32)                     # (B*E, K1p)
    h1 = jnp.tanh(jnp.dot(invT_ref[...], v, preferred_element_type=f32)
                  + b1_ref[...])                                                # (B*NN, K1p)
    zz = jnp.dot(h1, w2_ref[...], preferred_element_type=f32) + b2_ref[...]     # (B*NN, 2D)
    mean = zz[:, :D]
    std = jnp.abs(zz[:, D:])

    # ---------------- sample z0 in-kernel (pre-generated noise passed in) ----------------
    mean_t = jnp.concatenate([mean] * N_TRAJ, axis=0)                           # (Bp*NN, D)
    std_t = jnp.concatenate([std] * N_TRAJ, axis=0)
    y = noise_ref[...] * std_t + mean_t                                         # (Bp*NN, D)

    # ---------------- ODEFunc + fixed-step Euler ----------------
    S0 = sup_ref[0]                       # (Bp*NN, Bp*NN) block-diagonal supports
    S1 = sup_ref[1]
    w_th = wth_ref[...]                   # (M*D, D+U)  theta | hidden gconv fused on out axis
    b_th = bth_ref[...]                   # (1, D+U)    = [latent bias (init 1.0) | units bias 0.0]
    w_out = wout_ref[...]                 # (M*U, D)
    b_out = bout_ref[...]                 # (1, D)      shared latent bias (LayerParams quirk)

    def cheb_cat(xv):
        # Chebyshev diffusion features, matrix-major along the feature axis; x0/x1 carry over
        # across supports exactly like the reference _gconv.
        feats = [xv]
        x0 = xv
        x1 = xv
        for S in (S0, S1):
            x1 = jnp.dot(S, x0, preferred_element_type=f32)
            feats.append(x1)
            for _k in range(2, GCN_STEP + 1):
                x2 = 2.0 * jnp.dot(S, x1, preferred_element_type=f32) - x0
                feats.append(x2)
                x1, x0 = x2, x1
        return jnp.concatenate(feats, axis=-1)

    def ode_grad(yv):
        fd = cheb_cat(yv)                                                       # (Bp*NN, M*D)
        hh = jnp.dot(fd, w_th, preferred_element_type=f32) + b_th               # fused theta+hidden
        theta = jax.nn.sigmoid(hh[:, :D])                                       # bias_start = 1.0
        c = jnp.tanh(hh[:, D:])                                                 # bias_start = 0.0
        fu = cheb_cat(c)                                                        # (Bp*NN, M*U)
        c = jnp.tanh(jnp.dot(fu, w_out, preferred_element_type=f32) + b_out)    # (Bp*NN, D)
        return -(theta * c)

    ys = [y]
    for _ in range(NUM_PRED - 1):         # ODE function evaluated exactly NUM_PRED-1 times
        y = y + DT * ode_grad(y)
        ys.append(y)

    # ---------------- decoder hoisted out of the Euler chain: two matmuls, one store ----------
    ybig = jnp.concatenate(ys, axis=-1)                                         # (Bp*NN, P*D)
    yd = jnp.dot(ybig, decr_ref[...], preferred_element_type=f32)               # (Bp*NN, P) latent-mean
    out = jnp.dot(decl_ref[...], yd, preferred_element_type=f32)                # (B*E, P)  traj-mean @ G
    out_ref[...] = out                                                          # single slab store


# ----------------------- operand preparation (host, once) -----------------------
def prepare_operands(params, consts):
    H, Hp, D, U, M = RNN_UNITS, GATE_PAD, LATENT_DIM, GEN_UNITS, NUM_MATRICES
    B, NN = BATCH, NUM_NODES
    Bp = N_TRAJ * B
    f32 = jnp.float32

    def pad_gate_cols(w):
        # (..., 3H) -> (..., 3Hp) with each gate slab at a 128-lane boundary
        parts = []
        for g in range(3):
            blk = w[..., g * H:(g + 1) * H]
            pad = [(0, 0)] * (blk.ndim - 1) + [(0, Hp - H)]
            parts.append(jnp.pad(blk, pad))
        return jnp.concatenate(parts, axis=-1)

    w_ih = pad_gate_cols(params['w_ih'])                                        # (2, 3Hp)
    w_hh = jnp.pad(pad_gate_cols(params['w_hh']), ((0, Hp - H), (0, 0)))        # (Hp, 3Hp)
    b_ih = pad_gate_cols(params['b_ih'])                                        # (1, 3Hp)
    b_hh = pad_gate_cols(params['b_hh'])                                        # (1, 3Hp)

    K1, K1p = Z0_HID_REF, Z0_HID_PAD
    w1 = jnp.pad(params['w1_z0'], ((0, Hp - H), (0, K1p - K1)))                 # (Hp, K1p)
    b1 = jnp.pad(params['b1_z0'], ((0, 0), (0, K1p - K1)))                      # (1, K1p)
    w2 = jnp.pad(params['w2_z0'], ((0, K1p - K1), (0, 0)))                      # (K1p, 2D)
    b2 = params['b2_z0']                                                        # (1, 2D)

    # block-diagonal inverse-gradient projection over the batch
    invT_bd = jnp.kron(jnp.eye(B, dtype=f32), consts['invT'])                   # (B*NN, B*E)

    # block-diagonal supports over Bp = n_traj * batch
    sup_bd = jnp.stack([jnp.kron(jnp.eye(Bp, dtype=f32), consts['supports'][s])
                        for s in range(NUM_SUPPORTS)])                          # (2, Bp*NN, Bp*NN)

    # theta-gconv and hidden-gconv fused along the output axis; flatten (M, F, O) -> (M*F, O)
    w_th = jnp.concatenate([params['wt_g'], params['w1_g']], axis=-1).reshape(M * D, D + U)
    b_th = jnp.concatenate([params['bt_g'], params['bh_g']]).reshape(1, D + U)
    w_out = params['w2_g'].reshape(M * U, D)
    b_out = params['bt_g'].reshape(1, D)    # shared latent-dim bias (LayerParams cache quirk)

    # decoder folded into two constant matrices: latent-mean (right) / traj-mean + graph grad (left)
    dec_r = jnp.kron(jnp.eye(NUM_PRED, dtype=f32),
                     jnp.ones((D, 1), f32) / D)                                 # (P*D, P)
    G = consts['grad_g']                                                        # (NN, E)
    dec_l = jnp.kron(jnp.ones((1, N_TRAJ), f32) / N_TRAJ,
                     jnp.kron(jnp.eye(B, dtype=f32), G.T))                      # (B*E, Bp*NN)

    return dict(w_ih=w_ih, w_hh=w_hh, b_ih=b_ih, b_hh=b_hh,
                w1=w1, b1=b1, invT_bd=invT_bd, w2=w2, b2=b2,
                sup_bd=sup_bd, w_th=w_th, b_th=b_th, w_out=w_out, b_out=b_out,
                dec_l=dec_l, dec_r=dec_r)


# ----------------------- pallas_call wrapper -----------------------
def run_stden_kernel(ops, x_flat, noise, num_edges):
    n_in = 18
    vmem_spec = pl.BlockSpec(memory_space=pltpu.MemorySpace.VMEM)
    out = pl.pallas_call(
        stden_kernel,
        out_shape=jax.ShapeDtypeStruct((BATCH * num_edges, NUM_PRED), jnp.float32),
        in_specs=[vmem_spec] * n_in,
        out_specs=vmem_spec,
    )(x_flat, ops['w_ih'], ops['w_hh'], ops['b_ih'], ops['b_hh'],
      ops['w1'], ops['b1'], ops['invT_bd'], ops['w2'], ops['b2'],
      noise, ops['sup_bd'], ops['w_th'], ops['b_th'], ops['w_out'], ops['b_out'],
      ops['dec_l'], ops['dec_r'])
    return out


# ----------------------- full STDEN forward (single fused kernel) -----------------------
def stden_forward(inputs, params, consts, noise_key):
    """inputs: (num_his, batch, num_edges*input_dim) -> (num_pred, batch, num_edges*output_dim)."""
    T, B, _ = inputs.shape
    E, NN, D = consts['num_edges'], NUM_NODES, LATENT_DIM

    # encoder input: per-edge sequences, time-major, flattened rows (t, b, e)
    x_flat = inputs.reshape(T, B, E, INPUT_DIM).reshape(T * B * E, INPUT_DIM)

    # pre-generated z0 sampling noise, one copy per trajectory sample, rows (traj, b, n)
    noise = jax.random.normal(noise_key, (N_TRAJ * B * NN, D), jnp.float32)

    ops = prepare_operands(params, consts)
    out_cols = run_stden_kernel(ops, x_flat, noise, E)          # (B*E, NUM_PRED)

    outputs = out_cols.T.reshape(NUM_PRED, B, E * OUTPUT_DIM)   # wrapper-side layout plumbing only
    nfe = NUM_PRED - 1                                          # Euler fixed-grid evaluations
    return outputs, (nfe, 0.0)


# ----------------------- parameter init (deterministic, synthetic) -----------------------
def init_params(key):
    ks = jax.random.split(key, 9)

    def xavier(k, shape, fan_in, fan_out):
        std = np.sqrt(2.0 / (fan_in + fan_out)).astype(np.float32)
        return std * jax.random.normal(k, shape, jnp.float32)

    M, D, U, H = NUM_MATRICES, LATENT_DIM, GEN_UNITS, RNN_UNITS
    return dict(
        # GRU (gate order r,z,n), stored transposed for right-multiplication
        w_ih=0.1 * jax.random.normal(ks[0], (INPUT_DIM, 3 * H), jnp.float32),
        w_hh=0.1 * jax.random.normal(ks[1], (H, 3 * H), jnp.float32),
        b_ih=0.1 * jax.random.normal(ks[2], (1, 3 * H), jnp.float32),
        b_hh=0.1 * jax.random.normal(ks[3], (1, 3 * H), jnp.float32),
        # hiddens_to_z0: Linear(H,50) Tanh Linear(50, 2*D) -- normal(0,0.1), zero bias
        w1_z0=0.1 * jax.random.normal(ks[4], (H, Z0_HID_REF), jnp.float32),
        b1_z0=jnp.zeros((1, Z0_HID_REF), jnp.float32),
        w2_z0=0.1 * jax.random.normal(ks[5], (Z0_HID_REF, 2 * D), jnp.float32),
        b2_z0=jnp.zeros((1, 2 * D), jnp.float32),
        # gconv weights, parametrized per Chebyshev matrix: W[m] is (F_in, F_out)
        wt_g=xavier(ks[6], (M, D, D), D * M, D),
        w1_g=xavier(ks[7], (M, D, U), D * M, U),
        w2_g=xavier(ks[8], (M, U, D), U * M, D),
        # learned gconv biases (LayerParams caches by length: latent-dim bias init 1.0 is shared
        # by the theta gconv and the output gconv; num_units bias init 0.0 is the hidden gconv's)
        bt_g=jnp.ones((LATENT_DIM,), jnp.float32),
        bh_g=jnp.zeros((GEN_UNITS,), jnp.float32),
    )


def build_consts():
    adj = build_adj(NUM_NODES)
    grad_g = graph_grad_np(adj)                              # (NN, E)
    num_edges = grad_g.shape[1]
    inv = grad_g.T.copy()                                    # (E, NN)
    inv[inv != 0.0] = 0.5
    invT = inv.T.copy()                                      # (NN, E) transposed inv_grad
    supports = np.stack([random_walk_np(adj).T,
                         random_walk_np(adj.T).T], axis=0)   # (2, NN, NN), dense
    return dict(
        num_edges=num_edges,
        grad_g=jnp.asarray(grad_g),
        invT=jnp.asarray(invT),
        supports=jnp.asarray(supports),
    )


# ----------------------- main -----------------------
if __name__ == "__main__":
    key = jax.random.PRNGKey(0)
    k_param, k_in, k_noise = jax.random.split(key, 3)

    consts = build_consts()
    params = init_params(k_param)
    num_edges = consts['num_edges']

    inputs = jax.random.normal(k_in, (NUM_HIS, BATCH, num_edges * INPUT_DIM), jnp.float32)

    outputs, fe = stden_forward(inputs, params, consts, k_noise)
    outputs = jax.block_until_ready(outputs)

    assert outputs.shape == (NUM_PRED, BATCH, num_edges * OUTPUT_DIM), outputs.shape
    assert bool(jnp.all(jnp.isfinite(outputs)))
    print("KERNEL_OK")
</pallas_src>

<mosaic_0001>
module attributes {stable_mosaic.version = 11 : i64} {
  func.func @stden_kernel(%arg0: memref<256x2xf32, #tpu.memory_space<vmem>>, %arg1: memref<2x384xf32, #tpu.memory_space<vmem>>, %arg2: memref<128x384xf32, #tpu.memory_space<vmem>>, %arg3: memref<1x384xf32, #tpu.memory_space<vmem>>, %arg4: memref<1x384xf32, #tpu.memory_space<vmem>>, %arg5: memref<128x64xf32, #tpu.memory_space<vmem>>, %arg6: memref<1x64xf32, #tpu.memory_space<vmem>>, %arg7: memref<16x32xf32, #tpu.memory_space<vmem>>, %arg8: memref<64x8xf32, #tpu.memory_space<vmem>>, %arg9: memref<1x8xf32, #tpu.memory_space<vmem>>, %arg10: memref<48x4xf32, #tpu.memory_space<vmem>>, %arg11: memref<2x48x48xf32, #tpu.memory_space<vmem>>, %arg12: memref<20x36xf32, #tpu.memory_space<vmem>>, %arg13: memref<1x36xf32, #tpu.memory_space<vmem>>, %arg14: memref<160x4xf32, #tpu.memory_space<vmem>>, %arg15: memref<1x4xf32, #tpu.memory_space<vmem>>, %arg16: memref<32x48xf32, #tpu.memory_space<vmem>>, %arg17: memref<32x8xf32, #tpu.memory_space<vmem>>, %arg18: memref<32x8xf32, #tpu.memory_space<vmem>>) attributes {dimension_semantics = [], scalar_prefetch = 0 : i64, scratch_operands = 0 : i64, tpu.core_type = #tpu.core_type<tc>} {
    %c0 = arith.constant 0 : index
    %c0_0 = arith.constant 0 : index
    %0 = vector.load %arg0[%c0, %c0_0] : memref<256x2xf32, #tpu.memory_space<vmem>>, vector<256x2xf32>
    %1 = vector.extract_strided_slice %0 {offsets = [0, 0], sizes = [256, 1], strides = [1, 1]} : vector<256x2xf32> to vector<256x1xf32>
    %2 = vector.extract_strided_slice %0 {offsets = [0, 1], sizes = [256, 1], strides = [1, 1]} : vector<256x2xf32> to vector<256x1xf32>
    %c0_1 = arith.constant 0 : index
    %c0_2 = arith.constant 0 : index
    %3 = vector.load %arg1[%c0_1, %c0_2] : memref<2x384xf32, #tpu.memory_space<vmem>>, vector<2x384xf32>
    %c0_3 = arith.constant 0 : index
    %c0_4 = arith.constant 0 : index
    %4 = vector.load %arg2[%c0_3, %c0_4] : memref<128x384xf32, #tpu.memory_space<vmem>>, vector<128x384xf32>
    %c0_5 = arith.constant 0 : index
    %c0_6 = arith.constant 0 : index
    %5 = vector.load %arg3[%c0_5, %c0_6] : memref<1x384xf32, #tpu.memory_space<vmem>>, vector<1x384xf32>
    %c0_7 = arith.constant 0 : index
    %c0_8 = arith.constant 0 : index
    %6 = vector.load %arg4[%c0_7, %c0_8] : memref<1x384xf32, #tpu.memory_space<vmem>>, vector<1x384xf32>
    %cst = arith.constant 0.000000e+00 : f32
    %7 = vector.broadcast %cst : f32 to vector<32x128xf32>
    %8 = vector.extract_strided_slice %1 {offsets = [0, 0], sizes = [32, 1], strides = [1, 1]} : vector<256x1xf32> to vector<32x1xf32>
    %9 = vector.extract_strided_slice %3 {offsets = [0, 0], sizes = [1, 384], strides = [1, 1]} : vector<2x384xf32> to vector<1x384xf32>
    %10 = vector.broadcast %8 : vector<32x1xf32> to vector<32x384xf32>
    %11 = vector.broadcast %9 : vector<1x384xf32> to vector<32x384xf32>
    %12 = arith.mulf %10, %11 : vector<32x384xf32>
    %13 = vector.extract_strided_slice %2 {offsets = [0, 0], sizes = [32, 1], strides = [1, 1]} : vector<256x1xf32> to vector<32x1xf32>
    %14 = vector.extract_strided_slice %3 {offsets = [1, 0], sizes = [1, 384], strides = [1, 1]} : vector<2x384xf32> to vector<1x384xf32>
    %15 = vector.broadcast %13 : vector<32x1xf32> to vector<32x384xf32>
    %16 = vector.broadcast %14 : vector<1x384xf32> to vector<32x384xf32>
    %17 = arith.mulf %15, %16 : vector<32x384xf32>
    %18 = arith.addf %12, %17 : vector<32x384xf32>
    %19 = vector.broadcast %5 : vector<1x384xf32> to vector<32x384xf32>
    %20 = arith.addf %18, %19 : vector<32x384xf32>
    %cst_9 = arith.constant dense<0.000000e+00> : vector<32x384xf32>
    %21 = tpu.matmul %7, %4, %cst_9 {dimension_numbers = #tpu.dot_dimension_numbers<[1], [0], [0], [1], [0, 0, 1, 1], [], []>} : vector<32x128xf32>, vector<128x384xf32>, vector<32x384xf32> -> vector<32x384xf32>
    %22 = vector.broadcast %6 : vector<1x384xf32> to vector<32x384xf32>
    %23 = arith.addf %21, %22 : vector<32x384xf32>
    %24 = vector.extract_strided_slice %20 {offsets = [0, 0], sizes = [32, 128], strides = [1, 1]} : vector<32x384xf32> to vector<32x128xf32>
    %25 = vector.extract_strided_slice %23 {offsets = [0, 0], sizes = [32, 128], strides = [1, 1]} : vector<32x384xf32> to vector<32x128xf32>
    %26 = arith.addf %24, %25 : vector<32x128xf32>
    %27 = arith.negf %26 : vector<32x128xf32>
    %28 = math.exp %27 : vector<32x128xf32>
    %cst_10 = arith.constant 1.000000e+00 : f32
    %29 = vector.broadcast %cst_10 : f32 to vector<32x128xf32>
    %30 = arith.addf %29, %28 : vector<32x128xf32>
    %31 = arith.divf %29, %30 : vector<32x128xf32>
    %32 = vector.extract_strided_slice %20 {offsets = [0, 128], sizes = [32, 128], strides = [1, 1]} : vector<32x384xf32> to vector<32x128xf32>
    %33 = vector.extract_strided_slice %23 {offsets = [0, 128], sizes = [32, 128], strides = [1, 1]} : vector<32x384xf32> to vector<32x128xf32>
    %34 = arith.addf %32, %33 : vector<32x128xf32>
    %35 = arith.negf %34 : vector<32x128xf32>
    %36 = math.exp %35 : vector<32x128xf32>
    %cst_11 = arith.constant 1.000000e+00 : f32
    %37 = vector.broadcast %cst_11 : f32 to vector<32x128xf32>
    %38 = arith.addf %37, %36 : vector<32x128xf32>
    %39 = arith.divf %37, %38 : vector<32x128xf32>
    %40 = vector.extract_strided_slice %20 {offsets = [0, 256], sizes = [32, 128], strides = [1, 1]} : vector<32x384xf32> to vector<32x128xf32>
    %41 = vector.extract_strided_slice %23 {offsets = [0, 256], sizes = [32, 128], strides = [1, 1]} : vector<32x384xf32> to vector<32x128xf32>
    %42 = arith.mulf %31, %41 : vector<32x128xf32>
    %43 = arith.addf %40, %42 : vector<32x128xf32>
    %44 = math.tanh %43 : vector<32x128xf32>
    %cst_12 = arith.constant 1.000000e+00 : f32
    %45 = vector.broadcast %cst_12 : f32 to vector<32x128xf32>
    %46 = arith.subf %45, %39 : vector<32x128xf32>
    %47 = arith.mulf %46, %44 : vector<32x128xf32>
    %48 = arith.mulf %39, %7 : vector<32x128xf32>
    %49 = arith.addf %47, %48 : vector<32x128xf32>
    %50 = vector.extract_strided_slice %1 {offsets = [32, 0], sizes = [32, 1], strides = [1, 1]} : vector<256x1xf32> to vector<32x1xf32>
    %51 = vector.extract_strided_slice %3 {offsets = [0, 0], sizes = [1, 384], strides = [1, 1]} : vector<2x384xf32> to vector<1x384xf32>
    %52 = vector.broadcast %50 : vector<32x1xf32> to vector<32x384xf32>
    %53 = vector.broadcast %51 : vector<1x384xf32> to vector<32x384xf32>
    %54 = arith.mulf %52, %53 : vector<32x384xf32>
    %55 = vector.extract_strided_slice %2 {offsets = [32, 0], sizes = [32, 1], strides = [1, 1]} : vector<256x1xf32> to vector<32x1xf32>
    %56 = vector.extract_strided_slice %3 {offsets = [1, 0], sizes = [1, 384], strides = [1, 1]} : vector<2x384xf32> to vector<1x384xf32>
    %57 = vector.broadcast %55 : vector<32x1xf32> to vector<32x384xf32>
    %58 = vector.broadcast %56 : vector<1x384xf32> to vector<32x384xf32>
    %59 = arith.mulf %57, %58 : vector<32x384xf32>
    %60 = arith.addf %54, %59 : vector<32x384xf32>
    %61 = vector.broadcast %5 : vector<1x384xf32> to vector<32x384xf32>
    %62 = arith.addf %60, %61 : vector<32x384xf32>
    %cst_13 = arith.constant dense<0.000000e+00> : vector<32x384xf32>
    %63 = tpu.matmul %49, %4, %cst_13 {dimension_numbers = #tpu.dot_dimension_numbers<[1], [0], [0], [1], [0, 0, 1, 1], [], []>} : vector<32x128xf32>, vector<128x384xf32>, vector<32x384xf32> -> vector<32x384xf32>
    %64 = vector.broadcast %6 : vector<1x384xf32> to vector<32x384xf32>
    %65 = arith.addf %63, %64 : vector<32x384xf32>
    %66 = vector.extract_strided_slice %62 {offsets = [0, 0], sizes = [32, 128], strides = [1, 1]} : vector<32x384xf32> to vector<32x128xf32>
    %67 = vector.extract_strided_slice %65 {offsets = [0, 0], sizes = [32, 128], strides = [1, 1]} : vector<32x384xf32> to vector<32x128xf32>
    %68 = arith.addf %66, %67 : vector<32x128xf32>
    %69 = arith.negf %68 : vector<32x128xf32>
    %70 = math.exp %69 : vector<32x128xf32>
    %cst_14 = arith.constant 1.000000e+00 : f32
    %71 = vector.broadcast %cst_14 : f32 to vector<32x128xf32>
    %72 = arith.addf %71, %70 : vector<32x128xf32>
    %73 = arith.divf %71, %72 : vector<32x128xf32>
    %74 = vector.extract_strided_slice %62 {offsets = [0, 128], sizes = [32, 128], strides = [1, 1]} : vector<32x384xf32> to vector<32x128xf32>
    %75 = vector.extract_strided_slice %65 {offsets = [0, 128], sizes = [32, 128], strides = [1, 1]} : vector<32x384xf32> to vector<32x128xf32>
    %76 = arith.addf %74, %75 : vector<32x128xf32>
    %77 = arith.negf %76 : vector<32x128xf32>
    %78 = math.exp %77 : vector<32x128xf32>
    %cst_15 = arith.constant 1.000000e+00 : f32
    %79 = vector.broadcast %cst_15 : f32 to vector<32x128xf32>
    %80 = arith.addf %79, %78 : vector<32x128xf32>
    %81 = arith.divf %79, %80 : vector<32x128xf32>
    %82 = vector.extract_strided_slice %62 {offsets = [0, 256], sizes = [32, 128], strides = [1, 1]} : vector<32x384xf32> to vector<32x128xf32>
    %83 = vector.extract_strided_slice %65 {offsets = [0, 256], sizes = [32, 128], strides = [1, 1]} : vector<32x384xf32> to vector<32x128xf32>
    %84 = arith.mulf %73, %83 : vector<32x128xf32>
    %85 = arith.addf %82, %84 : vector<32x128xf32>
    %86 = math.tanh %85 : vector<32x128xf32>
    %cst_16 = arith.constant 1.000000e+00 : f32
    %87 = vector.broadcast %cst_16 : f32 to vector<32x128xf32>
    %88 = arith.subf %87, %81 : vector<32x128xf32>
    %89 = arith.mulf %88, %86 : vector<32x128xf32>
    %90 = arith.mulf %81, %49 : vector<32x128xf32>
    %91 = arith.addf %89, %90 : vector<32x128xf32>
    %92 = vector.extract_strided_slice %1 {offsets = [64, 0], sizes = [32, 1], strides = [1, 1]} : vector<256x1xf32> to vector<32x1xf32>
    %93 = vector.extract_strided_slice %3 {offsets = [0, 0], sizes = [1, 384], strides = [1, 1]} : vector<2x384xf32> to vector<1x384xf32>
    %94 = vector.broadcast %92 : vector<32x1xf32> to vector<32x384xf32>
    %95 = vector.broadcast %93 : vector<1x384xf32> to vector<32x384xf32>
    %96 = arith.mulf %94, %95 : vector<32x384xf32>
    %97 = vector.extract_strided_slice %2 {offsets = [64, 0], sizes = [32, 1], strides = [1, 1]} : vector<256x1xf32> to vector<32x1xf32>
    %98 = vector.extract_strided_slice %3 {offsets = [1, 0], sizes = [1, 384], strides = [1, 1]} : vector<2x384xf32> to vector<1x384xf32>
    %99 = vector.broadcast %97 : vector<32x1xf32> to vector<32x384xf32>
    %100 = vector.broadcast %98 : vector<1x384xf32> to vector<32x384xf32>
    %101 = arith.mulf %99, %100 : vector<32x384xf32>
    %102 = arith.addf %96, %101 : vector<32x384xf32>
    %103 = vector.broadcast %5 : vector<1x384xf32> to vector<32x384xf32>
    %104 = arith.addf %102, %103 : vector<32x384xf32>
    %cst_17 = arith.constant dense<0.000000e+00> : vector<32x384xf32>
    %105 = tpu.matmul %91, %4, %cst_17 {dimension_numbers = #tpu.dot_dimension_numbers<[1], [0], [0], [1], [0, 0, 1, 1], [], []>} : vector<32x128xf32>, vector<128x384xf32>, vector<32x384xf32> -> vector<32x384xf32>
    %106 = vector.broadcast %6 : vector<1x384xf32> to vector<32x384xf32>
    %107 = arith.addf %105, %106 : vector<32x384xf32>
    %108 = vector.extract_strided_slice %104 {offsets = [0, 0], sizes = [32, 128], strides = [1, 1]} : vector<32x384xf32> to vector<32x128xf32>
    %109 = vector.extract_strided_slice %107 {offsets = [0, 0], sizes = [32, 128], strides = [1, 1]} : vector<32x384xf32> to vector<32x128xf32>
    %110 = arith.addf %108, %109 : vector<32x128xf32>
    %111 = arith.negf %110 : vector<32x128xf32>
    %112 = math.exp %111 : vector<32x128xf32>
    %cst_18 = arith.constant 1.000000e+00 : f32
    %113 = vector.broadcast %cst_18 : f32 to vector<32x128xf32>
    %114 = arith.addf %113, %112 : vector<32x128xf32>
    %115 = arith.divf %113, %114 : vector<32x128xf32>
    %116 = vector.extract_strided_slice %104 {offsets = [0, 128], sizes = [32, 128], strides = [1, 1]} : vector<32x384xf32> to vector<32x128xf32>
    %117 = vector.extract_strided_slice %107 {offsets = [0, 128], sizes = [32, 128], strides = [1, 1]} : vector<32x384xf32> to vector<32x128xf32>
    %118 = arith.addf %116, %117 : vector<32x128xf32>
    %119 = arith.negf %118 : vector<32x128xf32>
    %120 = math.exp %119 : vector<32x128xf32>
    %cst_19 = arith.constant 1.000000e+00 : f32
    %121 = vector.broadcast %cst_19 : f32 to vector<32x128xf32>
    %122 = arith.addf %121, %120 : vector<32x128xf32>
    %123 = arith.divf %121, %122 : vector<32x128xf32>
    %124 = vector.extract_strided_slice %104 {offsets = [0, 256], sizes = [32, 128], strides = [1, 1]} : vector<32x384xf32> to vector<32x128xf32>
    %125 = vector.extract_strided_slice %107 {offsets = [0, 256], sizes = [32, 128], strides = [1, 1]} : vector<32x384xf32> to vector<32x128xf32>
    %126 = arith.mulf %115, %125 : vector<32x128xf32>
    %127 = arith.addf %124, %126 : vector<32x128xf32>
    %128 = math.tanh %127 : vector<32x128xf32>
    %cst_20 = arith.constant 1.000000e+00 : f32
    %129 = vector.broadcast %cst_20 : f32 to vector<32x128xf32>
    %130 = arith.subf %129, %123 : vector<32x128xf32>
    %131 = arith.mulf %130, %128 : vector<32x128xf32>
    %132 = arith.mulf %123, %91 : vector<32x128xf32>
    %133 = arith.addf %131, %132 : vector<32x128xf32>
    %134 = vector.extract_strided_slice %1 {offsets = [96, 0], sizes = [32, 1], strides = [1, 1]} : vector<256x1xf32> to vector<32x1xf32>
    %135 = vector.extract_strided_slice %3 {offsets = [0, 0], sizes = [1, 384], strides = [1, 1]} : vector<2x384xf32> to vector<1x384xf32>
    %136 = vector.broadcast %134 : vector<32x1xf32> to vector<32x384xf32>
    %137 = vector.broadcast %135 : vector<1x384xf32> to vector<32x384xf32>
    %138 = arith.mulf %136, %137 : vector<32x384xf32>
    %139 = vector.extract_strided_slice %2 {offsets = [96, 0], sizes = [32, 1], strides = [1, 1]} : vector<256x1xf32> to vector<32x1xf32>
    %140 = vector.extract_strided_slice %3 {offsets = [1, 0], sizes = [1, 384], strides = [1, 1]} : vector<2x384xf32> to vector<1x384xf32>
    %141 = vector.broadcast %139 : vector<32x1xf32> to vector<32x384xf32>
    %142 = vector.broadcast %140 : vector<1x384xf32> to vector<32x384xf32>
    %143 = arith.mulf %141, %142 : vector<32x384xf32>
    %144 = arith.addf %138, %143 : vector<32x384xf32>
    %145 = vector.broadcast %5 : vector<1x384xf32> to vector<32x384xf32>
    %146 = arith.addf %144, %145 : vector<32x384xf32>
    %cst_21 = arith.constant dense<0.000000e+00> : vector<32x384xf32>
    %147 = tpu.matmul %133, %4, %cst_21 {dimension_numbers = #tpu.dot_dimension_numbers<[1], [0], [0], [1], [0, 0, 1, 1], [], []>} : vector<32x128xf32>, vector<128x384xf32>, vector<32x384xf32> -> vector<32x384xf32>
    %148 = vector.broadcast %6 : vector<1x384xf32> to vector<32x384xf32>
    %149 = arith.addf %147, %148 : vector<32x384xf32>
    %150 = vector.extract_strided_slice %146 {offsets = [0, 0], sizes = [32, 128], strides = [1, 1]} : vector<32x384xf32> to vector<32x128xf32>
    %151 = vector.extract_strided_slice %149 {offsets = [0, 0], sizes = [32, 128], strides = [1, 1]} : vector<32x384xf32> to vector<32x128xf32>
    %152 = arith.addf %150, %151 : vector<32x128xf32>
    %153 = arith.negf %152 : vector<32x128xf32>
    %154 = math.exp %153 : vector<32x128xf32>
    %cst_22 = arith.constant 1.000000e+00 : f32
    %155 = vector.broadcast %cst_22 : f32 to vector<32x128xf32>
    %156 = arith.addf %155, %154 : vector<32x128xf32>
    %157 = arith.divf %155, %156 : vector<32x128xf32>
    %158 = vector.extract_strided_slice %146 {offsets = [0, 128], sizes = [32, 128], strides = [1, 1]} : vector<32x384xf32> to vector<32x128xf32>
    %159 = vector.extract_strided_slice %149 {offsets = [0, 128], sizes = [32, 128], strides = [1, 1]} : vector<32x384xf32> to vector<32x128xf32>
    %160 = arith.addf %158, %159 : vector<32x128xf32>
    %161 = arith.negf %160 : vector<32x128xf32>
    %162 = math.exp %161 : vector<32x128xf32>
    %cst_23 = arith.constant 1.000000e+00 : f32
    %163 = vector.broadcast %cst_23 : f32 to vector<32x128xf32>
    %164 = arith.addf %163, %162 : vector<32x128xf32>
    %165 = arith.divf %163, %164 : vector<32x128xf32>
    %166 = vector.extract_strided_slice %146 {offsets = [0, 256], sizes = [32, 128], strides = [1, 1]} : vector<32x384xf32> to vector<32x128xf32>
    %167 = vector.extract_strided_slice %149 {offsets = [0, 256], sizes = [32, 128], strides = [1, 1]} : vector<32x384xf32> to vector<32x128xf32>
    %168 = arith.mulf %157, %167 : vector<32x128xf32>
    %169 = arith.addf %166, %168 : vector<32x128xf32>
    %170 = math.tanh %169 : vector<32x128xf32>
    %cst_24 = arith.constant 1.000000e+00 : f32
    %171 = vector.broadcast %cst_24 : f32 to vector<32x128xf32>
    %172 = arith.subf %171, %165 : vector<32x128xf32>
    %173 = arith.mulf %172, %170 : vector<32x128xf32>
    %174 = arith.mulf %165, %133 : vector<32x128xf32>
    %175 = arith.addf %173, %174 : vector<32x128xf32>
    %176 = vector.extract_strided_slice %1 {offsets = [128, 0], sizes = [32, 1], strides = [1, 1]} : vector<256x1xf32> to vector<32x1xf32>
    %177 = vector.extract_strided_slice %3 {offsets = [0, 0], sizes = [1, 384], strides = [1, 1]} : vector<2x384xf32> to vector<1x384xf32>
    %178 = vector.broadcast %176 : vector<32x1xf32> to vector<32x384xf32>
    %179 = vector.broadcast %177 : vector<1x384xf32> to vector<32x384xf32>
    %180 = arith.mulf %178, %179 : vector<32x384xf32>
    %181 = vector.extract_strided_slice %2 {offsets = [128, 0], sizes = [32, 1], strides = [1, 1]} : vector<256x1xf32> to vector<32x1xf32>
    %182 = vector.extract_strided_slice %3 {offsets = [1, 0], sizes = [1, 384], strides = [1, 1]} : vector<2x384xf32> to vector<1x384xf32>
    %183 = vector.broadcast %181 : vector<32x1xf32> to vector<32x384xf32>
    %184 = vector.broadcast %182 : vector<1x384xf32> to vector<32x384xf32>
    %185 = arith.mulf %183, %184 : vector<32x384xf32>
    %186 = arith.addf %180, %185 : vector<32x384xf32>
    %187 = vector.broadcast %5 : vector<1x384xf32> to vector<32x384xf32>
    %188 = arith.addf %186, %187 : vector<32x384xf32>
    %cst_25 = arith.constant dense<0.000000e+00> : vector<32x384xf32>
    %189 = tpu.matmul %175, %4, %cst_25 {dimension_numbers = #tpu.dot_dimension_numbers<[1], [0], [0], [1], [0, 0, 1, 1], [], []>} : vector<32x128xf32>, vector<128x384xf32>, vector<32x384xf32> -> vector<32x384xf32>
    %190 = vector.broadcast %6 : vector<1x384xf32> to vector<32x384xf32>
    %191 = arith.addf %189, %190 : vector<32x384xf32>
    %192 = vector.extract_strided_slice %188 {offsets = [0, 0], sizes = [32, 128], strides = [1, 1]} : vector<32x384xf32> to vector<32x128xf32>
    %193 = vector.extract_strided_slice %191 {offsets = [0, 0], sizes = [32, 128], strides = [1, 1]} : vector<32x384xf32> to vector<32x128xf32>
    %194 = arith.addf %192, %193 : vector<32x128xf32>
    %195 = arith.negf %194 : vector<32x128xf32>
    %196 = math.exp %195 : vector<32x128xf32>
    %cst_26 = arith.constant 1.000000e+00 : f32
    %197 = vector.broadcast %cst_26 : f32 to vector<32x128xf32>
    %198 = arith.addf %197, %196 : vector<32x128xf32>
    %199 = arith.divf %197, %198 : vector<32x128xf32>
    %200 = vector.extract_strided_slice %188 {offsets = [0, 128], sizes = [32, 128], strides = [1, 1]} : vector<32x384xf32> to vector<32x128xf32>
    %201 = vector.extract_strided_slice %191 {offsets = [0, 128], sizes = [32, 128], strides = [1, 1]} : vector<32x384xf32> to vector<32x128xf32>
    %202 = arith.addf %200, %201 : vector<32x128xf32>
    %203 = arith.negf %202 : vector<32x128xf32>
    %204 = math.exp %203 : vector<32x128xf32>
    %cst_27 = arith.constant 1.000000e+00 : f32
    %205 = vector.broadcast %cst_27 : f32 to vector<32x128xf32>
    %206 = arith.addf %205, %204 : vector<32x128xf32>
    %207 = arith.divf %205, %206 : vector<32x128xf32>
    %208 = vector.extract_strided_slice %188 {offsets = [0, 256], sizes = [32, 128], strides = [1, 1]} : vector<32x384xf32> to vector<32x128xf32>
    %209 = vector.extract_strided_slice %191 {offsets = [0, 256], sizes = [32, 128], strides = [1, 1]} : vector<32x384xf32> to vector<32x128xf32>
    %210 = arith.mulf %199, %209 : vector<32x128xf32>
    %211 = arith.addf %208, %210 : vector<32x128xf32>
    %212 = math.tanh %211 : vector<32x128xf32>
    %cst_28 = arith.constant 1.000000e+00 : f32
    %213 = vector.broadcast %cst_28 : f32 to vector<32x128xf32>
    %214 = arith.subf %213, %207 : vector<32x128xf32>
    %215 = arith.mulf %214, %212 : vector<32x128xf32>
    %216 = arith.mulf %207, %175 : vector<32x128xf32>
    %217 = arith.addf %215, %216 : vector<32x128xf32>
    %218 = vector.extract_strided_slice %1 {offsets = [160, 0], sizes = [32, 1], strides = [1, 1]} : vector<256x1xf32> to vector<32x1xf32>
    %219 = vector.extract_strided_slice %3 {offsets = [0, 0], sizes = [1, 384], strides = [1, 1]} : vector<2x384xf32> to vector<1x384xf32>
    %220 = vector.broadcast %218 : vector<32x1xf32> to vector<32x384xf32>
    %221 = vector.broadcast %219 : vector<1x384xf32> to vector<32x384xf32>
    %222 = arith.mulf %220, %221 : vector<32x384xf32>
    %223 = vector.extract_strided_slice %2 {offsets = [160, 0], sizes = [32, 1], strides = [1, 1]} : vector<256x1xf32> to vector<32x1xf32>
    %224 = vector.extract_strided_slice %3 {offsets = [1, 0], sizes = [1, 384], strides = [1, 1]} : vector<2x384xf32> to vector<1x384xf32>
    %225 = vector.broadcast %223 : vector<32x1xf32> to vector<32x384xf32>
    %226 = vector.broadcast %224 : vector<1x384xf32> to vector<32x384xf32>
    %227 = arith.mulf %225, %226 : vector<32x384xf32>
    %228 = arith.addf %222, %227 : vector<32x384xf32>
    %229 = vector.broadcast %5 : vector<1x384xf32> to vector<32x384xf32>
    %230 = arith.addf %228, %229 : vector<32x384xf32>
    %cst_29 = arith.constant dense<0.000000e+00> : vector<32x384xf32>
    %231 = tpu.matmul %217, %4, %cst_29 {dimension_numbers = #tpu.dot_dimension_numbers<[1], [0], [0], [1], [0, 0, 1, 1], [], []>} : vector<32x128xf32>, vector<128x384xf32>, vector<32x384xf32> -> vector<32x384xf32>
    %232 = vector.broadcast %6 : vector<1x384xf32> to vector<32x384xf32>
    %233 = arith.addf %231, %232 : vector<32x384xf32>
    %234 = vector.extract_strided_slice %230 {offsets = [0, 0], sizes = [32, 128], strides = [1, 1]} : vector<32x384xf32> to vector<32x128xf32>
    %235 = vector.extract_strided_slice %233 {offsets = [0, 0], sizes = [32, 128], strides = [1, 1]} : vector<32x384xf32> to vector<32x128xf32>
    %236 = arith.addf %234, %235 : vector<32x128xf32>
    %237 = arith.negf %236 : vector<32x128xf32>
    %238 = math.exp %237 : vector<32x128xf32>
    %cst_30 = arith.constant 1.000000e+00 : f32
    %239 = vector.broadcast %cst_30 : f32 to vector<32x128xf32>
    %240 = arith.addf %239, %238 : vector<32x128xf32>
    %241 = arith.divf %239, %240 : vector<32x128xf32>
    %242 = vector.extract_strided_slice %230 {offsets = [0, 128], sizes = [32, 128], strides = [1, 1]} : vector<32x384xf32> to vector<32x128xf32>
    %243 = vector.extract_strided_slice %233 {offsets = [0, 128], sizes = [32, 128], strides = [1, 1]} : vector<32x384xf32> to vector<32x128xf32>
    %244 = arith.addf %242, %243 : vector<32x128xf32>
    %245 = arith.negf %244 : vector<32x128xf32>
    %246 = math.exp %245 : vector<32x128xf32>
    %cst_31 = arith.constant 1.000000e+00 : f32
    %247 = vector.broadcast %cst_31 : f32 to vector<32x128xf32>
    %248 = arith.addf %247, %246 : vector<32x128xf32>
    %249 = arith.divf %247, %248 : vector<32x128xf32>
    %250 = vector.extract_strided_slice %230 {offsets = [0, 256], sizes = [32, 128], strides = [1, 1]} : vector<32x384xf32> to vector<32x128xf32>
    %251 = vector.extract_strided_slice %233 {offsets = [0, 256], sizes = [32, 128], strides = [1, 1]} : vector<32x384xf32> to vector<32x128xf32>
    %252 = arith.mulf %241, %251 : vector<32x128xf32>
    %253 = arith.addf %250, %252 : vector<32x128xf32>
    %254 = math.tanh %253 : vector<32x128xf32>
    %cst_32 = arith.constant 1.000000e+00 : f32
    %255 = vector.broadcast %cst_32 : f32 to vector<32x128xf32>
    %256 = arith.subf %255, %249 : vector<32x128xf32>
    %257 = arith.mulf %256, %254 : vector<32x128xf32>
    %258 = arith.mulf %249, %217 : vector<32x128xf32>
    %259 = arith.addf %257, %258 : vector<32x128xf32>
    %260 = vector.extract_strided_slice %1 {offsets = [192, 0], sizes = [32, 1], strides = [1, 1]} : vector<256x1xf32> to vector<32x1xf32>
    %261 = vector.extract_strided_slice %3 {offsets = [0, 0], sizes = [1, 384], strides = [1, 1]} : vector<2x384xf32> to vector<1x384xf32>
    %262 = vector.broadcast %260 : vector<32x1xf32> to vector<32x384xf32>
    %263 = vector.broadcast %261 : vector<1x384xf32> to vector<32x384xf32>
    %264 = arith.mulf %262, %263 : vector<32x384xf32>
    %265 = vector.extract_strided_slice %2 {offsets = [192, 0], sizes = [32, 1], strides = [1, 1]} : vector<256x1xf32> to vector<32x1xf32>
    %266 = vector.extract_strided_slice %3 {offsets = [1, 0], sizes = [1, 384], strides = [1, 1]} : vector<2x384xf32> to vector<1x384xf32>
    %267 = vector.broadcast %265 : vector<32x1xf32> to vector<32x384xf32>
    %268 = vector.broadcast %266 : vector<1x384xf32> to vector<32x384xf32>
    %269 = arith.mulf %267, %268 : vector<32x384xf32>
    %270 = arith.addf %264, %269 : vector<32x384xf32>
    %271 = vector.broadcast %5 : vector<1x384xf32> to vector<32x384xf32>
    %272 = arith.addf %270, %271 : vector<32x384xf32>
    %cst_33 = arith.constant dense<0.000000e+00> : vector<32x384xf32>
    %273 = tpu.matmul %259, %4, %cst_33 {dimension_numbers = #tpu.dot_dimension_numbers<[1], [0], [0], [1], [0, 0, 1, 1], [], []>} : vector<32x128xf32>, vector<128x384xf32>, vector<32x384xf32> -> vector<32x384xf32>
    %274 = vector.broadcast %6 : vector<1x384xf32> to vector<32x384xf32>
    %275 = arith.addf %273, %274 : vector<32x384xf32>
    %276 = vector.extract_strided_slice %272 {offsets = [0, 0], sizes = [32, 128], strides = [1, 1]} : vector<32x384xf32> to vector<32x128xf32>
    %277 = vector.extract_strided_slice %275 {offsets = [0, 0], sizes = [32, 128], strides = [1, 1]} : vector<32x384xf32> to vector<32x128xf32>
    %278 = arith.addf %276, %277 : vector<32x128xf32>
    %279 = arith.negf %278 : vector<32x128xf32>
    %280 = math.exp %279 : vector<32x128xf32>
    %cst_34 = arith.constant 1.000000e+00 : f32
    %281 = vector.broadcast %cst_34 : f32 to vector<32x128xf32>
    %282 = arith.addf %281, %280 : vector<32x128xf32>
    %283 = arith.divf %281, %282 : vector<32x128xf32>
    %284 = vector.extract_strided_slice %272 {offsets = [0, 128], sizes = [32, 128], strides = [1, 1]} : vector<32x384xf32> to vector<32x128xf32>
    %285 = vector.extract_strided_slice %275 {offsets = [0, 128], sizes = [32, 128], strides = [1, 1]} : vector<32x384xf32> to vector<32x128xf32>
    %286 = arith.addf %284, %285 : vector<32x128xf32>
    %287 = arith.negf %286 : vector<32x128xf32>
    %288 = math.exp %287 : vector<32x128xf32>
    %cst_35 = arith.constant 1.000000e+00 : f32
    %289 = vector.broadcast %cst_35 : f32 to vector<32x128xf32>
    %290 = arith.addf %289, %288 : vector<32x128xf32>
    %291 = arith.divf %289, %290 : vector<32x128xf32>
    %292 = vector.extract_strided_slice %272 {offsets = [0, 256], sizes = [32, 128], strides = [1, 1]} : vector<32x384xf32> to vector<32x128xf32>
    %293 = vector.extract_strided_slice %275 {offsets = [0, 256], sizes = [32, 128], strides = [1, 1]} : vector<32x384xf32> to vector<32x128xf32>
    %294 = arith.mulf %283, %293 : vector<32x128xf32>
    %295 = arith.addf %292, %294 : vector<32x128xf32>
    %296 = math.tanh %295 : vector<32x128xf32>
    %cst_36 = arith.constant 1.000000e+00 : f32
    %297 = vector.broadcast %cst_36 : f32 to vector<32x128xf32>
    %298 = arith.subf %297, %291 : vector<32x128xf32>
    %299 = arith.mulf %298, %296 : vector<32x128xf32>
    %300 = arith.mulf %291, %259 : vector<32x128xf32>
    %301 = arith.addf %299, %300 : vector<32x128xf32>
    %302 = vector.extract_strided_slice %1 {offsets = [224, 0], sizes = [32, 1], strides = [1, 1]} : vector<256x1xf32> to vector<32x1xf32>
    %303 = vector.extract_strided_slice %3 {offsets = [0, 0], sizes = [1, 384], strides = [1, 1]} : vector<2x384xf32> to vector<1x384xf32>
    %304 = vector.broadcast %302 : vector<32x1xf32> to vector<32x384xf32>
    %305 = vector.broadcast %303 : vector<1x384xf32> to vector<32x384xf32>
    %306 = arith.mulf %304, %305 : vector<32x384xf32>
    %307 = vector.extract_strided_slice %2 {offsets = [224, 0], sizes = [32, 1], strides = [1, 1]} : vector<256x1xf32> to vector<32x1xf32>
    %308 = vector.extract_strided_slice %3 {offsets = [1, 0], sizes = [1, 384], strides = [1, 1]} : vector<2x384xf32> to vector<1x384xf32>
    %309 = vector.broadcast %307 : vector<32x1xf32> to vector<32x384xf32>
    %310 = vector.broadcast %308 : vector<1x384xf32> to vector<32x384xf32>
    %311 = arith.mulf %309, %310 : vector<32x384xf32>
    %312 = arith.addf %306, %311 : vector<32x384xf32>
    %313 = vector.broadcast %5 : vector<1x384xf32> to vector<32x384xf32>
    %314 = arith.addf %312, %313 : vector<32x384xf32>
    %cst_37 = arith.constant dense<0.000000e+00> : vector<32x384xf32>
    %315 = tpu.matmul %301, %4, %cst_37 {dimension_numbers = #tpu.dot_dimension_numbers<[1], [0], [0], [1], [0, 0, 1, 1], [], []>} : vector<32x128xf32>, vector<128x384xf32>, vector<32x384xf32> -> vector<32x384xf32>
    %316 = vector.broadcast %6 : vector<1x384xf32> to vector<32x384xf32>
    %317 = arith.addf %315, %316 : vector<32x384xf32>
    %318 = vector.extract_strided_slice %314 {offsets = [0, 0], sizes = [32, 128], strides = [1, 1]} : vector<32x384xf32> to vector<32x128xf32>
    %319 = vector.extract_strided_slice %317 {offsets = [0, 0], sizes = [32, 128], strides = [1, 1]} : vector<32x384xf32> to vector<32x128xf32>
    %320 = arith.addf %318, %319 : vector<32x128xf32>
    %321 = arith.negf %320 : vector<32x128xf32>
    %322 = math.exp %321 : vector<32x128xf32>
    %cst_38 = arith.constant 1.000000e+00 : f32
    %323 = vector.broadcast %cst_38 : f32 to vector<32x128xf32>
    %324 = arith.addf %323, %322 : vector<32x128xf32>
    %325 = arith.divf %323, %324 : vector<32x128xf32>
    %326 = vector.extract_strided_slice %314 {offsets = [0, 128], sizes = [32, 128], strides = [1, 1]} : vector<32x384xf32> to vector<32x128xf32>
    %327 = vector.extract_strided_slice %317 {offsets = [0, 128], sizes = [32, 128], strides = [1, 1]} : vector<32x384xf32> to vector<32x128xf32>
    %328 = arith.addf %326, %327 : vector<32x128xf32>
    %329 = arith.negf %328 : vector<32x128xf32>
    %330 = math.exp %329 : vector<32x128xf32>
    %cst_39 = arith.constant 1.000000e+00 : f32
    %331 = vector.broadcast %cst_39 : f32 to vector<32x128xf32>
    %332 = arith.addf %331, %330 : vector<32x128xf32>
    %333 = arith.divf %331, %332 : vector<32x128xf32>
    %334 = vector.extract_strided_slice %314 {offsets = [0, 256], sizes = [32, 128], strides = [1, 1]} : vector<32x384xf32> to vector<32x128xf32>
    %335 = vector.extract_strided_slice %317 {offsets = [0, 256], sizes = [32, 128], strides = [1, 1]} : vector<32x384xf32> to vector<32x128xf32>
    %336 = arith.mulf %325, %335 : vector<32x128xf32>
    %337 = arith.addf %334, %336 : vector<32x128xf32>
    %338 = math.tanh %337 : vector<32x128xf32>
    %cst_40 = arith.constant 1.000000e+00 : f32
    %339 = vector.broadcast %cst_40 : f32 to vector<32x128xf32>
    %340 = arith.subf %339, %333 : vector<32x128xf32>
    %341 = arith.mulf %340, %338 : vector<32x128xf32>
    %342 = arith.mulf %333, %301 : vector<32x128xf32>
    %343 = arith.addf %341, %342 : vector<32x128xf32>
    %c0_41 = arith.constant 0 : index
    %c0_42 = arith.constant 0 : index
    %344 = vector.load %arg5[%c0_41, %c0_42] : memref<128x64xf32, #tpu.memory_space<vmem>>, vector<128x64xf32>
    %cst_43 = arith.constant dense<0.000000e+00> : vector<32x64xf32>
    %345 = tpu.matmul %343, %344, %cst_43 {dimension_numbers = #tpu.dot_dimension_numbers<[1], [0], [0], [1], [0, 0, 1, 1], [], []>} : vector<32x128xf32>, vector<128x64xf32>, vector<32x64xf32> -> vector<32x64xf32>
    %c0_44 = arith.constant 0 : index
    %c0_45 = arith.constant 0 : index
    %346 = vector.load %arg7[%c0_44, %c0_45] : memref<16x32xf32, #tpu.memory_space<vmem>>, vector<16x32xf32>
    %cst_46 = arith.constant dense<0.000000e+00> : vector<16x64xf32>
    %347 = tpu.matmul %346, %345, %cst_46 {dimension_numbers = #tpu.dot_dimension_numbers<[1], [0], [0], [1], [0, 0, 1, 1], [], []>} : vector<16x32xf32>, vector<32x64xf32>, vector<16x64xf32> -> vector<16x64xf32>
    %c0_47 = arith.constant 0 : index
    %c0_48 = arith.constant 0 : index
    %348 = vector.load %arg6[%c0_47, %c0_48] : memref<1x64xf32, #tpu.memory_space<vmem>>, vector<1x64xf32>
    %349 = vector.broadcast %348 : vector<1x64xf32> to vector<16x64xf32>
    %350 = arith.addf %347, %349 : vector<16x64xf32>
    %351 = math.tanh %350 : vector<16x64xf32>
    %c0_49 = arith.constant 0 : index
    %c0_50 = arith.constant 0 : index
    %352 = vector.load %arg8[%c0_49, %c0_50] : memref<64x8xf32, #tpu.memory_space<vmem>>, vector<64x8xf32>
    %cst_51 = arith.constant dense<0.000000e+00> : vector<16x8xf32>
    %353 = tpu.matmul %351, %352, %cst_51 {dimension_numbers = #tpu.dot_dimension_numbers<[1], [0], [0], [1], [0, 0, 1, 1], [], []>} : vector<16x64xf32>, vector<64x8xf32>, vector<16x8xf32> -> vector<16x8xf32>
    %c0_52 = arith.constant 0 : index
    %c0_53 = arith.constant 0 : index
    %354 = vector.load %arg9[%c0_52, %c0_53] : memref<1x8xf32, #tpu.memory_space<vmem>>, vector<1x8xf32>
    %355 = vector.broadcast %354 : vector<1x8xf32> to vector<16x8xf32>
    %356 = arith.addf %353, %355 : vector<16x8xf32>
    %357 = vector.extract_strided_slice %356 {offsets = [0, 0], sizes = [16, 4], strides = [1, 1]} : vector<16x8xf32> to vector<16x4xf32>
    %358 = vector.extract_strided_slice %356 {offsets = [0, 4], sizes = [16, 4], strides = [1, 1]} : vector<16x8xf32> to vector<16x4xf32>
    %359 = math.absf %358 : vector<16x4xf32>
    %360 = tpu.concatenate %357, %357, %357 in 0 : vector<16x4xf32>, vector<16x4xf32>, vector<16x4xf32> -> vector<48x4xf32>
    %361 = tpu.concatenate %359, %359, %359 in 0 : vector<16x4xf32>, vector<16x4xf32>, vector<16x4xf32> -> vector<48x4xf32>
    %c0_54 = arith.constant 0 : index
    %c0_55 = arith.constant 0 : index
    %362 = vector.load %arg10[%c0_54, %c0_55] : memref<48x4xf32, #tpu.memory_space<vmem>>, vector<48x4xf32>
    %363 = arith.mulf %362, %361 : vector<48x4xf32>
    %364 = arith.addf %363, %360 : vector<48x4xf32>
    %c0_56 = arith.constant 0 : index
    %c0_57 = arith.constant 0 : index
    %c0_58 = arith.constant 0 : index
    %365 = vector.load %arg11[%c0_56, %c0_57, %c0_58] : memref<2x48x48xf32, #tpu.memory_space<vmem>>, vector<1x48x48xf32>
    %366 = vector.shape_cast %365 : vector<1x48x48xf32> to vector<48x48xf32>
    %c1 = arith.constant 1 : index
    %c0_59 = arith.constant 0 : index
    %c0_60 = arith.constant 0 : index
    %367 = vector.load %arg11[%c1, %c0_59, %c0_60] : memref<2x48x48xf32, #tpu.memory_space<vmem>>, vector<1x48x48xf32>
    %368 = vector.shape_cast %367 : vector<1x48x48xf32> to vector<48x48xf32>
    %c0_61 = arith.constant 0 : index
    %c0_62 = arith.constant 0 : index
    %369 = vector.load %arg12[%c0_61, %c0_62] : memref<20x36xf32, #tpu.memory_space<vmem>>, vector<20x36xf32>
    %c0_63 = arith.constant 0 : index
    %c0_64 = arith.constant 0 : index
    %370 = vector.load %arg13[%c0_63, %c0_64] : memref<1x36xf32, #tpu.memory_space<vmem>>, vector<1x36xf32>
    %c0_65 = arith.constant 0 : index
    %c0_66 = arith.constant 0 : index
    %371 = vector.load %arg14[%c0_65, %c0_66] : memref<160x4xf32, #tpu.memory_space<vmem>>, vector<160x4xf32>
    %c0_67 = arith.constant 0 : index
    %c0_68 = arith.constant 0 : index
    %372 = vector.load %arg15[%c0_67, %c0_68] : memref<1x4xf32, #tpu.memory_space<vmem>>, vector<1x4xf32>
    %cst_69 = arith.constant dense<0.000000e+00> : vector<48x4xf32>
    %373 = tpu.matmul %366, %364, %cst_69 {dimension_numbers = #tpu.dot_dimension_numbers<[1], [0], [0], [1], [0, 0, 1, 1], [], []>} : vector<48x48xf32>, vector<48x4xf32>, vector<48x4xf32> -> vector<48x4xf32>
    %cst_70 = arith.constant dense<0.000000e+00> : vector<48x4xf32>
    %374 = tpu.matmul %366, %373, %cst_70 {dimension_numbers = #tpu.dot_dimension_numbers<[1], [0], [0], [1], [0, 0, 1, 1], [], []>} : vector<48x48xf32>, vector<48x4xf32>, vector<48x4xf32> -> vector<48x4xf32>
    %cst_71 = arith.constant 2.000000e+00 : f32
    %375 = vector.broadcast %cst_71 : f32 to vector<48x4xf32>
    %376 = arith.mulf %375, %374 : vector<48x4xf32>
    %377 = arith.subf %376, %364 : vector<48x4xf32>
    %cst_72 = arith.constant dense<0.000000e+00> : vector<48x4xf32>
    %378 = tpu.matmul %368, %373, %cst_72 {dimension_numbers = #tpu.dot_dimension_numbers<[1], [0], [0], [1], [0, 0, 1, 1], [], []>} : vector<48x48xf32>, vector<48x4xf32>, vector<48x4xf32> -> vector<48x4xf32>
    %cst_73 = arith.constant dense<0.000000e+00> : vector<48x4xf32>
    %379 = tpu.matmul %368, %378, %cst_73 {dimension_numbers = #tpu.dot_dimension_numbers<[1], [0], [0], [1], [0, 0, 1, 1], [], []>} : vector<48x48xf32>, vector<48x4xf32>, vector<48x4xf32> -> vector<48x4xf32>
    %cst_74 = arith.constant 2.000000e+00 : f32
    %380 = vector.broadcast %cst_74 : f32 to vector<48x4xf32>
    %381 = arith.mulf %380, %379 : vector<48x4xf32>
    %382 = arith.subf %381, %373 : vector<48x4xf32>
    %383 = tpu.concatenate %364, %373, %377, %378, %382 in 1 : vector<48x4xf32>, vector<48x4xf32>, vector<48x4xf32>, vector<48x4xf32>, vector<48x4xf32> -> vector<48x20xf32>
    %cst_75 = arith.constant dense<0.000000e+00> : vector<48x36xf32>
    %384 = tpu.matmul %383, %369, %cst_75 {dimension_numbers = #tpu.dot_dimension_numbers<[1], [0], [0], [1], [0, 0, 1, 1], [], []>} : vector<48x20xf32>, vector<20x36xf32>, vector<48x36xf32> -> vector<48x36xf32>
    %385 = vector.broadcast %370 : vector<1x36xf32> to vector<48x36xf32>
    %386 = arith.addf %384, %385 : vector<48x36xf32>
    %387 = vector.extract_strided_slice %386 {offsets = [0, 0], sizes = [48, 4], strides = [1, 1]} : vector<48x36xf32> to vector<48x4xf32>
    %388 = arith.negf %387 : vector<48x4xf32>
    %389 = math.exp %388 : vector<48x4xf32>
    %cst_76 = arith.constant 1.000000e+00 : f32
    %390 = vector.broadcast %cst_76 : f32 to vector<48x4xf32>
    %391 = arith.addf %390, %389 : vector<48x4xf32>
    %392 = arith.divf %390, %391 : vector<48x4xf32>
    %393 = vector.extract_strided_slice %386 {offsets = [0, 4], sizes = [48, 32], strides = [1, 1]} : vector<48x36xf32> to vector<48x32xf32>
    %394 = math.tanh %393 : vector<48x32xf32>
    %cst_77 = arith.constant dense<0.000000e+00> : vector<48x32xf32>
    %395 = tpu.matmul %366, %394, %cst_77 {dimension_numbers = #tpu.dot_dimension_numbers<[1], [0], [0], [1], [0, 0, 1, 1], [], []>} : vector<48x48xf32>, vector<48x32xf32>, vector<48x32xf32> -> vector<48x32xf32>
    %cst_78 = arith.constant dense<0.000000e+00> : vector<48x32xf32>
    %396 = tpu.matmul %366, %395, %cst_78 {dimension_numbers = #tpu.dot_dimension_numbers<[1], [0], [0], [1], [0, 0, 1, 1], [], []>} : vector<48x48xf32>, vector<48x32xf32>, vector<48x32xf32> -> vector<48x32xf32>
    %cst_79 = arith.constant 2.000000e+00 : f32
    %397 = vector.broadcast %cst_79 : f32 to vector<48x32xf32>
    %398 = arith.mulf %397, %396 : vector<48x32xf32>
    %399 = arith.subf %398, %394 : vector<48x32xf32>
    %cst_80 = arith.constant dense<0.000000e+00> : vector<48x32xf32>
    %400 = tpu.matmul %368, %395, %cst_80 {dimension_numbers = #tpu.dot_dimension_numbers<[1], [0], [0], [1], [0, 0, 1, 1], [], []>} : vector<48x48xf32>, vector<48x32xf32>, vector<48x32xf32> -> vector<48x32xf32>
    %cst_81 = arith.constant dense<0.000000e+00> : vector<48x32xf32>
    %401 = tpu.matmul %368, %400, %cst_81 {dimension_numbers = #tpu.dot_dimension_numbers<[1], [0], [0], [1], [0, 0, 1, 1], [], []>} : vector<48x48xf32>, vector<48x32xf32>, vector<48x32xf32> -> vector<48x32xf32>
    %cst_82 = arith.constant 2.000000e+00 : f32
    %402 = vector.broadcast %cst_82 : f32 to vector<48x32xf32>
    %403 = arith.mulf %402, %401 : vector<48x32xf32>
    %404 = arith.subf %403, %395 : vector<48x32xf32>
    %405 = tpu.concatenate %394, %395, %399, %400, %404 in 1 : vector<48x32xf32>, vector<48x32xf32>, vector<48x32xf32>, vector<48x32xf32>, vector<48x32xf32> -> vector<48x160xf32>
    %cst_83 = arith.constant dense<0.000000e+00> : vector<48x4xf32>
    %406 = tpu.matmul %405, %371, %cst_83 {dimension_numbers = #tpu.dot_dimension_numbers<[1], [0], [0], [1], [0, 0, 1, 1], [], []>} : vector<48x160xf32>, vector<160x4xf32>, vector<48x4xf32> -> vector<48x4xf32>
    %407 = vector.broadcast %372 : vector<1x4xf32> to vector<48x4xf32>
    %408 = arith.addf %406, %407 : vector<48x4xf32>
    %409 = math.tanh %408 : vector<48x4xf32>
    %410 = arith.mulf %392, %409 : vector<48x4xf32>
    %cst_84 = arith.constant 0.000000e+00 : f32
    %411 = vector.broadcast %cst_84 : f32 to vector<48x4xf32>
    %412 = arith.subf %411, %410 : vector<48x4xf32>
    %cst_85 = arith.constant 1.250000e-01 : f32
    %413 = vector.broadcast %cst_85 : f32 to vector<48x4xf32>
    %414 = arith.mulf %413, %412 : vector<48x4xf32>
    %415 = arith.addf %364, %414 : vector<48x4xf32>
    %cst_86 = arith.constant dense<0.000000e+00> : vector<48x4xf32>
    %416 = tpu.matmul %366, %415, %cst_86 {dimension_numbers = #tpu.dot_dimension_numbers<[1], [0], [0], [1], [0, 0, 1, 1], [], []>} : vector<48x48xf32>, vector<48x4xf32>, vector<48x4xf32> -> vector<48x4xf32>
    %cst_87 = arith.constant dense<0.000000e+00> : vector<48x4xf32>
    %417 = tpu.matmul %366, %416, %cst_87 {dimension_numbers = #tpu.dot_dimension_numbers<[1], [0], [0], [1], [0, 0, 1, 1], [], []>} : vector<48x48xf32>, vector<48x4xf32>, vector<48x4xf32> -> vector<48x4xf32>
    %cst_88 = arith.constant 2.000000e+00 : f32
    %418 = vector.broadcast %cst_88 : f32 to vector<48x4xf32>
    %419 = arith.mulf %418, %417 : vector<48x4xf32>
    %420 = arith.subf %419, %415 : vector<48x4xf32>
    %cst_89 = arith.constant dense<0.000000e+00> : vector<48x4xf32>
    %421 = tpu.matmul %368, %416, %cst_89 {dimension_numbers = #tpu.dot_dimension_numbers<[1], [0], [0], [1], [0, 0, 1, 1], [], []>} : vector<48x48xf32>, vector<48x4xf32>, vector<48x4xf32> -> vector<48x4xf32>
    %cst_90 = arith.constant dense<0.000000e+00> : vector<48x4xf32>
    %422 = tpu.matmul %368, %421, %cst_90 {dimension_numbers = #tpu.dot_dimension_numbers<[1], [0], [0], [1], [0, 0, 1, 1], [], []>} : vector<48x48xf32>, vector<48x4xf32>, vector<48x4xf32> -> vector<48x4xf32>
    %cst_91 = arith.constant 2.000000e+00 : f32
    %423 = vector.broadcast %cst_91 : f32 to vector<48x4xf32>
    %424 = arith.mulf %423, %422 : vector<48x4xf32>
    %425 = arith.subf %424, %416 : vector<48x4xf32>
    %426 = tpu.concatenate %415, %416, %420, %421, %425 in 1 : vector<48x4xf32>, vector<48x4xf32>, vector<48x4xf32>, vector<48x4xf32>, vector<48x4xf32> -> vector<48x20xf32>
    %cst_92 = arith.constant dense<0.000000e+00> : vector<48x36xf32>
    %427 = tpu.matmul %426, %369, %cst_92 {dimension_numbers = #tpu.dot_dimension_numbers<[1], [0], [0], [1], [0, 0, 1, 1], [], []>} : vector<48x20xf32>, vector<20x36xf32>, vector<48x36xf32> -> vector<48x36xf32>
    %428 = vector.broadcast %370 : vector<1x36xf32> to vector<48x36xf32>
    %429 = arith.addf %427, %428 : vector<48x36xf32>
    %430 = vector.extract_strided_slice %429 {offsets = [0, 0], sizes = [48, 4], strides = [1, 1]} : vector<48x36xf32> to vector<48x4xf32>
    %431 = arith.negf %430 : vector<48x4xf32>
    %432 = math.exp %431 : vector<48x4xf32>
    %cst_93 = arith.constant 1.000000e+00 : f32
    %433 = vector.broadcast %cst_93 : f32 to vector<48x4xf32>
    %434 = arith.addf %433, %432 : vector<48x4xf32>
    %435 = arith.divf %433, %434 : vector<48x4xf32>
    %436 = vector.extract_strided_slice %429 {offsets = [0, 4], sizes = [48, 32], strides = [1, 1]} : vector<48x36xf32> to vector<48x32xf32>
    %437 = math.tanh %436 : vector<48x32xf32>
    %cst_94 = arith.constant dense<0.000000e+00> : vector<48x32xf32>
    %438 = tpu.matmul %366, %437, %cst_94 {dimension_numbers = #tpu.dot_dimension_numbers<[1], [0], [0], [1], [0, 0, 1, 1], [], []>} : vector<48x48xf32>, vector<48x32xf32>, vector<48x32xf32> -> vector<48x32xf32>
    %cst_95 = arith.constant dense<0.000000e+00> : vector<48x32xf32>
    %439 = tpu.matmul %366, %438, %cst_95 {dimension_numbers = #tpu.dot_dimension_numbers<[1], [0], [0], [1], [0, 0, 1, 1], [], []>} : vector<48x48xf32>, vector<48x32xf32>, vector<48x32xf32> -> vector<48x32xf32>
    %cst_96 = arith.constant 2.000000e+00 : f32
    %440 = vector.broadcast %cst_96 : f32 to vector<48x32xf32>
    %441 = arith.mulf %440, %439 : vector<48x32xf32>
    %442 = arith.subf %441, %437 : vector<48x32xf32>
    %cst_97 = arith.constant dense<0.000000e+00> : vector<48x32xf32>
    %443 = tpu.matmul %368, %438, %cst_97 {dimension_numbers = #tpu.dot_dimension_numbers<[1], [0], [0], [1], [0, 0, 1, 1], [], []>} : vector<48x48xf32>, vector<48x32xf32>, vector<48x32xf32> -> vector<48x32xf32>
    %cst_98 = arith.constant dense<0.000000e+00> : vector<48x32xf32>
    %444 = tpu.matmul %368, %443, %cst_98 {dimension_numbers = #tpu.dot_dimension_numbers<[1], [0], [0], [1], [0, 0, 1, 1], [], []>} : vector<48x48xf32>, vector<48x32xf32>, vector<48x32xf32> -> vector<48x32xf32>
    %cst_99 = arith.constant 2.000000e+00 : f32
    %445 = vector.broadcast %cst_99 : f32 to vector<48x32xf32>
    %446 = arith.mulf %445, %444 : vector<48x32xf32>
    %447 = arith.subf %446, %438 : vector<48x32xf32>
    %448 = tpu.concatenate %437, %438, %442, %443, %447 in 1 : vector<48x32xf32>, vector<48x32xf32>, vector<48x32xf32>, vector<48x32xf32>, vector<48x32xf32> -> vector<48x160xf32>
    %cst_100 = arith.constant dense<0.000000e+00> : vector<48x4xf32>
    %449 = tpu.matmul %448, %371, %cst_100 {dimension_numbers = #tpu.dot_dimension_numbers<[1], [0], [0], [1], [0, 0, 1, 1], [], []>} : vector<48x160xf32>, vector<160x4xf32>, vector<48x4xf32> -> vector<48x4xf32>
    %450 = vector.broadcast %372 : vector<1x4xf32> to vector<48x4xf32>
    %451 = arith.addf %449, %450 : vector<48x4xf32>
    %452 = math.tanh %451 : vector<48x4xf32>
    %453 = arith.mulf %435, %452 : vector<48x4xf32>
    %cst_101 = arith.constant 0.000000e+00 : f32
    %454 = vector.broadcast %cst_101 : f32 to vector<48x4xf32>
    %455 = arith.subf %454, %453 : vector<48x4xf32>
    %cst_102 = arith.constant 1.250000e-01 : f32
    %456 = vector.broadcast %cst_102 : f32 to vector<48x4xf32>
    %457 = arith.mulf %456, %455 : vector<48x4xf32>
    %458 = arith.addf %415, %457 : vector<48x4xf32>
    %cst_103 = arith.constant dense<0.000000e+00> : vector<48x4xf32>
    %459 = tpu.matmul %366, %458, %cst_103 {dimension_numbers = #tpu.dot_dimension_numbers<[1], [0], [0], [1], [0, 0, 1, 1], [], []>} : vector<48x48xf32>, vector<48x4xf32>, vector<48x4xf32> -> vector<48x4xf32>
    %cst_104 = arith.constant dense<0.000000e+00> : vector<48x4xf32>
    %460 = tpu.matmul %366, %459, %cst_104 {dimension_numbers = #tpu.dot_dimension_numbers<[1], [0], [0], [1], [0, 0, 1, 1], [], []>} : vector<48x48xf32>, vector<48x4xf32>, vector<48x4xf32> -> vector<48x4xf32>
    %cst_105 = arith.constant 2.000000e+00 : f32
    %461 = vector.broadcast %cst_105 : f32 to vector<48x4xf32>
    %462 = arith.mulf %461, %460 : vector<48x4xf32>
    %463 = arith.subf %462, %458 : vector<48x4xf32>
    %cst_106 = arith.constant dense<0.000000e+00> : vector<48x4xf32>
    %464 = tpu.matmul %368, %459, %cst_106 {dimension_numbers = #tpu.dot_dimension_numbers<[1], [0], [0], [1], [0, 0, 1, 1], [], []>} : vector<48x48xf32>, vector<48x4xf32>, vector<48x4xf32> -> vector<48x4xf32>
    %cst_107 = arith.constant dense<0.000000e+00> : vector<48x4xf32>
    %465 = tpu.matmul %368, %464, %cst_107 {dimension_numbers = #tpu.dot_dimension_numbers<[1], [0], [0], [1], [0, 0, 1, 1], [], []>} : vector<48x48xf32>, vector<48x4xf32>, vector<48x4xf32> -> vector<48x4xf32>
    %cst_108 = arith.constant 2.000000e+00 : f32
    %466 = vector.broadcast %cst_108 : f32 to vector<48x4xf32>
    %467 = arith.mulf %466, %465 : vector<48x4xf32>
    %468 = arith.subf %467, %459 : vector<48x4xf32>
    %469 = tpu.concatenate %458, %459, %463, %464, %468 in 1 : vector<48x4xf32>, vector<48x4xf32>, vector<48x4xf32>, vector<48x4xf32>, vector<48x4xf32> -> vector<48x20xf32>
    %cst_109 = arith.constant dense<0.000000e+00> : vector<48x36xf32>
    %470 = tpu.matmul %469, %369, %cst_109 {dimension_numbers = #tpu.dot_dimension_numbers<[1], [0], [0], [1], [0, 0, 1, 1], [], []>} : vector<48x20xf32>, vector<20x36xf32>, vector<48x36xf32> -> vector<48x36xf32>
    %471 = vector.broadcast %370 : vector<1x36xf32> to vector<48x36xf32>
    %472 = arith.addf %470, %471 : vector<48x36xf32>
    %473 = vector.extract_strided_slice %472 {offsets = [0, 0], sizes = [48, 4], strides = [1, 1]} : vector<48x36xf32> to vector<48x4xf32>
    %474 = arith.negf %473 : vector<48x4xf32>
    %475 = math.exp %474 : vector<48x4xf32>
    %cst_110 = arith.constant 1.000000e+00 : f32
    %476 = vector.broadcast %cst_110 : f32 to vector<48x4xf32>
    %477 = arith.addf %476, %475 : vector<48x4xf32>
    %478 = arith.divf %476, %477 : vector<48x4xf32>
    %479 = vector.extract_strided_slice %472 {offsets = [0, 4], sizes = [48, 32], strides = [1, 1]} : vector<48x36xf32> to vector<48x32xf32>
    %480 = math.tanh %479 : vector<48x32xf32>
    %cst_111 = arith.constant dense<0.000000e+00> : vector<48x32xf32>
    %481 = tpu.matmul %366, %480, %cst_111 {dimension_numbers = #tpu.dot_dimension_numbers<[1], [0], [0], [1], [0, 0, 1, 1], [], []>} : vector<48x48xf32>, vector<48x32xf32>, vector<48x32xf32> -> vector<48x32xf32>
    %cst_112 = arith.constant dense<0.000000e+00> : vector<48x32xf32>
    %482 = tpu.matmul %366, %481, %cst_112 {dimension_numbers = #tpu.dot_dimension_numbers<[1], [0], [0], [1], [0, 0, 1, 1], [], []>} : vector<48x48xf32>, vector<48x32xf32>, vector<48x32xf32> -> vector<48x32xf32>
    %cst_113 = arith.constant 2.000000e+00 : f32
    %483 = vector.broadcast %cst_113 : f32 to vector<48x32xf32>
    %484 = arith.mulf %483, %482 : vector<48x32xf32>
    %485 = arith.subf %484, %480 : vector<48x32xf32>
    %cst_114 = arith.constant dense<0.000000e+00> : vector<48x32xf32>
    %486 = tpu.matmul %368, %481, %cst_114 {dimension_numbers = #tpu.dot_dimension_numbers<[1], [0], [0], [1], [0, 0, 1, 1], [], []>} : vector<48x48xf32>, vector<48x32xf32>, vector<48x32xf32> -> vector<48x32xf32>
    %cst_115 = arith.constant dense<0.000000e+00> : vector<48x32xf32>
    %487 = tpu.matmul %368, %486, %cst_115 {dimension_numbers = #tpu.dot_dimension_numbers<[1], [0], [0], [1], [0, 0, 1, 1], [], []>} : vector<48x48xf32>, vector<48x32xf32>, vector<48x32xf32> -> vector<48x32xf32>
    %cst_116 = arith.constant 2.000000e+00 : f32
    %488 = vector.broadcast %cst_116 : f32 to vector<48x32xf32>
    %489 = arith.mulf %488, %487 : vector<48x32xf32>
    %490 = arith.subf %489, %481 : vector<48x32xf32>
    %491 = tpu.concatenate %480, %481, %485, %486, %490 in 1 : vector<48x32xf32>, vector<48x32xf32>, vector<48x32xf32>, vector<48x32xf32>, vector<48x32xf32> -> vector<48x160xf32>
    %cst_117 = arith.constant dense<0.000000e+00> : vector<48x4xf32>
    %492 = tpu.matmul %491, %371, %cst_117 {dimension_numbers = #tpu.dot_dimension_numbers<[1], [0], [0], [1], [0, 0, 1, 1], [], []>} : vector<48x160xf32>, vector<160x4xf32>, vector<48x4xf32> -> vector<48x4xf32>
    %493 = vector.broadcast %372 : vector<1x4xf32> to vector<48x4xf32>
    %494 = arith.addf %492, %493 : vector<48x4xf32>
    %495 = math.tanh %494 : vector<48x4xf32>
    %496 = arith.mulf %478, %495 : vector<48x4xf32>
    %cst_118 = arith.constant 0.000000e+00 : f32
    %497 = vector.broadcast %cst_118 : f32 to vector<48x4xf32>
    %498 = arith.subf %497, %496 : vector<48x4xf32>
    %cst_119 = arith.constant 1.250000e-01 : f32
    %499 = vector.broadcast %cst_119 : f32 to vector<48x4xf32>
    %500 = arith.mulf %499, %498 : vector<48x4xf32>
    %501 = arith.addf %458, %500 : vector<48x4xf32>
    %cst_120 = arith.constant dense<0.000000e+00> : vector<48x4xf32>
    %502 = tpu.matmul %366, %501, %cst_120 {dimension_numbers = #tpu.dot_dimension_numbers<[1], [0], [0], [1], [0, 0, 1, 1], [], []>} : vector<48x48xf32>, vector<48x4xf32>, vector<48x4xf32> -> vector<48x4xf32>
    %cst_121 = arith.constant dense<0.000000e+00> : vector<48x4xf32>
    %503 = tpu.matmul %366, %502, %cst_121 {dimension_numbers = #tpu.dot_dimension_numbers<[1], [0], [0], [1], [0, 0, 1, 1], [], []>} : vector<48x48xf32>, vector<48x4xf32>, vector<48x4xf32> -> vector<48x4xf32>
    %cst_122 = arith.constant 2.000000e+00 : f32
    %504 = vector.broadcast %cst_122 : f32 to vector<48x4xf32>
    %505 = arith.mulf %504, %503 : vector<48x4xf32>
    %506 = arith.subf %505, %501 : vector<48x4xf32>
    %cst_123 = arith.constant dense<0.000000e+00> : vector<48x4xf32>
    %507 = tpu.matmul %368, %502, %cst_123 {dimension_numbers = #tpu.dot_dimension_numbers<[1], [0], [0], [1], [0, 0, 1, 1], [], []>} : vector<48x48xf32>, vector<48x4xf32>, vector<48x4xf32> -> vector<48x4xf32>
    %cst_124 = arith.constant dense<0.000000e+00> : vector<48x4xf32>
    %508 = tpu.matmul %368, %507, %cst_124 {dimension_numbers = #tpu.dot_dimension_numbers<[1], [0], [0], [1], [0, 0, 1, 1], [], []>} : vector<48x48xf32>, vector<48x4xf32>, vector<48x4xf32> -> vector<48x4xf32>
    %cst_125 = arith.constant 2.000000e+00 : f32
    %509 = vector.broadcast %cst_125 : f32 to vector<48x4xf32>
    %510 = arith.mulf %509, %508 : vector<48x4xf32>
    %511 = arith.subf %510, %502 : vector<48x4xf32>
    %512 = tpu.concatenate %501, %502, %506, %507, %511 in 1 : vector<48x4xf32>, vector<48x4xf32>, vector<48x4xf32>, vector<48x4xf32>, vector<48x4xf32> -> vector<48x20xf32>
    %cst_126 = arith.constant dense<0.000000e+00> : vector<48x36xf32>
    %513 = tpu.matmul %512, %369, %cst_126 {dimension_numbers = #tpu.dot_dimension_numbers<[1], [0], [0], [1], [0, 0, 1, 1], [], []>} : vector<48x20xf32>, vector<20x36xf32>, vector<48x36xf32> -> vector<48x36xf32>
    %514 = vector.broadcast %370 : vector<1x36xf32> to vector<48x36xf32>
    %515 = arith.addf %513, %514 : vector<48x36xf32>
    %516 = vector.extract_strided_slice %515 {offsets = [0, 0], sizes = [48, 4], strides = [1, 1]} : vector<48x36xf32> to vector<48x4xf32>
    %517 = arith.negf %516 : vector<48x4xf32>
    %518 = math.exp %517 : vector<48x4xf32>
    %cst_127 = arith.constant 1.000000e+00 : f32
    %519 = vector.broadcast %cst_127 : f32 to vector<48x4xf32>
    %520 = arith.addf %519, %518 : vector<48x4xf32>
    %521 = arith.divf %519, %520 : vector<48x4xf32>
    %522 = vector.extract_strided_slice %515 {offsets = [0, 4], sizes = [48, 32], strides = [1, 1]} : vector<48x36xf32> to vector<48x32xf32>
    %523 = math.tanh %522 : vector<48x32xf32>
    %cst_128 = arith.constant dense<0.000000e+00> : vector<48x32xf32>
    %524 = tpu.matmul %366, %523, %cst_128 {dimension_numbers = #tpu.dot_dimension_numbers<[1], [0], [0], [1], [0, 0, 1, 1], [], []>} : vector<48x48xf32>, vector<48x32xf32>, vector<48x32xf32> -> vector<48x32xf32>
    %cst_129 = arith.constant dense<0.000000e+00> : vector<48x32xf32>
    %525 = tpu.matmul %366, %524, %cst_129 {dimension_numbers = #tpu.dot_dimension_numbers<[1], [0], [0], [1], [0, 0, 1, 1], [], []>} : vector<48x48xf32>, vector<48x32xf32>, vector<48x32xf32> -> vector<48x32xf32>
    %cst_130 = arith.constant 2.000000e+00 : f32
    %526 = vector.broadcast %cst_130 : f32 to vector<48x32xf32>
    %527 = arith.mulf %526, %525 : vector<48x32xf32>
    %528 = arith.subf %527, %523 : vector<48x32xf32>
    %cst_131 = arith.constant dense<0.000000e+00> : vector<48x32xf32>
    %529 = tpu.matmul %368, %524, %cst_131 {dimension_numbers = #tpu.dot_dimension_numbers<[1], [0], [0], [1], [0, 0, 1, 1], [], []>} : vector<48x48xf32>, vector<48x32xf32>, vector<48x32xf32> -> vector<48x32xf32>
    %cst_132 = arith.constant dense<0.000000e+00> : vector<48x32xf32>
    %530 = tpu.matmul %368, %529, %cst_132 {dimension_numbers = #tpu.dot_dimension_numbers<[1], [0], [0], [1], [0, 0, 1, 1], [], []>} : vector<48x48xf32>, vector<48x32xf32>, vector<48x32xf32> -> vector<48x32xf32>
    %cst_133 = arith.constant 2.000000e+00 : f32
    %531 = vector.broadcast %cst_133 : f32 to vector<48x32xf32>
    %532 = arith.mulf %531, %530 : vector<48x32xf32>
    %533 = arith.subf %532, %524 : vector<48x32xf32>
    %534 = tpu.concatenate %523, %524, %528, %529, %533 in 1 : vector<48x32xf32>, vector<48x32xf32>, vector<48x32xf32>, vector<48x32xf32>, vector<48x32xf32> -> vector<48x160xf32>
    %cst_134 = arith.constant dense<0.000000e+00> : vector<48x4xf32>
    %535 = tpu.matmul %534, %371, %cst_134 {dimension_numbers = #tpu.dot_dimension_numbers<[1], [0], [0], [1], [0, 0, 1, 1], [], []>} : vector<48x160xf32>, vector<160x4xf32>, vector<48x4xf32> -> vector<48x4xf32>
    %536 = vector.broadcast %372 : vector<1x4xf32> to vector<48x4xf32>
    %537 = arith.addf %535, %536 : vector<48x4xf32>
    %538 = math.tanh %537 : vector<48x4xf32>
    %539 = arith.mulf %521, %538 : vector<48x4xf32>
    %cst_135 = arith.constant 0.000000e+00 : f32
    %540 = vector.broadcast %cst_135 : f32 to vector<48x4xf32>
    %541 = arith.subf %540, %539 : vector<48x4xf32>
    %cst_136 = arith.constant 1.250000e-01 : f32
    %542 = vector.broadcast %cst_136 : f32 to vector<48x4xf32>
    %543 = arith.mulf %542, %541 : vector<48x4xf32>
    %544 = arith.addf %501, %543 : vector<48x4xf32>
    %cst_137 = arith.constant dense<0.000000e+00> : vector<48x4xf32>
    %545 = tpu.matmul %366, %544, %cst_137 {dimension_numbers = #tpu.dot_dimension_numbers<[1], [0], [0], [1], [0, 0, 1, 1], [], []>} : vector<48x48xf32>, vector<48x4xf32>, vector<48x4xf32> -> vector<48x4xf32>
    %cst_138 = arith.constant dense<0.000000e+00> : vector<48x4xf32>
    %546 = tpu.matmul %366, %545, %cst_138 {dimension_numbers = #tpu.dot_dimension_numbers<[1], [0], [0], [1], [0, 0, 1, 1], [], []>} : vector<48x48xf32>, vector<48x4xf32>, vector<48x4xf32> -> vector<48x4xf32>
    %cst_139 = arith.constant 2.000000e+00 : f32
    %547 = vector.broadcast %cst_139 : f32 to vector<48x4xf32>
    %548 = arith.mulf %547, %546 : vector<48x4xf32>
    %549 = arith.subf %548, %544 : vector<48x4xf32>
    %cst_140 = arith.constant dense<0.000000e+00> : vector<48x4xf32>
    %550 = tpu.matmul %368, %545, %cst_140 {dimension_numbers = #tpu.dot_dimension_numbers<[1], [0], [0], [1], [0, 0, 1, 1], [], []>} : vector<48x48xf32>, vector<48x4xf32>, vector<48x4xf32> -> vector<48x4xf32>
    %cst_141 = arith.constant dense<0.000000e+00> : vector<48x4xf32>
    %551 = tpu.matmul %368, %550, %cst_141 {dimension_numbers = #tpu.dot_dimension_numbers<[1], [0], [0], [1], [0, 0, 1, 1], [], []>} : vector<48x48xf32>, vector<48x4xf32>, vector<48x4xf32> -> vector<48x4xf32>
    %cst_142 = arith.constant 2.000000e+00 : f32
    %552 = vector.broadcast %cst_142 : f32 to vector<48x4xf32>
    %553 = arith.mulf %552, %551 : vector<48x4xf32>
    %554 = arith.subf %553, %545 : vector<48x4xf32>
    %555 = tpu.concatenate %544, %545, %549, %550, %554 in 1 : vector<48x4xf32>, vector<48x4xf32>, vector<48x4xf32>, vector<48x4xf32>, vector<48x4xf32> -> vector<48x20xf32>
    %cst_143 = arith.constant dense<0.000000e+00> : vector<48x36xf32>
    %556 = tpu.matmul %555, %369, %cst_143 {dimension_numbers = #tpu.dot_dimension_numbers<[1], [0], [0], [1], [0, 0, 1, 1], [], []>} : vector<48x20xf32>, vector<20x36xf32>, vector<48x36xf32> -> vector<48x36xf32>
    %557 = vector.broadcast %370 : vector<1x36xf32> to vector<48x36xf32>
    %558 = arith.addf %556, %557 : vector<48x36xf32>
    %559 = vector.extract_strided_slice %558 {offsets = [0, 0], sizes = [48, 4], strides = [1, 1]} : vector<48x36xf32> to vector<48x4xf32>
    %560 = arith.negf %559 : vector<48x4xf32>
    %561 = math.exp %560 : vector<48x4xf32>
    %cst_144 = arith.constant 1.000000e+00 : f32
    %562 = vector.broadcast %cst_144 : f32 to vector<48x4xf32>
    %563 = arith.addf %562, %561 : vector<48x4xf32>
    %564 = arith.divf %562, %563 : vector<48x4xf32>
    %565 = vector.extract_strided_slice %558 {offsets = [0, 4], sizes = [48, 32], strides = [1, 1]} : vector<48x36xf32> to vector<48x32xf32>
    %566 = math.tanh %565 : vector<48x32xf32>
    %cst_145 = arith.constant dense<0.000000e+00> : vector<48x32xf32>
    %567 = tpu.matmul %366, %566, %cst_145 {dimension_numbers = #tpu.dot_dimension_numbers<[1], [0], [0], [1], [0, 0, 1, 1], [], []>} : vector<48x48xf32>, vector<48x32xf32>, vector<48x32xf32> -> vector<48x32xf32>
    %cst_146 = arith.constant dense<0.000000e+00> : vector<48x32xf32>
    %568 = tpu.matmul %366, %567, %cst_146 {dimension_numbers = #tpu.dot_dimension_numbers<[1], [0], [0], [1], [0, 0, 1, 1], [], []>} : vector<48x48xf32>, vector<48x32xf32>, vector<48x32xf32> -> vector<48x32xf32>
    %cst_147 = arith.constant 2.000000e+00 : f32
    %569 = vector.broadcast %cst_147 : f32 to vector<48x32xf32>
    %570 = arith.mulf %569, %568 : vector<48x32xf32>
    %571 = arith.subf %570, %566 : vector<48x32xf32>
    %cst_148 = arith.constant dense<0.000000e+00> : vector<48x32xf32>
    %572 = tpu.matmul %368, %567, %cst_148 {dimension_numbers = #tpu.dot_dimension_numbers<[1], [0], [0], [1], [0, 0, 1, 1], [], []>} : vector<48x48xf32>, vector<48x32xf32>, vector<48x32xf32> -> vector<48x32xf32>
    %cst_149 = arith.constant dense<0.000000e+00> : vector<48x32xf32>
    %573 = tpu.matmul %368, %572, %cst_149 {dimension_numbers = #tpu.dot_dimension_numbers<[1], [0], [0], [1], [0, 0, 1, 1], [], []>} : vector<48x48xf32>, vector<48x32xf32>, vector<48x32xf32> -> vector<48x32xf32>
    %cst_150 = arith.constant 2.000000e+00 : f32
    %574 = vector.broadcast %cst_150 : f32 to vector<48x32xf32>
    %575 = arith.mulf %574, %573 : vector<48x32xf32>
    %576 = arith.subf %575, %567 : vector<48x32xf32>
    %577 = tpu.concatenate %566, %567, %571, %572, %576 in 1 : vector<48x32xf32>, vector<48x32xf32>, vector<48x32xf32>, vector<48x32xf32>, vector<48x32xf32> -> vector<48x160xf32>
    %cst_151 = arith.constant dense<0.000000e+00> : vector<48x4xf32>
    %578 = tpu.matmul %577, %371, %cst_151 {dimension_numbers = #tpu.dot_dimension_numbers<[1], [0], [0], [1], [0, 0, 1, 1], [], []>} : vector<48x160xf32>, vector<160x4xf32>, vector<48x4xf32> -> vector<48x4xf32>
    %579 = vector.broadcast %372 : vector<1x4xf32> to vector<48x4xf32>
    %580 = arith.addf %578, %579 : vector<48x4xf32>
    %581 = math.tanh %580 : vector<48x4xf32>
    %582 = arith.mulf %564, %581 : vector<48x4xf32>
    %cst_152 = arith.constant 0.000000e+00 : f32
    %583 = vector.broadcast %cst_152 : f32 to vector<48x4xf32>
    %584 = arith.subf %583, %582 : vector<48x4xf32>
    %cst_153 = arith.constant 1.250000e-01 : f32
    %585 = vector.broadcast %cst_153 : f32 to vector<48x4xf32>
    %586 = arith.mulf %585, %584 : vector<48x4xf32>
    %587 = arith.addf %544, %586 : vector<48x4xf32>
    %cst_154 = arith.constant dense<0.000000e+00> : vector<48x4xf32>
    %588 = tpu.matmul %366, %587, %cst_154 {dimension_numbers = #tpu.dot_dimension_numbers<[1], [0], [0], [1], [0, 0, 1, 1], [], []>} : vector<48x48xf32>, vector<48x4xf32>, vector<48x4xf32> -> vector<48x4xf32>
    %cst_155 = arith.constant dense<0.000000e+00> : vector<48x4xf32>
    %589 = tpu.matmul %366, %588, %cst_155 {dimension_numbers = #tpu.dot_dimension_numbers<[1], [0], [0], [1], [0, 0, 1, 1], [], []>} : vector<48x48xf32>, vector<48x4xf32>, vector<48x4xf32> -> vector<48x4xf32>
    %cst_156 = arith.constant 2.000000e+00 : f32
    %590 = vector.broadcast %cst_156 : f32 to vector<48x4xf32>
    %591 = arith.mulf %590, %589 : vector<48x4xf32>
    %592 = arith.subf %591, %587 : vector<48x4xf32>
    %cst_157 = arith.constant dense<0.000000e+00> : vector<48x4xf32>
    %593 = tpu.matmul %368, %588, %cst_157 {dimension_numbers = #tpu.dot_dimension_numbers<[1], [0], [0], [1], [0, 0, 1, 1], [], []>} : vector<48x48xf32>, vector<48x4xf32>, vector<48x4xf32> -> vector<48x4xf32>
    %cst_158 = arith.constant dense<0.000000e+00> : vector<48x4xf32>
    %594 = tpu.matmul %368, %593, %cst_158 {dimension_numbers = #tpu.dot_dimension_numbers<[1], [0], [0], [1], [0, 0, 1, 1], [], []>} : vector<48x48xf32>, vector<48x4xf32>, vector<48x4xf32> -> vector<48x4xf32>
    %cst_159 = arith.constant 2.000000e+00 : f32
    %595 = vector.broadcast %cst_159 : f32 to vector<48x4xf32>
    %596 = arith.mulf %595, %594 : vector<48x4xf32>
    %597 = arith.subf %596, %588 : vector<48x4xf32>
    %598 = tpu.concatenate %587, %588, %592, %593, %597 in 1 : vector<48x4xf32>, vector<48x4xf32>, vector<48x4xf32>, vector<48x4xf32>, vector<48x4xf32> -> vector<48x20xf32>
    %cst_160 = arith.constant dense<0.000000e+00> : vector<48x36xf32>
    %599 = tpu.matmul %598, %369, %cst_160 {dimension_numbers = #tpu.dot_dimension_numbers<[1], [0], [0], [1], [0, 0, 1, 1], [], []>} : vector<48x20xf32>, vector<20x36xf32>, vector<48x36xf32> -> vector<48x36xf32>
    %600 = vector.broadcast %370 : vector<1x36xf32> to vector<48x36xf32>
    %601 = arith.addf %599, %600 : vector<48x36xf32>
    %602 = vector.extract_strided_slice %601 {offsets = [0, 0], sizes = [48, 4], strides = [1, 1]} : vector<48x36xf32> to vector<48x4xf32>
    %603 = arith.negf %602 : vector<48x4xf32>
    %604 = math.exp %603 : vector<48x4xf32>
    %cst_161 = arith.constant 1.000000e+00 : f32
    %605 = vector.broadcast %cst_161 : f32 to vector<48x4xf32>
    %606 = arith.addf %605, %604 : vector<48x4xf32>
    %607 = arith.divf %605, %606 : vector<48x4xf32>
    %608 = vector.extract_strided_slice %601 {offsets = [0, 4], sizes = [48, 32], strides = [1, 1]} : vector<48x36xf32> to vector<48x32xf32>
    %609 = math.tanh %608 : vector<48x32xf32>
    %cst_162 = arith.constant dense<0.000000e+00> : vector<48x32xf32>
    %610 = tpu.matmul %366, %609, %cst_162 {dimension_numbers = #tpu.dot_dimension_numbers<[1], [0], [0], [1], [0, 0, 1, 1], [], []>} : vector<48x48xf32>, vector<48x32xf32>, vector<48x32xf32> -> vector<48x32xf32>
    %cst_163 = arith.constant dense<0.000000e+00> : vector<48x32xf32>
    %611 = tpu.matmul %366, %610, %cst_163 {dimension_numbers = #tpu.dot_dimension_numbers<[1], [0], [0], [1], [0, 0, 1, 1], [], []>} : vector<48x48xf32>, vector<48x32xf32>, vector<48x32xf32> -> vector<48x32xf32>
    %cst_164 = arith.constant 2.000000e+00 : f32
    %612 = vector.broadcast %cst_164 : f32 to vector<48x32xf32>
    %613 = arith.mulf %612, %611 : vector<48x32xf32>
    %614 = arith.subf %613, %609 : vector<48x32xf32>
    %cst_165 = arith.constant dense<0.000000e+00> : vector<48x32xf32>
    %615 = tpu.matmul %368, %610, %cst_165 {dimension_numbers = #tpu.dot_dimension_numbers<[1], [0], [0], [1], [0, 0, 1, 1], [], []>} : vector<48x48xf32>, vector<48x32xf32>, vector<48x32xf32> -> vector<48x32xf32>
    %cst_166 = arith.constant dense<0.000000e+00> : vector<48x32xf32>
    %616 = tpu.matmul %368, %615, %cst_166 {dimension_numbers = #tpu.dot_dimension_numbers<[1], [0], [0], [1], [0, 0, 1, 1], [], []>} : vector<48x48xf32>, vector<48x32xf32>, vector<48x32xf32> -> vector<48x32xf32>
    %cst_167 = arith.constant 2.000000e+00 : f32
    %617 = vector.broadcast %cst_167 : f32 to vector<48x32xf32>
    %618 = arith.mulf %617, %616 : vector<48x32xf32>
    %619 = arith.subf %618, %610 : vector<48x32xf32>
    %620 = tpu.concatenate %609, %610, %614, %615, %619 in 1 : vector<48x32xf32>, vector<48x32xf32>, vector<48x32xf32>, vector<48x32xf32>, vector<48x32xf32> -> vector<48x160xf32>
    %cst_168 = arith.constant dense<0.000000e+00> : vector<48x4xf32>
    %621 = tpu.matmul %620, %371, %cst_168 {dimension_numbers = #tpu.dot_dimension_numbers<[1], [0], [0], [1], [0, 0, 1, 1], [], []>} : vector<48x160xf32>, vector<160x4xf32>, vector<48x4xf32> -> vector<48x4xf32>
    %622 = vector.broadcast %372 : vector<1x4xf32> to vector<48x4xf32>
    %623 = arith.addf %621, %622 : vector<48x4xf32>
    %624 = math.tanh %623 : vector<48x4xf32>
    %625 = arith.mulf %607, %624 : vector<48x4xf32>
    %cst_169 = arith.constant 0.000000e+00 : f32
    %626 = vector.broadcast %cst_169 : f32 to vector<48x4xf32>
    %627 = arith.subf %626, %625 : vector<48x4xf32>
    %cst_170 = arith.constant 1.250000e-01 : f32
    %628 = vector.broadcast %cst_170 : f32 to vector<48x4xf32>
    %629 = arith.mulf %628, %627 : vector<48x4xf32>
    %630 = arith.addf %587, %629 : vector<48x4xf32>
    %cst_171 = arith.constant dense<0.000000e+00> : vector<48x4xf32>
    %631 = tpu.matmul %366, %630, %cst_171 {dimension_numbers = #tpu.dot_dimension_numbers<[1], [0], [0], [1], [0, 0, 1, 1], [], []>} : vector<48x48xf32>, vector<48x4xf32>, vector<48x4xf32> -> vector<48x4xf32>
    %cst_172 = arith.constant dense<0.000000e+00> : vector<48x4xf32>
    %632 = tpu.matmul %366, %631, %cst_172 {dimension_numbers = #tpu.dot_dimension_numbers<[1], [0], [0], [1], [0, 0, 1, 1], [], []>} : vector<48x48xf32>, vector<48x4xf32>, vector<48x4xf32> -> vector<48x4xf32>
    %cst_173 = arith.constant 2.000000e+00 : f32
    %633 = vector.broadcast %cst_173 : f32 to vector<48x4xf32>
    %634 = arith.mulf %633, %632 : vector<48x4xf32>
    %635 = arith.subf %634, %630 : vector<48x4xf32>
    %cst_174 = arith.constant dense<0.000000e+00> : vector<48x4xf32>
    %636 = tpu.matmul %368, %631, %cst_174 {dimension_numbers = #tpu.dot_dimension_numbers<[1], [0], [0], [1], [0, 0, 1, 1], [], []>} : vector<48x48xf32>, vector<48x4xf32>, vector<48x4xf32> -> vector<48x4xf32>
    %cst_175 = arith.constant dense<0.000000e+00> : vector<48x4xf32>
    %637 = tpu.matmul %368, %636, %cst_175 {dimension_numbers = #tpu.dot_dimension_numbers<[1], [0], [0], [1], [0, 0, 1, 1], [], []>} : vector<48x48xf32>, vector<48x4xf32>, vector<48x4xf32> -> vector<48x4xf32>
    %cst_176 = arith.constant 2.000000e+00 : f32
    %638 = vector.broadcast %cst_176 : f32 to vector<48x4xf32>
    %639 = arith.mulf %638, %637 : vector<48x4xf32>
    %640 = arith.subf %639, %631 : vector<48x4xf32>
    %641 = tpu.concatenate %630, %631, %635, %636, %640 in 1 : vector<48x4xf32>, vector<48x4xf32>, vector<48x4xf32>, vector<48x4xf32>, vector<48x4xf32> -> vector<48x20xf32>
    %cst_177 = arith.constant dense<0.000000e+00> : vector<48x36xf32>
    %642 = tpu.matmul %641, %369, %cst_177 {dimension_numbers = #tpu.dot_dimension_numbers<[1], [0], [0], [1], [0, 0, 1, 1], [], []>} : vector<48x20xf32>, vector<20x36xf32>, vector<48x36xf32> -> vector<48x36xf32>
    %643 = vector.broadcast %370 : vector<1x36xf32> to vector<48x36xf32>
    %644 = arith.addf %642, %643 : vector<48x36xf32>
    %645 = vector.extract_strided_slice %644 {offsets = [0, 0], sizes = [48, 4], strides = [1, 1]} : vector<48x36xf32> to vector<48x4xf32>
    %646 = arith.negf %645 : vector<48x4xf32>
    %647 = math.exp %646 : vector<48x4xf32>
    %cst_178 = arith.constant 1.000000e+00 : f32
    %648 = vector.broadcast %cst_178 : f32 to vector<48x4xf32>
    %649 = arith.addf %648, %647 : vector<48x4xf32>
    %650 = arith.divf %648, %649 : vector<48x4xf32>
    %651 = vector.extract_strided_slice %644 {offsets = [0, 4], sizes = [48, 32], strides = [1, 1]} : vector<48x36xf32> to vector<48x32xf32>
    %652 = math.tanh %651 : vector<48x32xf32>
    %cst_179 = arith.constant dense<0.000000e+00> : vector<48x32xf32>
    %653 = tpu.matmul %366, %652, %cst_179 {dimension_numbers = #tpu.dot_dimension_numbers<[1], [0], [0], [1], [0, 0, 1, 1], [], []>} : vector<48x48xf32>, vector<48x32xf32>, vector<48x32xf32> -> vector<48x32xf32>
    %cst_180 = arith.constant dense<0.000000e+00> : vector<48x32xf32>
    %654 = tpu.matmul %366, %653, %cst_180 {dimension_numbers = #tpu.dot_dimension_numbers<[1], [0], [0], [1], [0, 0, 1, 1], [], []>} : vector<48x48xf32>, vector<48x32xf32>, vector<48x32xf32> -> vector<48x32xf32>
    %cst_181 = arith.constant 2.000000e+00 : f32
    %655 = vector.broadcast %cst_181 : f32 to vector<48x32xf32>
    %656 = arith.mulf %655, %654 : vector<48x32xf32>
    %657 = arith.subf %656, %652 : vector<48x32xf32>
    %cst_182 = arith.constant dense<0.000000e+00> : vector<48x32xf32>
    %658 = tpu.matmul %368, %653, %cst_182 {dimension_numbers = #tpu.dot_dimension_numbers<[1], [0], [0], [1], [0, 0, 1, 1], [], []>} : vector<48x48xf32>, vector<48x32xf32>, vector<48x32xf32> -> vector<48x32xf32>
    %cst_183 = arith.constant dense<0.000000e+00> : vector<48x32xf32>
    %659 = tpu.matmul %368, %658, %cst_183 {dimension_numbers = #tpu.dot_dimension_numbers<[1], [0], [0], [1], [0, 0, 1, 1], [], []>} : vector<48x48xf32>, vector<48x32xf32>, vector<48x32xf32> -> vector<48x32xf32>
    %cst_184 = arith.constant 2.000000e+00 : f32
    %660 = vector.broadcast %cst_184 : f32 to vector<48x32xf32>
    %661 = arith.mulf %660, %659 : vector<48x32xf32>
    %662 = arith.subf %661, %653 : vector<48x32xf32>
    %663 = tpu.concatenate %652, %653, %657, %658, %662 in 1 : vector<48x32xf32>, vector<48x32xf32>, vector<48x32xf32>, vector<48x32xf32>, vector<48x32xf32> -> vector<48x160xf32>
    %cst_185 = arith.constant dense<0.000000e+00> : vector<48x4xf32>
    %664 = tpu.matmul %663, %371, %cst_185 {dimension_numbers = #tpu.dot_dimension_numbers<[1], [0], [0], [1], [0, 0, 1, 1], [], []>} : vector<48x160xf32>, vector<160x4xf32>, vector<48x4xf32> -> vector<48x4xf32>
    %665 = vector.broadcast %372 : vector<1x4xf32> to vector<48x4xf32>
    %666 = arith.addf %664, %665 : vector<48x4xf32>
    %667 = math.tanh %666 : vector<48x4xf32>
    %668 = arith.mulf %650, %667 : vector<48x4xf32>
    %cst_186 = arith.constant 0.000000e+00 : f32
    %669 = vector.broadcast %cst_186 : f32 to vector<48x4xf32>
    %670 = arith.subf %669, %668 : vector<48x4xf32>
    %cst_187 = arith.constant 1.250000e-01 : f32
    %671 = vector.broadcast %cst_187 : f32 to vector<48x4xf32>
    %672 = arith.mulf %671, %670 : vector<48x4xf32>
    %673 = arith.addf %630, %672 : vector<48x4xf32>
    %674 = tpu.concatenate %364, %415, %458, %501, %544, %587, %630, %673 in 1 : vector<48x4xf32>, vector<48x4xf32>, vector<48x4xf32>, vector<48x4xf32>, vector<48x4xf32>, vector<48x4xf32>, vector<48x4xf32>, vector<48x4xf32> -> vector<48x32xf32>
    %c0_188 = arith.constant 0 : index
    %c0_189 = arith.constant 0 : index
    %675 = vector.load %arg17[%c0_188, %c0_189] : memref<32x8xf32, #tpu.memory_space<vmem>>, vector<32x8xf32>
    %cst_190 = arith.constant dense<0.000000e+00> : vector<48x8xf32>
    %676 = tpu.matmul %674, %675, %cst_190 {dimension_numbers = #tpu.dot_dimension_numbers<[1], [0], [0], [1], [0, 0, 1, 1], [], []>} : vector<48x32xf32>, vector<32x8xf32>, vector<48x8xf32> -> vector<48x8xf32>
    %c0_191 = arith.constant 0 : index
    %c0_192 = arith.constant 0 : index
    %677 = vector.load %arg16[%c0_191, %c0_192] : memref<32x48xf32, #tpu.memory_space<vmem>>, vector<32x48xf32>
    %cst_193 = arith.constant dense<0.000000e+00> : vector<32x8xf32>
    %678 = tpu.matmul %677, %676, %cst_193 {dimension_numbers = #tpu.dot_dimension_numbers<[1], [0], [0], [1], [0, 0, 1, 1], [], []>} : vector<32x48xf32>, vector<48x8xf32>, vector<32x8xf32> -> vector<32x8xf32>
    %c0_194 = arith.constant 0 : index
    %c0_195 = arith.constant 0 : index
    %679 = vector.load %arg18[%c0_194, %c0_195] : memref<32x8xf32, #tpu.memory_space<vmem>>, vector<32x8xf32>
    tpu.vector_store %arg18[%c0_194, %c0_195], %678 {strides = array<i32>} : memref<32x8xf32, #tpu.memory_space<vmem>>, vector<32x8xf32>,
    return
  }
}

</mosaic_0001>

<bundles_post_ra>
// kernel: tpu_custom_call.1
= control target key start
LH: loop header
LB: loop body
LE: loop exit
PB: predicated region body
PF: predicated region fallthrough
CT: control target
= control target key end

     0   :  { %v18859_v0 = vmov 0   ;;  %v24029_v12 = vmov 0.0   ;;  %v18861_v17 = vmov 1   ;;  %vm3075_vm0 = vcmask 261120   ;;  %s18866_s21 = smov 16   ;;  %s18867_s23 = smov 32   ;;  %s24008_s0 = inlined_call_operand.vmem [shape: f32[256,2], index: 0, kind: input, shape index: {}]   ;;  %s24009_s2 = inlined_call_operand.vmem [shape: f32[128,384], index: 2, kind: input, shape index: {}]   ;;  %s24010_s1 = inlined_call_operand.vmem [shape: f32[2,384], index: 1, kind: input, shape index: {}]   ;;  %s24011_s3 = inlined_call_operand.vmem [shape: f32[1,384], index: 3, kind: input, shape index: {}]   ;;  %s24012_s4 = inlined_call_operand.vmem [shape: f32[1,384], index: 4, kind: input, shape index: {}]   ;;  %s24013_s5 = inlined_call_operand.vmem [shape: f32[128,64], index: 5, kind: input, shape index: {}]   ;;  %s24014_s7 = inlined_call_operand.vmem [shape: f32[16,32], index: 7, kind: input, shape index: {}]   ;;  %s24015_s8 = inlined_call_operand.vmem [shape: f32[64,8], index: 8, kind: input, shape index: {}]   ;;  %s24016_s6 = inlined_call_operand.vmem [shape: f32[1,64], index: 6, kind: input, shape index: {}]   ;;  %s24017_s9 = inlined_call_operand.vmem [shape: f32[1,8], index: 9, kind: input, shape index: {}]   ;;  %s24018_s11 = inlined_call_operand.vmem [shape: f32[2,48,48], index: 11, kind: input, shape index: {}]   ;;  %s24019_s10 = inlined_call_operand.vmem [shape: f32[48,4], index: 10, kind: input, shape index: {}]   ;;  %s24020_s12 = inlined_call_operand.vmem [shape: f32[20,36], index: 12, kind: input, shape index: {}]   ;;  %s24021_s13 = inlined_call_operand.vmem [shape: f32[1,36], index: 13, kind: input, shape index: {}]   ;;  %s24022_s14 = inlined_call_operand.vmem [shape: f32[160,4], index: 14, kind: input, shape index: {}]   ;;  %s24023_s15 = inlined_call_operand.vmem [shape: f32[1,4], index: 15, kind: input, shape index: {}]   ;;  %s24024_s17 = inlined_call_operand.vmem [shape: f32[32,8], index: 17, kind: input, shape index: {}]   ;;  %s24025_s16 = inlined_call_operand.vmem [shape: f32[32,48], index: 16, kind: input, shape index: {}]   ;;  %s24026_s18 = inlined_call_operand.vmem [shape: f32[32,8], index: 18, kind: output, shape index: {}]  }
   0x1   :  { %24140 = sst [smem:[#allocation42_spill]] %s24008_s0  ;;  %17910 = vset.pattern.permute.xlu1 %v18859_v0  ;;  %17908 = vset.pattern.permute.xlu0 %v18859_v0  ;;  %vm3174_vm1 = vcmask 523264   ;;  %vm3322_vm2 = vcmask 392192   ;;  %s18865_s0 = smov 12   ;;  %vm3912_vm3 = vcmask 1043456   ;;  %vm3859_vm4 = vcmask 31744  }
   0x2   :  { %24141 = sst [smem:[#allocation43_spill]] %s24009_s2  ;;  %s24143_s29 = sld [smem:[#allocation42_spill]]  ;;  %377 = vmatprep.mubr.f32.mxu0 %v24029_v12  ;;  %14739 = vmatprep.mubr.f32.mxu1 %v24029_v12  ;;  %vm3866_vm5 = vcmask 64512   ;;  %vm3873_vm6 = vcmask 97280   ;;  %vm3880_vm7 = vcmask 130048   ;;  %vm3893_vm8 = vcmask 162816  }
   0x3   :  { %24142 = sst [smem:[#allocation44_spill]] %s24010_s1  ;;  %s24144_s20 = sld [smem:[#allocation43_spill]]  ;;  %vm4565_vm9 = vcmask 785408   ;;  %vm12959_vm10 = vcmask 195584   ;;  %vm12966_vm11 = vcmask 228352  }
   0x4   :  { %s24155_s30 = sld [smem:[#allocation44_spill]]  ;;  %s18863_s1 = smov 4  }
   0x5   :  { %s18868_s24 = smov 96   ;;  %s18869_s25 = smov 64  }
   0x8   :  { %v60_v1 = vld [vmem:[%s24143_s29 + $0x8] sm:$0xff]  ;;  %v59_v2 = vld [vmem:[%s24143_s29] sm:$0xff]  ;;  %v61_v24 = vld [vmem:[%s24143_s29 + $0x10] sm:$0xff] }
   0x9   :  { %v93_v3 = vld [vmem:[%s24144_s20 + $0x8] sm:$0xff]  ;;  %149 = vperm.xlu1 %17910, %v60_v1   ;;  %144 = vperm.xlu0 %17908, %v59_v2   ;;  %v96_v4 = vld [vmem:[%s24144_s20 + $0x20] sm:$0xff]  ;;  %v95_v6 = vld [vmem:[%s24144_s20 + $0x18] sm:$0xff] }
   0xa   :  { %v92_v5 = vld [vmem:[%s24144_s20] sm:$0xff]  ;;  %v18987_v7 = vpack.c.bf16 %v96_v4, %v93_v3  ;;  %v99_v9 = vld [vmem:[%s24144_s20 + $0x38] sm:$0xff]  ;;  %v102_v10 = vld [vmem:[%s24144_s20 + $0x50] sm:$0xff] }
   0xb   :  { %v18989_v8 = vpack.c.bf16 %v95_v6, %v92_v5  ;;  %v98_v11 = vld [vmem:[%s24144_s20 + $0x30] sm:$0xff]  ;;  %v19002_v13 = vpack.c.bf16 %v102_v10, %v99_v9  ;;  %v101_v14 = vld [vmem:[%s24144_s20 + $0x48] sm:$0xff]  ;;  %v108_v16 = vld [vmem:[%s24144_s20 + $0x80] sm:$0xff] }
   0xc   :  { %24145 = vst [vmem:[#allocation2_spill] sm:$0xff] %v18987_v7  ;;  %v105_v15 = vld [vmem:[%s24144_s20 + $0x68] sm:$0xff]  ;;  %16396 = vmatprep.subr.bf16.mxu0 %v18987_v7  ;;  %v19015_v18 = vpack.c.bf16 %v101_v14, %v98_v11  ;;  %v104_v20 = vld [vmem:[%s24144_s20 + $0x60] sm:$0xff]  ;;  %v107_v21 = vld [vmem:[%s24144_s20 + $0x78] sm:$0xff] }
   0xd   :  { %16398 = vmatpush1.bf16.msra.mxu0 %v18989_v8  ;;  %17911 = vset.pattern.permute.xlu1 %v18861_v17  ;;  %v19017_v19 = vpack.c.bf16 %v108_v16, %v105_v15  ;;  %v111_v22 = vld [vmem:[%s24144_s20 + $0x98] sm:$0xff]  ;;  %v114_v23 = vld [vmem:[%s24144_s20 + $0xb0] sm:$0xff]  ;;  %v19036_v25 = vpack.c.bf16 %v107_v21, %v104_v20  ;;  %v113_v28 = vld [vmem:[%s24144_s20 + $0xa8] sm:$0xff] }
   0xe   :  { %17909 = vset.pattern.permute.xlu0 %v18861_v17  ;;  %207 = vperm.xlu1 %17911, %v60_v1   ;;  %v19039_v26 = vpack.c.bf16 %v114_v23, %v111_v22  ;;  %v110_v27 = vld [vmem:[%s24144_s20 + $0x90] sm:$0xff]  ;;  %v117_v29 = vld [vmem:[%s24144_s20 + $0xc8] sm:$0xff]  ;;  %v120_v30 = vld [vmem:[%s24144_s20 + $0xe0] sm:$0xff] }
   0xf   :  { %203 = vperm.xlu0 %17909, %v59_v2   ;;  %16400 = vmatprep.subr.bf16.mxu0 %v19002_v13  ;;  %v94_v31 = vld [vmem:[%s24144_s20 + $0x10] sm:$0xff]  ;;  %v62_v32 = vld [vmem:[%s24143_s29 + $0x18] sm:$0xff]  ;;  %v97_v33 = vld [vmem:[%s24144_s20 + $0x28] sm:$0xff]  ;;  %v19063_v34 = vpack.c.bf16 %v113_v28, %v110_v27  ;;  %v19074_v38 = vpack.c.bf16 %v120_v30, %v117_v29 }
  0x10   :  { %v116_v35 = vld [vmem:[%s24144_s20 + $0xc0] sm:$0xff]  ;;  %v119_v36 = vld [vmem:[%s24144_s20 + $0xd8] sm:$0xff]  ;;  %v19071_v37 = vpack.c.bf16 %v97_v33, %v94_v31  ;;  %v126_v42 = vld [vmem:[%s24144_s20 + $0x110] sm:$0xff] }
  0x11   :  { %16402 = vmatpush1.bf16.msra.mxu0 %v19015_v18  ;;  %v123_v39 = vld [vmem:[%s24144_s20 + $0xf8] sm:$0xff]  ;;  %v100_v40 = vld [vmem:[%s24144_s20 + $0x40] sm:$0xff]  ;;  %v106_v44 = vld [vmem:[%s24144_s20 + $0x70] sm:$0xff]  ;;  %v19101_v47 = vpack.c.bf16 %v119_v36, %v116_v35 }
  0x12   :  { %17912 = vset.pattern.permute.xlu1 %v18859_v0  ;;  %16404 = vmatprep.subr.bf16.mxu0 %v19017_v19  ;;  %v103_v41 = vld [vmem:[%s24144_s20 + $0x58] sm:$0xff]  ;;  %v109_v45 = vld [vmem:[%s24144_s20 + $0x88] sm:$0xff]  ;;  %v63_v46 = vld [vmem:[%s24143_s29 + $0x20] sm:$0xff]  ;;  %v19105_v48 = vpack.c.bf16 %v126_v42, %v123_v39 }
  0x13   :  { %211 = vperm.xlu0 %17909, %v61_v24   ;;  %154 = vperm.xlu1 %17912, %v61_v24   ;;  %v19088_v43 = vpack.c.bf16 %v103_v41, %v100_v40  ;;  %v122_v49 = vld [vmem:[%s24144_s20 + $0xf0] sm:$0xff]  ;;  %v125_v50 = vld [vmem:[%s24144_s20 + $0x108] sm:$0xff]  ;;  %v19117_v52 = vpack.c.bf16 %v109_v45, %v106_v44  ;;  %v132_v53 = vld [vmem:[%s24144_s20 + $0x140] sm:$0xff] }
  0x14   :  { %16428 = vmatprep.subr.bf16.mxu1 %v19071_v37  ;;  %v129_v51 = vld [vmem:[%s24144_s20 + $0x128] sm:$0xff]  ;;  %v112_v54 = vld [vmem:[%s24144_s20 + $0xa0] sm:$0xff]  ;;  %v115_v55 = vld [vmem:[%s24144_s20 + $0xb8] sm:$0xff]  ;;  %v19132_v57 = vpack.c.bf16 %v125_v50, %v122_v49 }
  0x15   :  { %16406 = vmatpush1.bf16.msra.mxu0 %v19036_v25  ;;  %16430 = vmatpush3.bf16.msra.mxu1 %v19071_v37  ;;  %v64_v56 = vld [vmem:[%s24143_s29 + $0x28] sm:$0xff]  ;;  %v19136_v58 = vpack.c.bf16 %v132_v53, %v129_v51  ;;  %v128_v59 = vld [vmem:[%s24144_s20 + $0x120] sm:$0xff]  ;;  %v131_v60 = vld [vmem:[%s24144_s20 + $0x138] sm:$0xff]  ;;  %v19148_v62 = vpack.c.bf16 %v115_v55, %v112_v54 }
  0x16   :  { %16408 = vmatprep.subr.bf16.mxu0 %v19039_v26  ;;  %16432 = vmatprep.subr.bf16.mxu1 %v19088_v43  ;;  %24146 = vst [vmem:[#allocation3_spill] sm:$0xff] %v19132_v57  ;;  %v135_v61 = vld [vmem:[%s24144_s20 + $0x158] sm:$0xff]  ;;  %v138_v63 = vld [vmem:[%s24144_s20 + $0x170] sm:$0xff]  ;;  %v121_v1 = vld [vmem:[%s24144_s20 + $0xe8] sm:$0xff]  ;;  %v19163_v3 = vpack.c.bf16 %v131_v60, %v128_v59  ;;  %v163_v60 = vlaneseq }
  0x17   :  { %215 = vperm.xlu0 %17909, %v62_v32   ;;  %159 = vperm.xlu1 %17912, %v62_v32   ;;  %24147 = vst [vmem:[#allocation4_spill] sm:$0xff] %v19136_v58  ;;  %v118_v0 = vld [vmem:[%s24144_s20 + $0xd0] sm:$0xff]  ;;  %v19167_v4 = vpack.c.bf16 %v138_v63, %v135_v61  ;;  %v137_v6 = vld [vmem:[%s24144_s20 + $0x168] sm:$0xff]  ;;  %v124_v10 = vld [vmem:[%s24144_s20 + $0x100] sm:$0xff] }
  0x18   :  { %v65_v2 = vld [vmem:[%s24143_s29 + $0x30] sm:$0xff]  ;;  %24148 = vst [vmem:[#allocation5_spill] sm:$0xff] %v19163_v3  ;;  %v19176_v9 = vpack.c.bf16 %v121_v1, %v118_v0  ;;  %v127_v11 = vld [vmem:[%s24144_s20 + $0x118] sm:$0xff]  ;;  %v133_v20 = vld [vmem:[%s24144_s20 + $0x148] sm:$0xff]  ;;  %v19336_v61 = vshrl.u32 %v163_v60, 7 }
  0x19   :  { %16410 = vmatpush1.bf16.msra.mxu0 %v19063_v34  ;;  %16434 = vmatpush3.bf16.msra.mxu1 %v19088_v43  ;;  %24149 = vst [vmem:[#allocation6_spill] sm:$0xff] %v19167_v4  ;;  %v134_v5 = vld [vmem:[%s24144_s20 + $0x150] sm:$0xff]  ;;  %v66_v14 = vld [vmem:[%s24143_s29 + $0x38] sm:$0xff]  ;;  %v19193_v16 = vpack.c.bf16 %v127_v11, %v124_v10  ;;  %v67_v21 = vld [vmem:[%s24143_s29 + $0x40] sm:$0xff] }
  0x1a   :  { %16412 = vmatprep.subr.bf16.mxu0 %v19074_v38  ;;  %16436 = vmatprep.subr.bf16.mxu1 %v19117_v52  ;;  %24150 = vst [vmem:[#allocation7_spill] sm:$0xff] %v19176_v9  ;;  %v19188_v15 = vpack.c.bf16 %v137_v6, %v134_v5  ;;  %v130_v17 = vld [vmem:[%s24144_s20 + $0x130] sm:$0xff]  ;;  %v136_v23 = vld [vmem:[%s24144_s20 + $0x160] sm:$0xff]  ;;  %v139_v24 = vld [vmem:[%s24144_s20 + $0x178] sm:$0xff]  ;;  %v19339_v63 = vsub.s32 0, %v19336_v61  ;;  %v19342_v0 = vsub.s32 1, %v19336_v61 }
  0x1b   :  { %604 = vperm.xlu0 %17909, %v63_v46   ;;  %573 = vperm.xlu1 %17912, %v63_v46   ;;  %24152 = vst [vmem:[#allocation9_spill] sm:$0xff] %v19193_v16  ;;  %v19207_v22 = vpack.c.bf16 %v133_v20, %v130_v17  ;;  %v68_v27 = vld [vmem:[%s24143_s29 + $0x48] sm:$0xff]  ;;  %v19223_v28 = vpack.c.bf16 %v139_v24, %v136_v23  ;;  %v69_v29 = vld [vmem:[%s24143_s29 + $0x50] sm:$0xff]  ;;  %v70_v30 = vld [vmem:[%s24143_s29 + $0x58] sm:$0xff]  ;;  %v224_v5 = vsub.s32 3, %v19336_v61 }
  0x1c   :  { %24151 = vst [vmem:[#allocation8_spill] sm:$0xff] %v19188_v15  ;;  %v71_v31 = vld [vmem:[%s24143_s29 + $0x60] sm:$0xff]  ;;  %v72_v32 = vld [vmem:[%s24143_s29 + $0x68] sm:$0xff]  ;;  %v73_v33 = vld [vmem:[%s24143_s29 + $0x70] sm:$0xff] }
  0x1d   :  { %16414 = vmatpush1.bf16.msra.mxu0 %v19101_v47  ;;  %16438 = vmatpush3.bf16.msra.mxu1 %v19117_v52  ;;  %24153 = vst [vmem:[#allocation10_spill] sm:$0xff] %v19207_v22  ;;  %24154 = vst [vmem:[#allocation11_spill] sm:$0xff] %v19223_v28  ;;  %v74_v35 = vld [vmem:[%s24143_s29 + $0x78] sm:$0xff]  ;;  %v75_v36 = vld [vmem:[%s24143_s29 + $0x80] sm:$0xff] }
  0x1e   :  { %16416 = vmatprep.subr.bf16.mxu0 %v19105_v48  ;;  %16440 = vmatprep.subr.bf16.mxu1 %v19148_v62  ;;  %v76_v39 = vld [vmem:[%s24143_s29 + $0x88] sm:$0xff]  ;;  %v77_v40 = vld [vmem:[%s24143_s29 + $0x90] sm:$0xff]  ;;  %v78_v41 = vld [vmem:[%s24143_s29 + $0x98] sm:$0xff] }
  0x1f   :  { %608 = vperm.xlu0 %17909, %v64_v56   ;;  %578 = vperm.xlu1 %17912, %v64_v56   ;;  %v79_v42 = vld [vmem:[%s24143_s29 + $0xa0] sm:$0xff]  ;;  %v80_v44 = vld [vmem:[%s24143_s29 + $0xa8] sm:$0xff]  ;;  %v81_v45 = vld [vmem:[%s24143_s29 + $0xb0] sm:$0xff] }
  0x20   :  { %v82_v46 = vld [vmem:[%s24143_s29 + $0xb8] sm:$0xff]  ;;  %v83_v49 = vld [vmem:[%s24143_s29 + $0xc0] sm:$0xff]  ;;  %v84_v50 = vld [vmem:[%s24143_s29 + $0xc8] sm:$0xff] }
  0x21   :  { %16418 = vmatpush1.bf16.msra.mxu0 %v19132_v57  ;;  %16442 = vmatpush3.bf16.msra.mxu1 %v19148_v62  ;;  %v85_v51 = vld [vmem:[%s24143_s29 + $0xd0] sm:$0xff]  ;;  %v86_v53 = vld [vmem:[%s24143_s29 + $0xd8] sm:$0xff]  ;;  %v87_v54 = vld [vmem:[%s24143_s29 + $0xe0] sm:$0xff] }
  0x22   :  { %16420 = vmatprep.subr.bf16.mxu0 %v19136_v58  ;;  %16444 = vmatprep.subr.bf16.mxu1 %v19176_v9  ;;  %v88_v55 = vld [vmem:[%s24143_s29 + $0xe8] sm:$0xff]  ;;  %v89_v56 = vld [vmem:[%s24143_s29 + $0xf0] sm:$0xff]  ;;  %v90_v59 = vld [vmem:[%s24143_s29 + $0xf8] sm:$0xff]  ;;  %s18864_s29 = smov 8  }
  0x23   :  { %612 = vperm.xlu0 %17909, %v65_v2   ;;  %583 = vperm.xlu1 %17912, %v65_v2   ;;  %v19347_v1 = vld [vmem:[%s24155_s30] sm:$0x3f]  ;;  %v19350_v2 = vsub.s32 2, %v19336_v61 }
  0x24   :  { %v166_v6 = vrot.slane %v19347_v1, %v19339_v63  ;;  %v221_v11 = vrot.slane %v19347_v1, %v19342_v0  ;;  %v225_v20 = vrot.slane %v19347_v1, %v224_v5 }
  0x25   :  { %16422 = vmatpush1.bf16.msra.mxu0 %v19163_v3  ;;  %16446 = vmatpush3.bf16.msra.mxu1 %v19176_v9  ;;  %v170_v17 = vrot.slane %v19347_v1, %v19350_v2 }
  0x26   :  { %16424 = vmatprep.subr.bf16.mxu0 %v19167_v4  ;;  %16448 = vmatprep.subr.bf16.mxu1 %v19193_v16  ;;  %v19368_v23 = vrot.slane %v221_v11, %v19342_v0 }
  0x27   :  { %616 = vperm.xlu0 %17909, %v66_v14   ;;  %588 = vperm.xlu1 %17912, %v66_v14  }
  0x28   :  { %24157 = vst [vmem:[#allocation13_spill] sm:$0xff] %v19368_v23 }
  0x29   :  { %16426 = vmatpush1.bf16.msra.mxu0 %v19188_v15  ;;  %16450 = vmatpush3.bf16.msra.mxu1 %v19193_v16 }
  0x2a   :  { %16460 = vmatprep.subr.bf16.mxu0 %v18987_v7  ;;  %16452 = vmatprep.subr.bf16.mxu1 %v19207_v22 }
  0x2b   :  { %946 = vperm.xlu0 %17909, %v67_v21   ;;  %915 = vperm.xlu1 %17912, %v67_v21   ;;  %v19365_v21 = vrot.slane %v166_v6, %v19339_v63 }
  0x2c   :  { %378 = vmatmul.mubr.f32.vlgmr.msra.gmra.mrb[0].mxu0 %v24029_v12 }
  0x2d   :  { %383 = vmatprep.mubr.f32.mxu0 %v24029_v12  ;;  %16462 = vmatpush1.bf16.msra.mxu0 %v18989_v8  ;;  %24156 = vst [vmem:[#allocation12_spill] sm:$0xff] %v19365_v21 }
  0x2e   :  { %16464 = vmatprep.subr.bf16.mxu0 %v19002_v13  ;;  %16454 = vmatpush3.bf16.msra.mxu1 %v19207_v22 }
  0x2f   :  { %950 = vperm.xlu0 %17909, %v68_v27   ;;  %920 = vperm.xlu1 %17912, %v68_v27   ;;  %v19373_v27 = vrot.slane %v170_v17, %v19339_v63 }
  0x30   :  { %384 = vmatmul.mubr.f32.gmra.mrb[2].mxu0 %v24029_v12  ;;  %16456 = vmatprep.subr.bf16.mxu1 %v19223_v28 }
  0x31   :  { %389 = vmatprep.mubr.f32.mxu0 %v24029_v12  ;;  %16466 = vmatpush1.bf16.msra.mxu0 %v19015_v18  ;;  %24158 = vst [vmem:[#allocation14_spill] sm:$0xff] %v19373_v27 }
  0x32   :  { %16468 = vmatprep.subr.bf16.mxu0 %v19017_v19  ;;  %16458 = vmatpush3.bf16.msra.mxu1 %v19223_v28 }
  0x33   :  { %954 = vperm.xlu0 %17909, %v69_v29   ;;  %925 = vperm.xlu1 %17912, %v69_v29   ;;  %v19376_v29 = vrot.slane %v225_v20, %v19342_v0 }
  0x34   :  { %390 = vmatmul.mubr.f32.gmra.mrb[4].mxu0 %v24029_v12  ;;  %16492 = vmatprep.subr.bf16.mxu1 %v19071_v37 }
  0x35   :  { %395 = vmatprep.mubr.f32.mxu0 %v24029_v12  ;;  %16470 = vmatpush1.bf16.msra.mxu0 %v19036_v25  ;;  %24159 = vst [vmem:[#allocation15_spill] sm:$0xff] %v19376_v29 }
  0x36   :  { %14740 = vmatmul.mubr.f32.vlgmr.msra.gmra.mrb[0].mxu1 %v24029_v12  ;;  %16472 = vmatprep.subr.bf16.mxu0 %v19039_v26 }
  0x37   :  { %958 = vperm.xlu0 %17909, %v70_v30   ;;  %930 = vperm.xlu1 %17912, %v70_v30  }
  0x38   :  { %396 = vmatmul.mubr.f32.gmra.mrb[6].mxu0 %v24029_v12  ;;  %14742 = vmatprep.mubr.f32.mxu1 %v24029_v12 }
  0x39   :  { %16494 = vmatpush3.bf16.msra.mxu1 %v19071_v37  ;;  %16474 = vmatpush1.bf16.msra.mxu0 %v19063_v34 }
  0x3a   :  { %16496 = vmatprep.subr.bf16.mxu1 %v19088_v43  ;;  %14743 = vmatmul.mubr.f32.gmra.mrb[2].mxu1 %v24029_v12 }
  0x3b   :  { %1288 = vperm.xlu0 %17909, %v71_v31   ;;  %1257 = vperm.xlu1 %17912, %v71_v31  }
  0x3c   :  { %16476 = vmatprep.subr.bf16.mxu0 %v19074_v38  ;;  %719 = vmatprep.mubr.f32.mxu0 %v24029_v12 }
  0x3d   :  { %16498 = vmatpush3.bf16.msra.mxu1 %v19088_v43  ;;  %16478 = vmatpush1.bf16.msra.mxu0 %v19101_v47 }
  0x3e   :  { %16500 = vmatprep.subr.bf16.mxu1 %v19117_v52  ;;  %16480 = vmatprep.subr.bf16.mxu0 %v19105_v48 }
  0x3f   :  { %1292 = vperm.xlu0 %17909, %v72_v32   ;;  %1262 = vperm.xlu1 %17912, %v72_v32  }
  0x41   :  { %16502 = vmatpush3.bf16.msra.mxu1 %v19117_v52  ;;  %16482 = vmatpush1.bf16.msra.mxu0 %v19132_v57 }
  0x42   :  { %16504 = vmatprep.subr.bf16.mxu1 %v19148_v62  ;;  %16484 = vmatprep.subr.bf16.mxu0 %v19136_v58 }
  0x43   :  { %1296 = vperm.xlu0 %17909, %v73_v33   ;;  %1267 = vperm.xlu1 %17912, %v73_v33   ;;  %v19387_v33 = vld [vmem:[%s24011_s3] sm:$0x7] }
  0x45   :  { %16506 = vmatpush3.bf16.msra.mxu1 %v19148_v62  ;;  %16486 = vmatpush1.bf16.msra.mxu0 %v19163_v3 }
  0x46   :  { %16508 = vmatprep.subr.bf16.mxu1 %v19176_v9  ;;  %16488 = vmatprep.subr.bf16.mxu0 %v19167_v4 }
  0x47   :  { %1300 = vperm.xlu0 %17909, %v74_v35   ;;  %1272 = vperm.xlu1 %17912, %v74_v35   ;;  %v19392_v35 = vld [vmem:[%s24012_s4] sm:$0x7] }
  0x49   :  { %16510 = vmatpush3.bf16.msra.mxu1 %v19176_v9  ;;  %16490 = vmatpush1.bf16.msra.mxu0 %v19188_v15 }
  0x4a   :  { %16512 = vmatprep.subr.bf16.mxu1 %v19193_v16  ;;  %16524 = vmatprep.subr.bf16.mxu0 %v18987_v7 }
  0x4b   :  { %1630 = vperm.xlu0 %17909, %v75_v36   ;;  %1599 = vperm.xlu1 %17912, %v75_v36  }
  0x4d   :  { %16514 = vmatpush3.bf16.msra.mxu1 %v19193_v16 }
  0x4e   :  { %16516 = vmatprep.subr.bf16.mxu1 %v19207_v22 }
  0x4f   :  { %1634 = vperm.xlu0 %17909, %v76_v39   ;;  %1604 = vperm.xlu1 %17912, %v76_v39  }
  0x51   :  { %16518 = vmatpush3.bf16.msra.mxu1 %v19207_v22 }
  0x52   :  { %16520 = vmatprep.subr.bf16.mxu1 %v19223_v28 }
  0x53   :  { %1638 = vperm.xlu0 %17909, %v77_v40   ;;  %1609 = vperm.xlu1 %17912, %v77_v40  }
  0x55   :  { %16522 = vmatpush3.bf16.msra.mxu1 %v19223_v28 }
  0x56   :  { %16556 = vmatprep.subr.bf16.mxu1 %v19071_v37 }
  0x57   :  { %1642 = vperm.xlu0 %17909, %v78_v41   ;;  %1614 = vperm.xlu1 %17912, %v78_v41  }
  0x5b   :  { %1972 = vperm.xlu0 %17909, %v79_v42   ;;  %1941 = vperm.xlu1 %17912, %v79_v42  }
  0x5f   :  { %1976 = vperm.xlu0 %17909, %v80_v44   ;;  %1946 = vperm.xlu1 %17912, %v80_v44  }
  0x63   :  { %1980 = vperm.xlu0 %17909, %v81_v45   ;;  %1951 = vperm.xlu1 %17912, %v81_v45   ;;  %v19406_v45 = vrot.slane %v19387_v33, %v19339_v63 }
  0x67   :  { %1984 = vperm.xlu0 %17909, %v82_v46   ;;  %1956 = vperm.xlu1 %17912, %v82_v46   ;;  %v19410_v46 = vrot.slane %v19392_v35, %v19339_v63 }
  0x6b   :  { %2314 = vperm.xlu0 %17909, %v83_v49   ;;  %2283 = vperm.xlu1 %17912, %v83_v49  }
  0x6f   :  { %2318 = vperm.xlu0 %17909, %v84_v50   ;;  %2288 = vperm.xlu1 %17912, %v84_v50   ;;  %v19416_v50 = vrot.slane %v19392_v35, %v19342_v0 }
  0x73   :  { %2322 = vperm.xlu0 %17909, %v85_v51   ;;  %2293 = vperm.xlu1 %17912, %v85_v51  }
  0x77   :  { %2326 = vperm.xlu0 %17909, %v86_v53   ;;  %2298 = vperm.xlu1 %17912, %v86_v53  }
  0x7b   :  { %2656 = vperm.xlu0 %17909, %v87_v54   ;;  %2625 = vperm.xlu1 %17912, %v87_v54   ;;  %v19424_v54 = vrot.slane %v19387_v33, %v19342_v0 }
  0x7f   :  { %2660 = vperm.xlu0 %17909, %v88_v55   ;;  %2630 = vperm.xlu1 %17912, %v88_v55  }
  0x83   :  { %2664 = vperm.xlu0 %17909, %v89_v56   ;;  %2635 = vperm.xlu1 %17912, %v89_v56  }
  0x87   :  { %2668 = vperm.xlu0 %17909, %v90_v59   ;;  %2640 = vperm.xlu1 %17912, %v90_v59  }
  0x88   :  { %v19355_v10 = vpop.permute.xlu0 %144  ;;  %v19359_v14 = vpop.permute.xlu1 %149 }
  0x89   :  { %v190_v31 = vmul.f32 %v19365_v21, %v19355_v10  ;;  %v191_v36 = vmul.f32 %v19373_v27, %v19355_v10  ;;  %v193_v39 = vmul.f32 %v19365_v21, %v19359_v14  ;;  %v194_v51 = vmul.f32 %v19373_v27, %v19359_v14 }
  0x8d   :  { %v19378_v30 = vpop.permute.xlu1 %207 }
  0x8e   :  { %v19370_v24 = vpop.permute.xlu0 %203  ;;  %v248_v41 = vmul.f32 %v19368_v23, %v19378_v30  ;;  %v249_v53 = vmul.f32 %v19376_v29, %v19378_v30 }
  0x8f   :  { %v245_v32 = vmul.f32 %v19368_v23, %v19370_v24  ;;  %v246_v40 = vmul.f32 %v19376_v29, %v19370_v24 }
  0x90   :  { %v260_v56 = vadd.f32 %v248_v41, %v193_v39 }
  0x91   :  { %v257_v42 = vadd.f32 %v245_v32, %v190_v31  ;;  %v258_v55 = vadd.f32 %v246_v40, %v191_v36  ;;  %v261_v40 = vadd.f32 %v249_v53, %v194_v51 }
  0x92   :  { %v19402_v44 = vpop.permute.xlu0 %211  ;;  %v19412_v49 = vpop.permute.xlu1 %154 }
  0x93   :  { %v251_v59 = vmul.f32 %v19368_v23, %v19402_v44  ;;  %v196_v60 = vmul.f32 %v19365_v21, %v19412_v49  ;;  %v285_v6 = vadd.f32 %v19406_v45, %v257_v42  ;;  %v252_v20 = vmul.f32 %v19376_v29, %v19402_v44 }
  0x94   :  { %v197_v31 = vmul.f32 %v19373_v27, %v19412_v49  ;;  %v286_v42 = vadd.f32 %v19424_v54, %v258_v55 }
  0x95   :  { %v263_v41 = vadd.f32 %v251_v59, %v196_v60  ;;  %v173_v60 = vsub.s32 4, %v19336_v61 }
  0x96   :  { %v19437_v36 = vpop.permute.xlu0 %215  ;;  %v19439_v12 = vpop.permute.xlu1 %159 }
  0x97   :  { %v254_v28 = vmul.f32 %v19368_v23, %v19437_v36  ;;  %v199_v15 = vmul.f32 %v19365_v21, %v19439_v12  ;;  %v255_v55 = vmul.f32 %v19376_v29, %v19437_v36 }
  0x99   :  { %v266_v21 = vadd.f32 %v254_v28, %v199_v15 }
  0xff   :  { %v379_v5 = vpop.f32.mrb[0].mxu0 }
 0x100   :  { %v380_v11 = vadd.f32 %v379_v5, %v19410_v46  ;;  %v381_v17 = vpop.f32.mrb[1].mxu0  ;;  %v288_v5 = vadd.f32 %v19406_v45, %v260_v56  ;;  %v200_v56 = vmul.f32 %v19373_v27, %v19439_v12 }
 0x101   :  { %v382_v32 = vadd.f32 %v381_v17, %v19416_v50 }
 0x102   :  { %v487_v39 = vadd.f32 %v380_v11, %v285_v6  ;;  %v264_v6 = vadd.f32 %v252_v20, %v197_v31  ;;  %v289_v11 = vadd.f32 %v19424_v54, %v261_v40  ;;  %v291_v20 = vadd.f32 %v19406_v45, %v263_v41 }
 0x103   :  { %v385_v7 = vpop.f32.mrb[2].mxu0  ;;  %v515_v51 = vadd.f32 %v382_v32, %v286_v42  ;;  %v228_v32 = vsub.s32 5, %v19336_v61  ;;  %v294_v41 = vadd.f32 %v19406_v45, %v266_v21  ;;  %v174_v61 = vrot.slane %v19347_v1, %v173_v60 }
 0x104   :  { %v13199_v4 = vmul.f32 -1.442695, %v487_v39  ;;  %v386_v17 = vadd.f32 %v385_v7, %v19410_v46  ;;  %v387_v22 = vpop.f32.mrb[3].mxu0  ;;  %v292_v27 = vadd.f32 %v19424_v54, %v264_v6 }
 0x105   :  { %v388_v53 = vadd.f32 %v387_v22, %v19416_v50  ;;  %v13203_v42 = vmul.f32 -1.442695, %v515_v51  ;;  %v19469_v60 = vrot.slane %v174_v61, %v19339_v63 }
 0x106   :  { %18123 = vpow2.f32 %v13199_v4  ;;  %v488_v59 = vadd.f32 %v386_v17, %v288_v5  ;;  %v267_v4 = vadd.f32 %v255_v55, %v200_v56 }
 0x107   :  { %v391_v39 = vpop.f32.mrb[4].mxu0  ;;  %v516_v29 = vadd.f32 %v388_v53, %v289_v11  ;;  %v229_v53 = vrot.slane %v19347_v1, %v228_v32 }
 0x108   :  { %v13200_v7 = vmul.f32 -1.442695, %v488_v59  ;;  %v392_v31 = vadd.f32 %v391_v39, %v19410_v46  ;;  %v393_v22 = vpop.f32.mrb[5].mxu0  ;;  %v295_v56 = vadd.f32 %v19424_v54, %v267_v4  ;;  %v192_v4 = vmul.f32 %v19469_v60, %v19355_v10 }
 0x109   :  { %v394_v17 = vadd.f32 %v393_v22, %v19416_v50  ;;  %v14741_v23 = vpop.f32.mrb[0].mxu1  ;;  %v13204_v51 = vmul.f32 -1.442695, %v516_v29  ;;  %v19472_v29 = vrot.slane %v229_v53, %v19342_v0 }
 0x10a   :  { %18125 = vpow2.f32 %v13200_v7  ;;  %v489_v5 = vadd.f32 %v392_v31, %v291_v20  ;;  %v468_v3 = vpop.f32.mrb[1].mxu1 }
 0x10b   :  { %v397_v40 = vpop.f32.mrb[6].mxu0  ;;  %v517_v28 = vadd.f32 %v394_v17, %v292_v27  ;;  %18127 = vpow2.f32 %v13203_v42  ;;  %v19480_v17 = vrot.slane %v19392_v35, %v19350_v2 }
 0x10c   :  { %v13201_v15 = vmul.f32 -1.442695, %v489_v5  ;;  %v398_v59 = vadd.f32 %v397_v40, %v19410_v46  ;;  %v399_v39 = vpop.f32.mrb[7].mxu0  ;;  %v247_v5 = vmul.f32 %v19472_v29, %v19370_v24  ;;  %v195_v40 = vmul.f32 %v19469_v60, %v19359_v14 }
 0x10d   :  { %v400_v6 = vadd.f32 %v399_v39, %v19416_v50  ;;  %v19466_v11 = vpop.f32.mrb[2].mxu1  ;;  %v13205_v21 = vmul.f32 -1.442695, %v517_v28  ;;  %v19488_v24 = vrot.slane %v19387_v33, %v19350_v2  ;;  %v469_v35 = vadd.f32 %v468_v3, %v19480_v17 }
 0x10e   :  { %18129 = vpow2.f32 %v13201_v15  ;;  %v490_v55 = vadd.f32 %v398_v59, %v294_v41  ;;  %v478_v31 = vpop.f32.mrb[3].mxu1  ;;  %v250_v15 = vmul.f32 %v19472_v29, %v19378_v30  ;;  %v259_v41 = vadd.f32 %v247_v5, %v192_v4 }
 0x10f   :  { %v518_v20 = vadd.f32 %v400_v6, %v295_v56  ;;  %18131 = vpow2.f32 %v13204_v51  ;;  %v253_v14 = vmul.f32 %v19472_v29, %v19402_v44  ;;  %v198_v30 = vmul.f32 %v19469_v60, %v19412_v49 }
 0x110   :  { %v18124_v27 = vpop.eup %18123  ;;  %v13202_v7 = vmul.f32 -1.442695, %v490_v55  ;;  %v262_v51 = vadd.f32 %v250_v15, %v195_v40  ;;  %v287_v2 = vadd.f32 %v19488_v24, %v259_v41  ;;  %v474_v3 = vadd.f32 %v14741_v23, %v19480_v17 }
 0x111   :  { %v503_v22 = vadd.f32 1.0, %v18124_v27  ;;  %v13206_v32 = vmul.f32 -1.442695, %v518_v20  ;;  %v484_v40 = vadd.f32 %v19466_v11, %v19480_v17 }
 0x112   :  { %18133 = vpow2.f32 %v13202_v7  ;;  %v256_v7 = vmul.f32 %v19472_v29, %v19437_v36  ;;  %v290_v20 = vadd.f32 %v19488_v24, %v262_v51 }
 0x113   :  { %18135 = vrcp.f32 %v503_v22  ;;  %v201_v22 = vmul.f32 %v19469_v60, %v19439_v12 }
 0x114   :  { %v18126_v1 = vpop.eup %18125  ;;  %18137 = vpow2.f32 %v13205_v21  ;;  %v265_v21 = vadd.f32 %v253_v14, %v198_v30 }
 0x115   :  { %v504_v42 = vadd.f32 1.0, %v18126_v1  ;;  %v18128_v63 = vpop.eup %18127  ;;  %v268_v5 = vadd.f32 %v256_v7, %v201_v22 }
 0x116   :  { %v531_v10 = vadd.f32 1.0, %v18128_v63  ;;  %v293_v36 = vadd.f32 %v19488_v24, %v265_v21 }
 0x117   :  { %18139 = vrcp.f32 %v504_v42 }
 0x118   :  { %v18130_v0 = vpop.eup %18129  ;;  %18141 = vpow2.f32 %v13206_v32  ;;  %v479_v32 = vadd.f32 %v478_v31, %v19480_v17 }
 0x119   :  { %v505_v28 = vadd.f32 1.0, %v18130_v0  ;;  %v18132_v59 = vpop.eup %18131 }
 0x11a   :  { %v532_v55 = vadd.f32 1.0, %v18132_v59 }
 0x11b   :  { %18143 = vrcp.f32 %v505_v28  ;;  %v296_v28 = vadd.f32 %v19488_v24, %v268_v5  ;;  %v24165_v5 = vld [vmem:[#allocation11_spill] sm:$0xff] }
 0x11c   :  { %v18134_v39 = vpop.eup %18133  ;;  %18145 = vrcp.f32 %v531_v10 }
 0x11d   :  { %v18136_v61 = vpop.eup %18135  ;;  %v506_v6 = vadd.f32 1.0, %v18134_v39 }
 0x11e   :  { %v18138_v53 = vpop.eup %18137  ;;  %v543_v33 = vmul.f32 %v18136_v61, %v469_v35 }
 0x11f   :  { %18147 = vrcp.f32 %v506_v6  ;;  %v533_v44 = vadd.f32 1.0, %v18138_v53 }
 0x120   :  { %v547_v56 = vadd.f32 %v543_v33, %v287_v2  ;;  %18149 = vrcp.f32 %v532_v55  ;;  %v24160_v2 = vmov 0.0  }
 0x121   :  { %v18140_v27 = vpop.eup %18139 }
 0x122   :  { %v18142_v49 = vpop.eup %18141  ;;  %v544_v1 = vmul.f32 %v18140_v27, %v474_v3  ;;  %18151 = vtanh.f32 %v547_v56 }
 0x123   :  { %18153 = vrcp.f32 %v533_v44  ;;  %v534_v4 = vadd.f32 1.0, %v18142_v49 }
 0x124   :  { %v548_v42 = vadd.f32 %v544_v1, %v290_v20 }
 0x125   :  { %v18144_v23 = vpop.eup %18143 }
 0x126   :  { %18155 = vtanh.f32 %v548_v42  ;;  %v545_v63 = vmul.f32 %v18144_v23, %v479_v32  ;;  %v18146_v0 = vpop.eup %18145  ;;  %v24161_v32 = vld [vmem:[#allocation5_spill] sm:$0xff]  ;;  %v24162_v42 = vld [vmem:[#allocation10_spill] sm:$0xff] }
 0x127   :  { %18157 = vrcp.f32 %v534_v4  ;;  %v555_v35 = vsub.f32 1.0, %v18146_v0  ;;  %v563_v61 = vmul.f32 0.0, %v18146_v0  ;;  %v24163_v23 = vld [vmem:[#allocation6_spill] sm:$0xff]  ;;  %v24164_v4 = vld [vmem:[#allocation8_spill] sm:$0xff]  ;;  %v19561_v0 = vpop.permute.xlu1 %573 }
 0x128   :  { %v549_v15 = vadd.f32 %v545_v63, %v293_v36  ;;  %v24166_v36 = vld [vmem:[#allocation2_spill] sm:$0xff]  ;;  %v19559_v63 = vpop.permute.xlu0 %604 }
 0x129   :  { %v18148_v12 = vpop.eup %18147 }
 0x12a   :  { %v546_v31 = vmul.f32 %v18148_v12, %v484_v40  ;;  %18159 = vtanh.f32 %v549_v15  ;;  %v18150_v41 = vpop.eup %18149  ;;  %v24167_v12 = vld [vmem:[#allocation13_spill] sm:$0xff] }
 0x12b   :  { %v556_v14 = vsub.f32 1.0, %v18150_v41  ;;  %v564_v53 = vmul.f32 0.0, %v18150_v41  ;;  %v19565_v15 = vpop.permute.xlu1 %578 }
 0x12c   :  { %v550_v10 = vadd.f32 %v546_v31, %v296_v28  ;;  %v18152_v59 = vpop.eup %18151  ;;  %v19563_v40 = vpop.permute.xlu0 %608  ;;  %v619_v28 = vmul.f32 %v19559_v63, %v24167_v12  ;;  %v24168_v31 = vld [vmem:[#allocation12_spill] sm:$0xff] }
 0x12d   :  { %v559_v39 = vmul.f32 %v18152_v59, %v555_v35  ;;  %v18154_v51 = vpop.eup %18153  ;;  %v591_v41 = vmul.f32 %v19561_v0, %v24168_v31  ;;  %v24170_v59 = vld [vmem:[#allocation14_spill] sm:$0xff] }
 0x12e   :  { %18161 = vtanh.f32 %v550_v10  ;;  %v557_v3 = vsub.f32 1.0, %v18154_v51  ;;  %v565_v21 = vmul.f32 0.0, %v18154_v51  ;;  %v24169_v10 = vld [vmem:[#allocation15_spill] sm:$0xff] }
 0x12f   :  { %v19507_v6 = vadd.f32 %v563_v61, %v559_v39  ;;  %v620_v35 = vmul.f32 %v19559_v63, %v24169_v10  ;;  %v592_v39 = vmul.f32 %v19561_v0, %v24170_v59  ;;  %v631_v61 = vadd.f32 %v619_v28, %v591_v41 }
 0x130   :  { %v18156_v30 = vpop.eup %18155  ;;  %v19575_v51 = vpop.permute.xlu0 %612 }
 0x131   :  { %v560_v11 = vmul.f32 %v18156_v30, %v556_v14  ;;  %720 = vmatmul.mubr.f32.vlgmr.msra.gmra.mrb[8].mxu0 %v19507_v6  ;;  %14777 = vmatprep.mubr.f32.mxu1 %v19507_v6  ;;  %v18158_v55 = vpop.eup %18157  ;;  %v622_v14 = vmul.f32 %v19563_v40, %v24167_v12  ;;  %v594_v30 = vmul.f32 %v19565_v15, %v24168_v31 }
 0x132   :  { %725 = vmatprep.mubr.f32.mxu0 %v24160_v2  ;;  %16526 = vmatpush1.bf16.msra.mxu0 %v18989_v8  ;;  %v558_v44 = vsub.f32 1.0, %v18158_v55  ;;  %v566_v22 = vmul.f32 0.0, %v18158_v55  ;;  %v595_v55 = vmul.f32 %v19565_v15, %v24170_v59  ;;  %v626_v41 = vmul.f32 %v19575_v51, %v24169_v10 }
 0x133   :  { %v19512_v33 = vadd.f32 %v564_v53, %v560_v11  ;;  %16528 = vmatprep.subr.bf16.mxu0 %v19002_v13  ;;  %v19581_v11 = vpop.permute.xlu1 %583  ;;  %v623_v53 = vmul.f32 %v19563_v40, %v24169_v10 }
 0x134   :  { %v18160_v56 = vpop.eup %18159 }
 0x135   :  { %14778 = vmatmul.mubr.f32.vlgmr.msra.gmra.mrb[4].mxu1 %v19512_v33  ;;  %v561_v27 = vmul.f32 %v18160_v56, %v557_v3  ;;  %726 = vmatmul.mubr.f32.gmra.mrb[10].mxu0 %v19512_v33  ;;  %v632_v3 = vadd.f32 %v620_v35, %v592_v39  ;;  %v643_v56 = vadd.f32 %v631_v61, %v19406_v45  ;;  %v19597_v39 = vpop.permute.xlu0 %616 }
 0x136   :  { %16558 = vmatpush3.bf16.msra.mxu1 %v19071_v37  ;;  %731 = vmatprep.mubr.f32.mxu0 %v24160_v2  ;;  %v635_v28 = vadd.f32 %v623_v53, %v595_v55  ;;  %v598_v35 = vmul.f32 %v19581_v11, %v24170_v59 }
 0x137   :  { %v19520_v7 = vadd.f32 %v565_v21, %v561_v27  ;;  %16530 = vmatpush1.bf16.msra.mxu0 %v19015_v18  ;;  %16560 = vmatprep.subr.bf16.mxu1 %v19088_v43  ;;  %v634_v21 = vadd.f32 %v622_v14, %v594_v30  ;;  %v19600_v14 = vpop.permute.xlu1 %588  ;;  %v644_v55 = vadd.f32 %v632_v3, %v19424_v54 }
 0x138   :  { %v18162_v20 = vpop.eup %18161  ;;  %16532 = vmatprep.subr.bf16.mxu0 %v19017_v19  ;;  %v600_v53 = vmul.f32 %v19600_v14, %v24168_v31  ;;  %v601_v3 = vmul.f32 %v19600_v14, %v24170_v59 }
 0x139   :  { %14780 = vmatprep.mubr.f32.mxu1 %v19520_v7  ;;  %v562_v49 = vmul.f32 %v18162_v20, %v558_v44  ;;  %732 = vmatmul.mubr.f32.gmra.mrb[12].mxu0 %v19520_v7  ;;  %v625_v44 = vmul.f32 %v19575_v51, %v24167_v12  ;;  %v597_v20 = vmul.f32 %v19581_v11, %v24168_v31 }
 0x13a   :  { %16562 = vmatpush3.bf16.msra.mxu1 %v19088_v43  ;;  %737 = vmatprep.mubr.f32.mxu0 %v24160_v2  ;;  %v629_v31 = vmul.f32 %v19597_v39, %v24169_v10 }
 0x13b   :  { %v19529_v1 = vadd.f32 %v566_v22, %v562_v49  ;;  %16534 = vmatpush1.bf16.msra.mxu0 %v19036_v25  ;;  %16564 = vmatprep.subr.bf16.mxu1 %v19117_v52 }
 0x13c   :  { %16536 = vmatprep.subr.bf16.mxu0 %v19039_v26 }
 0x13d   :  { %14781 = vmatmul.mubr.f32.gmra.mrb[6].mxu1 %v19529_v1  ;;  %738 = vmatmul.mubr.f32.gmra.mrb[14].mxu0 %v19529_v1 }
 0x13e   :  { %16566 = vmatpush3.bf16.msra.mxu1 %v19117_v52  ;;  %1061 = vmatprep.mubr.f32.mxu0 %v24160_v2 }
 0x13f   :  { %16538 = vmatpush1.bf16.msra.mxu0 %v19063_v34  ;;  %16568 = vmatprep.subr.bf16.mxu1 %v19148_v62 }
 0x140   :  { %16540 = vmatprep.subr.bf16.mxu0 %v19074_v38 }
 0x142   :  { %16570 = vmatpush3.bf16.msra.mxu1 %v19148_v62 }
 0x143   :  { %16542 = vmatpush1.bf16.msra.mxu0 %v19101_v47  ;;  %16572 = vmatprep.subr.bf16.mxu1 %v19176_v9 }
 0x144   :  { %16544 = vmatprep.subr.bf16.mxu0 %v19105_v48 }
 0x146   :  { %16574 = vmatpush3.bf16.msra.mxu1 %v19176_v9 }
 0x147   :  { %16546 = vmatpush1.bf16.msra.mxu0 %v19132_v57  ;;  %16576 = vmatprep.subr.bf16.mxu1 %v19193_v16 }
 0x148   :  { %16548 = vmatprep.subr.bf16.mxu0 %v19136_v58  ;;  %v647_v58 = vadd.f32 %v635_v28, %v19424_v54 }
 0x14a   :  { %16578 = vmatpush3.bf16.msra.mxu1 %v19193_v16 }
 0x14b   :  { %16550 = vmatpush1.bf16.msra.mxu0 %v24161_v32  ;;  %16580 = vmatprep.subr.bf16.mxu1 %v24162_v42 }
 0x14c   :  { %16552 = vmatprep.subr.bf16.mxu0 %v24163_v23 }
 0x14e   :  { %16582 = vmatpush3.bf16.msra.mxu1 %v24162_v42  ;;  %v637_v42 = vadd.f32 %v625_v44, %v597_v20 }
 0x14f   :  { %16554 = vmatpush1.bf16.msra.mxu0 %v24164_v4  ;;  %16584 = vmatprep.subr.bf16.mxu1 %v24165_v5 }
 0x150   :  { %16588 = vmatprep.subr.bf16.mxu0 %v24166_v36 }
 0x152   :  { %16586 = vmatpush3.bf16.msra.mxu1 %v24165_v5 }
 0x153   :  { %16620 = vmatprep.subr.bf16.mxu1 %v19071_v37 }
 0x204   :  { %v721_v27 = vpop.f32.mrb[8].mxu0 }
 0x205   :  { %v722_v49 = vadd.f32 %v721_v27, %v19410_v46  ;;  %v723_v22 = vpop.f32.mrb[9].mxu0  ;;  %v628_v27 = vmul.f32 %v19597_v39, %v24167_v12 }
 0x206   :  { %v724_v61 = vadd.f32 %v723_v22, %v19416_v50  ;;  %v646_v22 = vadd.f32 %v634_v21, %v19406_v45 }
 0x207   :  { %v829_v30 = vadd.f32 %v722_v49, %v643_v56  ;;  %v638_v49 = vadd.f32 %v626_v41, %v598_v35  ;;  %v640_v20 = vadd.f32 %v628_v27, %v600_v53 }
 0x208   :  { %v19602_v5 = vpop.f32.mrb[4].mxu1  ;;  %v727_v36 = vpop.f32.mrb[10].mxu0  ;;  %v857_v16 = vadd.f32 %v724_v61, %v644_v55  ;;  %v641_v55 = vadd.f32 %v629_v31, %v601_v3 }
 0x209   :  { %v19609_v4 = vpop.f32.mrb[5].mxu1  ;;  %v13207_v23 = vmul.f32 -1.442695, %v829_v30  ;;  %v728_v32 = vadd.f32 %v727_v36, %v19410_v46  ;;  %v729_v56 = vpop.f32.mrb[11].mxu0  ;;  %v649_v36 = vadd.f32 %v637_v42, %v19406_v45  ;;  %v650_v10 = vadd.f32 %v638_v49, %v19424_v54 }
 0x20a   :  { %v730_v12 = vadd.f32 %v729_v56, %v19416_v50  ;;  %v13211_v28 = vmul.f32 -1.442695, %v857_v16  ;;  %v653_v3 = vadd.f32 %v641_v55, %v19424_v54  ;;  %v624_v55 = vmul.f32 %v19563_v40, %v19472_v29 }
 0x20b   :  { %18163 = vpow2.f32 %v13207_v23  ;;  %v830_v44 = vadd.f32 %v728_v32, %v646_v22  ;;  %v652_v32 = vadd.f32 %v640_v20, %v19406_v45  ;;  %v599_v40 = vmul.f32 %v19581_v11, %v19469_v60 }
 0x20c   :  { %v733_v30 = vpop.f32.mrb[12].mxu0  ;;  %v858_v57 = vadd.f32 %v730_v12, %v647_v58  ;;  %v630_v11 = vmul.f32 %v19597_v39, %v19472_v29 }
 0x20d   :  { %v13208_v21 = vmul.f32 -1.442695, %v830_v44  ;;  %v734_v41 = vadd.f32 %v733_v30, %v19410_v46  ;;  %v735_v35 = vpop.f32.mrb[13].mxu0 }
 0x20e   :  { %v736_v61 = vadd.f32 %v735_v35, %v19416_v50  ;;  %v13212_v58 = vmul.f32 -1.442695, %v858_v57  ;;  %v593_v35 = vmul.f32 %v19561_v0, %v19469_v60  ;;  %v811_v0 = vadd.f32 %v19609_v4, %v19480_v17 }
 0x20f   :  { %18165 = vpow2.f32 %v13208_v21  ;;  %v831_v56 = vadd.f32 %v734_v41, %v649_v36  ;;  %v621_v41 = vmul.f32 %v19559_v63, %v19472_v29 }
 0x210   :  { %v19623_v59 = vpop.f32.mrb[6].mxu1  ;;  %v739_v23 = vpop.f32.mrb[14].mxu0  ;;  %v859_v42 = vadd.f32 %v736_v61, %v650_v10  ;;  %18167 = vpow2.f32 %v13211_v28 }
 0x211   :  { %v820_v27 = vpop.f32.mrb[7].mxu1  ;;  %v13209_v12 = vmul.f32 -1.442695, %v831_v56  ;;  %v740_v53 = vadd.f32 %v739_v23, %v19410_v46  ;;  %v741_v22 = vpop.f32.mrb[15].mxu0  ;;  %v596_v56 = vmul.f32 %v19565_v15, %v19469_v60  ;;  %v826_v39 = vadd.f32 %v19623_v59, %v19480_v17 }
 0x212   :  { %v742_v16 = vadd.f32 %v741_v22, %v19416_v50  ;;  %v13213_v44 = vmul.f32 -1.442695, %v859_v42  ;;  %v627_v22 = vmul.f32 %v19575_v51, %v19472_v29 }
 0x213   :  { %18169 = vpow2.f32 %v13209_v12  ;;  %v832_v31 = vadd.f32 %v740_v53, %v652_v32  ;;  %v636_v63 = vadd.f32 %v624_v55, %v596_v56 }
 0x214   :  { %18171 = vpow2.f32 %v13212_v58  ;;  %v860_v20 = vadd.f32 %v742_v16, %v653_v3  ;;  %v633_v58 = vadd.f32 %v621_v41, %v593_v35  ;;  %v821_v35 = vadd.f32 %v820_v27, %v19480_v17 }
 0x215   :  { %v18164_v49 = vpop.eup %18163  ;;  %v13210_v30 = vmul.f32 -1.442695, %v832_v31 }
 0x216   :  { %v845_v21 = vadd.f32 1.0, %v18164_v49  ;;  %v13214_v10 = vmul.f32 -1.442695, %v860_v20  ;;  %v645_v3 = vadd.f32 %v633_v58, %v19488_v24  ;;  %v639_v20 = vadd.f32 %v627_v22, %v599_v40 }
 0x217   :  { %18173 = vpow2.f32 %v13210_v30 }
 0x218   :  { %18175 = vrcp.f32 %v845_v21  ;;  %v648_v21 = vadd.f32 %v636_v63, %v19488_v24  ;;  %v651_v55 = vadd.f32 %v639_v20, %v19488_v24 }
 0x219   :  { %v18166_v57 = vpop.eup %18165  ;;  %18177 = vpow2.f32 %v13213_v44  ;;  %v816_v44 = vadd.f32 %v19602_v5, %v19480_v17 }
 0x21a   :  { %v846_v36 = vadd.f32 1.0, %v18166_v57  ;;  %v18168_v28 = vpop.eup %18167 }
 0x21b   :  { %v873_v12 = vadd.f32 1.0, %v18168_v28 }
 0x21c   :  { %18179 = vrcp.f32 %v846_v36 }
 0x21d   :  { %v18170_v61 = vpop.eup %18169  ;;  %18181 = vpow2.f32 %v13214_v10  ;;  %v602_v10 = vmul.f32 %v19600_v14, %v19469_v60 }
 0x21e   :  { %v847_v32 = vadd.f32 1.0, %v18170_v61  ;;  %v18172_v23 = vpop.eup %18171 }
 0x21f   :  { %v874_v16 = vadd.f32 1.0, %v18172_v23  ;;  %v642_v61 = vadd.f32 %v630_v11, %v602_v10  ;;  %v24172_v10 = vld [vmem:[#allocation4_spill] sm:$0xff] }
 0x220   :  { %18183 = vrcp.f32 %v847_v32 }
 0x221   :  { %v18174_v42 = vpop.eup %18173  ;;  %18185 = vrcp.f32 %v873_v12  ;;  %v654_v14 = vadd.f32 %v642_v61, %v19488_v24  ;;  %v24178_v61 = vld [vmem:[#allocation2_spill] sm:$0xff] }
 0x222   :  { %v18176_v53 = vpop.eup %18175  ;;  %v848_v15 = vadd.f32 1.0, %v18174_v42 }
 0x223   :  { %v18178_v31 = vpop.eup %18177  ;;  %v885_v49 = vmul.f32 %v18176_v53, %v811_v0 }
 0x224   :  { %18187 = vrcp.f32 %v848_v15  ;;  %v875_v51 = vadd.f32 1.0, %v18178_v31 }
 0x225   :  { %v889_v30 = vadd.f32 %v885_v49, %v645_v3  ;;  %18189 = vrcp.f32 %v874_v16 }
 0x226   :  { %v18180_v4 = vpop.eup %18179 }
 0x227   :  { %v18182_v57 = vpop.eup %18181  ;;  %v886_v36 = vmul.f32 %v18180_v4, %v816_v44  ;;  %18191 = vtanh.f32 %v889_v30 }
 0x228   :  { %18193 = vrcp.f32 %v875_v51  ;;  %v876_v28 = vadd.f32 1.0, %v18182_v57 }
 0x229   :  { %v890_v41 = vadd.f32 %v886_v36, %v648_v21  ;;  %v24173_v36 = vld [vmem:[#allocation9_spill] sm:$0xff] }
 0x22a   :  { %v18184_v5 = vpop.eup %18183 }
 0x22b   :  { %18195 = vtanh.f32 %v890_v41  ;;  %v887_v56 = vmul.f32 %v18184_v5, %v821_v35  ;;  %v18186_v32 = vpop.eup %18185  ;;  %v24174_v41 = vld [vmem:[#allocation5_spill] sm:$0xff]  ;;  %v24175_v35 = vld [vmem:[#allocation6_spill] sm:$0xff] }
 0x22c   :  { %18197 = vrcp.f32 %v876_v28  ;;  %v897_v42 = vsub.f32 1.0, %v18186_v32  ;;  %v905_v22 = vmul.f32 %v18186_v32, %v19507_v6  ;;  %v24176_v5 = vld [vmem:[#allocation10_spill] sm:$0xff]  ;;  %v24177_v28 = vld [vmem:[#allocation8_spill] sm:$0xff]  ;;  %v19714_v32 = vpop.permute.xlu1 %915 }
 0x22d   :  { %v891_v23 = vadd.f32 %v887_v56, %v651_v55  ;;  %v24179_v55 = vld [vmem:[#allocation11_spill] sm:$0xff]  ;;  %v19712_v56 = vpop.permute.xlu0 %946 }
 0x22e   :  { %v18188_v58 = vpop.eup %18187 }
 0x22f   :  { %v888_v12 = vmul.f32 %v18188_v58, %v826_v39  ;;  %18199 = vtanh.f32 %v891_v23  ;;  %v18190_v27 = vpop.eup %18189  ;;  %v24180_v58 = vld [vmem:[#allocation13_spill] sm:$0xff] }
 0x230   :  { %v898_v15 = vsub.f32 1.0, %v18190_v27  ;;  %v906_v3 = vmul.f32 %v18190_v27, %v19512_v33  ;;  %v19718_v23 = vpop.permute.xlu1 %920 }
 0x231   :  { %v18192_v63 = vpop.eup %18191  ;;  %v892_v0 = vadd.f32 %v888_v12, %v654_v14  ;;  %v19716_v39 = vpop.permute.xlu0 %950  ;;  %v961_v14 = vmul.f32 %v19712_v56, %v24180_v58  ;;  %v24181_v12 = vld [vmem:[#allocation12_spill] sm:$0xff] }
 0x232   :  { %v901_v53 = vmul.f32 %v18192_v63, %v897_v42  ;;  %v18194_v40 = vpop.eup %18193  ;;  %v933_v27 = vmul.f32 %v19714_v32, %v24181_v12  ;;  %v24182_v42 = vld [vmem:[#allocation15_spill] sm:$0xff] }
 0x233   :  { %18201 = vtanh.f32 %v892_v0  ;;  %v899_v6 = vsub.f32 1.0, %v18194_v40  ;;  %v907_v20 = vmul.f32 %v18194_v40, %v19520_v7  ;;  %v962_v63 = vmul.f32 %v19712_v56, %v24182_v42  ;;  %v24183_v0 = vld [vmem:[#allocation14_spill] sm:$0xff] }
 0x234   :  { %v19657_v16 = vadd.f32 %v905_v22, %v901_v53  ;;  %v934_v53 = vmul.f32 %v19714_v32, %v24183_v0  ;;  %v973_v22 = vadd.f32 %v961_v14, %v933_v27  ;;  %v964_v40 = vmul.f32 %v19716_v39, %v24180_v58 }
 0x235   :  { %v18196_v59 = vpop.eup %18195 }
 0x236   :  { %1062 = vmatmul.mubr.f32.vlgmr.msra.gmra.mrb[16].mxu0 %v19657_v16  ;;  %14815 = vmatprep.mubr.f32.mxu1 %v19657_v16  ;;  %v902_v31 = vmul.f32 %v18196_v59, %v898_v15  ;;  %v18198_v49 = vpop.eup %18197  ;;  %v936_v15 = vmul.f32 %v19718_v23, %v24181_v12  ;;  %v19732_v59 = vpop.permute.xlu0 %954 }
 0x237   :  { %1067 = vmatprep.mubr.f32.mxu0 %v24160_v2  ;;  %16590 = vmatpush1.bf16.msra.mxu0 %v18989_v8  ;;  %v900_v21 = vsub.f32 1.0, %v18198_v49  ;;  %v908_v7 = vmul.f32 %v18198_v49, %v19529_v1  ;;  %v24171_v1 = vld [vmem:[#allocation3_spill] sm:$0xff]  ;;  %v937_v49 = vmul.f32 %v19718_v23, %v24183_v0  ;;  %v968_v27 = vmul.f32 %v19732_v59, %v24182_v42 }
 0x238   :  { %v19664_v44 = vadd.f32 %v906_v3, %v902_v31  ;;  %16592 = vmatprep.subr.bf16.mxu0 %v19002_v13  ;;  %v19734_v31 = vpop.permute.xlu1 %925  ;;  %v965_v3 = vmul.f32 %v19716_v39, %v24182_v42 }
 0x239   :  { %v18200_v30 = vpop.eup %18199 }
 0x23a   :  { %1068 = vmatmul.mubr.f32.gmra.mrb[18].mxu0 %v19664_v44  ;;  %14816 = vmatmul.mubr.f32.vlgmr.msra.gmra.mrb[8].mxu1 %v19664_v44  ;;  %v903_v4 = vmul.f32 %v18200_v30, %v899_v6  ;;  %v974_v6 = vadd.f32 %v962_v63, %v934_v53  ;;  %v985_v30 = vadd.f32 %v973_v22, %v19406_v45  ;;  %v19751_v22 = vpop.permute.xlu0 %958 }
 0x23b   :  { %1073 = vmatprep.mubr.f32.mxu0 %v24160_v2  ;;  %16594 = vmatpush1.bf16.msra.mxu0 %v19015_v18  ;;  %v977_v14 = vadd.f32 %v965_v3, %v937_v49  ;;  %v940_v63 = vmul.f32 %v19734_v31, %v24183_v0 }
 0x23c   :  { %v19672_v33 = vadd.f32 %v907_v20, %v903_v4  ;;  %16622 = vmatpush3.bf16.msra.mxu1 %v19071_v37  ;;  %16596 = vmatprep.subr.bf16.mxu0 %v19017_v19  ;;  %v976_v20 = vadd.f32 %v964_v40, %v936_v15  ;;  %v19753_v40 = vpop.permute.xlu1 %930  ;;  %v986_v3 = vadd.f32 %v974_v6, %v19424_v54 }
 0x23d   :  { %v18202_v51 = vpop.eup %18201  ;;  %16624 = vmatprep.subr.bf16.mxu1 %v19088_v43  ;;  %v971_v6 = vmul.f32 %v19751_v22, %v24182_v42 }
 0x23e   :  { %1074 = vmatmul.mubr.f32.gmra.mrb[20].mxu0 %v19672_v33  ;;  %14818 = vmatprep.mubr.f32.mxu1 %v19672_v33  ;;  %v904_v57 = vmul.f32 %v18202_v51, %v900_v21  ;;  %v967_v21 = vmul.f32 %v19732_v59, %v24180_v58  ;;  %v939_v51 = vmul.f32 %v19734_v31, %v24181_v12 }
 0x23f   :  { %1079 = vmatprep.mubr.f32.mxu0 %v24160_v2  ;;  %16598 = vmatpush1.bf16.msra.mxu0 %v19036_v25 }
 0x240   :  { %v19682_v11 = vadd.f32 %v908_v7, %v904_v57  ;;  %16626 = vmatpush3.bf16.msra.mxu1 %v19088_v43  ;;  %16600 = vmatprep.subr.bf16.mxu0 %v19039_v26 }
 0x241   :  { %16628 = vmatprep.subr.bf16.mxu1 %v19117_v52 }
 0x242   :  { %1080 = vmatmul.mubr.f32.gmra.mrb[22].mxu0 %v19682_v11  ;;  %14819 = vmatmul.mubr.f32.gmra.mrb[10].mxu1 %v19682_v11 }
 0x243   :  { %16602 = vmatpush1.bf16.msra.mxu0 %v19063_v34  ;;  %1403 = vmatprep.mubr.f32.mxu0 %v24160_v2 }
 0x244   :  { %16630 = vmatpush3.bf16.msra.mxu1 %v19117_v52  ;;  %16604 = vmatprep.subr.bf16.mxu0 %v19074_v38 }
 0x245   :  { %16632 = vmatprep.subr.bf16.mxu1 %v19148_v62 }
 0x247   :  { %16606 = vmatpush1.bf16.msra.mxu0 %v19101_v47 }
 0x248   :  { %16634 = vmatpush3.bf16.msra.mxu1 %v19148_v62  ;;  %16608 = vmatprep.subr.bf16.mxu0 %v19105_v48 }
 0x249   :  { %16636 = vmatprep.subr.bf16.mxu1 %v19176_v9 }
 0x24b   :  { %16610 = vmatpush1.bf16.msra.mxu0 %v24171_v1 }
 0x24c   :  { %16638 = vmatpush3.bf16.msra.mxu1 %v19176_v9  ;;  %16612 = vmatprep.subr.bf16.mxu0 %v24172_v10 }
 0x24d   :  { %16640 = vmatprep.subr.bf16.mxu1 %v24173_v36 }
 0x24f   :  { %16614 = vmatpush1.bf16.msra.mxu0 %v24174_v41 }
 0x250   :  { %16642 = vmatpush3.bf16.msra.mxu1 %v24173_v36  ;;  %16616 = vmatprep.subr.bf16.mxu0 %v24175_v35 }
 0x251   :  { %16644 = vmatprep.subr.bf16.mxu1 %v24176_v5 }
 0x253   :  { %16618 = vmatpush1.bf16.msra.mxu0 %v24177_v28  ;;  %v979_v28 = vadd.f32 %v967_v21, %v939_v51  ;;  %v943_v21 = vmul.f32 %v19753_v40, %v24183_v0 }
 0x254   :  { %16646 = vmatpush3.bf16.msra.mxu1 %v24176_v5  ;;  %16652 = vmatprep.subr.bf16.mxu0 %v24178_v61 }
 0x255   :  { %16648 = vmatprep.subr.bf16.mxu1 %v24179_v55  ;;  %v991_v1 = vadd.f32 %v979_v28, %v19406_v45 }
 0x258   :  { %16650 = vmatpush3.bf16.msra.mxu1 %v24179_v55  ;;  %v970_v55 = vmul.f32 %v19751_v22, %v24180_v58  ;;  %v989_v58 = vadd.f32 %v977_v14, %v19424_v54 }
 0x259   :  { %16684 = vmatprep.subr.bf16.mxu1 %v19071_v37 }
 0x309   :  { %v1063_v4 = vpop.f32.mrb[16].mxu0 }
 0x30a   :  { %v1064_v57 = vadd.f32 %v1063_v4, %v19410_v46  ;;  %v1065_v7 = vpop.f32.mrb[17].mxu0  ;;  %v942_v4 = vmul.f32 %v19753_v40, %v24181_v12 }
 0x30b   :  { %v1066_v53 = vadd.f32 %v1065_v7, %v19416_v50  ;;  %v988_v7 = vadd.f32 %v976_v20, %v19406_v45 }
 0x30c   :  { %v1171_v15 = vadd.f32 %v1064_v57, %v985_v30  ;;  %v980_v30 = vadd.f32 %v968_v27, %v940_v63  ;;  %v982_v20 = vadd.f32 %v970_v55, %v942_v4 }
 0x30d   :  { %v1069_v49 = vpop.f32.mrb[18].mxu0  ;;  %v19760_v61 = vpop.f32.mrb[8].mxu1  ;;  %v1199_v57 = vadd.f32 %v1066_v53, %v986_v3  ;;  %v983_v53 = vadd.f32 %v971_v6, %v943_v21 }
 0x30e   :  { %v13215_v5 = vmul.f32 -1.442695, %v1171_v15  ;;  %v1070_v35 = vadd.f32 %v1069_v49, %v19410_v46  ;;  %v1071_v41 = vpop.f32.mrb[19].mxu0  ;;  %v19764_v36 = vpop.f32.mrb[9].mxu1  ;;  %v992_v42 = vadd.f32 %v980_v30, %v19424_v54 }
 0x30f   :  { %v1072_v12 = vadd.f32 %v1071_v41, %v19416_v50  ;;  %v13219_v14 = vmul.f32 -1.442695, %v1199_v57 }
 0x310   :  { %18203 = vpow2.f32 %v13215_v5  ;;  %v1172_v51 = vadd.f32 %v1070_v35, %v988_v7  ;;  %v994_v5 = vadd.f32 %v982_v20, %v19406_v45 }
 0x311   :  { %v1075_v15 = vpop.f32.mrb[20].mxu0  ;;  %v1200_v10 = vadd.f32 %v1072_v12, %v989_v58 }
 0x312   :  { %v13216_v49 = vmul.f32 -1.442695, %v1172_v51  ;;  %v1076_v27 = vadd.f32 %v1075_v15, %v19410_v46  ;;  %v1077_v63 = vpop.f32.mrb[21].mxu0 }
 0x313   :  { %v1078_v41 = vadd.f32 %v1077_v63, %v19416_v50  ;;  %v13220_v4 = vmul.f32 -1.442695, %v1200_v10  ;;  %v963_v63 = vmul.f32 %v19712_v56, %v19472_v29 }
 0x314   :  { %18205 = vpow2.f32 %v13216_v49  ;;  %v1173_v3 = vadd.f32 %v1076_v27, %v991_v1  ;;  %v995_v1 = vadd.f32 %v983_v53, %v19424_v54 }
 0x315   :  { %v1081_v35 = vpop.f32.mrb[22].mxu0  ;;  %v19777_v55 = vpop.f32.mrb[10].mxu1  ;;  %v1201_v12 = vadd.f32 %v1078_v41, %v992_v42  ;;  %18207 = vpow2.f32 %v13219_v14  ;;  %v935_v14 = vmul.f32 %v19714_v32, %v19469_v60  ;;  %v1153_v32 = vadd.f32 %v19764_v36, %v19480_v17 }
 0x316   :  { %v13217_v58 = vmul.f32 -1.442695, %v1173_v3  ;;  %v1082_v28 = vadd.f32 %v1081_v35, %v19410_v46  ;;  %v1083_v7 = vpop.f32.mrb[23].mxu0  ;;  %v1162_v51 = vpop.f32.mrb[11].mxu1  ;;  %v966_v3 = vmul.f32 %v19716_v39, %v19472_v29  ;;  %v941_v39 = vmul.f32 %v19734_v31, %v19469_v60 }
 0x317   :  { %v1084_v57 = vadd.f32 %v1083_v7, %v19416_v50  ;;  %v13221_v21 = vmul.f32 -1.442695, %v1201_v12  ;;  %v972_v31 = vmul.f32 %v19751_v22, %v19472_v29  ;;  %v1168_v22 = vadd.f32 %v19777_v55, %v19480_v17 }
 0x318   :  { %18209 = vpow2.f32 %v13217_v58  ;;  %v1174_v6 = vadd.f32 %v1082_v28, %v994_v5  ;;  %v938_v5 = vmul.f32 %v19718_v23, %v19469_v60  ;;  %v975_v58 = vadd.f32 %v963_v63, %v935_v14 }
 0x319   :  { %18211 = vpow2.f32 %v13220_v4  ;;  %v1202_v15 = vadd.f32 %v1084_v57, %v995_v1  ;;  %v969_v57 = vmul.f32 %v19732_v59, %v19472_v29 }
 0x31a   :  { %v18204_v30 = vpop.eup %18203  ;;  %v13218_v20 = vmul.f32 -1.442695, %v1174_v6  ;;  %v978_v56 = vadd.f32 %v966_v3, %v938_v5 }
 0x31b   :  { %v1187_v49 = vadd.f32 1.0, %v18204_v30  ;;  %v13222_v42 = vmul.f32 -1.442695, %v1202_v15  ;;  %v987_v30 = vadd.f32 %v975_v58, %v19488_v24 }
 0x31c   :  { %18213 = vpow2.f32 %v13218_v20  ;;  %v1158_v20 = vadd.f32 %v19760_v61, %v19480_v17 }
 0x31d   :  { %18215 = vrcp.f32 %v1187_v49  ;;  %v981_v49 = vadd.f32 %v969_v57, %v941_v39 }
 0x31e   :  { %v18206_v10 = vpop.eup %18205  ;;  %18217 = vpow2.f32 %v13221_v21 }
 0x31f   :  { %v1188_v27 = vadd.f32 1.0, %v18206_v10  ;;  %v18208_v41 = vpop.eup %18207  ;;  %v990_v10 = vadd.f32 %v978_v56, %v19488_v24  ;;  %v993_v5 = vadd.f32 %v981_v49, %v19488_v24 }
 0x320   :  { %v1215_v12 = vadd.f32 1.0, %v18208_v41  ;;  %v1163_v41 = vadd.f32 %v1162_v51, %v19480_v17 }
 0x321   :  { %18219 = vrcp.f32 %v1188_v27  ;;  %v944_v27 = vmul.f32 %v19753_v40, %v19469_v60 }
 0x322   :  { %v18210_v53 = vpop.eup %18209  ;;  %18221 = vpow2.f32 %v13222_v42 }
 0x323   :  { %v1189_v35 = vadd.f32 1.0, %v18210_v53  ;;  %v18212_v4 = vpop.eup %18211  ;;  %v984_v3 = vadd.f32 %v972_v31, %v944_v27 }
 0x324   :  { %v1216_v6 = vadd.f32 1.0, %v18212_v4 }
 0x325   :  { %18223 = vrcp.f32 %v1189_v35  ;;  %v996_v40 = vadd.f32 %v984_v3, %v19488_v24  ;;  %v24190_v3 = vld [vmem:[#allocation8_spill] sm:$0xff] }
 0x326   :  { %v18214_v28 = vpop.eup %18213  ;;  %18225 = vrcp.f32 %v1215_v12 }
 0x327   :  { %v18216_v7 = vpop.eup %18215  ;;  %v1190_v23 = vadd.f32 1.0, %v18214_v28 }
 0x328   :  { %v18218_v1 = vpop.eup %18217  ;;  %v1227_v21 = vmul.f32 %v18216_v7, %v1153_v32 }
 0x329   :  { %18227 = vrcp.f32 %v1190_v23  ;;  %v1217_v59 = vadd.f32 1.0, %v18218_v1 }
 0x32a   :  { %v1231_v15 = vadd.f32 %v1227_v21, %v987_v30  ;;  %18229 = vrcp.f32 %v1216_v6 }
 0x32b   :  { %v18220_v36 = vpop.eup %18219 }
 0x32c   :  { %v18222_v42 = vpop.eup %18221  ;;  %v1228_v63 = vmul.f32 %v18220_v36, %v1158_v20  ;;  %18231 = vtanh.f32 %v1231_v15 }
 0x32d   :  { %18233 = vrcp.f32 %v1217_v59  ;;  %v1218_v53 = vadd.f32 1.0, %v18222_v42 }
 0x32e   :  { %v1232_v14 = vadd.f32 %v1228_v63, %v990_v10  ;;  %v24185_v63 = vld [vmem:[#allocation4_spill] sm:$0xff] }
 0x32f   :  { %v18224_v61 = vpop.eup %18223 }
 0x330   :  { %18235 = vtanh.f32 %v1232_v14  ;;  %v1229_v35 = vmul.f32 %v18224_v61, %v1163_v41  ;;  %v18226_v4 = vpop.eup %18225  ;;  %v24186_v14 = vld [vmem:[#allocation9_spill] sm:$0xff]  ;;  %v24188_v61 = vld [vmem:[#allocation6_spill] sm:$0xff] }
 0x331   :  { %18237 = vrcp.f32 %v1218_v53  ;;  %v1239_v56 = vsub.f32 1.0, %v18226_v4  ;;  %v1247_v39 = vmul.f32 %v18226_v4, %v19657_v16  ;;  %v24187_v41 = vld [vmem:[#allocation5_spill] sm:$0xff]  ;;  %v24189_v53 = vld [vmem:[#allocation10_spill] sm:$0xff]  ;;  %v19865_v4 = vpop.permute.xlu0 %1288 }
 0x332   :  { %v1233_v58 = vadd.f32 %v1229_v35, %v993_v5  ;;  %v24191_v5 = vld [vmem:[#allocation2_spill] sm:$0xff]  ;;  %v24192_v35 = vld [vmem:[#allocation11_spill] sm:$0xff] }
 0x333   :  { %v18228_v12 = vpop.eup %18227 }
 0x334   :  { %v1230_v28 = vmul.f32 %v18228_v12, %v1168_v22  ;;  %18239 = vtanh.f32 %v1233_v58  ;;  %v18230_v51 = vpop.eup %18229  ;;  %v19867_v22 = vpop.permute.xlu1 %1257 }
 0x335   :  { %v1240_v1 = vsub.f32 1.0, %v18230_v51  ;;  %v1248_v21 = vmul.f32 %v18230_v51, %v19664_v44  ;;  %v19869_v58 = vpop.permute.xlu0 %1292  ;;  %v24194_v51 = vld [vmem:[#allocation12_spill] sm:$0xff] }
 0x336   :  { %v18232_v32 = vpop.eup %18231  ;;  %v1234_v7 = vadd.f32 %v1230_v28, %v996_v40  ;;  %v24193_v40 = vld [vmem:[#allocation13_spill] sm:$0xff] }
 0x337   :  { %v1243_v57 = vmul.f32 %v18232_v32, %v1239_v56  ;;  %v18234_v6 = vpop.eup %18233  ;;  %v1303_v28 = vmul.f32 %v19865_v4, %v24193_v40  ;;  %v1275_v56 = vmul.f32 %v19867_v22, %v24194_v51  ;;  %v24195_v32 = vld [vmem:[#allocation15_spill] sm:$0xff] }
 0x338   :  { %18241 = vtanh.f32 %v1234_v7  ;;  %v1241_v16 = vsub.f32 1.0, %v18234_v6  ;;  %v1249_v10 = vmul.f32 %v18234_v6, %v19672_v33  ;;  %v19871_v12 = vpop.permute.xlu1 %1262  ;;  %v1304_v7 = vmul.f32 %v19865_v4, %v24195_v32 }
 0x339   :  { %v19810_v23 = vadd.f32 %v1247_v39, %v1243_v57  ;;  %v1276_v57 = vmul.f32 %v19867_v22, %v24183_v0  ;;  %v1315_v39 = vadd.f32 %v1303_v28, %v1275_v56  ;;  %v1306_v6 = vmul.f32 %v19869_v58, %v24193_v40 }
 0x33a   :  { %v18236_v55 = vpop.eup %18235 }
 0x33b   :  { %1404 = vmatmul.mubr.f32.vlgmr.msra.gmra.mrb[24].mxu0 %v19810_v23  ;;  %14853 = vmatprep.mubr.f32.mxu1 %v19810_v23  ;;  %v1244_v30 = vmul.f32 %v18236_v55, %v1240_v1  ;;  %v18238_v20 = vpop.eup %18237  ;;  %v1278_v1 = vmul.f32 %v19871_v12, %v24194_v51  ;;  %v19885_v55 = vpop.permute.xlu0 %1296 }
 0x33c   :  { %1409 = vmatprep.mubr.f32.mxu0 %v24160_v2  ;;  %16654 = vmatpush1.bf16.msra.mxu0 %v18989_v8  ;;  %v1242_v59 = vsub.f32 1.0, %v18238_v20  ;;  %v1250_v33 = vmul.f32 %v18238_v20, %v19682_v11  ;;  %v24184_v11 = vld [vmem:[#allocation3_spill] sm:$0xff]  ;;  %v1279_v20 = vmul.f32 %v19871_v12, %v24183_v0  ;;  %v1310_v56 = vmul.f32 %v19885_v55, %v24195_v32 }
 0x33d   :  { %v19817_v15 = vadd.f32 %v1248_v21, %v1244_v30  ;;  %16656 = vmatprep.subr.bf16.mxu0 %v19002_v13  ;;  %v19887_v30 = vpop.permute.xlu1 %1267  ;;  %v1307_v21 = vmul.f32 %v19869_v58, %v24195_v32 }
 0x33e   :  { %v18240_v36 = vpop.eup %18239 }
 0x33f   :  { %1410 = vmatmul.mubr.f32.gmra.mrb[26].mxu0 %v19817_v15  ;;  %14854 = vmatmul.mubr.f32.vlgmr.msra.gmra.mrb[12].mxu1 %v19817_v15  ;;  %v1245_v49 = vmul.f32 %v18240_v36, %v1241_v16  ;;  %v1316_v16 = vadd.f32 %v1304_v7, %v1276_v57  ;;  %v1327_v36 = vadd.f32 %v1315_v39, %v19406_v45  ;;  %v19904_v39 = vpop.permute.xlu0 %1300 }
 0x340   :  { %1415 = vmatprep.mubr.f32.mxu0 %v24160_v2  ;;  %16658 = vmatpush1.bf16.msra.mxu0 %v19015_v18  ;;  %v1319_v28 = vadd.f32 %v1307_v21, %v1279_v20  ;;  %v1282_v7 = vmul.f32 %v19887_v30, %v24183_v0 }
 0x341   :  { %v19825_v44 = vadd.f32 %v1249_v10, %v1245_v49  ;;  %16686 = vmatpush3.bf16.msra.mxu1 %v19071_v37  ;;  %16660 = vmatprep.subr.bf16.mxu0 %v19017_v19  ;;  %v1318_v10 = vadd.f32 %v1306_v6, %v1278_v1  ;;  %v19906_v6 = vpop.permute.xlu1 %1272  ;;  %v1328_v21 = vadd.f32 %v1316_v16, %v19424_v54 }
 0x342   :  { %v18242_v42 = vpop.eup %18241  ;;  %16688 = vmatprep.subr.bf16.mxu1 %v19088_v43  ;;  %v1313_v16 = vmul.f32 %v19904_v39, %v24195_v32 }
 0x343   :  { %1416 = vmatmul.mubr.f32.gmra.mrb[28].mxu0 %v19825_v44  ;;  %14856 = vmatprep.mubr.f32.mxu1 %v19825_v44  ;;  %v1246_v31 = vmul.f32 %v18242_v42, %v1242_v59  ;;  %v1309_v59 = vmul.f32 %v19885_v55, %v24193_v40  ;;  %v1281_v42 = vmul.f32 %v19887_v30, %v24194_v51 }
 0x344   :  { %1421 = vmatprep.mubr.f32.mxu0 %v24160_v2  ;;  %16662 = vmatpush1.bf16.msra.mxu0 %v19036_v25 }
 0x345   :  { %v19835_v27 = vadd.f32 %v1250_v33, %v1246_v31  ;;  %16690 = vmatpush3.bf16.msra.mxu1 %v19088_v43  ;;  %16664 = vmatprep.subr.bf16.mxu0 %v19039_v26 }
 0x346   :  { %16692 = vmatprep.subr.bf16.mxu1 %v19117_v52 }
 0x347   :  { %1422 = vmatmul.mubr.f32.gmra.mrb[30].mxu0 %v19835_v27  ;;  %14857 = vmatmul.mubr.f32.gmra.mrb[14].mxu1 %v19835_v27 }
 0x348   :  { %16666 = vmatpush1.bf16.msra.mxu0 %v19063_v34  ;;  %1745 = vmatprep.mubr.f32.mxu0 %v24160_v2 }
 0x349   :  { %16694 = vmatpush3.bf16.msra.mxu1 %v19117_v52  ;;  %16668 = vmatprep.subr.bf16.mxu0 %v19074_v38 }
 0x34a   :  { %16696 = vmatprep.subr.bf16.mxu1 %v19148_v62 }
 0x34c   :  { %16670 = vmatpush1.bf16.msra.mxu0 %v19101_v47 }
 0x34d   :  { %16698 = vmatpush3.bf16.msra.mxu1 %v19148_v62  ;;  %16672 = vmatprep.subr.bf16.mxu0 %v19105_v48 }
 0x34e   :  { %16700 = vmatprep.subr.bf16.mxu1 %v19176_v9 }
 0x350   :  { %16674 = vmatpush1.bf16.msra.mxu0 %v24184_v11 }
 0x351   :  { %16702 = vmatpush3.bf16.msra.mxu1 %v19176_v9  ;;  %16676 = vmatprep.subr.bf16.mxu0 %v24185_v63 }
 0x352   :  { %16704 = vmatprep.subr.bf16.mxu1 %v24186_v14 }
 0x354   :  { %16678 = vmatpush1.bf16.msra.mxu0 %v24187_v41 }
 0x355   :  { %16706 = vmatpush3.bf16.msra.mxu1 %v24186_v14  ;;  %16680 = vmatprep.subr.bf16.mxu0 %v24188_v61 }
 0x356   :  { %16708 = vmatprep.subr.bf16.mxu1 %v24189_v53 }
 0x358   :  { %16682 = vmatpush1.bf16.msra.mxu0 %v24190_v3  ;;  %v1321_v3 = vadd.f32 %v1309_v59, %v1281_v42  ;;  %v1285_v59 = vmul.f32 %v19906_v6, %v24183_v0 }
 0x359   :  { %16710 = vmatpush3.bf16.msra.mxu1 %v24189_v53  ;;  %16716 = vmatprep.subr.bf16.mxu0 %v24191_v5 }
 0x35a   :  { %16712 = vmatprep.subr.bf16.mxu1 %v24192_v35  ;;  %v1333_v11 = vadd.f32 %v1321_v3, %v19406_v45 }
 0x35d   :  { %16714 = vmatpush3.bf16.msra.mxu1 %v24192_v35  ;;  %v1312_v35 = vmul.f32 %v19904_v39, %v24193_v40  ;;  %v1331_v40 = vadd.f32 %v1319_v28, %v19424_v54 }
 0x35e   :  { %16748 = vmatprep.subr.bf16.mxu1 %v19071_v37 }
 0x40e   :  { %v1405_v49 = vpop.f32.mrb[24].mxu0 }
 0x40f   :  { %v1406_v31 = vadd.f32 %v1405_v49, %v19410_v46  ;;  %v1407_v33 = vpop.f32.mrb[25].mxu0  ;;  %v1284_v49 = vmul.f32 %v19906_v6, %v24194_v51 }
 0x410   :  { %v1408_v57 = vadd.f32 %v1407_v33, %v19416_v50  ;;  %v1330_v33 = vadd.f32 %v1318_v10, %v19406_v45 }
 0x411   :  { %v1513_v1 = vadd.f32 %v1406_v31, %v1327_v36  ;;  %v1322_v36 = vadd.f32 %v1310_v56, %v1282_v7  ;;  %v1324_v10 = vadd.f32 %v1312_v35, %v1284_v49 }
 0x412   :  { %v1411_v20 = vpop.f32.mrb[26].mxu0  ;;  %v19913_v5 = vpop.f32.mrb[12].mxu1  ;;  %v1541_v31 = vadd.f32 %v1408_v57, %v1328_v21  ;;  %v1325_v57 = vadd.f32 %v1313_v16, %v1285_v59 }
 0x413   :  { %v13223_v53 = vmul.f32 -1.442695, %v1513_v1  ;;  %v1412_v61 = vadd.f32 %v1411_v20, %v19410_v46  ;;  %v1413_v41 = vpop.f32.mrb[27].mxu0  ;;  %v19917_v14 = vpop.f32.mrb[13].mxu1  ;;  %v1334_v32 = vadd.f32 %v1322_v36, %v19424_v54 }
 0x414   :  { %v1414_v51 = vadd.f32 %v1413_v41, %v19416_v50  ;;  %v13227_v28 = vmul.f32 -1.442695, %v1541_v31 }
 0x415   :  { %18243 = vpow2.f32 %v13223_v53  ;;  %v1514_v42 = vadd.f32 %v1412_v61, %v1330_v33  ;;  %v1336_v53 = vadd.f32 %v1324_v10, %v19406_v45 }
 0x416   :  { %v1417_v1 = vpop.f32.mrb[28].mxu0  ;;  %v1542_v63 = vadd.f32 %v1414_v51, %v1331_v40 }
 0x417   :  { %v13224_v20 = vmul.f32 -1.442695, %v1514_v42  ;;  %v1418_v56 = vadd.f32 %v1417_v1, %v19410_v46  ;;  %v1419_v7 = vpop.f32.mrb[29].mxu0 }
 0x418   :  { %v1420_v41 = vadd.f32 %v1419_v7, %v19416_v50  ;;  %v13228_v49 = vmul.f32 -1.442695, %v1542_v63  ;;  %v1305_v7 = vmul.f32 %v19865_v4, %v19472_v29 }
 0x419   :  { %18245 = vpow2.f32 %v13224_v20  ;;  %v1515_v21 = vadd.f32 %v1418_v56, %v1333_v11  ;;  %v1337_v11 = vadd.f32 %v1325_v57, %v19424_v54 }
 0x41a   :  { %v1423_v61 = vpop.f32.mrb[30].mxu0  ;;  %v19930_v35 = vpop.f32.mrb[14].mxu1  ;;  %v1543_v51 = vadd.f32 %v1420_v41, %v1334_v32  ;;  %18247 = vpow2.f32 %v13227_v28  ;;  %v1277_v28 = vmul.f32 %v19867_v22, %v19469_v60  ;;  %v1495_v22 = vadd.f32 %v19917_v14, %v19480_v17 }
 0x41b   :  { %v13225_v40 = vmul.f32 -1.442695, %v1515_v21  ;;  %v1424_v3 = vadd.f32 %v1423_v61, %v19410_v46  ;;  %v1425_v33 = vpop.f32.mrb[31].mxu0  ;;  %v1504_v42 = vpop.f32.mrb[15].mxu1  ;;  %v1308_v21 = vmul.f32 %v19869_v58, %v19472_v29  ;;  %v1283_v58 = vmul.f32 %v19887_v30, %v19469_v60 }
 0x41c   :  { %v1426_v31 = vadd.f32 %v1425_v33, %v19416_v50  ;;  %v13229_v59 = vmul.f32 -1.442695, %v1543_v51  ;;  %v1314_v30 = vmul.f32 %v19904_v39, %v19472_v29  ;;  %v1510_v39 = vadd.f32 %v19930_v35, %v19480_v17 }
 0x41d   :  { %18249 = vpow2.f32 %v13225_v40  ;;  %v1516_v16 = vadd.f32 %v1424_v3, %v1336_v53  ;;  %v1280_v53 = vmul.f32 %v19871_v12, %v19469_v60  ;;  %v1317_v40 = vadd.f32 %v1305_v7, %v1277_v28 }
 0x41e   :  { %18251 = vpow2.f32 %v13228_v49  ;;  %v1544_v1 = vadd.f32 %v1426_v31, %v1337_v11  ;;  %v1311_v31 = vmul.f32 %v19885_v55, %v19472_v29 }
 0x41f   :  { %v18244_v36 = vpop.eup %18243  ;;  %v13226_v10 = vmul.f32 -1.442695, %v1516_v16  ;;  %v1320_v4 = vadd.f32 %v1308_v21, %v1280_v53 }
 0x420   :  { %v1529_v20 = vadd.f32 1.0, %v18244_v36  ;;  %v13230_v32 = vmul.f32 -1.442695, %v1544_v1  ;;  %v1329_v36 = vadd.f32 %v1317_v40, %v19488_v24 }
 0x421   :  { %18253 = vpow2.f32 %v13226_v10  ;;  %v1500_v10 = vadd.f32 %v19913_v5, %v19480_v17 }
 0x422   :  { %18255 = vrcp.f32 %v1529_v20  ;;  %v1323_v20 = vadd.f32 %v1311_v31, %v1283_v58 }
 0x423   :  { %v18246_v63 = vpop.eup %18245  ;;  %18257 = vpow2.f32 %v13229_v59 }
 0x424   :  { %v1530_v56 = vadd.f32 1.0, %v18246_v63  ;;  %v18248_v41 = vpop.eup %18247  ;;  %v1332_v63 = vadd.f32 %v1320_v4, %v19488_v24  ;;  %v1335_v53 = vadd.f32 %v1323_v20, %v19488_v24 }
 0x425   :  { %v1557_v51 = vadd.f32 1.0, %v18248_v41  ;;  %v1505_v41 = vadd.f32 %v1504_v42, %v19480_v17 }
 0x426   :  { %18259 = vrcp.f32 %v1530_v56  ;;  %v1286_v56 = vmul.f32 %v19906_v6, %v19469_v60 }
 0x427   :  { %v18250_v57 = vpop.eup %18249  ;;  %18261 = vpow2.f32 %v13230_v32 }
 0x428   :  { %v1531_v61 = vadd.f32 1.0, %v18250_v57  ;;  %v18252_v49 = vpop.eup %18251  ;;  %v1326_v21 = vadd.f32 %v1314_v30, %v1286_v56 }
 0x429   :  { %v1558_v16 = vadd.f32 1.0, %v18252_v49 }
 0x42a   :  { %18263 = vrcp.f32 %v1531_v61  ;;  %v1338_v6 = vadd.f32 %v1326_v21, %v19488_v24  ;;  %v24202_v21 = vld [vmem:[#allocation8_spill] sm:$0xff] }
 0x42b   :  { %v18254_v3 = vpop.eup %18253  ;;  %18265 = vrcp.f32 %v1557_v51 }
 0x42c   :  { %v18256_v33 = vpop.eup %18255  ;;  %v1532_v12 = vadd.f32 1.0, %v18254_v3 }
 0x42d   :  { %v18258_v11 = vpop.eup %18257  ;;  %v1569_v59 = vmul.f32 %v18256_v33, %v1495_v22 }
 0x42e   :  { %18267 = vrcp.f32 %v1532_v12  ;;  %v1559_v55 = vadd.f32 1.0, %v18258_v11 }
 0x42f   :  { %v1573_v1 = vadd.f32 %v1569_v59, %v1329_v36  ;;  %18269 = vrcp.f32 %v1558_v16 }
 0x430   :  { %v18260_v14 = vpop.eup %18259 }
 0x431   :  { %v18262_v32 = vpop.eup %18261  ;;  %v1570_v7 = vmul.f32 %v18260_v14, %v1500_v10  ;;  %18271 = vtanh.f32 %v1573_v1 }
 0x432   :  { %18273 = vrcp.f32 %v1559_v55  ;;  %v1560_v57 = vadd.f32 1.0, %v18262_v32 }
 0x433   :  { %v1574_v28 = vadd.f32 %v1570_v7, %v1332_v63  ;;  %v24197_v7 = vld [vmem:[#allocation4_spill] sm:$0xff] }
 0x434   :  { %v18264_v5 = vpop.eup %18263 }
 0x435   :  { %18275 = vtanh.f32 %v1574_v28  ;;  %v1571_v61 = vmul.f32 %v18264_v5, %v1505_v41  ;;  %v18266_v49 = vpop.eup %18265  ;;  %v24198_v28 = vld [vmem:[#allocation9_spill] sm:$0xff]  ;;  %v24200_v5 = vld [vmem:[#allocation6_spill] sm:$0xff] }
 0x436   :  { %18277 = vrcp.f32 %v1560_v57  ;;  %v1581_v4 = vsub.f32 1.0, %v18266_v49  ;;  %v1589_v58 = vmul.f32 %v18266_v49, %v19810_v23  ;;  %v24199_v41 = vld [vmem:[#allocation5_spill] sm:$0xff]  ;;  %v24201_v57 = vld [vmem:[#allocation10_spill] sm:$0xff]  ;;  %v20018_v49 = vpop.permute.xlu0 %1630 }
 0x437   :  { %v1575_v40 = vadd.f32 %v1571_v61, %v1335_v53  ;;  %v24203_v53 = vld [vmem:[#allocation2_spill] sm:$0xff]  ;;  %v24204_v61 = vld [vmem:[#allocation11_spill] sm:$0xff] }
 0x438   :  { %v18268_v51 = vpop.eup %18267 }
 0x439   :  { %v1572_v3 = vmul.f32 %v18268_v51, %v1510_v39  ;;  %18279 = vtanh.f32 %v1575_v40  ;;  %v18270_v42 = vpop.eup %18269  ;;  %v20020_v39 = vpop.permute.xlu1 %1599 }
 0x43a   :  { %v1582_v11 = vsub.f32 1.0, %v18270_v42  ;;  %v1590_v59 = vmul.f32 %v18270_v42, %v19817_v15  ;;  %v20022_v40 = vpop.permute.xlu0 %1634  ;;  %v24206_v42 = vld [vmem:[#allocation12_spill] sm:$0xff] }
 0x43b   :  { %v18272_v22 = vpop.eup %18271  ;;  %v1576_v33 = vadd.f32 %v1572_v3, %v1338_v6  ;;  %v24205_v6 = vld [vmem:[#allocation13_spill] sm:$0xff] }
 0x43c   :  { %v1585_v31 = vmul.f32 %v18272_v22, %v1581_v4  ;;  %v18274_v16 = vpop.eup %18273  ;;  %v1645_v3 = vmul.f32 %v20018_v49, %v24205_v6  ;;  %v1617_v4 = vmul.f32 %v20020_v39, %v24206_v42  ;;  %v24207_v22 = vld [vmem:[#allocation15_spill] sm:$0xff] }
 0x43d   :  { %18281 = vtanh.f32 %v1576_v33  ;;  %v1583_v23 = vsub.f32 1.0, %v18274_v16  ;;  %v1591_v63 = vmul.f32 %v18274_v16, %v19825_v44  ;;  %v20024_v51 = vpop.permute.xlu1 %1604  ;;  %v1646_v33 = vmul.f32 %v20018_v49, %v24207_v22 }
 0x43e   :  { %v19963_v12 = vadd.f32 %v1589_v58, %v1585_v31  ;;  %v1618_v31 = vmul.f32 %v20020_v39, %v24183_v0  ;;  %v1657_v58 = vadd.f32 %v1645_v3, %v1617_v4  ;;  %v1648_v16 = vmul.f32 %v20022_v40, %v24205_v6 }
 0x43f   :  { %v18276_v35 = vpop.eup %18275 }
 0x440   :  { %1746 = vmatmul.mubr.f32.vlgmr.msra.gmra.mrb[32].mxu0 %v19963_v12  ;;  %14891 = vmatprep.mubr.f32.mxu1 %v19963_v12  ;;  %v1586_v36 = vmul.f32 %v18276_v35, %v1582_v11  ;;  %v18278_v10 = vpop.eup %18277  ;;  %v1620_v11 = vmul.f32 %v20024_v51, %v24206_v42  ;;  %v20038_v35 = vpop.permute.xlu0 %1638 }
 0x441   :  { %1751 = vmatprep.mubr.f32.mxu0 %v24160_v2  ;;  %16718 = vmatpush1.bf16.msra.mxu0 %v18989_v8  ;;  %v1584_v55 = vsub.f32 1.0, %v18278_v10  ;;  %v1592_v44 = vmul.f32 %v18278_v10, %v19835_v27  ;;  %v24196_v27 = vld [vmem:[#allocation3_spill] sm:$0xff]  ;;  %v1621_v10 = vmul.f32 %v20024_v51, %v24183_v0  ;;  %v1652_v4 = vmul.f32 %v20038_v35, %v24207_v22 }
 0x442   :  { %v19970_v1 = vadd.f32 %v1590_v59, %v1586_v36  ;;  %16720 = vmatprep.subr.bf16.mxu0 %v19002_v13  ;;  %v20040_v36 = vpop.permute.xlu1 %1609  ;;  %v1649_v59 = vmul.f32 %v20022_v40, %v24207_v22 }
 0x443   :  { %v18280_v14 = vpop.eup %18279 }
 0x444   :  { %1752 = vmatmul.mubr.f32.gmra.mrb[34].mxu0 %v19970_v1  ;;  %14892 = vmatmul.mubr.f32.vlgmr.msra.gmra.mrb[16].mxu1 %v19970_v1  ;;  %v1587_v20 = vmul.f32 %v18280_v14, %v1583_v23  ;;  %v1658_v23 = vadd.f32 %v1646_v33, %v1618_v31  ;;  %v1669_v14 = vadd.f32 %v1657_v58, %v19406_v45  ;;  %v20057_v58 = vpop.permute.xlu0 %1642 }
 0x445   :  { %1757 = vmatprep.mubr.f32.mxu0 %v24160_v2  ;;  %16722 = vmatpush1.bf16.msra.mxu0 %v19015_v18  ;;  %v1661_v3 = vadd.f32 %v1649_v59, %v1621_v10  ;;  %v1624_v33 = vmul.f32 %v20040_v36, %v24183_v0 }
 0x446   :  { %v19978_v15 = vadd.f32 %v1591_v63, %v1587_v20  ;;  %16750 = vmatpush3.bf16.msra.mxu1 %v19071_v37  ;;  %16724 = vmatprep.subr.bf16.mxu0 %v19017_v19  ;;  %v1660_v63 = vadd.f32 %v1648_v16, %v1620_v11  ;;  %v20059_v16 = vpop.permute.xlu1 %1614  ;;  %v1670_v59 = vadd.f32 %v1658_v23, %v19424_v54 }
 0x447   :  { %v18282_v32 = vpop.eup %18281  ;;  %16752 = vmatprep.subr.bf16.mxu1 %v19088_v43  ;;  %v1655_v23 = vmul.f32 %v20057_v58, %v24207_v22 }
 0x448   :  { %1758 = vmatmul.mubr.f32.gmra.mrb[36].mxu0 %v19978_v15  ;;  %14894 = vmatprep.mubr.f32.mxu1 %v19978_v15  ;;  %v1588_v30 = vmul.f32 %v18282_v32, %v1584_v55  ;;  %v1651_v55 = vmul.f32 %v20038_v35, %v24205_v6  ;;  %v1623_v32 = vmul.f32 %v20040_v36, %v24206_v42 }
 0x449   :  { %1763 = vmatprep.mubr.f32.mxu0 %v24160_v2  ;;  %16726 = vmatpush1.bf16.msra.mxu0 %v19036_v25 }
 0x44a   :  { %v19988_v56 = vadd.f32 %v1592_v44, %v1588_v30  ;;  %16754 = vmatpush3.bf16.msra.mxu1 %v19088_v43  ;;  %16728 = vmatprep.subr.bf16.mxu0 %v19039_v26 }
 0x44b   :  { %16756 = vmatprep.subr.bf16.mxu1 %v19117_v52 }
 0x44c   :  { %1764 = vmatmul.mubr.f32.gmra.mrb[38].mxu0 %v19988_v56  ;;  %14895 = vmatmul.mubr.f32.gmra.mrb[18].mxu1 %v19988_v56 }
 0x44d   :  { %16730 = vmatpush1.bf16.msra.mxu0 %v19063_v34  ;;  %2087 = vmatprep.mubr.f32.mxu0 %v24160_v2 }
 0x44e   :  { %16758 = vmatpush3.bf16.msra.mxu1 %v19117_v52  ;;  %16732 = vmatprep.subr.bf16.mxu0 %v19074_v38 }
 0x44f   :  { %16760 = vmatprep.subr.bf16.mxu1 %v19148_v62 }
 0x451   :  { %16734 = vmatpush1.bf16.msra.mxu0 %v19101_v47 }
 0x452   :  { %16762 = vmatpush3.bf16.msra.mxu1 %v19148_v62  ;;  %16736 = vmatprep.subr.bf16.mxu0 %v19105_v48 }
 0x453   :  { %16764 = vmatprep.subr.bf16.mxu1 %v19176_v9 }
 0x455   :  { %16738 = vmatpush1.bf16.msra.mxu0 %v24196_v27 }
 0x456   :  { %16766 = vmatpush3.bf16.msra.mxu1 %v19176_v9  ;;  %16740 = vmatprep.subr.bf16.mxu0 %v24197_v7 }
 0x457   :  { %16768 = vmatprep.subr.bf16.mxu1 %v24198_v28 }
 0x459   :  { %16742 = vmatpush1.bf16.msra.mxu0 %v24199_v41 }
 0x45a   :  { %16770 = vmatpush3.bf16.msra.mxu1 %v24198_v28  ;;  %16744 = vmatprep.subr.bf16.mxu0 %v24200_v5 }
 0x45b   :  { %16772 = vmatprep.subr.bf16.mxu1 %v24201_v57 }
 0x45d   :  { %16746 = vmatpush1.bf16.msra.mxu0 %v24202_v21  ;;  %v1663_v21 = vadd.f32 %v1651_v55, %v1623_v32  ;;  %v1627_v55 = vmul.f32 %v20059_v16, %v24183_v0 }
 0x45e   :  { %16774 = vmatpush3.bf16.msra.mxu1 %v24201_v57  ;;  %16780 = vmatprep.subr.bf16.mxu0 %v24203_v53 }
 0x45f   :  { %16776 = vmatprep.subr.bf16.mxu1 %v24204_v61  ;;  %v1675_v27 = vadd.f32 %v1663_v21, %v19406_v45 }
 0x462   :  { %16778 = vmatpush3.bf16.msra.mxu1 %v24204_v61  ;;  %v1654_v61 = vmul.f32 %v20057_v58, %v24205_v6  ;;  %v1673_v6 = vadd.f32 %v1661_v3, %v19424_v54 }
 0x463   :  { %16812 = vmatprep.subr.bf16.mxu1 %v19071_v37 }
 0x513   :  { %v1747_v20 = vpop.f32.mrb[32].mxu0 }
 0x514   :  { %v1748_v30 = vadd.f32 %v1747_v20, %v19410_v46  ;;  %v1749_v44 = vpop.f32.mrb[33].mxu0  ;;  %v1626_v20 = vmul.f32 %v20059_v16, %v24206_v42 }
 0x515   :  { %v1750_v31 = vadd.f32 %v1749_v44, %v19416_v50  ;;  %v1672_v44 = vadd.f32 %v1660_v63, %v19406_v45 }
 0x516   :  { %v1855_v11 = vadd.f32 %v1748_v30, %v1669_v14  ;;  %v1664_v14 = vadd.f32 %v1652_v4, %v1624_v33  ;;  %v1666_v63 = vadd.f32 %v1654_v61, %v1626_v20 }
 0x517   :  { %v1753_v10 = vpop.f32.mrb[34].mxu0  ;;  %v20066_v53 = vpop.f32.mrb[16].mxu1  ;;  %v1883_v30 = vadd.f32 %v1750_v31, %v1670_v59  ;;  %v1667_v31 = vadd.f32 %v1655_v23, %v1627_v55 }
 0x518   :  { %v13231_v57 = vmul.f32 -1.442695, %v1855_v11  ;;  %v1754_v5 = vadd.f32 %v1753_v10, %v19410_v46  ;;  %v1755_v41 = vpop.f32.mrb[35].mxu0  ;;  %v20070_v28 = vpop.f32.mrb[17].mxu1  ;;  %v1676_v22 = vadd.f32 %v1664_v14, %v19424_v54 }
 0x519   :  { %v1756_v42 = vadd.f32 %v1755_v41, %v19416_v50  ;;  %v13235_v3 = vmul.f32 -1.442695, %v1883_v30 }
 0x51a   :  { %18283 = vpow2.f32 %v13231_v57  ;;  %v1856_v32 = vadd.f32 %v1754_v5, %v1672_v44  ;;  %v1678_v57 = vadd.f32 %v1666_v63, %v19406_v45 }
 0x51b   :  { %v1759_v11 = vpop.f32.mrb[36].mxu0  ;;  %v1884_v7 = vadd.f32 %v1756_v42, %v1673_v6 }
 0x51c   :  { %v13232_v10 = vmul.f32 -1.442695, %v1856_v32  ;;  %v1760_v4 = vadd.f32 %v1759_v11, %v19410_v46  ;;  %v1761_v33 = vpop.f32.mrb[37].mxu0 }
 0x51d   :  { %v1762_v41 = vadd.f32 %v1761_v33, %v19416_v50  ;;  %v13236_v20 = vmul.f32 -1.442695, %v1884_v7  ;;  %v1647_v33 = vmul.f32 %v20018_v49, %v19472_v29 }
 0x51e   :  { %18285 = vpow2.f32 %v13232_v10  ;;  %v1857_v59 = vadd.f32 %v1760_v4, %v1675_v27  ;;  %v1679_v27 = vadd.f32 %v1667_v31, %v19424_v54 }
 0x51f   :  { %v1765_v5 = vpop.f32.mrb[38].mxu0  ;;  %v20083_v61 = vpop.f32.mrb[18].mxu1  ;;  %v1885_v42 = vadd.f32 %v1762_v41, %v1676_v22  ;;  %18287 = vpow2.f32 %v13235_v3  ;;  %v1619_v3 = vmul.f32 %v20020_v39, %v19469_v60  ;;  %v1837_v39 = vadd.f32 %v20070_v28, %v19480_v17 }
 0x520   :  { %v13233_v6 = vmul.f32 -1.442695, %v1857_v59  ;;  %v1766_v21 = vadd.f32 %v1765_v5, %v19410_v46  ;;  %v1767_v44 = vpop.f32.mrb[39].mxu0  ;;  %v1846_v32 = vpop.f32.mrb[19].mxu1  ;;  %v1650_v59 = vmul.f32 %v20022_v40, %v19472_v29  ;;  %v1625_v40 = vmul.f32 %v20040_v36, %v19469_v60 }
 0x521   :  { %v1768_v30 = vadd.f32 %v1767_v44, %v19416_v50  ;;  %v13237_v55 = vmul.f32 -1.442695, %v1885_v42  ;;  %v1656_v36 = vmul.f32 %v20057_v58, %v19472_v29  ;;  %v1852_v58 = vadd.f32 %v20083_v61, %v19480_v17 }
 0x522   :  { %18289 = vpow2.f32 %v13233_v6  ;;  %v1858_v23 = vadd.f32 %v1766_v21, %v1678_v57  ;;  %v1622_v57 = vmul.f32 %v20024_v51, %v19469_v60  ;;  %v1659_v6 = vadd.f32 %v1647_v33, %v1619_v3 }
 0x523   :  { %18291 = vpow2.f32 %v13236_v20  ;;  %v1886_v11 = vadd.f32 %v1768_v30, %v1679_v27  ;;  %v1653_v30 = vmul.f32 %v20038_v35, %v19472_v29 }
 0x524   :  { %v18284_v14 = vpop.eup %18283  ;;  %v13234_v63 = vmul.f32 -1.442695, %v1858_v23  ;;  %v1662_v49 = vadd.f32 %v1650_v59, %v1622_v57 }
 0x525   :  { %v1871_v10 = vadd.f32 1.0, %v18284_v14  ;;  %v13238_v22 = vmul.f32 -1.442695, %v1886_v11  ;;  %v1671_v14 = vadd.f32 %v1659_v6, %v19488_v24 }
 0x526   :  { %18293 = vpow2.f32 %v13234_v63  ;;  %v1842_v63 = vadd.f32 %v20066_v53, %v19480_v17 }
 0x527   :  { %18295 = vrcp.f32 %v1871_v10  ;;  %v1665_v10 = vadd.f32 %v1653_v30, %v1625_v40 }
 0x528   :  { %v18286_v7 = vpop.eup %18285  ;;  %18297 = vpow2.f32 %v13237_v55 }
 0x529   :  { %v1872_v4 = vadd.f32 1.0, %v18286_v7  ;;  %v18288_v41 = vpop.eup %18287  ;;  %v1674_v7 = vadd.f32 %v1662_v49, %v19488_v24  ;;  %v1677_v57 = vadd.f32 %v1665_v10, %v19488_v24 }
 0x52a   :  { %v1899_v42 = vadd.f32 1.0, %v18288_v41  ;;  %v1847_v41 = vadd.f32 %v1846_v32, %v19480_v17 }
 0x52b   :  { %18299 = vrcp.f32 %v1872_v4  ;;  %v1628_v4 = vmul.f32 %v20059_v16, %v19469_v60 }
 0x52c   :  { %v18290_v31 = vpop.eup %18289  ;;  %18301 = vpow2.f32 %v13238_v22 }
 0x52d   :  { %v1873_v5 = vadd.f32 1.0, %v18290_v31  ;;  %v18292_v20 = vpop.eup %18291  ;;  %v1668_v59 = vadd.f32 %v1656_v36, %v1628_v4 }
 0x52e   :  { %v1900_v23 = vadd.f32 1.0, %v18292_v20 }
 0x52f   :  { %18303 = vrcp.f32 %v1873_v5  ;;  %v1680_v16 = vadd.f32 %v1668_v59, %v19488_v24  ;;  %v24214_v59 = vld [vmem:[#allocation8_spill] sm:$0xff] }
 0x530   :  { %v18294_v21 = vpop.eup %18293  ;;  %18305 = vrcp.f32 %v1899_v42 }
 0x531   :  { %v18296_v44 = vpop.eup %18295  ;;  %v1874_v51 = vadd.f32 1.0, %v18294_v21 }
 0x532   :  { %v18298_v27 = vpop.eup %18297  ;;  %v1911_v55 = vmul.f32 %v18296_v44, %v1837_v39 }
 0x533   :  { %18307 = vrcp.f32 %v1874_v51  ;;  %v1901_v35 = vadd.f32 1.0, %v18298_v27 }
 0x534   :  { %v1915_v11 = vadd.f32 %v1911_v55, %v1671_v14  ;;  %18309 = vrcp.f32 %v1900_v23 }
 0x535   :  { %v18300_v28 = vpop.eup %18299 }
 0x536   :  { %v18302_v22 = vpop.eup %18301  ;;  %v1912_v33 = vmul.f32 %v18300_v28, %v1842_v63  ;;  %18311 = vtanh.f32 %v1915_v11 }
 0x537   :  { %18313 = vrcp.f32 %v1901_v35  ;;  %v1902_v31 = vadd.f32 1.0, %v18302_v22 }
 0x538   :  { %v1916_v3 = vadd.f32 %v1912_v33, %v1674_v7  ;;  %v24209_v33 = vld [vmem:[#allocation4_spill] sm:$0xff] }
 0x539   :  { %v18304_v53 = vpop.eup %18303 }
 0x53a   :  { %18315 = vtanh.f32 %v1916_v3  ;;  %v1913_v5 = vmul.f32 %v18304_v53, %v1847_v41  ;;  %v18306_v20 = vpop.eup %18305  ;;  %v24210_v3 = vld [vmem:[#allocation9_spill] sm:$0xff]  ;;  %v24212_v53 = vld [vmem:[#allocation6_spill] sm:$0xff] }
 0x53b   :  { %18317 = vrcp.f32 %v1902_v31  ;;  %v1923_v49 = vsub.f32 1.0, %v18306_v20  ;;  %v1931_v40 = vmul.f32 %v18306_v20, %v19963_v12  ;;  %v24211_v41 = vld [vmem:[#allocation5_spill] sm:$0xff]  ;;  %v24213_v31 = vld [vmem:[#allocation10_spill] sm:$0xff]  ;;  %v20171_v20 = vpop.permute.xlu0 %1972 }
 0x53c   :  { %v1917_v6 = vadd.f32 %v1913_v5, %v1677_v57  ;;  %v24215_v57 = vld [vmem:[#allocation2_spill] sm:$0xff]  ;;  %v24216_v5 = vld [vmem:[#allocation11_spill] sm:$0xff] }
 0x53d   :  { %v18308_v42 = vpop.eup %18307 }
 0x53e   :  { %v1914_v21 = vmul.f32 %v18308_v42, %v1852_v58  ;;  %18319 = vtanh.f32 %v1917_v6  ;;  %v18310_v32 = vpop.eup %18309  ;;  %v20173_v58 = vpop.permute.xlu1 %1941 }
 0x53f   :  { %v1924_v27 = vsub.f32 1.0, %v18310_v32  ;;  %v1932_v55 = vmul.f32 %v18310_v32, %v19970_v1  ;;  %v20175_v6 = vpop.permute.xlu0 %1976  ;;  %v24218_v32 = vld [vmem:[#allocation12_spill] sm:$0xff] }
 0x540   :  { %v18312_v39 = vpop.eup %18311  ;;  %v1918_v44 = vadd.f32 %v1914_v21, %v1680_v16  ;;  %v24217_v16 = vld [vmem:[#allocation13_spill] sm:$0xff] }
 0x541   :  { %v1927_v30 = vmul.f32 %v18312_v39, %v1923_v49  ;;  %v18314_v23 = vpop.eup %18313  ;;  %v1987_v21 = vmul.f32 %v20171_v20, %v24217_v16  ;;  %v1959_v49 = vmul.f32 %v20173_v58, %v24218_v32  ;;  %v24219_v39 = vld [vmem:[#allocation15_spill] sm:$0xff] }
 0x542   :  { %18321 = vtanh.f32 %v1918_v44  ;;  %v1925_v12 = vsub.f32 1.0, %v18314_v23  ;;  %v1933_v7 = vmul.f32 %v18314_v23, %v19978_v15  ;;  %v20177_v42 = vpop.permute.xlu1 %1946  ;;  %v1988_v44 = vmul.f32 %v20171_v20, %v24219_v39 }
 0x543   :  { %v20116_v51 = vadd.f32 %v1931_v40, %v1927_v30  ;;  %v1960_v30 = vmul.f32 %v20173_v58, %v24183_v0  ;;  %v1999_v40 = vadd.f32 %v1987_v21, %v1959_v49  ;;  %v1990_v23 = vmul.f32 %v20175_v6, %v24217_v16 }
 0x544   :  { %v18316_v61 = vpop.eup %18315 }
 0x545   :  { %2088 = vmatmul.mubr.f32.vlgmr.msra.gmra.mrb[40].mxu0 %v20116_v51  ;;  %14929 = vmatprep.mubr.f32.mxu1 %v20116_v51  ;;  %v1928_v14 = vmul.f32 %v18316_v61, %v1924_v27  ;;  %v18318_v63 = vpop.eup %18317  ;;  %v1962_v27 = vmul.f32 %v20177_v42, %v24218_v32  ;;  %v20191_v61 = vpop.permute.xlu0 %1980 }
 0x546   :  { %2093 = vmatprep.mubr.f32.mxu0 %v24160_v2  ;;  %16782 = vmatpush1.bf16.msra.mxu0 %v18989_v8  ;;  %v1926_v35 = vsub.f32 1.0, %v18318_v63  ;;  %v1934_v15 = vmul.f32 %v18318_v63, %v19988_v56  ;;  %v24208_v56 = vld [vmem:[#allocation3_spill] sm:$0xff]  ;;  %v1963_v63 = vmul.f32 %v20177_v42, %v24183_v0 }
 0x547   :  { %v20123_v11 = vadd.f32 %v1932_v55, %v1928_v14  ;;  %16784 = vmatprep.subr.bf16.mxu0 %v19002_v13  ;;  %v20193_v14 = vpop.permute.xlu1 %1951  ;;  %v1991_v55 = vmul.f32 %v20175_v6, %v24219_v39 }
 0x548   :  { %v18320_v28 = vpop.eup %18319  ;;  %v1966_v21 = vmul.f32 %v20193_v14, %v24183_v0 }
 0x549   :  { %2094 = vmatmul.mubr.f32.gmra.mrb[42].mxu0 %v20123_v11  ;;  %14930 = vmatmul.mubr.f32.vlgmr.msra.gmra.mrb[20].mxu1 %v20123_v11  ;;  %v1929_v10 = vmul.f32 %v18320_v28, %v1925_v12  ;;  %v2011_v12 = vadd.f32 %v1999_v40, %v19406_v45  ;;  %v2003_v40 = vadd.f32 %v1991_v55, %v1963_v63 }
 0x54a   :  { %2099 = vmatprep.mubr.f32.mxu0 %v24160_v2  ;;  %16786 = vmatpush1.bf16.msra.mxu0 %v19015_v18 }
 0x54b   :  { %v20131_v1 = vadd.f32 %v1933_v7, %v1929_v10  ;;  %16814 = vmatpush3.bf16.msra.mxu1 %v19071_v37  ;;  %16788 = vmatprep.subr.bf16.mxu0 %v19017_v19  ;;  %v2000_v10 = vadd.f32 %v1988_v44, %v1960_v30  ;;  %v1993_v7 = vmul.f32 %v20191_v61, %v24217_v16  ;;  %v20210_v44 = vpop.permute.xlu0 %1984  ;;  %v20212_v30 = vpop.permute.xlu1 %1956 }
 0x54c   :  { %v18322_v22 = vpop.eup %18321  ;;  %16816 = vmatprep.subr.bf16.mxu1 %v19088_v43 }
 0x54d   :  { %2100 = vmatmul.mubr.f32.gmra.mrb[44].mxu0 %v20131_v1  ;;  %14932 = vmatprep.mubr.f32.mxu1 %v20131_v1  ;;  %v1930_v36 = vmul.f32 %v18322_v22, %v1926_v35  ;;  %v1965_v35 = vmul.f32 %v20193_v14, %v24218_v32 }
 0x54e   :  { %2105 = vmatprep.mubr.f32.mxu0 %v24160_v2  ;;  %16790 = vmatpush1.bf16.msra.mxu0 %v19036_v25 }
 0x54f   :  { %v20141_v4 = vadd.f32 %v1934_v15, %v1930_v36  ;;  %16818 = vmatpush3.bf16.msra.mxu1 %v19088_v43  ;;  %16792 = vmatprep.subr.bf16.mxu0 %v19039_v26  ;;  %v2002_v15 = vadd.f32 %v1990_v23, %v1962_v27  ;;  %v1968_v23 = vmul.f32 %v20212_v30, %v24218_v32 }
 0x550   :  { %16820 = vmatprep.subr.bf16.mxu1 %v19117_v52  ;;  %v2012_v27 = vadd.f32 %v2000_v10, %v19424_v54  ;;  %v1997_v10 = vmul.f32 %v20210_v44, %v24219_v39 }
 0x551   :  { %2106 = vmatmul.mubr.f32.gmra.mrb[46].mxu0 %v20141_v4  ;;  %14933 = vmatmul.mubr.f32.gmra.mrb[22].mxu1 %v20141_v4 }
 0x552   :  { %16794 = vmatpush1.bf16.msra.mxu0 %v19063_v34  ;;  %2429 = vmatprep.mubr.f32.mxu0 %v24160_v2 }
 0x553   :  { %16822 = vmatpush3.bf16.msra.mxu1 %v19117_v52  ;;  %16796 = vmatprep.subr.bf16.mxu0 %v19074_v38 }
 0x554   :  { %16824 = vmatprep.subr.bf16.mxu1 %v19148_v62 }
 0x556   :  { %16798 = vmatpush1.bf16.msra.mxu0 %v19101_v47 }
 0x557   :  { %16826 = vmatpush3.bf16.msra.mxu1 %v19148_v62  ;;  %16800 = vmatprep.subr.bf16.mxu0 %v19105_v48 }
 0x558   :  { %16828 = vmatprep.subr.bf16.mxu1 %v19176_v9 }
 0x55a   :  { %16802 = vmatpush1.bf16.msra.mxu0 %v24208_v56 }
 0x55b   :  { %16830 = vmatpush3.bf16.msra.mxu1 %v19176_v9  ;;  %16804 = vmatprep.subr.bf16.mxu0 %v24209_v33 }
 0x55c   :  { %16832 = vmatprep.subr.bf16.mxu1 %v24210_v3 }
 0x55e   :  { %16806 = vmatpush1.bf16.msra.mxu0 %v24211_v41 }
 0x55f   :  { %16834 = vmatpush3.bf16.msra.mxu1 %v24210_v3  ;;  %16808 = vmatprep.subr.bf16.mxu0 %v24212_v53 }
 0x560   :  { %16836 = vmatprep.subr.bf16.mxu1 %v24213_v31 }
 0x562   :  { %16810 = vmatpush1.bf16.msra.mxu0 %v24214_v59  ;;  %v1996_v59 = vmul.f32 %v20210_v44, %v24217_v16  ;;  %v2015_v16 = vadd.f32 %v2003_v40, %v19424_v54 }
 0x563   :  { %16838 = vmatpush3.bf16.msra.mxu1 %v24213_v31  ;;  %16844 = vmatprep.subr.bf16.mxu0 %v24215_v57  ;;  %v1994_v57 = vmul.f32 %v20191_v61, %v24219_v39 }
 0x564   :  { %16840 = vmatprep.subr.bf16.mxu1 %v24216_v5 }
 0x565   :  { %v2006_v32 = vadd.f32 %v1994_v57, %v1966_v21 }
 0x567   :  { %16842 = vmatpush3.bf16.msra.mxu1 %v24216_v5 }
 0x568   :  { %16876 = vmatprep.subr.bf16.mxu1 %v19071_v37 }
 0x618   :  { %v2089_v28 = vpop.f32.mrb[40].mxu0 }
 0x619   :  { %v2090_v22 = vadd.f32 %v2089_v28, %v19410_v46  ;;  %v2091_v36 = vpop.f32.mrb[41].mxu0 }
 0x61a   :  { %v2092_v49 = vadd.f32 %v2091_v36, %v19416_v50  ;;  %v2014_v36 = vadd.f32 %v2002_v15, %v19406_v45 }
 0x61b   :  { %v2197_v5 = vadd.f32 %v2090_v22, %v2011_v12  ;;  %v2005_v12 = vadd.f32 %v1993_v7, %v1965_v35 }
 0x61c   :  { %v2095_v28 = vpop.f32.mrb[42].mxu0  ;;  %v20219_v31 = vpop.f32.mrb[20].mxu1  ;;  %v2225_v22 = vadd.f32 %v2092_v49, %v2012_v27  ;;  %v2018_v27 = vadd.f32 %v2006_v32, %v19424_v54 }
 0x61d   :  { %v13239_v53 = vmul.f32 -1.442695, %v2197_v5  ;;  %v2096_v55 = vadd.f32 %v2095_v28, %v19410_v46  ;;  %v2097_v63 = vpop.f32.mrb[43].mxu0  ;;  %v20223_v41 = vpop.f32.mrb[21].mxu1  ;;  %v1969_v5 = vmul.f32 %v20212_v30, %v24183_v0  ;;  %v2008_v28 = vadd.f32 %v1996_v59, %v1968_v23 }
 0x61e   :  { %v2098_v3 = vadd.f32 %v2097_v63, %v19416_v50  ;;  %v2017_v7 = vadd.f32 %v2005_v12, %v19406_v45  ;;  %v13243_v40 = vmul.f32 -1.442695, %v2225_v22 }
 0x61f   :  { %18323 = vpow2.f32 %v13239_v53  ;;  %v2198_v15 = vadd.f32 %v2096_v55, %v2014_v36  ;;  %v2009_v63 = vadd.f32 %v1997_v10, %v1969_v5  ;;  %v2020_v53 = vadd.f32 %v2008_v28, %v19406_v45 }
 0x620   :  { %v2101_v33 = vpop.f32.mrb[44].mxu0  ;;  %v2226_v9 = vadd.f32 %v2098_v3, %v2015_v16 }
 0x621   :  { %v13240_v56 = vmul.f32 -1.442695, %v2198_v15  ;;  %v2102_v35 = vadd.f32 %v2101_v33, %v19410_v46  ;;  %v2103_v49 = vpop.f32.mrb[45].mxu0  ;;  %v2021_v32 = vadd.f32 %v2009_v63, %v19424_v54  ;;  %v1992_v63 = vmul.f32 %v20175_v6, %v19472_v29 }
 0x622   :  { %v2104_v57 = vadd.f32 %v2103_v49, %v19416_v50  ;;  %v13244_v59 = vmul.f32 -1.442695, %v2226_v9  ;;  %v1967_v6 = vmul.f32 %v20193_v14, %v19469_v60  ;;  %v1998_v14 = vmul.f32 %v20210_v44, %v19472_v29 }
 0x623   :  { %18325 = vpow2.f32 %v13240_v56  ;;  %v2199_v21 = vadd.f32 %v2102_v35, %v2017_v7 }
 0x624   :  { %v2107_v36 = vpop.f32.mrb[46].mxu0  ;;  %v20236_v55 = vpop.f32.mrb[22].mxu1  ;;  %v2227_v16 = vadd.f32 %v2104_v57, %v2018_v27  ;;  %18327 = vpow2.f32 %v13243_v40  ;;  %v1989_v40 = vmul.f32 %v20171_v20, %v19472_v29  ;;  %v1961_v57 = vmul.f32 %v20173_v58, %v19469_v60 }
 0x625   :  { %v13241_v3 = vmul.f32 -1.442695, %v2199_v21  ;;  %v2108_v23 = vadd.f32 %v2107_v36, %v19410_v46  ;;  %v2109_v33 = vpop.f32.mrb[47].mxu0  ;;  %v2188_v12 = vpop.f32.mrb[23].mxu1  ;;  %v2179_v58 = vadd.f32 %v20223_v41, %v19480_v17  ;;  %v2194_v44 = vadd.f32 %v20236_v55, %v19480_v17 }
 0x626   :  { %v2110_v22 = vadd.f32 %v2109_v33, %v19416_v50  ;;  %v13245_v5 = vmul.f32 -1.442695, %v2227_v16 }
 0x627   :  { %18329 = vpow2.f32 %v13241_v3  ;;  %v2200_v56 = vadd.f32 %v2108_v23, %v2020_v53  ;;  %v1964_v53 = vmul.f32 %v20177_v42, %v19469_v60  ;;  %v2001_v3 = vadd.f32 %v1989_v40, %v1961_v57 }
 0x628   :  { %18331 = vpow2.f32 %v13244_v59  ;;  %v2228_v28 = vadd.f32 %v2110_v22, %v2021_v32  ;;  %v1995_v22 = vmul.f32 %v20191_v61, %v19472_v29 }
 0x629   :  { %v18324_v10 = vpop.eup %18323  ;;  %v13242_v15 = vmul.f32 -1.442695, %v2200_v56  ;;  %v2004_v20 = vadd.f32 %v1992_v63, %v1964_v53 }
 0x62a   :  { %v2213_v7 = vadd.f32 1.0, %v18324_v10  ;;  %v13246_v35 = vmul.f32 -1.442695, %v2228_v28  ;;  %v2013_v10 = vadd.f32 %v2001_v3, %v19488_v24 }
 0x62b   :  { %18333 = vpow2.f32 %v13242_v15  ;;  %v2184_v15 = vadd.f32 %v20219_v31, %v19480_v17 }
 0x62c   :  { %18335 = vrcp.f32 %v2213_v7  ;;  %v2007_v7 = vadd.f32 %v1995_v22, %v1967_v6 }
 0x62d   :  { %v18326_v9 = vpop.eup %18325  ;;  %18337 = vpow2.f32 %v13245_v5 }
 0x62e   :  { %v2214_v49 = vadd.f32 1.0, %v18326_v9  ;;  %v18328_v21 = vpop.eup %18327  ;;  %v2016_v9 = vadd.f32 %v2004_v20, %v19488_v24  ;;  %v2019_v53 = vadd.f32 %v2007_v7, %v19488_v24 }
 0x62f   :  { %v2241_v16 = vadd.f32 1.0, %v18328_v21  ;;  %v2189_v21 = vadd.f32 %v2188_v12, %v19480_v17 }
 0x630   :  { %18339 = vrcp.f32 %v2214_v49  ;;  %v1970_v49 = vmul.f32 %v20212_v30, %v19469_v60 }
 0x631   :  { %v18330_v27 = vpop.eup %18329  ;;  %18341 = vpow2.f32 %v13246_v35 }
 0x632   :  { %v2215_v36 = vadd.f32 1.0, %v18330_v27  ;;  %v18332_v59 = vpop.eup %18331  ;;  %v2010_v63 = vadd.f32 %v1998_v14, %v1970_v49  ;;  %v24229_v14 = vld [vmem:[#allocation13_spill] sm:$0xff] }
 0x633   :  { %v2242_v56 = vadd.f32 1.0, %v18332_v59 }
 0x634   :  { %18343 = vrcp.f32 %v2215_v36  ;;  %v2022_v30 = vadd.f32 %v2010_v63, %v19488_v24 }
 0x635   :  { %v18334_v23 = vpop.eup %18333  ;;  %18345 = vrcp.f32 %v2241_v16 }
 0x636   :  { %v18336_v33 = vpop.eup %18335  ;;  %v2216_v42 = vadd.f32 1.0, %v18334_v23 }
 0x637   :  { %v18338_v32 = vpop.eup %18337  ;;  %v2253_v5 = vmul.f32 %v18336_v33, %v2179_v58 }
 0x638   :  { %18347 = vrcp.f32 %v2216_v42  ;;  %v2243_v61 = vadd.f32 1.0, %v18338_v32 }
 0x639   :  { %v2257_v28 = vadd.f32 %v2253_v5, %v2013_v10  ;;  %18349 = vrcp.f32 %v2242_v56 }
 0x63a   :  { %v18340_v41 = vpop.eup %18339 }
 0x63b   :  { %v18342_v35 = vpop.eup %18341  ;;  %v2254_v40 = vmul.f32 %v18340_v41, %v2184_v15  ;;  %18351 = vtanh.f32 %v2257_v28 }
 0x63c   :  { %18353 = vrcp.f32 %v2243_v61  ;;  %v2244_v27 = vadd.f32 1.0, %v18342_v35 }
 0x63d   :  { %v2258_v57 = vadd.f32 %v2254_v40, %v2016_v9  ;;  %v24230_v40 = vld [vmem:[#allocation12_spill] sm:$0xff] }
 0x63e   :  { %v18344_v31 = vpop.eup %18343 }
 0x63f   :  { %18355 = vtanh.f32 %v2258_v57  ;;  %v2255_v36 = vmul.f32 %v18344_v31, %v2189_v21  ;;  %v18346_v59 = vpop.eup %18345 }
 0x640   :  { %18357 = vrcp.f32 %v2244_v27  ;;  %v2265_v20 = vsub.f32 1.0, %v18346_v59  ;;  %v2273_v6 = vmul.f32 %v18346_v59, %v20116_v51 }
 0x641   :  { %v2259_v3 = vadd.f32 %v2255_v36, %v2019_v53 }
 0x642   :  { %v18348_v16 = vpop.eup %18347 }
 0x643   :  { %v2256_v23 = vmul.f32 %v18348_v16, %v2194_v44  ;;  %18359 = vtanh.f32 %v2259_v3  ;;  %v18350_v12 = vpop.eup %18349 }
 0x644   :  { %v2266_v32 = vsub.f32 1.0, %v18350_v12  ;;  %v2274_v5 = vmul.f32 %v18350_v12, %v20123_v11 }
 0x645   :  { %v18352_v58 = vpop.eup %18351  ;;  %v2260_v33 = vadd.f32 %v2256_v23, %v2022_v30 }
 0x646   :  { %v2269_v22 = vmul.f32 %v18352_v58, %v2265_v20  ;;  %v18354_v56 = vpop.eup %18353 }
 0x647   :  { %18361 = vtanh.f32 %v2260_v33  ;;  %v2267_v51 = vsub.f32 1.0, %v18354_v56  ;;  %v2275_v9 = vmul.f32 %v18354_v56, %v20131_v1 }
 0x648   :  { %v20269_v42 = vadd.f32 %v2273_v6, %v2269_v22 }
 0x649   :  { %v18356_v55 = vpop.eup %18355 }
 0x64a   :  { %2430 = vmatmul.mubr.f32.vlgmr.msra.gmra.mrb[48].mxu0 %v20269_v42  ;;  %14967 = vmatprep.mubr.f32.mxu1 %v20269_v42  ;;  %v2270_v10 = vmul.f32 %v18356_v55, %v2266_v32  ;;  %v18358_v15 = vpop.eup %18357 }
 0x64b   :  { %2435 = vmatprep.mubr.f32.mxu0 %v24160_v2  ;;  %16846 = vmatpush1.bf16.msra.mxu0 %v18989_v8  ;;  %v2268_v8 = vsub.f32 1.0, %v18358_v15  ;;  %v2276_v1 = vmul.f32 %v18358_v15, %v20141_v4 }
 0x64c   :  { %v20276_v28 = vadd.f32 %v2274_v5, %v2270_v10  ;;  %16848 = vmatprep.subr.bf16.mxu0 %v19002_v13 }
 0x64d   :  { %v18360_v41 = vpop.eup %18359 }
 0x64e   :  { %2436 = vmatmul.mubr.f32.gmra.mrb[50].mxu0 %v20276_v28  ;;  %14968 = vmatmul.mubr.f32.vlgmr.msra.gmra.mrb[24].mxu1 %v20276_v28  ;;  %v2271_v7 = vmul.f32 %v18360_v41, %v2267_v51 }
 0x64f   :  { %2441 = vmatprep.mubr.f32.mxu0 %v24160_v2  ;;  %16850 = vmatpush1.bf16.msra.mxu0 %v19015_v18 }
 0x650   :  { %v20284_v11 = vadd.f32 %v2275_v9, %v2271_v7  ;;  %16878 = vmatpush3.bf16.msra.mxu1 %v19071_v37  ;;  %16852 = vmatprep.subr.bf16.mxu0 %v19017_v19  ;;  %v24220_v19 = vld [vmem:[#allocation7_spill] sm:$0xff]  ;;  %v24224_v37 = vld [vmem:[#allocation5_spill] sm:$0xff] }
 0x651   :  { %v18362_v13 = vpop.eup %18361  ;;  %16880 = vmatprep.subr.bf16.mxu1 %v19088_v43 }
 0x652   :  { %2442 = vmatmul.mubr.f32.gmra.mrb[52].mxu0 %v20284_v11  ;;  %14970 = vmatprep.mubr.f32.mxu1 %v20284_v11  ;;  %v2272_v61 = vmul.f32 %v18362_v13, %v2268_v8 }
 0x653   :  { %2447 = vmatprep.mubr.f32.mxu0 %v24160_v2  ;;  %16854 = vmatpush1.bf16.msra.mxu0 %v19036_v25  ;;  %v24221_v25 = vld [vmem:[#allocation3_spill] sm:$0xff] }
 0x654   :  { %v20294_v18 = vadd.f32 %v2276_v1, %v2272_v61  ;;  %16882 = vmatpush3.bf16.msra.mxu1 %v19088_v43  ;;  %16856 = vmatprep.subr.bf16.mxu0 %v19039_v26  ;;  %v24222_v26 = vld [vmem:[#allocation4_spill] sm:$0xff]  ;;  %v24226_v43 = vld [vmem:[#allocation10_spill] sm:$0xff] }
 0x655   :  { %16884 = vmatprep.subr.bf16.mxu1 %v19117_v52 }
 0x656   :  { %2448 = vmatmul.mubr.f32.gmra.mrb[54].mxu0 %v20294_v18  ;;  %14971 = vmatmul.mubr.f32.gmra.mrb[26].mxu1 %v20294_v18 }
 0x657   :  { %16858 = vmatpush1.bf16.msra.mxu0 %v19063_v34  ;;  %2771 = vmatprep.mubr.f32.mxu0 %v24160_v2  ;;  %v24223_v34 = vld [vmem:[#allocation9_spill] sm:$0xff] }
 0x658   :  { %16886 = vmatpush3.bf16.msra.mxu1 %v19117_v52  ;;  %16860 = vmatprep.subr.bf16.mxu0 %v19074_v38  ;;  %v24225_v38 = vld [vmem:[#allocation6_spill] sm:$0xff]  ;;  %v20322_v52 = vpop.permute.xlu0 %2314 }
 0x659   :  { %16888 = vmatprep.subr.bf16.mxu1 %v19148_v62  ;;  %v2329_v49 = vmul.f32 %v20322_v52, %v24229_v14  ;;  %v2330_v21 = vmul.f32 %v20322_v52, %v24219_v39 }
 0x65b   :  { %16862 = vmatpush1.bf16.msra.mxu0 %v19101_v47  ;;  %v24227_v47 = vld [vmem:[#allocation8_spill] sm:$0xff] }
 0x65c   :  { %16890 = vmatpush3.bf16.msra.mxu1 %v19148_v62  ;;  %16864 = vmatprep.subr.bf16.mxu0 %v19105_v48  ;;  %v24228_v48 = vld [vmem:[#allocation11_spill] sm:$0xff]  ;;  %v20324_v62 = vpop.permute.xlu1 %2283  ;;  %v20326_v4 = vpop.permute.xlu0 %2318 }
 0x65d   :  { %16892 = vmatprep.subr.bf16.mxu1 %v24220_v19  ;;  %v2301_v57 = vmul.f32 %v20324_v62, %v24230_v40  ;;  %v2302_v31 = vmul.f32 %v20324_v62, %v24183_v0  ;;  %v2332_v63 = vmul.f32 %v20326_v4, %v24229_v14  ;;  %v2333_v44 = vmul.f32 %v20326_v4, %v24219_v39 }
 0x65f   :  { %16866 = vmatpush1.bf16.msra.mxu0 %v24221_v25  ;;  %v2341_v27 = vadd.f32 %v2329_v49, %v2301_v57  ;;  %v2342_v23 = vadd.f32 %v2330_v21, %v2302_v31 }
 0x660   :  { %16894 = vmatpush3.bf16.msra.mxu1 %v24220_v19  ;;  %16868 = vmatprep.subr.bf16.mxu0 %v24222_v26  ;;  %v20328_v35 = vpop.permute.xlu1 %2288  ;;  %v20342_v36 = vpop.permute.xlu0 %2322 }
 0x661   :  { %16896 = vmatprep.subr.bf16.mxu1 %v24223_v34  ;;  %v2304_v53 = vmul.f32 %v20328_v35, %v24230_v40  ;;  %v2305_v3 = vmul.f32 %v20328_v35, %v24183_v0  ;;  %v2353_v16 = vadd.f32 %v2341_v27, %v19406_v45  ;;  %v2335_v12 = vmul.f32 %v20342_v36, %v24229_v14 }
 0x662   :  { %v2336_v6 = vmul.f32 %v20342_v36, %v24219_v39  ;;  %v2354_v7 = vadd.f32 %v2342_v23, %v19424_v54 }
 0x663   :  { %16870 = vmatpush1.bf16.msra.mxu0 %v24224_v37  ;;  %v2344_v22 = vadd.f32 %v2332_v63, %v2304_v53  ;;  %v2345_v55 = vadd.f32 %v2333_v44, %v2305_v3 }
 0x664   :  { %16898 = vmatpush3.bf16.msra.mxu1 %v24223_v34  ;;  %16872 = vmatprep.subr.bf16.mxu0 %v24225_v38  ;;  %v20344_v59 = vpop.permute.xlu1 %2293  ;;  %v20361_v10 = vpop.permute.xlu0 %2326 }
 0x665   :  { %16900 = vmatprep.subr.bf16.mxu1 %v24226_v43  ;;  %v2307_v20 = vmul.f32 %v20344_v59, %v24230_v40  ;;  %v2308_v56 = vmul.f32 %v20344_v59, %v24183_v0  ;;  %v2338_v51 = vmul.f32 %v20361_v10, %v24229_v14  ;;  %v2356_v61 = vadd.f32 %v2344_v22, %v19406_v45 }
 0x666   :  { %v2357_v37 = vadd.f32 %v2345_v55, %v19424_v54 }
 0x667   :  { %16874 = vmatpush1.bf16.msra.mxu0 %v24227_v47  ;;  %v2347_v26 = vadd.f32 %v2335_v12, %v2307_v20  ;;  %v2339_v47 = vmul.f32 %v20361_v10, %v24219_v39 }
 0x668   :  { %16902 = vmatpush3.bf16.msra.mxu1 %v24226_v43  ;;  %v20363_v5 = vpop.permute.xlu1 %2298  ;;  %v2348_v43 = vadd.f32 %v2336_v6, %v2308_v56 }
 0x669   :  { %16904 = vmatprep.subr.bf16.mxu1 %v24228_v48  ;;  %v2310_v41 = vmul.f32 %v20363_v5, %v24230_v40  ;;  %v2359_v63 = vadd.f32 %v2347_v26, %v19406_v45 }
 0x66a   :  { %v2360_v23 = vadd.f32 %v2348_v43, %v19424_v54  ;;  %v2303_v43 = vmul.f32 %v20324_v62, %v19469_v60 }
 0x66b   :  { %v2350_v21 = vadd.f32 %v2338_v51, %v2310_v41 }
 0x66c   :  { %16906 = vmatpush3.bf16.msra.mxu1 %v24228_v48  ;;  %v2311_v48 = vmul.f32 %v20363_v5, %v24183_v0 }
 0x66d   :  { %v2362_v20 = vadd.f32 %v2350_v21, %v19406_v45 }
 0x66e   :  { %v2351_v12 = vadd.f32 %v2339_v47, %v2311_v48 }
 0x71d   :  { %v2431_v30 = vpop.f32.mrb[48].mxu0 }
 0x71e   :  { %v2432_v58 = vadd.f32 %v2431_v30, %v19410_v46  ;;  %v2433_v33 = vpop.f32.mrb[49].mxu0 }
 0x71f   :  { %v2434_v32 = vadd.f32 %v2433_v33, %v19416_v50 }
 0x720   :  { %v2539_v15 = vadd.f32 %v2432_v58, %v2353_v16 }
 0x721   :  { %v2437_v9 = vpop.f32.mrb[50].mxu0  ;;  %v20370_v8 = vpop.f32.mrb[24].mxu1  ;;  %v2567_v34 = vadd.f32 %v2434_v32, %v2354_v7  ;;  %v2363_v7 = vadd.f32 %v2351_v12, %v19424_v54 }
 0x722   :  { %v13247_v13 = vmul.f32 -1.442695, %v2539_v15  ;;  %v2438_v1 = vadd.f32 %v2437_v9, %v19410_v46  ;;  %v2439_v19 = vpop.f32.mrb[51].mxu0  ;;  %v20374_v25 = vpop.f32.mrb[25].mxu1 }
 0x723   :  { %v2440_v38 = vadd.f32 %v2439_v19, %v19416_v50  ;;  %v13251_v3 = vmul.f32 -1.442695, %v2567_v34  ;;  %v2521_v62 = vadd.f32 %v20374_v25, %v19480_v17 }
 0x724   :  { %18363 = vpow2.f32 %v13247_v13  ;;  %v2540_v49 = vadd.f32 %v2438_v1, %v2356_v61 }
 0x725   :  { %v2443_v57 = vpop.f32.mrb[52].mxu0  ;;  %v2568_v27 = vadd.f32 %v2440_v38, %v2357_v37  ;;  %v2331_v38 = vmul.f32 %v20322_v52, %v19472_v29 }
 0x726   :  { %v13248_v31 = vmul.f32 -1.442695, %v2540_v49  ;;  %v2444_v53 = vadd.f32 %v2443_v57, %v19410_v46  ;;  %v2445_v44 = vpop.f32.mrb[53].mxu0  ;;  %v2334_v49 = vmul.f32 %v20326_v4, %v19472_v29  ;;  %v2306_v57 = vmul.f32 %v20328_v35, %v19469_v60 }
 0x727   :  { %v2446_v16 = vadd.f32 %v2445_v44, %v19416_v50  ;;  %v13252_v22 = vmul.f32 -1.442695, %v2568_v27  ;;  %v2343_v27 = vadd.f32 %v2331_v38, %v2303_v43  ;;  %v2309_v4 = vmul.f32 %v20344_v59, %v19469_v60 }
 0x728   :  { %18365 = vpow2.f32 %v13248_v31  ;;  %v2541_v30 = vadd.f32 %v2444_v53, %v2359_v63  ;;  %v2346_v52 = vadd.f32 %v2334_v49, %v2306_v57  ;;  %v2340_v59 = vmul.f32 %v20361_v10, %v19472_v29 }
 0x729   :  { %v2449_v58 = vpop.f32.mrb[54].mxu0  ;;  %v20387_v33 = vpop.f32.mrb[26].mxu1  ;;  %v2569_v56 = vadd.f32 %v2446_v16, %v2360_v23  ;;  %18367 = vpow2.f32 %v13251_v3  ;;  %v2337_v3 = vmul.f32 %v20342_v36, %v19472_v29  ;;  %v2355_v23 = vadd.f32 %v2343_v27, %v19488_v24 }
 0x72a   :  { %v13249_v6 = vmul.f32 -1.442695, %v2541_v30  ;;  %v2450_v32 = vadd.f32 %v2449_v58, %v19410_v46  ;;  %v2451_v55 = vpop.f32.mrb[55].mxu0  ;;  %v2530_v15 = vpop.f32.mrb[27].mxu1  ;;  %v2536_v10 = vadd.f32 %v20387_v33, %v19480_v17 }
 0x72b   :  { %v2452_v51 = vadd.f32 %v2451_v55, %v19416_v50  ;;  %v13253_v13 = vmul.f32 -1.442695, %v2569_v56 }
 0x72c   :  { %18369 = vpow2.f32 %v13249_v6  ;;  %v2542_v41 = vadd.f32 %v2450_v32, %v2362_v20  ;;  %v2526_v20 = vadd.f32 %v20370_v8, %v19480_v17  ;;  %v2358_v6 = vadd.f32 %v2346_v52, %v19488_v24 }
 0x72d   :  { %18371 = vpow2.f32 %v13252_v22  ;;  %v2570_v1 = vadd.f32 %v2452_v51, %v2363_v7  ;;  %v2349_v22 = vadd.f32 %v2337_v3, %v2309_v4  ;;  %v2312_v32 = vmul.f32 %v20363_v5, %v19469_v60 }
 0x72e   :  { %v18364_v9 = vpop.eup %18363  ;;  %v13250_v61 = vmul.f32 -1.442695, %v2542_v41  ;;  %v2531_v41 = vadd.f32 %v2530_v15, %v19480_v17 }
 0x72f   :  { %v2555_v19 = vadd.f32 1.0, %v18364_v9  ;;  %v13254_v34 = vmul.f32 -1.442695, %v2570_v1  ;;  %v2352_v9 = vadd.f32 %v2340_v59, %v2312_v32  ;;  %v2973_v59 = vld [vmem:[%s24013_s5 + $0x40] sm:$0xff]  ;;  %v2974_v32 = vld [vmem:[%s24013_s5 + $0x48] sm:$0xff] }
 0x730   :  { %18373 = vpow2.f32 %v13250_v61 }
 0x731   :  { %18375 = vrcp.f32 %v2555_v19  ;;  %v2364_v5 = vadd.f32 %v2352_v9, %v19488_v24  ;;  %v2978_v9 = vld [vmem:[%s24013_s5 + $0x68] sm:$0xff] }
 0x732   :  { %v18366_v26 = vpop.eup %18365  ;;  %18377 = vpow2.f32 %v13253_v13  ;;  %v2361_v13 = vadd.f32 %v2349_v22, %v19488_v24 }
 0x733   :  { %v2556_v37 = vadd.f32 1.0, %v18366_v26  ;;  %v18368_v47 = vpop.eup %18367 }
 0x734   :  { %v2583_v63 = vadd.f32 1.0, %v18368_v47 }
 0x735   :  { %18379 = vrcp.f32 %v2556_v37 }
 0x736   :  { %v18370_v48 = vpop.eup %18369  ;;  %18381 = vpow2.f32 %v13254_v34 }
 0x737   :  { %v2557_v21 = vadd.f32 1.0, %v18370_v48  ;;  %v18372_v31 = vpop.eup %18371 }
 0x738   :  { %v2584_v16 = vadd.f32 1.0, %v18372_v31 }
 0x739   :  { %18383 = vrcp.f32 %v2557_v21 }
 0x73a   :  { %v18374_v53 = vpop.eup %18373  ;;  %18385 = vrcp.f32 %v2583_v63 }
 0x73b   :  { %v18376_v44 = vpop.eup %18375  ;;  %v2558_v35 = vadd.f32 1.0, %v18374_v53 }
 0x73c   :  { %v18378_v30 = vpop.eup %18377  ;;  %v2595_v12 = vmul.f32 %v18376_v44, %v2521_v62 }
 0x73d   :  { %18387 = vrcp.f32 %v2558_v35  ;;  %v2585_v36 = vadd.f32 1.0, %v18378_v30 }
 0x73e   :  { %v2599_v58 = vadd.f32 %v2595_v12, %v2355_v23  ;;  %18389 = vrcp.f32 %v2584_v16  ;;  %v2966_v23 = vld [vmem:[%s24013_s5 + $0x8] sm:$0xff] }
 0x73f   :  { %v18380_v25 = vpop.eup %18379 }
 0x740   :  { %v18382_v56 = vpop.eup %18381  ;;  %v2596_v55 = vmul.f32 %v18380_v25, %v2526_v20  ;;  %18391 = vtanh.f32 %v2599_v58  ;;  %v2969_v58 = vld [vmem:[%s24013_s5 + $0x20] sm:$0xff]  ;;  %v2970_v25 = vld [vmem:[%s24013_s5 + $0x28] sm:$0xff] }
 0x741   :  { %18393 = vrcp.f32 %v2585_v36  ;;  %v2586_v7 = vadd.f32 1.0, %v18382_v56  ;;  %v16915_v22 = vpack.c.bf16 %v2970_v25, %v2969_v58  ;;  %v2972_v36 = vld [vmem:[%s24013_s5 + $0x38] sm:$0xff] }
 0x742   :  { %v2600_v51 = vadd.f32 %v2596_v55, %v2358_v6  ;;  %v2971_v6 = vld [vmem:[%s24013_s5 + $0x30] sm:$0xff]  ;;  %v16923_v55 = vpack.c.bf16 %v2974_v32, %v2973_v59 }
 0x743   :  { %v18384_v8 = vpop.eup %18383  ;;  %v16919_v56 = vpack.c.bf16 %v2972_v36, %v2971_v6 }
 0x744   :  { %18395 = vtanh.f32 %v2600_v51  ;;  %v2597_v61 = vmul.f32 %v18384_v8, %v2531_v41  ;;  %v18386_v1 = vpop.eup %18385  ;;  %v2975_v51 = vld [vmem:[%s24013_s5 + $0x50] sm:$0xff]  ;;  %v2976_v41 = vld [vmem:[%s24013_s5 + $0x58] sm:$0xff] }
 0x745   :  { %18397 = vrcp.f32 %v2586_v7  ;;  %v2607_v37 = vsub.f32 1.0, %v18386_v1  ;;  %v2615_v48 = vmul.f32 %v18386_v1, %v20269_v42  ;;  %v16927_v8 = vpack.c.bf16 %v2976_v41, %v2975_v51  ;;  %v2977_v7 = vld [vmem:[%s24013_s5 + $0x60] sm:$0xff]  ;;  %v2980_v1 = vld [vmem:[%s24013_s5 + $0x78] sm:$0xff] }
 0x746   :  { %v2601_v19 = vadd.f32 %v2597_v61, %v2361_v13  ;;  %v2979_v13 = vld [vmem:[%s24013_s5 + $0x70] sm:$0xff]  ;;  %v16931_v61 = vpack.c.bf16 %v2978_v9, %v2977_v7 }
 0x747   :  { %v18388_v26 = vpop.eup %18387 }
 0x748   :  { %v2598_v34 = vmul.f32 %v18388_v26, %v2536_v10  ;;  %18399 = vtanh.f32 %v2601_v19  ;;  %v18390_v15 = vpop.eup %18389  ;;  %v16935_v10 = vpack.c.bf16 %v2980_v1, %v2979_v13  ;;  %v20490_v19 = vpop.permute.xlu0 %2656 }
 0x749   :  { %v2608_v21 = vsub.f32 1.0, %v18390_v15  ;;  %v2616_v27 = vmul.f32 %v18390_v15, %v20276_v28  ;;  %v20492_v26 = vpop.permute.xlu1 %2625  ;;  %v2671_v15 = vmul.f32 %v20490_v19, %v24229_v14 }
 0x74a   :  { %v18392_v38 = vpop.eup %18391  ;;  %v2602_v43 = vadd.f32 %v2598_v34, %v2364_v5 }
 0x74b   :  { %v2611_v47 = vmul.f32 %v18392_v38, %v2607_v37  ;;  %v18394_v49 = vpop.eup %18393  ;;  %v2643_v37 = vmul.f32 %v20492_v26, %v24230_v40 }
 0x74c   :  { %18401 = vtanh.f32 %v2602_v43  ;;  %v2609_v52 = vsub.f32 1.0, %v18394_v49  ;;  %v2617_v44 = vmul.f32 %v18394_v49, %v20284_v11  ;;  %v2965_v11 = vld [vmem:[%s24013_s5] sm:$0xff]  ;;  %v20494_v5 = vpop.permute.xlu0 %2660 }
 0x74d   :  { %v20420_v57 = vadd.f32 %v2615_v48, %v2611_v47  ;;  %v16907_v12 = vpack.c.bf16 %v2966_v23, %v2965_v11  ;;  %v20496_v34 = vpop.permute.xlu1 %2630  ;;  %v2672_v47 = vmul.f32 %v20490_v19, %v24219_v39  ;;  %v2644_v48 = vmul.f32 %v20492_v26, %v24183_v0 }
 0x74e   :  { %v18396_v33 = vpop.eup %18395  ;;  %v2683_v49 = vadd.f32 %v2671_v15, %v2643_v37 }
 0x74f   :  { %2772 = vmatmul.mubr.f32.vlgmr.msra.gmra.mrb[56].mxu0 %v20420_v57  ;;  %15005 = vmatprep.mubr.f32.mxu1 %v20420_v57  ;;  %v2612_v31 = vmul.f32 %v18396_v33, %v2608_v21  ;;  %v18398_v63 = vpop.eup %18397  ;;  %v2674_v21 = vmul.f32 %v20494_v5, %v24229_v14  ;;  %v2646_v33 = vmul.f32 %v20496_v34, %v24230_v40 }
 0x750   :  { %2777 = vmatprep.mubr.f32.mxu0 %v24160_v2  ;;  %v2610_v4 = vsub.f32 1.0, %v18398_v63  ;;  %v2618_v35 = vmul.f32 %v18398_v63, %v20294_v18  ;;  %16908 = vmatprep.subr.bf16.mxu0 %v16907_v12  ;;  %v2968_v18 = vld [vmem:[%s24013_s5 + $0x18] sm:$0xff]  ;;  %v20502_v38 = vpop.permute.xlu0 %2664 }
 0x751   :  { %v20426_v53 = vadd.f32 %v2616_v27, %v2612_v31  ;;  %16910 = vmatpush3.bf16.msra.mxu0 %v16907_v12  ;;  %v20504_v43 = vpop.permute.xlu1 %2635  ;;  %v2675_v31 = vmul.f32 %v20494_v5, %v24219_v39  ;;  %v2647_v27 = vmul.f32 %v20496_v34, %v24183_v0  ;;  %v2686_v11 = vadd.f32 %v2674_v21, %v2646_v33 }
 0x752   :  { %v18400_v42 = vpop.eup %18399 }
 0x753   :  { %2778 = vmatmul.mubr.f32.gmra.mrb[58].mxu0 %v20426_v53  ;;  %15006 = vmatmul.mubr.f32.vlgmr.msra.gmra.mrb[28].mxu1 %v20426_v53  ;;  %v2613_v62 = vmul.f32 %v18400_v42, %v2609_v52  ;;  %v2695_v52 = vadd.f32 %v2683_v49, %v19406_v45  ;;  %v2687_v12 = vadd.f32 %v2675_v31, %v2647_v27 }
 0x754   :  { %2783 = vmatprep.mubr.f32.mxu0 %v24160_v2  ;;  %v20518_v63 = vpop.permute.xlu0 %2668  ;;  %v2698_v59 = vadd.f32 %v2686_v11, %v19406_v45 }
 0x755   :  { %v20432_v3 = vadd.f32 %v2617_v44, %v2613_v62  ;;  %v2684_v62 = vadd.f32 %v2672_v47, %v2644_v48  ;;  %v2677_v44 = vmul.f32 %v20502_v38, %v24229_v14  ;;  %v2680_v58 = vmul.f32 %v20518_v63, %v24229_v14 }
 0x756   :  { %v18402_v28 = vpop.eup %18401  ;;  %v2681_v14 = vmul.f32 %v20518_v63, %v24219_v39 }
 0x757   :  { %2784 = vmatmul.mubr.f32.gmra.mrb[60].mxu0 %v20432_v3  ;;  %15008 = vmatprep.mubr.f32.mxu1 %v20432_v3  ;;  %v2614_v16 = vmul.f32 %v18402_v28, %v2610_v4  ;;  %v2649_v4 = vmul.f32 %v20504_v43, %v24230_v40  ;;  %v20525_v28 = vpop.permute.xlu1 %2640 }
 0x758   :  { %2789 = vmatprep.mubr.f32.mxu0 %v24160_v2  ;;  %v2967_v2 = vld [vmem:[%s24013_s5 + $0x10] sm:$0xff]  ;;  %v2652_v25 = vmul.f32 %v20525_v28, %v24230_v40  ;;  %v2699_v40 = vadd.f32 %v2687_v12, %v19424_v54  ;;  %v2653_v9 = vmul.f32 %v20525_v28, %v24183_v0 }
 0x759   :  { %v20438_v30 = vadd.f32 %v2618_v35, %v2614_v16  ;;  %v16911_v20 = vpack.c.bf16 %v2968_v18, %v2967_v2  ;;  %v2678_v2 = vmul.f32 %v20502_v38, %v24219_v39  ;;  %v2650_v18 = vmul.f32 %v20504_v43, %v24183_v0 }
 0x75a   :  { %v2689_v41 = vadd.f32 %v2677_v44, %v2649_v4  ;;  %v2693_v0 = vadd.f32 %v2681_v14, %v2653_v9 }
 0x75b   :  { %2790 = vmatmul.mubr.f32.gmra.mrb[62].mxu0 %v20438_v30  ;;  %15009 = vmatmul.mubr.f32.gmra.mrb[30].mxu1 %v20438_v30 }
 0x75c   :  { %16912 = vmatprep.subr.bf16.mxu0 %v16911_v20  ;;  %v2701_v47 = vadd.f32 %v2689_v41, %v19406_v45 }
 0x75d   :  { %16914 = vmatpush3.bf16.msra.mxu0 %v16911_v20 }
 0x75e   :  { %16916 = vmatprep.subr.bf16.mxu0 %v16915_v22 }
 0x761   :  { %16918 = vmatpush3.bf16.msra.mxu0 %v16915_v22  ;;  %v2696_v22 = vadd.f32 %v2684_v62, %v19424_v54 }
 0x762   :  { %16920 = vmatprep.subr.bf16.mxu0 %v16919_v56 }
 0x765   :  { %16922 = vmatpush3.bf16.msra.mxu0 %v16919_v56 }
 0x766   :  { %16924 = vmatprep.subr.bf16.mxu0 %v16923_v55 }
 0x769   :  { %16926 = vmatpush3.bf16.msra.mxu0 %v16923_v55 }
 0x76a   :  { %16928 = vmatprep.subr.bf16.mxu0 %v16927_v8 }
 0x76d   :  { %16930 = vmatpush3.bf16.msra.mxu0 %v16927_v8 }
 0x76e   :  { %16932 = vmatprep.subr.bf16.mxu0 %v16931_v61 }
 0x771   :  { %16934 = vmatpush3.bf16.msra.mxu0 %v16931_v61  ;;  %v2690_v61 = vadd.f32 %v2678_v2, %v2650_v18  ;;  %v2705_v2 = vadd.f32 %v2693_v0, %v19424_v54 }
 0x772   :  { %16936 = vmatprep.subr.bf16.mxu0 %v16935_v10 }
 0x773   :  { %v2702_v31 = vadd.f32 %v2690_v61, %v19424_v54 }
 0x775   :  { %16938 = vmatpush3.bf16.msra.mxu0 %v16935_v10  ;;  %v2692_v10 = vadd.f32 %v2680_v58, %v2652_v25 }
 0x777   :  { %v2704_v27 = vadd.f32 %v2692_v10, %v19406_v45 }
 0x822   :  { %v2773_v42 = vpop.f32.mrb[56].mxu0 }
 0x823   :  { %v2774_v16 = vadd.f32 %v2773_v42, %v19410_v46  ;;  %v2775_v35 = vpop.f32.mrb[57].mxu0 }
 0x824   :  { %v2776_v23 = vadd.f32 %v2775_v35, %v19416_v50 }
 0x825   :  { %v2881_v20 = vadd.f32 %v2774_v16, %v2695_v52 }
 0x826   :  { %v2779_v6 = vpop.f32.mrb[58].mxu0  ;;  %v20538_v36 = vpop.f32.mrb[28].mxu1  ;;  %v2909_v8 = vadd.f32 %v2776_v23, %v2696_v22 }
 0x827   :  { %v13255_v56 = vmul.f32 -1.442695, %v2881_v20  ;;  %v2780_v32 = vadd.f32 %v2779_v6, %v19410_v46  ;;  %v2781_v55 = vpop.f32.mrb[59].mxu0  ;;  %v20542_v51 = vpop.f32.mrb[29].mxu1 }
 0x828   :  { %v2782_v7 = vadd.f32 %v2781_v55, %v19416_v50  ;;  %v13259_v49 = vmul.f32 -1.442695, %v2909_v8  ;;  %v2648_v55 = vmul.f32 %v20496_v34, %v19469_v60 }
 0x829   :  { %18403 = vpow2.f32 %v13255_v56  ;;  %v2882_v13 = vadd.f32 %v2780_v32, %v2698_v59  ;;  %v2673_v56 = vmul.f32 %v20490_v19, %v19472_v29  ;;  %v2676_v32 = vmul.f32 %v20494_v5, %v19472_v29 }
 0x82a   :  { %v2785_v1 = vpop.f32.mrb[60].mxu0  ;;  %v2910_v37 = vadd.f32 %v2782_v7, %v2699_v40  ;;  %v2651_v5 = vmul.f32 %v20504_v43, %v19469_v60  ;;  %v2682_v43 = vmul.f32 %v20518_v63, %v19472_v29 }
 0x82b   :  { %v13256_v15 = vmul.f32 -1.442695, %v2882_v13  ;;  %v2786_v48 = vadd.f32 %v2785_v1, %v19410_v46  ;;  %v2787_v39 = vpop.f32.mrb[61].mxu0  ;;  %v2688_v19 = vadd.f32 %v2676_v32, %v2648_v55  ;;  %v2679_v13 = vmul.f32 %v20502_v38, %v19472_v29 }
 0x82c   :  { %v2788_v21 = vadd.f32 %v2787_v39, %v19416_v50  ;;  %v13260_v62 = vmul.f32 -1.442695, %v2910_v37  ;;  %v2868_v37 = vadd.f32 %v20538_v36, %v19480_v17 }
 0x82d   :  { %18405 = vpow2.f32 %v13256_v15  ;;  %v2883_v33 = vadd.f32 %v2786_v48, %v2701_v47  ;;  %v2691_v48 = vadd.f32 %v2679_v13, %v2651_v5  ;;  %v2700_v39 = vadd.f32 %v2688_v19, %v19488_v24  ;;  %v3161_v5 = vld [vmem:[%s24015_s8 + $0x10] sm:$0xff] }
 0x82e   :  { %v2791_v52 = vpop.f32.mrb[62].mxu0  ;;  %v20555_v42 = vpop.f32.mrb[30].mxu1  ;;  %v2911_v4 = vadd.f32 %v2788_v21, %v2702_v31  ;;  %18407 = vpow2.f32 %v13259_v49  ;;  %v2654_v21 = vmul.f32 %v20525_v28, %v19469_v60 }
 0x82f   :  { %v13257_v44 = vmul.f32 -1.442695, %v2883_v33  ;;  %v2792_v16 = vadd.f32 %v2791_v52, %v19410_v46  ;;  %v2793_v35 = vpop.f32.mrb[63].mxu0  ;;  %v2872_v11 = vpop.f32.mrb[31].mxu1  ;;  %v2878_v29 = vadd.f32 %v20555_v42, %v19480_v17 }
 0x830   :  { %v2794_v23 = vadd.f32 %v2793_v35, %v19416_v50  ;;  %v13261_v45 = vmul.f32 -1.442695, %v2911_v4  ;;  %v2645_v50 = vmul.f32 %v20492_v26, %v19469_v60  ;;  %v2863_v26 = vadd.f32 %v20542_v51, %v19480_v17 }
 0x831   :  { %18409 = vpow2.f32 %v13257_v44  ;;  %v2884_v12 = vadd.f32 %v2792_v16, %v2704_v27  ;;  %v2873_v0 = vadd.f32 %v2872_v11, %v19480_v17  ;;  %v2694_v52 = vadd.f32 %v2682_v43, %v2654_v21 }
 0x832   :  { %18411 = vpow2.f32 %v13260_v62  ;;  %v2912_v58 = vadd.f32 %v2794_v23, %v2705_v2  ;;  %v2685_v8 = vadd.f32 %v2673_v56, %v2645_v50  ;;  %v2703_v62 = vadd.f32 %v2691_v48, %v19488_v24  ;;  %v13263_v48 = vld [vmem:[%s24016_s6] ss:$0 sm:$0xff]  ;;  %s18862_s6 = smov 124  }
 0x833   :  { %v18404_v18 = vpop.eup %18403  ;;  %v13258_v20 = vmul.f32 -1.442695, %v2884_v12  ;;  %v2706_v60 = vadd.f32 %v2694_v52, %v19488_v24 }
 0x834   :  { %v2897_v25 = vadd.f32 1.0, %v18404_v18  ;;  %v13262_v46 = vmul.f32 -1.442695, %v2912_v58  ;;  %v2697_v10 = vadd.f32 %v2685_v8, %v19488_v24 }
 0x835   :  { %18413 = vpow2.f32 %v13258_v20 }
 0x836   :  { %18415 = vrcp.f32 %v2897_v25 }
 0x837   :  { %v18406_v22 = vpop.eup %18405  ;;  %18417 = vpow2.f32 %v13261_v45 }
 0x838   :  { %v2898_v6 = vadd.f32 1.0, %v18406_v22  ;;  %v18408_v59 = vpop.eup %18407 }
 0x839   :  { %v2925_v40 = vadd.f32 1.0, %v18408_v59 }
 0x83a   :  { %18419 = vrcp.f32 %v2898_v6 }
 0x83b   :  { %v18410_v54 = vpop.eup %18409  ;;  %18421 = vpow2.f32 %v13262_v46 }
 0x83c   :  { %v2899_v41 = vadd.f32 1.0, %v18410_v54  ;;  %v18412_v14 = vpop.eup %18411 }
 0x83d   :  { %v2926_v61 = vadd.f32 1.0, %v18412_v14 }
 0x83e   :  { %18423 = vrcp.f32 %v2899_v41 }
 0x83f   :  { %v18414_v7 = vpop.eup %18413  ;;  %18425 = vrcp.f32 %v2925_v40 }
 0x840   :  { %v18416_v9 = vpop.eup %18415  ;;  %v2900_v34 = vadd.f32 1.0, %v18414_v7 }
 0x841   :  { %v18418_v1 = vpop.eup %18417  ;;  %v2937_v15 = vmul.f32 %v18416_v9, %v2863_v26  ;;  %v3159_v26 = vld [vmem:[%s24015_s8] sm:$0xff]  ;;  %v3160_v9 = vld [vmem:[%s24015_s8 + $0x8] sm:$0xff] }
 0x842   :  { %18427 = vrcp.f32 %v2900_v34  ;;  %v2927_v38 = vadd.f32 1.0, %v18418_v1  ;;  %v16947_v13 = vpack.c.bf16 %v3160_v9, %v3159_v26  ;;  %v3163_v1 = vld [vmem:[%s24015_s8 + $0x20] sm:$0xff]  ;;  %v20765_v9 = vld [vmem:[%s24018_s11 + $0x38] sm:$0xff] }
 0x843   :  { %v2941_v47 = vadd.f32 %v2937_v15, %v2697_v10  ;;  %18429 = vrcp.f32 %v2926_v61  ;;  %v3162_v61 = vld [vmem:[%s24015_s8 + $0x18] sm:$0xff]  ;;  %v3164_v10 = vld [vmem:[%s24015_s8 + $0x28] sm:$0xff] }
 0x844   :  { %v18420_v51 = vpop.eup %18419  ;;  %v16951_v34 = vpack.c.bf16 %v3162_v61, %v3161_v5  ;;  %v16955_v15 = vpack.c.bf16 %v3164_v10, %v3163_v1  ;;  %v20779_v5 = vld [vmem:[%s24018_s11 + $0x48] sm:$0xff]  ;;  %v20784_v61 = vld [vmem:[%s24018_s11 + $0x50] sm:$0xff] }
 0x845   :  { %v18422_v49 = vpop.eup %18421  ;;  %v2938_v33 = vmul.f32 %v18420_v51, %v2868_v37  ;;  %18431 = vtanh.f32 %v2941_v47  ;;  %v3165_v37 = vld [vmem:[%s24015_s8 + $0x30] sm:$0xff]  ;;  %v3166_v47 = vld [vmem:[%s24015_s8 + $0x38] sm:$0xff] }
 0x846   :  { %18433 = vrcp.f32 %v2927_v38  ;;  %v2928_v27 = vadd.f32 1.0, %v18422_v49  ;;  %v16959_v51 = vpack.c.bf16 %v3166_v47, %v3165_v37 }
 0x847   :  { %v2942_v31 = vadd.f32 %v2938_v33, %v2700_v39 }
 0x848   :  { %v18424_v36 = vpop.eup %18423 }
 0x849   :  { %18435 = vtanh.f32 %v2942_v31  ;;  %v2939_v44 = vmul.f32 %v18424_v36, %v2873_v0  ;;  %v18426_v4 = vpop.eup %18425  ;;  %v13266_v31 = vld [vmem:[%s24017_s9] ss:$0 sm:$0xff] }
 0x84a   :  { %18437 = vrcp.f32 %v2928_v27  ;;  %v2949_v11 = vsub.f32 1.0, %v18426_v4  ;;  %v2957_v18 = vmul.f32 %v18426_v4, %v20420_v57  ;;  %v20636_v4 = vld [vmem:[%s24018_s11] sm:$0xff] }
 0x84b   :  { %v2943_v63 = vadd.f32 %v2939_v44, %v2703_v62 }
 0x84c   :  { %v18428_v16 = vpop.eup %18427 }
 0x84d   :  { %v2940_v28 = vmul.f32 %v18428_v16, %v2878_v29  ;;  %18439 = vtanh.f32 %v2943_v63  ;;  %v18430_v35 = vpop.eup %18429  ;;  %v3259_v29 = vld [vmem:[%s24019_s10 + $0x8] sm:$0xff]  ;;  %v3261_v63 = vld [vmem:[%s24019_s10 + $0x18] sm:$0xff]  ;;  %v3258_v16 = vld [vmem:[%s24019_s10] sm:$0xff] }
 0x84e   :  { %v2950_v58 = vsub.f32 1.0, %v18430_v35  ;;  %v2958_v42 = vmul.f32 %v18430_v35, %v20426_v53  ;;  %v3066_v53 = vld [vmem:[%s24014_s7] sm:$0xff] }
 0x84f   :  { %v18432_v23 = vpop.eup %18431  ;;  %v2944_v12 = vadd.f32 %v2940_v28, %v2706_v60  ;;  %15057 = vmatprep.mubr.msk.f32.mxu1 %vm3075_vm0, %v3066_v53  ;;  %v3260_v60 = vld [vmem:[%s24019_s10 + $0x10] sm:$0xff]  ;;  %v3263_v28 = vld [vmem:[%s24019_s10 + $0x28] sm:$0xff] }
 0x850   :  { %v2953_v2 = vmul.f32 %v18432_v23, %v2949_v11  ;;  %v18434_v45 = vpop.eup %18433 }
 0x851   :  { %18441 = vtanh.f32 %v2944_v12  ;;  %v2951_v46 = vsub.f32 1.0, %v18434_v45  ;;  %v2959_v50 = vmul.f32 %v18434_v45, %v20432_v3  ;;  %v3262_v12 = vld [vmem:[%s24019_s10 + $0x20] sm:$0xff] }
 0x852   :  { %v2961_v20 = vadd.f32 %v2957_v18, %v2953_v2 }
 0x853   :  { %v18436_v25 = vpop.eup %18435 }
 0x854   :  { %15043 = vmatprep.mubr.f32.mxu0 %v2961_v20  ;;  %v2954_v17 = vmul.f32 %v18436_v25, %v2950_v58  ;;  %v18438_v22 = vpop.eup %18437 }
 0x855   :  { %v2952_v54 = vsub.f32 1.0, %v18438_v22  ;;  %v2960_v55 = vmul.f32 %v18438_v22, %v20438_v30  ;;  %v3067_v30 = vld [vmem:[%s24014_s7 + $0x8] sm:$0xff] }
 0x856   :  { %v2962_v24 = vadd.f32 %v2958_v42, %v2954_v17 }
 0x857   :  { %v18440_v6 = vpop.eup %18439 }
 0x858   :  { %15044 = vmatmul.mubr.f32.vlgmr.msra.gmra.mrb[64].mxu0 %v2962_v24  ;;  %v2955_v56 = vmul.f32 %v18440_v6, %v2951_v46 }
 0x85a   :  { %v2963_v59 = vadd.f32 %v2959_v50, %v2955_v56 }
 0x85b   :  { %v18442_v57 = vpop.eup %18441 }
 0x85c   :  { %15046 = vmatprep.mubr.f32.mxu0 %v2963_v59  ;;  %v2956_v32 = vmul.f32 %v18442_v57, %v2952_v54  ;;  %v20679_v59 = vld [vmem:[%s24018_s11 + $0x8] sm:$0xff]  ;;  %v20684_v54 = vld [vmem:[%s24018_s11 + $0x10] sm:$0xff]  ;;  %v20693_v57 = vld [vmem:[%s24018_s11 + $0x18] sm:$0xff] }
 0x85e   :  { %v2964_v41 = vadd.f32 %v2960_v55, %v2956_v32  ;;  %v20698_v32 = vld [vmem:[%s24018_s11 + $0x20] sm:$0xff]  ;;  %v20707_v55 = vld [vmem:[%s24018_s11 + $0x28] sm:$0xff] }
 0x860   :  { %15047 = vmatmul.mubr.f32.gmra.mrb[66].mxu0 %v2964_v41  ;;  %v20716_v41 = vld [vmem:[%s24018_s11 + $0x30] sm:$0xff] }
 0x861   :  { %15154 = vmatprep.mubr.msk.f32.mxu0 %vm3322_vm2, %v20716_v41 }
 0x92b   :  { %v15045_v14 = vpop.f32.mrb[64].mxu0 }
 0x92c   :  { %v3047_v8 = vpop.f32.mrb[65].mxu0 }
 0x92d   :  { %v16939_v40 = vpack.c.bf16 %v15045_v14, %v3047_v8 }
 0x92f   :  { %16940 = vmatprep.subr.bf16.mxu1 %v16939_v40 }
 0x930   :  { %16942 = vmatpush3.bf16.msra.mxu1 %v16939_v40 }
 0x933   :  { %v15048_v3 = vpop.f32.mrb[66].mxu0 }
 0x934   :  { %v3057_v7 = vpop.f32.mrb[67].mxu0 }
 0x935   :  { %v16943_v19 = vpack.c.bf16 %v15048_v3, %v3057_v7 }
 0x937   :  { %16944 = vmatprep.subr.bf16.mxu1 %v16943_v19 }
 0x938   :  { %16946 = vmatpush3.bf16.msra.mxu1 %v16943_v19 }
 0x939   :  { %16948 = vmatprep.subr.bf16.mxu1 %v16947_v13 }
 0x93b   :  { %15058 = vmatmul.mubr.msk.f32.vlgmr.msra.gmra.mrb[32].mxu1 %vm3075_vm0, %v3067_v30 }
 0x93c   :  { %16950 = vmatpush3.bf16.msra.mxu1 %v16947_v13  ;;  %v20770_v13 = vld [vmem:[%s24018_s11 + $0x40] sm:$0xff] }
 0x93d   :  { %16952 = vmatprep.subr.bf16.mxu1 %v16951_v34 }
 0x940   :  { %16954 = vmatpush3.bf16.msra.mxu1 %v16951_v34  ;;  %v20793_v34 = vld [vmem:[%s24018_s11 + $0x58] sm:$0xff] }
 0x941   :  { %16956 = vmatprep.subr.bf16.mxu1 %v16955_v15 }
 0x944   :  { %16958 = vmatpush3.bf16.msra.mxu1 %v16955_v15 }
 0x945   :  { %16960 = vmatprep.subr.bf16.mxu1 %v16959_v51 }
 0x948   :  { %16962 = vmatpush3.bf16.msra.mxu1 %v16959_v51 }
 0xa0e   :  { %v15059_v39 = vpop.f32.mrb[32].mxu1 }
 0xa0f   :  { %v3154_v38 = vadd.f32 %v15059_v39, %v13263_v48  ;;  %v3148_v49 = vpop.f32.mrb[33].mxu1 }
 0xa10   :  { %v3149_v43 = vadd.f32 %v13263_v48, %v3148_v49 }
 0xa12   :  { %18443 = vtanh.f32 %v3149_v43 }
 0xa13   :  { %18445 = vtanh.f32 %v3154_v38 }
 0xa1c   :  { %v18444_v21 = vpop.eup %18443 }
 0xa1d   :  { %v18446_v33 = vpop.eup %18445  ;;  %15076 = vmatprep.mubr.msk.f32.mxu1 %vm3174_vm1, %v18444_v21 }
 0xa1e   :  { %15077 = vmatmul.mubr.msk.f32.vlgmr.msra.gmra.mrb[34].mxu1 %vm3174_vm1, %v18446_v33 }
 0xa1f   :  { %15091 = vmatprep.mubr.msk.f32.mxu1 %vm3322_vm2, %v20636_v4 }
 0xaf1   :  { %v15078_v0 = vpop.f32.mrb[34].mxu1 }
 0xaf2   :  { %v3253_v36 = vadd.f32 %v15078_v0, %v13266_v31  ;;  %v3247_v27 = vpop.f32.mrb[35].mxu1 }
 0xaf3   :  { %v3248_v52 = vadd.f32 %v13266_v31, %v3247_v27 }
 0xaf4   :  { %v3257_v62 = vand.u32 2147483647, %v3253_v36 }
 0xaf5   :  { %v3256_v44 = vand.u32 2147483647, %v3248_v52 }
 0xaf6   :  { %3268 = vrot.lane.b32.xlu0 %v3257_v62, %s18862_s6 }
 0xaf7   :  { %3266 = vrot.lane.b32.xlu1 %v3256_v44, %s18862_s6 }
 0xb68   :  { %v3269_v35 = vpop.permute.xlu0 %3268 }
 0xb69   :  { %v3273_v11 = vmul.f32 %v3269_v35, %v3259_v29  ;;  %v3275_v23 = vmul.f32 %v3269_v35, %v3261_v63  ;;  %v3267_v2 = vpop.permute.xlu1 %3266  ;;  %v3277_v20 = vmul.f32 %v3269_v35, %v3263_v28 }
 0xb6a   :  { %v3272_v18 = vmul.f32 %v3267_v2, %v3258_v16  ;;  %v3274_v45 = vmul.f32 %v3267_v2, %v3260_v60  ;;  %v3276_v17 = vmul.f32 %v3267_v2, %v3262_v12  ;;  %v3298_v12 = vld [vmem:[%s24020_s12 + $0x8] sm:$0xff] }
 0xb6b   :  { %v20658_v58 = vadd.f32 %v3273_v11, %v3253_v36  ;;  %v20660_v25 = vadd.f32 %v3275_v23, %v3253_v36  ;;  %v20668_v46 = vadd.f32 %v3277_v20, %v3253_v36  ;;  %v3297_v23 = vld [vmem:[%s24020_s12] sm:$0xff] }
 0xb6c   :  { %v20662_v42 = vadd.f32 %v3272_v18, %v3248_v52  ;;  %v20664_v22 = vadd.f32 %v3274_v45, %v3248_v52  ;;  %v20670_v6 = vadd.f32 %v3276_v17, %v3248_v52  ;;  %v20833_v2 = vpack.c.bf16 %v3298_v12, %v3297_v23  ;;  %v20840_v18 = vld [vmem:[%s24020_s12 + $0x10] sm:$0xf] }
 0xb6d   :  { %24231 = vst [vmem:[#allocation14_spill] sm:$0xff] %v20658_v58  ;;  %24232 = vst [vmem:[#allocation2_spill] sm:$0xff] %v20660_v25 }
 0xb6e   :  { %24233 = vst [vmem:[#allocation15_spill] sm:$0xff] %v20662_v42  ;;  %24234 = vst [vmem:[#allocation7_spill] sm:$0xff] %v20664_v22  ;;  %v16963_v24 = vpack.c.bf16 %v20658_v58, %v20662_v42  ;;  %v16967_v56 = vpack.c.bf16 %v20660_v25, %v20664_v22  ;;  %v16971_v50 = vpack.c.bf16 %v20668_v46, %v20670_v6 }
 0xb6f   :  { %24235 = vst [vmem:[#allocation3_spill] sm:$0xff] %v20668_v46  ;;  %24236 = vst [vmem:[#allocation4_spill] sm:$0xff] %v20670_v6 }
 0xb70   :  { %16964 = vmatprep.subr.bf16.mxu1 %v16963_v24 }
 0xb71   :  { %16966 = vmatpush3.bf16.msra.mxu1 %v16963_v24 }
 0xb72   :  { %16968 = vmatprep.subr.bf16.mxu1 %v16967_v56 }
 0xb75   :  { %16970 = vmatpush3.bf16.msra.mxu1 %v16967_v56 }
 0xb76   :  { %16972 = vmatprep.subr.bf16.mxu1 %v16971_v50 }
 0xb79   :  { %16974 = vmatpush3.bf16.msra.mxu1 %v16971_v50 }
 0xb7c   :  { %15092 = vmatmul.mubr.msk.f32.vlgmr.msra.gmra.mrb[36].mxu1 %vm3322_vm2, %v20679_v59 }
 0xb7d   :  { %15094 = vmatprep.mubr.msk.f32.mxu1 %vm3322_vm2, %v20684_v54 }
 0xb80   :  { %15095 = vmatmul.mubr.msk.f32.gmra.mrb[38].mxu1 %vm3322_vm2, %v20693_v57 }
 0xb81   :  { %15097 = vmatprep.mubr.msk.f32.mxu1 %vm3322_vm2, %v20698_v32 }
 0xb84   :  { %15098 = vmatmul.mubr.msk.f32.gmra.mrb[40].mxu1 %vm3322_vm2, %v20707_v55 }
 0xb85   :  { %15112 = vmatprep.mubr.msk.f32.mxu1 %vm3322_vm2, %v20636_v4 }
 0xc4f   :  { %v20720_v53 = vpop.f32.mrb[36].mxu1 }
 0xc50   :  { %3771 = vrot.lane.b32.xlu0 %v20720_v53, %s18863_s1  ;;  %v20724_v14 = vpop.f32.mrb[37].mxu1 }
 0xc51   :  { %v16975_v8 = vpack.c.bf16 %v20720_v53, %v20724_v14  ;;  %3769 = vrot.lane.b32.xlu1 %v20724_v14, %s18863_s1 }
 0xc53   :  { %v20730_v40 = vpop.f32.mrb[38].mxu1  ;;  %16976 = vmatprep.subr.bf16.mxu1 %v16975_v8 }
 0xc54   :  { %16978 = vmatpush3.bf16.msra.mxu1 %v16975_v8  ;;  %3775 = vrot.lane.b32.xlu0 %v20730_v40, %s18863_s1  ;;  %v20734_v3 = vpop.f32.mrb[39].mxu1 }
 0xc55   :  { %v16979_v7 = vpack.c.bf16 %v20730_v40, %v20734_v3 }
 0xc57   :  { %v20738_v19 = vpop.f32.mrb[40].mxu1  ;;  %16980 = vmatprep.subr.bf16.mxu1 %v16979_v7 }
 0xc58   :  { %3773 = vrot.lane.b32.xlu0 %v20734_v3, %s18863_s1  ;;  %v20742_v30 = vpop.f32.mrb[41].mxu1  ;;  %16982 = vmatpush3.bf16.msra.mxu1 %v16979_v7 }
 0xc59   :  { %v16983_v26 = vpack.c.bf16 %v20738_v19, %v20742_v30 }
 0xc5b   :  { %16984 = vmatprep.subr.bf16.mxu1 %v16983_v26 }
 0xc5c   :  { %3779 = vrot.lane.b32.xlu0 %v20738_v19, %s18863_s1  ;;  %16986 = vmatpush3.bf16.msra.mxu1 %v16983_v26 }
 0xc5d   :  { %16988 = vmatprep.subr.bf16.mxu1 %v16975_v8 }
 0xc5f   :  { %15113 = vmatmul.mubr.msk.f32.vlgmr.msra.gmra.mrb[42].mxu1 %vm3322_vm2, %v20679_v59 }
 0xc60   :  { %3777 = vrot.lane.b32.xlu0 %v20742_v30, %s18863_s1  ;;  %16990 = vmatpush3.bf16.msra.mxu1 %v16975_v8 }
 0xc61   :  { %16992 = vmatprep.subr.bf16.mxu1 %v16979_v7  ;;  %15115 = vmatprep.mubr.msk.f32.mxu1 %vm3322_vm2, %v20684_v54 }
 0xc63   :  { %15116 = vmatmul.mubr.msk.f32.gmra.mrb[44].mxu1 %vm3322_vm2, %v20693_v57 }
 0xc64   :  { %16994 = vmatpush3.bf16.msra.mxu1 %v16979_v7  ;;  %15118 = vmatprep.mubr.msk.f32.mxu1 %vm3322_vm2, %v20698_v32 }
 0xc65   :  { %16996 = vmatprep.subr.bf16.mxu1 %v16983_v26 }
 0xc67   :  { %15119 = vmatmul.mubr.msk.f32.gmra.mrb[46].mxu1 %vm3322_vm2, %v20707_v55 }
 0xc68   :  { %16998 = vmatpush3.bf16.msra.mxu1 %v16983_v26  ;;  %15133 = vmatprep.mubr.msk.f32.mxu1 %vm3322_vm2, %v20716_v41 }
 0xc69   :  { %17012 = vmatprep.subr.bf16.mxu1 %v20833_v2 }
 0xc6b   :  { %15134 = vmatmul.mubr.msk.f32.vlgmr.msra.gmra.mrb[48].mxu1 %vm3322_vm2, %v20765_v9 }
 0xc6c   :  { %15136 = vmatprep.mubr.msk.f32.mxu1 %vm3322_vm2, %v20770_v13  ;;  %17014 = vmatpush3.bf16.msra.mxu1 %v20833_v2 }
 0xc6d   :  { %15167 = vmatprep.subr.msk.mxu1 %vm3912_vm3, %v20840_v18 }
 0xc6f   :  { %15137 = vmatmul.mubr.msk.f32.gmra.mrb[50].mxu1 %vm3322_vm2, %v20779_v5 }
 0xc70   :  { %15139 = vmatprep.mubr.msk.f32.mxu1 %vm3322_vm2, %v20784_v61  ;;  %15168 = vmatpush3.msk.msra.mxu1 %vm3912_vm3, %v20840_v18 }
 0xc73   :  { %15140 = vmatmul.mubr.msk.f32.gmra.mrb[52].mxu1 %vm3322_vm2, %v20793_v34 }
 0xd32   :  { %v15114_v1 = vpop.f32.mrb[42].mxu1 }
 0xd33   :  { %v3532_v10 = vmul.f32 2.0, %v15114_v1  ;;  %v3502_v15 = vpop.f32.mrb[43].mxu1 }
 0xd34   :  { %v3531_v37 = vmul.f32 2.0, %v3502_v15 }
 0xd35   :  { %v3538_v47 = vsub.f32 %v3532_v10, %v20658_v58 }
 0xd36   :  { %v3537_v51 = vsub.f32 %v3531_v37, %v20662_v42  ;;  %v15117_v48 = vpop.f32.mrb[44].mxu1 }
 0xd37   :  { %v3534_v39 = vmul.f32 2.0, %v15117_v48  ;;  %3795 = vrot.lane.b32.xlu0 %v3538_v47, %s18864_s29  ;;  %v3512_v38 = vpop.f32.mrb[45].mxu1 }
 0xd38   :  { %v3533_v49 = vmul.f32 2.0, %v3512_v38  ;;  %3793 = vrot.lane.b32.xlu1 %v3537_v51, %s18864_s29 }
 0xd39   :  { %v3540_v43 = vsub.f32 %v3534_v39, %v20660_v25  ;;  %v3770_v39 = vpop.permute.xlu1 %3769 }
 0xd3a   :  { %v3539_v21 = vsub.f32 %v3533_v49, %v20664_v22  ;;  %v15120_v33 = vpop.f32.mrb[46].mxu1 }
 0xd3b   :  { %3799 = vrot.lane.b32.xlu0 %v3540_v43, %s18864_s29  ;;  %v3522_v31 = vpop.f32.mrb[47].mxu1  ;;  %v3536_v0 = vmul.f32 2.0, %v15120_v33 }
 0xd3c   :  { %3797 = vrot.lane.b32.xlu1 %v3539_v21, %s18864_s29  ;;  %v3535_v36 = vmul.f32 2.0, %v3522_v31 }
 0xd3d   :  { %v3542_v44 = vsub.f32 %v3536_v0, %v20668_v46 }
 0xd3e   :  { %v15135_v27 = vpop.f32.mrb[48].mxu1  ;;  %v3541_v29 = vsub.f32 %v3535_v36, %v20670_v6 }
 0xd3f   :  { %3819 = vrot.lane.b32.xlu0 %v15135_v27, %s18865_s0  ;;  %v3627_v52 = vpop.f32.mrb[49].mxu1 }
 0xd40   :  { %v16999_v62 = vpack.c.bf16 %v15135_v27, %v3627_v52  ;;  %3817 = vrot.lane.b32.xlu1 %v3627_v52, %s18865_s0 }
 0xd42   :  { %v15138_v63 = vpop.f32.mrb[50].mxu1  ;;  %17000 = vmatprep.subr.bf16.mxu0 %v16999_v62 }
 0xd43   :  { %3803 = vrot.lane.b32.xlu0 %v3542_v44, %s18864_s29  ;;  %v3637_v16 = vpop.f32.mrb[51].mxu1  ;;  %17002 = vmatpush3.bf16.msra.mxu0 %v16999_v62 }
 0xd44   :  { %v17003_v60 = vpack.c.bf16 %v15138_v63, %v3637_v16  ;;  %3801 = vrot.lane.b32.xlu1 %v3541_v29, %s18864_s29  ;;  %v3860_v29 = vsel %vm3859_vm4, %v20662_v42, %v3770_v39 }
 0xd46   :  { %v15141_v28 = vpop.f32.mrb[52].mxu1  ;;  %17004 = vmatprep.subr.bf16.mxu0 %v17003_v60 }
 0xd47   :  { %3823 = vrot.lane.b32.xlu0 %v15138_v63, %s18865_s0  ;;  %v3647_v35 = vpop.f32.mrb[53].mxu1  ;;  %17006 = vmatpush3.bf16.msra.mxu0 %v17003_v60 }
 0xd48   :  { %v17007_v11 = vpack.c.bf16 %v15141_v28, %v3647_v35  ;;  %3821 = vrot.lane.b32.xlu1 %v3637_v16, %s18865_s0 }
 0xd4a   :  { %17008 = vmatprep.subr.bf16.mxu0 %v17007_v11 }
 0xd4b   :  { %3827 = vrot.lane.b32.xlu0 %v15141_v28, %s18865_s0  ;;  %17010 = vmatpush3.bf16.msra.mxu0 %v17007_v11 }
 0xd4c   :  { %3825 = vrot.lane.b32.xlu1 %v3647_v35, %s18865_s0 }
 0xd4e   :  { %15155 = vmatmul.mubr.msk.f32.vlgmr.msra.gmra.mrb[68].mxu0 %vm3322_vm2, %v20765_v9 }
 0xd4f   :  { %15157 = vmatprep.mubr.msk.f32.mxu0 %vm3322_vm2, %v20770_v13 }
 0xd52   :  { %15158 = vmatmul.mubr.msk.f32.gmra.mrb[70].mxu0 %vm3322_vm2, %v20779_v5 }
 0xd53   :  { %15160 = vmatprep.mubr.msk.f32.mxu0 %vm3322_vm2, %v20784_v61 }
 0xd56   :  { %15161 = vmatmul.mubr.msk.f32.gmra.mrb[72].mxu0 %vm3322_vm2, %v20793_v34 }
 0xd57   :  { %15190 = vmatprep.mubr.msk.f32.mxu0 %vm3322_vm2, %v20636_v4 }
 0xdaa   :  { %v3794_v49 = vpop.permute.xlu1 %3793 }
 0xdab   :  { %v3867_v16 = vsel %vm3866_vm5, %v3860_v29, %v3794_v49  ;;  %v13299_v49 = vld [vmem:[%s24021_s13] ss:$0 sm:$0xff] }
 0xdae   :  { %v3798_v21 = vpop.permute.xlu1 %3797 }
 0xdb2   :  { %v3818_v31 = vpop.permute.xlu1 %3817 }
 0xdb3   :  { %v3874_v28 = vsel %vm3873_vm6, %v3867_v16, %v3818_v31 }
 0xdb6   :  { %v3802_v0 = vpop.permute.xlu1 %3801 }
 0xdba   :  { %v3822_v36 = vpop.permute.xlu1 %3821 }
 0xdbe   :  { %v3826_v52 = vpop.permute.xlu1 %3825 }
 0xe21   :  { %v15156_v45 = vpop.f32.mrb[68].mxu0 }
 0xe22   :  { %v3752_v20 = vmul.f32 2.0, %v15156_v45  ;;  %v3722_v17 = vpop.f32.mrb[69].mxu0 }
 0xe23   :  { %v3751_v24 = vmul.f32 2.0, %v3722_v17 }
 0xe24   :  { %v3758_v56 = vsub.f32 %v3752_v20, %v20720_v53 }
 0xe25   :  { %v3757_v50 = vsub.f32 %v3751_v24, %v20724_v14  ;;  %v15159_v8 = vpop.f32.mrb[70].mxu0 }
 0xe26   :  { %v3754_v7 = vmul.f32 2.0, %v15159_v8  ;;  %v3732_v26 = vpop.f32.mrb[71].mxu0  ;;  %3843 = vrot.lane.b32.xlu1 %v3758_v56, %s18866_s21 }
 0xe27   :  { %v3753_v1 = vmul.f32 2.0, %v3732_v26 }
 0xe28   :  { %v3760_v10 = vsub.f32 %v3754_v7, %v20730_v40  ;;  %v3772_v40 = vpop.permute.xlu0 %3771 }
 0xe29   :  { %v3759_v15 = vsub.f32 %v3753_v1, %v20734_v3  ;;  %v15162_v37 = vpop.f32.mrb[72].mxu0  ;;  %v3861_v63 = vsel %vm3859_vm4, %v20658_v58, %v3772_v40 }
 0xe2a   :  { %v3756_v47 = vmul.f32 2.0, %v15162_v37  ;;  %v3742_v51 = vpop.f32.mrb[73].mxu0  ;;  %3841 = vrot.lane.b32.xlu1 %v3757_v50, %s18866_s21 }
 0xe2b   :  { %v3755_v48 = vmul.f32 2.0, %v3742_v51 }
 0xe2c   :  { %v3762_v53 = vsub.f32 %v3756_v47, %v20738_v19  ;;  %v3776_v3 = vpop.permute.xlu0 %3775 }
 0xe2d   :  { %v3761_v14 = vsub.f32 %v3755_v48, %v20742_v30  ;;  %v3863_v24 = vsel %vm3859_vm4, %v20660_v25, %v3776_v3 }
 0xe2e   :  { %3851 = vrot.lane.b32.xlu0 %v3762_v53, %s18866_s21  ;;  %3847 = vrot.lane.b32.xlu1 %v3760_v10, %s18866_s21 }
 0xe30   :  { %v3774_v38 = vpop.permute.xlu0 %3773 }
 0xe31   :  { %v3862_v17 = vsel %vm3859_vm4, %v20664_v22, %v3774_v38 }
 0xe32   :  { %3845 = vrot.lane.b32.xlu1 %v3759_v15, %s18866_s21  ;;  %v3869_v56 = vsel %vm3866_vm5, %v3862_v17, %v3798_v21 }
 0xe33   :  { %v3876_v7 = vsel %vm3873_vm6, %v3869_v56, %v3822_v36 }
 0xe34   :  { %v3780_v43 = vpop.permute.xlu0 %3779 }
 0xe35   :  { %v3865_v47 = vsel %vm3859_vm4, %v20668_v46, %v3780_v43 }
 0xe36   :  { %3849 = vrot.lane.b32.xlu1 %v3761_v14, %s18866_s21 }
 0xe38   :  { %v3778_v33 = vpop.permute.xlu0 %3777 }
 0xe39   :  { %v3864_v15 = vsel %vm3859_vm4, %v20670_v6, %v3778_v33 }
 0xe3a   :  { %v3871_v51 = vsel %vm3866_vm5, %v3864_v15, %v3802_v0 }
 0xe3b   :  { %v3878_v14 = vsel %vm3873_vm6, %v3871_v51, %v3826_v52 }
 0xe3c   :  { %v3796_v19 = vpop.permute.xlu0 %3795 }
 0xe3d   :  { %v3868_v60 = vsel %vm3866_vm5, %v3861_v63, %v3796_v19 }
 0xe40   :  { %v3800_v30 = vpop.permute.xlu0 %3799 }
 0xe41   :  { %v3870_v8 = vsel %vm3866_vm5, %v3863_v24, %v3800_v30 }
 0xe44   :  { %v3820_v27 = vpop.permute.xlu0 %3819 }
 0xe45   :  { %v3875_v11 = vsel %vm3873_vm6, %v3868_v60, %v3820_v27 }
 0xe48   :  { %v3804_v62 = vpop.permute.xlu0 %3803 }
 0xe49   :  { %v3872_v53 = vsel %vm3866_vm5, %v3865_v47, %v3804_v62 }
 0xe4c   :  { %v3824_v23 = vpop.permute.xlu0 %3823 }
 0xe4d   :  { %v3877_v1 = vsel %vm3873_vm6, %v3870_v8, %v3824_v23 }
 0xe50   :  { %v3828_v50 = vpop.permute.xlu0 %3827 }
 0xe51   :  { %v3879_v3 = vsel %vm3873_vm6, %v3872_v53, %v3828_v50 }
 0xe98   :  { %v3844_v44 = vpop.permute.xlu1 %3843 }
 0xe99   :  { %v3882_v45 = vsel %vm3880_vm7, %v3875_v11, %v3844_v44 }
 0xe9c   :  { %v3842_v35 = vpop.permute.xlu1 %3841 }
 0xe9d   :  { %v3881_v12 = vsel %vm3880_vm7, %v3874_v28, %v3842_v35 }
 0xe9e   :  { %15169 = vmatprep.mubr.msk.f32.mxu1 %vm3893_vm8, %v3881_v12 }
 0xe9f   :  { %15170 = vmatmul.mubr.msk.f32.vlgmr.msra.gmra.mrb[54].mxu1 %vm3893_vm8, %v3882_v45 }
 0xea0   :  { %v3848_v20 = vpop.permute.xlu1 %3847  ;;  %v3852_v48 = vpop.permute.xlu0 %3851 }
 0xea1   :  { %v3884_v37 = vsel %vm3880_vm7, %v3877_v1, %v3848_v20  ;;  %v3886_v38 = vsel %vm3880_vm7, %v3879_v3, %v3852_v48 }
 0xea4   :  { %v3846_v26 = vpop.permute.xlu1 %3845 }
 0xea5   :  { %v3883_v10 = vsel %vm3880_vm7, %v3876_v7, %v3846_v26 }
 0xea6   :  { %15172 = vmatprep.mubr.msk.f32.mxu1 %vm3893_vm8, %v3883_v10 }
 0xea7   :  { %15173 = vmatmul.mubr.msk.f32.gmra.mrb[56].mxu1 %vm3893_vm8, %v3884_v37 }
 0xea8   :  { %v3850_v40 = vpop.permute.xlu1 %3849 }
 0xea9   :  { %v3885_v39 = vsel %vm3880_vm7, %v3878_v14, %v3850_v40 }
 0xeaa   :  { %15175 = vmatprep.mubr.msk.f32.mxu1 %vm3893_vm8, %v3885_v39 }
 0xeab   :  { %15176 = vmatmul.mubr.msk.f32.gmra.mrb[58].mxu1 %vm3893_vm8, %v3886_v38 }
 0xeac   :  { %15211 = vmatprep.mubr.msk.f32.mxu1 %vm3322_vm2, %v20636_v4 }
 0xf72   :  { %v15171_v43 = vpop.f32.mrb[54].mxu1 }
 0xf73   :  { %v20899_v21 = vadd.f32 %v15171_v43, %v13299_v49  ;;  %v3982_v33 = vpop.f32.mrb[55].mxu1 }
 0xf74   :  { %v20901_v31 = vadd.f32 %v13299_v49, %v3982_v33 }
 0xf75   :  { %18447 = vtanh.f32 %v20899_v21 }
 0xf76   :  { %18449 = vtanh.f32 %v20901_v31 }
 0xf7a   :  { %v15174_v19 = vpop.f32.mrb[56].mxu1 }
 0xf7b   :  { %v20905_v0 = vadd.f32 %v15174_v19, %v13299_v49  ;;  %v3992_v30 = vpop.f32.mrb[57].mxu1 }
 0xf7c   :  { %v20907_v36 = vadd.f32 %v13299_v49, %v3992_v30 }
 0xf7d   :  { %18451 = vtanh.f32 %v20905_v0 }
 0xf7e   :  { %18453 = vtanh.f32 %v20907_v36  ;;  %v15177_v27 = vpop.f32.mrb[58].mxu1 }
 0xf7f   :  { %v18448_v52 = vpop.eup %18447  ;;  %v20911_v62 = vadd.f32 %v15177_v27, %v13299_v49  ;;  %v4002_v44 = vpop.f32.mrb[59].mxu1 }
 0xf80   :  { %v18450_v29 = vpop.eup %18449  ;;  %v20913_v63 = vadd.f32 %v13299_v49, %v4002_v44  ;;  %4061 = vrot.lane.b32.xlu0 %v18448_v52, %s18862_s6 }
 0xf81   :  { %18455 = vtanh.f32 %v20911_v62  ;;  %4059 = vrot.lane.b32.xlu1 %v18450_v29, %s18862_s6 }
 0xf82   :  { %18457 = vtanh.f32 %v20913_v63 }
 0xf87   :  { %v18452_v16 = vpop.eup %18451 }
 0xf88   :  { %v18454_v60 = vpop.eup %18453  ;;  %4065 = vrot.lane.b32.xlu0 %v18452_v16, %s18862_s6 }
 0xf89   :  { %4063 = vrot.lane.b32.xlu1 %v18454_v60, %s18862_s6 }
 0xf8b   :  { %v18456_v28 = vpop.eup %18455 }
 0xf8c   :  { %v18458_v35 = vpop.eup %18457  ;;  %4069 = vrot.lane.b32.xlu0 %v18456_v28, %s18862_s6 }
 0xf8d   :  { %4067 = vrot.lane.b32.xlu1 %v18458_v35, %s18862_s6 }
 0xff2   :  { %v20923_v11 = vpop.permute.xlu0 %4061 }
 0xff3   :  { %v20925_v23 = vpop.permute.xlu1 %4059 }
 0xff4   :  { %v17015_v12 = vpack.c.bf16 %v20923_v11, %v20925_v23 }
 0xff6   :  { %17016 = vmatprep.subr.bf16.mxu0 %v17015_v12 }
 0xff7   :  { %17018 = vmatpush3.bf16.msra.mxu0 %v17015_v12 }
 0xffa   :  { %v20929_v45 = vpop.permute.xlu0 %4065 }
 0xffb   :  { %v20931_v20 = vpop.permute.xlu1 %4063 }
 0xffc   :  { %v17019_v17 = vpack.c.bf16 %v20929_v45, %v20931_v20 }
 0xffe   :  { %v20935_v24 = vpop.permute.xlu0 %4069  ;;  %17020 = vmatprep.subr.bf16.mxu0 %v17019_v17 }
 0xfff   :  { %17022 = vmatpush3.bf16.msra.mxu0 %v17019_v17  ;;  %v20937_v56 = vpop.permute.xlu1 %4067 }
0x1000   :  { %v17023_v50 = vpack.c.bf16 %v20935_v24, %v20937_v56 }
0x1002   :  { %17024 = vmatprep.subr.bf16.mxu0 %v17023_v50 }
0x1003   :  { %17026 = vmatpush3.bf16.msra.mxu0 %v17023_v50 }
0x1006   :  { %15191 = vmatmul.mubr.msk.f32.vlgmr.msra.gmra.mrb[74].mxu0 %vm3322_vm2, %v20679_v59 }
0x1007   :  { %15193 = vmatprep.mubr.msk.f32.mxu0 %vm3322_vm2, %v20684_v54 }
0x100a   :  { %15194 = vmatmul.mubr.msk.f32.gmra.mrb[76].mxu0 %vm3322_vm2, %v20693_v57 }
0x100b   :  { %15196 = vmatprep.mubr.msk.f32.mxu0 %vm3322_vm2, %v20698_v32 }
0x100e   :  { %15197 = vmatmul.mubr.msk.f32.gmra.mrb[78].mxu0 %vm3322_vm2, %v20707_v55 }
0x100f   :  { %15232 = vmatprep.mubr.msk.f32.mxu0 %vm3322_vm2, %v20716_v41 }
0x10d9   :  { %v20953_v8 = vpop.f32.mrb[74].mxu0 }
0x10da   :  { %v20955_v7 = vpop.f32.mrb[75].mxu0 }
0x10db   :  { %v17913_v26 = vpack.i.bf16 %v20953_v8, %v20955_v7  ;;  %v17027_v1 = vpack.c.bf16 %v20953_v8, %v20955_v7 }
0x10dd   :  { %17914 = vrot.lane.b32.xlu1 %v17913_v26, %s18867_s23  ;;  %v20962_v10 = vpop.f32.mrb[76].mxu0  ;;  %17028 = vmatprep.subr.bf16.mxu1 %v17027_v1 }
0x10de   :  { %17040 = vmatprep.subr.bf16.mxu0 %v17027_v1  ;;  %v20964_v15 = vpop.f32.mrb[77].mxu0  ;;  %17030 = vmatpush3.bf16.msra.mxu1 %v17027_v1 }
0x10df   :  { %v17928_v37 = vpack.i.bf16 %v20962_v10, %v20964_v15  ;;  %v17031_v47 = vpack.c.bf16 %v20962_v10, %v20964_v15  ;;  %17042 = vmatpush3.bf16.msra.mxu0 %v17027_v1  ;;  %v24090_v1 = vmov 0.0|0.0  }
0x10e1   :  { %v20970_v51 = vpop.f32.mrb[78].mxu0  ;;  %17032 = vmatprep.subr.bf16.mxu1 %v17031_v47  ;;  %17044 = vmatprep.subr.bf16.mxu0 %v17031_v47 }
0x10e2   :  { %v20972_v48 = vpop.f32.mrb[79].mxu0  ;;  %17034 = vmatpush3.bf16.msra.mxu1 %v17031_v47 }
0x10e3   :  { %v17035_v53 = vpack.c.bf16 %v20970_v51, %v20972_v48  ;;  %17046 = vmatpush3.bf16.msra.mxu0 %v17031_v47  ;;  %v3301_v47 = vld [vmem:[%s24022_s14] sm:$0xff] }
0x10e5   :  { %17036 = vmatprep.subr.bf16.mxu1 %v17035_v53  ;;  %17048 = vmatprep.subr.bf16.mxu0 %v17035_v53 }
0x10e6   :  { %17038 = vmatpush3.bf16.msra.mxu1 %v17035_v53 }
0x10e7   :  { %17050 = vmatpush3.bf16.msra.mxu0 %v17035_v53  ;;  %v3302_v53 = vld [vmem:[%s24022_s14 + $0x8] sm:$0xff] }
0x10e8   :  { %17063 = vmatprep.subr.bf16.mxu0 %v24090_v1 }
0x10e9   :  { %15212 = vmatmul.mubr.msk.f32.vlgmr.msra.gmra.mrb[60].mxu1 %vm3322_vm2, %v20679_v59 }
0x10ea   :  { %15233 = vmatmul.mubr.msk.f32.vlgmr.msra.gmra.mrb[80].mxu0 %vm3322_vm2, %v20765_v9  ;;  %15214 = vmatprep.mubr.msk.f32.mxu1 %vm3322_vm2, %v20684_v54 }
0x10eb   :  { %15235 = vmatprep.mubr.msk.f32.mxu0 %vm3322_vm2, %v20770_v13 }
0x10ed   :  { %15215 = vmatmul.mubr.msk.f32.gmra.mrb[62].mxu1 %vm3322_vm2, %v20693_v57 }
0x10ee   :  { %15236 = vmatmul.mubr.msk.f32.gmra.mrb[82].mxu0 %vm3322_vm2, %v20779_v5  ;;  %15217 = vmatprep.mubr.msk.f32.mxu1 %vm3322_vm2, %v20698_v32 }
0x10ef   :  { %15238 = vmatprep.mubr.msk.f32.mxu0 %vm3322_vm2, %v20784_v61 }
0x10f1   :  { %15218 = vmatmul.mubr.msk.f32.gmra.mrb[64].mxu1 %vm3322_vm2, %v20707_v55 }
0x10f2   :  { %15239 = vmatmul.mubr.msk.f32.gmra.mrb[84].mxu0 %vm3322_vm2, %v20793_v34  ;;  %15253 = vmatprep.mubr.msk.f32.mxu1 %vm3322_vm2, %v20716_v41 }
0x11bc   :  { %v15213_v59 = vpop.f32.mrb[60].mxu1 }
0x11bd   :  { %v4268_v54 = vmul.f32 2.0, %v15213_v59  ;;  %v15234_v57 = vpop.f32.mrb[80].mxu0  ;;  %v4238_v14 = vpop.f32.mrb[61].mxu1  ;;  %v21019_v59 = vpack.c.bf16 %v3302_v53, %v3301_v47 }
0x11be   :  { %v4267_v40 = vmul.f32 2.0, %v4238_v14  ;;  %v4345_v3 = vpop.f32.mrb[81].mxu0 }
0x11bf   :  { %v4274_v32 = vsub.f32 %v4268_v54, %v20923_v11  ;;  %v17923_v39 = vpack.i.bf16 %v15234_v57, %v4345_v3  ;;  %v17051_v38 = vpack.c.bf16 %v15234_v57, %v4345_v3  ;;  %24237 = vst [vmem:[#allocation9_spill] sm:$0xff] %v21019_v59  ;;  %v3304_v54 = vld [vmem:[%s24022_s14 + $0x18] sm:$0xff]  ;;  %17065 = vmatpush1.bf16.msra.mxu0 %v21019_v59  ;;  %v3305_v3 = vld [vmem:[%s24022_s14 + $0x20] sm:$0xff] }
0x11c0   :  { %v4273_v49 = vsub.f32 %v4267_v40, %v20925_v23  ;;  %v15216_v43 = vpop.f32.mrb[62].mxu1  ;;  %17066 = vmatprep.subr.bf16.mxu0 %v24090_v1 }
0x11c1   :  { %17924 = vrot.lane.b32.xlu1 %v17923_v39, %s18868_s24  ;;  %v4270_v55 = vmul.f32 2.0, %v15216_v43  ;;  %v15237_v33 = vpop.f32.mrb[82].mxu0  ;;  %17052 = vmatprep.subr.bf16.mxu1 %v17051_v38  ;;  %v4248_v41 = vpop.f32.mrb[63].mxu1  ;;  %v3307_v39 = vld [vmem:[%s24022_s14 + $0x30] sm:$0xff]  ;;  %v3312_v43 = vld [vmem:[%s24022_s14 + $0x58] sm:$0xff] }
0x11c2   :  { %v4269_v19 = vmul.f32 2.0, %v4248_v41  ;;  %v4355_v30 = vpop.f32.mrb[83].mxu0  ;;  %17054 = vmatpush3.bf16.msra.mxu1 %v17051_v38  ;;  %v17918_v27 = vpack.i.bf16 %v4274_v32, %v4273_v49  ;;  %v3308_v38 = vld [vmem:[%s24022_s14 + $0x38] sm:$0xff]  ;;  %v3310_v49 = vld [vmem:[%s24022_s14 + $0x48] sm:$0xff] }
0x11c3   :  { %v4276_v52 = vsub.f32 %v4270_v55, %v20929_v45  ;;  %v17933_v44 = vpack.i.bf16 %v15237_v33, %v4355_v30  ;;  %v17055_v29 = vpack.c.bf16 %v15237_v33, %v4355_v30  ;;  %v3313_v33 = vld [vmem:[%s24022_s14 + $0x60] sm:$0xff]  ;;  %v3314_v41 = vld [vmem:[%s24022_s14 + $0x68] sm:$0xff]  ;;  %v3315_v30 = vld [vmem:[%s24022_s14 + $0x70] sm:$0xff] }
0x11c4   :  { %v4275_v16 = vsub.f32 %v4269_v19, %v20931_v20  ;;  %17919 = vrot.lane.b32.xlu0 %v17918_v27, %s18869_s25  ;;  %v15219_v60 = vpop.f32.mrb[64].mxu1  ;;  %v21095_v19 = vpack.c.bf16 %v3314_v41, %v3313_v33  ;;  %v3316_v27 = vld [vmem:[%s24022_s14 + $0x78] sm:$0xff] }
0x11c5   :  { %v15240_v28 = vpop.f32.mrb[84].mxu0  ;;  %17056 = vmatprep.subr.bf16.mxu1 %v17055_v29  ;;  %v4258_v35 = vpop.f32.mrb[65].mxu1  ;;  %v4272_v57 = vmul.f32 2.0, %v15219_v60  ;;  %v3319_v60 = vld [vmem:[%s24022_s14 + $0x90] sm:$0xff] }
0x11c6   :  { %v17938_v12 = vpack.i.bf16 %v4276_v52, %v4275_v16  ;;  %v4365_v17 = vpop.f32.mrb[85].mxu0  ;;  %17058 = vmatpush3.bf16.msra.mxu1 %v17055_v29  ;;  %v4271_v26 = vmul.f32 2.0, %v4258_v35  ;;  %24243 = vst [vmem:[#allocation13_spill] sm:$0xff] %v21095_v19  ;;  %v21105_v52 = vpack.c.bf16 %v3316_v27, %v3315_v30  ;;  %v3318_v29 = vld [vmem:[%s24022_s14 + $0x88] sm:$0xff] }
0x11c7   :  { %v17059_v50 = vpack.c.bf16 %v15240_v28, %v4365_v17 }
0x11c8   :  { %17929 = vrot.lane.b32.xlu0 %v17928_v37, %s18867_s23  ;;  %17939 = vrot.lane.b32.xlu1 %v17938_v12, %s18869_s25  ;;  %v3303_v37 = vld [vmem:[%s24022_s14 + $0x10] sm:$0xff]  ;;  %v4277_v14 = vsub.f32 %v4271_v26, %v20937_v56  ;;  %24244 = vst [vmem:[#allocation12_spill] sm:$0xff] %v21105_v52 }
0x11c9   :  { %17060 = vmatprep.subr.bf16.mxu1 %v17059_v50  ;;  %v21030_v40 = vpack.c.bf16 %v3304_v54, %v3303_v37 }
0x11ca   :  { %17062 = vmatpush3.bf16.msra.mxu1 %v17059_v50 }
0x11cb   :  { %24238 = vst [vmem:[#allocation5_spill] sm:$0xff] %v21030_v40  ;;  %17068 = vmatpush1.bf16.msra.mxu0 %v21030_v40 }
0x11cc   :  { %17934 = vrot.lane.b32.xlu0 %v17933_v44, %s18868_s24  ;;  %4495 = vrot.lane.b32.xlu1 %v20972_v48, %s18867_s23  ;;  %v3317_v44 = vld [vmem:[%s24022_s14 + $0x80] sm:$0xff] }
0x11cd   :  { %15254 = vmatmul.mubr.msk.f32.vlgmr.msra.gmra.mrb[66].mxu1 %vm3322_vm2, %v20765_v9  ;;  %v3306_v9 = vld [vmem:[%s24022_s14 + $0x28] sm:$0xff]  ;;  %17069 = vmatprep.subr.bf16.mxu0 %v24090_v1  ;;  %v21116_v16 = vpack.c.bf16 %v3318_v29, %v3317_v44 }
0x11ce   :  { %15256 = vmatprep.mubr.msk.f32.mxu1 %vm3322_vm2, %v20770_v13  ;;  %v4278_v13 = vsub.f32 %v4272_v57, %v20935_v24  ;;  %v21047_v32 = vpack.c.bf16 %v3306_v9, %v3305_v3 }
0x11cf   :  { %24245 = vst [vmem:[#allocation16_spill] sm:$0xff] %v21116_v16 }
0x11d0   :  { %4543 = vrot.lane.b32.xlu1 %v4365_v17, %s18868_s24  ;;  %4519 = vrot.lane.b32.xlu0 %v4277_v14, %s18869_s25  ;;  %24239 = vst [vmem:[#allocation6_spill] sm:$0xff] %v21047_v32  ;;  %v17915_v17 = vpop.permute.xlu1 %17914 }
0x11d1   :  { %15257 = vmatmul.mubr.msk.f32.gmra.mrb[68].mxu1 %vm3322_vm2, %v20779_v5  ;;  %17071 = vmatpush1.bf16.msra.mxu0 %v21047_v32  ;;  %v21062_v5 = vpack.c.bf16 %v3308_v38, %v3307_v39  ;;  %v17916_v50 = vunpack.i.l.bf16 %v17915_v17  ;;  %v17917_v54 = vunpack.i.h.bf16 %v17915_v17 }
0x11d2   :  { %15259 = vmatprep.mubr.msk.f32.mxu1 %vm3322_vm2, %v20784_v61  ;;  %17072 = vmatprep.subr.bf16.mxu0 %v24090_v1  ;;  %v3309_v61 = vld [vmem:[%s24022_s14 + $0x40] sm:$0xff] }
0x11d3   :  { %24240 = vst [vmem:[#allocation10_spill] sm:$0xff] %v21062_v5  ;;  %v4553_v3 = vsel %vm3075_vm0, %v20925_v23, %v17916_v50  ;;  %v4554_v27 = vsel %vm3075_vm0, %v20923_v11, %v17917_v54 }
0x11d4   :  { %4521 = vrot.lane.b32.xlu1 %v4278_v13, %s18869_s25  ;;  %4497 = vrot.lane.b32.xlu0 %v20970_v51, %s18867_s23 }
0x11d5   :  { %15260 = vmatmul.mubr.msk.f32.gmra.mrb[70].mxu1 %vm3322_vm2, %v20793_v34  ;;  %17074 = vmatpush1.bf16.msra.mxu0 %v21062_v5  ;;  %v21075_v34 = vpack.c.bf16 %v3310_v49, %v3309_v61 }
0x11d6   :  { %15274 = vmatprep.mubr.msk.f32.mxu1 %vm3322_vm2, %v20636_v4  ;;  %17075 = vmatprep.subr.bf16.mxu0 %v24090_v1  ;;  %v3311_v4 = vld [vmem:[%s24022_s14 + $0x50] sm:$0xff] }
0x11d7   :  { %24241 = vst [vmem:[#allocation8_spill] sm:$0xff] %v21075_v34  ;;  %v21085_v55 = vpack.c.bf16 %v3312_v43, %v3311_v4 }
0x11d8   :  { %4545 = vrot.lane.b32.xlu0 %v15240_v28, %s18868_s24  ;;  %v3320_v28 = vld [vmem:[%s24022_s14 + $0x98] sm:$0xff] }
0x11d9   :  { %17077 = vmatpush1.bf16.msra.mxu0 %v21075_v34  ;;  %24242 = vst [vmem:[#allocation11_spill] sm:$0xff] %v21085_v55  ;;  %v21126_v35 = vpack.c.bf16 %v3320_v28, %v3319_v60 }
0x11da   :  { %17078 = vmatprep.subr.bf16.mxu0 %v24090_v1 }
0x11db   :  { %24246 = vst [vmem:[#allocation17_spill] sm:$0xff] %v21126_v35 }
0x11dd   :  { %17080 = vmatpush1.bf16.msra.mxu0 %v21085_v55 }
0x11de   :  { %17081 = vmatprep.subr.bf16.mxu0 %v24090_v1 }
0x11e1   :  { %17083 = vmatpush1.bf16.msra.mxu0 %v21095_v19 }
0x11e2   :  { %17084 = vmatprep.subr.bf16.mxu0 %v24090_v1 }
0x11e5   :  { %17086 = vmatpush1.bf16.msra.mxu0 %v21105_v52 }
0x11e6   :  { %17087 = vmatprep.subr.bf16.mxu0 %v24090_v1 }
0x11e9   :  { %17089 = vmatpush1.bf16.msra.mxu0 %v21116_v16 }
0x11ea   :  { %17090 = vmatprep.subr.bf16.mxu0 %v24090_v1 }
0x11ed   :  { %17092 = vmatpush1.bf16.msra.mxu0 %v21126_v35 }
0x11ee   :  { %17142 = vmatprep.subr.bf16.mxu0 %v20833_v2 }
0x1233   :  { %v17925_v53 = vpop.permute.xlu1 %17924 }
0x1234   :  { %v17926_v61 = vunpack.i.l.bf16 %v17925_v53  ;;  %v17927_v60 = vunpack.i.h.bf16 %v17925_v53 }
0x1236   :  { %v17920_v12 = vpop.permute.xlu0 %17919 }
0x1237   :  { %v17921_v26 = vunpack.i.l.bf16 %v17920_v12  ;;  %v17922_v9 = vunpack.i.h.bf16 %v17920_v12 }
0x1239   :  { %v4559_v38 = vsel %vm3174_vm1, %v4553_v3, %v17921_v26  ;;  %v4560_v29 = vsel %vm3174_vm1, %v4554_v27, %v17922_v9  ;;  %v13308_v27 = vmul.f32 -1.442695, %v20899_v21  ;;  %v13312_v21 = vmul.f32 -1.442695, %v20911_v62 }
0x123a   :  { %v17930_v47 = vpop.permute.xlu0 %17929  ;;  %v17940_v49 = vpop.permute.xlu1 %17939  ;;  %v4567_v26 = vsel %vm4565_vm9, %v4560_v29, %v17927_v60  ;;  %v13337_v60 = vld [vmem:[%s24023_s15] ss:$0 sm:$0xff] }
0x123b   :  { %v17931_v44 = vunpack.i.l.bf16 %v17930_v47  ;;  %v17941_v11 = vunpack.i.l.bf16 %v17940_v49  ;;  %v17942_v9 = vunpack.i.h.bf16 %v17940_v49 }
0x123e   :  { %v17935_v33 = vpop.permute.xlu0 %17934  ;;  %v4496_v54 = vpop.permute.xlu1 %4495 }
0x123f   :  { %v17936_v53 = vunpack.i.l.bf16 %v17935_v33 }
0x12a0   :  { %v15255_v37 = vpop.f32.mrb[66].mxu1 }
0x12a1   :  { %v4470_v57 = vmul.f32 2.0, %v15255_v37  ;;  %v4440_v14 = vpop.f32.mrb[67].mxu1  ;;  %v17932_v37 = vunpack.i.h.bf16 %v17930_v47 }
0x12a2   :  { %v4469_v13 = vmul.f32 2.0, %v4440_v14 }
0x12a3   :  { %v4476_v39 = vsub.f32 %v4470_v57, %v20953_v8  ;;  %v4566_v8 = vsel %vm4565_vm9, %v4559_v38, %v17926_v61  ;;  %v4520_v57 = vpop.permute.xlu0 %4519  ;;  %v4544_v38 = vpop.permute.xlu1 %4543  ;;  %v4557_v61 = vsel %vm3075_vm0, %v20937_v56, %v4496_v54 }
0x12a4   :  { %v4475_v4 = vsub.f32 %v4469_v13, %v20955_v7  ;;  %v15258_v43 = vpop.f32.mrb[68].mxu1  ;;  %v17937_v13 = vunpack.i.h.bf16 %v17935_v33  ;;  %v4563_v49 = vsel %vm3174_vm1, %v4557_v61, %v4520_v57 }
0x12a5   :  { %v4472_v41 = vmul.f32 2.0, %v15258_v43  ;;  %v4450_v30 = vpop.f32.mrb[69].mxu1  ;;  %v4570_v43 = vsel %vm4565_vm9, %v4563_v49, %v4544_v38 }
0x12a6   :  { %v4471_v23 = vmul.f32 2.0, %v4450_v30  ;;  %13338 = vmatprep.mubr.msk.f32.mxu0 %vm3075_vm0, %v4475_v4  ;;  %v13307_v30 = vmul.f32 -1.442695, %v20901_v31 }
0x12a7   :  { %v4478_v28 = vsub.f32 %v4472_v41, %v20962_v10  ;;  %4661 = vmatmul.mubr.f32.vlgmr.msra.gmra.mrb[86].mxu0 %v4566_v8  ;;  %v4522_v4 = vpop.permute.xlu1 %4521  ;;  %v13311_v8 = vmul.f32 -1.442695, %v20913_v63 }
0x12a8   :  { %v4477_v7 = vsub.f32 %v4471_v23, %v20964_v15  ;;  %v15261_v12 = vpop.f32.mrb[70].mxu1  ;;  %13339 = vmatprep.mubr.msk.f32.mxu0 %vm3075_vm0, %v4476_v39  ;;  %17144 = vmatpush3.bf16.msra.mxu0 %v20833_v2  ;;  %v4555_v15 = vsel %vm3075_vm0, %v20931_v20, %v17931_v44  ;;  %v4556_v20 = vsel %vm3075_vm0, %v20929_v45, %v17932_v37  ;;  %18459 = vpow2.f32 %v13307_v30 }
0x12a9   :  { %v4474_v17 = vmul.f32 2.0, %v15261_v12  ;;  %v4460_v50 = vpop.f32.mrb[71].mxu1  ;;  %15350 = vmatprep.subr.msk.mxu0 %vm3912_vm3, %v20840_v18  ;;  %v4561_v47 = vsel %vm3174_vm1, %v4555_v15, %v17941_v11  ;;  %18461 = vpow2.f32 %v13308_v27  ;;  %v13309_v44 = vmul.f32 -1.442695, %v20907_v36 }
0x12aa   :  { %v4473_v10 = vmul.f32 2.0, %v4460_v50  ;;  %v4568_v39 = vsel %vm4565_vm9, %v4561_v47, %v17936_v53 }
0x12ab   :  { %v4480_v14 = vsub.f32 %v4474_v17, %v20970_v51  ;;  %4666 = vmatmul.mubr.f32.gmra.mrb[88].mxu0 %v4567_v26  ;;  %v4498_v51 = vpop.permute.xlu0 %4497  ;;  %18463 = vpow2.f32 %v13309_v44 }
0x12ac   :  { %v4479_v3 = vsub.f32 %v4473_v10, %v20972_v48  ;;  %13340 = vmatprep.mubr.msk.f32.mxu0 %vm3075_vm0, %v4477_v7  ;;  %15351 = vmatpush3.msk.msra.mxu0 %vm3912_vm3, %v20840_v18  ;;  %v4562_v48 = vsel %vm3174_vm1, %v4556_v20, %v17942_v9  ;;  %v4558_v45 = vsel %vm3075_vm0, %v20935_v24, %v4498_v51  ;;  %v13310_v24 = vmul.f32 -1.442695, %v20905_v0 }
0x12ad   :  { %v4569_v18 = vsel %vm4565_vm9, %v4562_v48, %v17937_v13  ;;  %v4564_v41 = vsel %vm3174_vm1, %v4558_v45, %v4522_v4 }
0x12ae   :  { %18465 = vpow2.f32 %v13310_v24 }
0x12af   :  { %4671 = vmatmul.mubr.f32.gmra.mrb[90].mxu0 %v4568_v39  ;;  %v4546_v33 = vpop.permute.xlu0 %4545  ;;  %18467 = vpow2.f32 %v13311_v8 }
0x12b0   :  { %13341 = vmatprep.mubr.msk.f32.mxu0 %vm3075_vm0, %v4478_v28  ;;  %v4571_v56 = vsel %vm4565_vm9, %v4564_v41, %v4546_v33 }
0x12b2   :  { %v18460_v23 = vpop.eup %18459 }
0x12b3   :  { %4676 = vmatmul.mubr.f32.gmra.mrb[92].mxu0 %v4569_v18  ;;  %v4029_v29 = vadd.f32 1.0, %v18460_v23  ;;  %v18462_v28 = vpop.eup %18461 }
0x12b4   :  { %13342 = vmatprep.mubr.msk.f32.mxu0 %vm3075_vm0, %v4479_v3  ;;  %v4030_v36 = vadd.f32 1.0, %v18462_v28 }
0x12b5   :  { %18469 = vrcp.f32 %v4029_v29  ;;  %v18464_v0 = vpop.eup %18463 }
0x12b6   :  { %v4031_v50 = vadd.f32 1.0, %v18464_v0 }
0x12b7   :  { %4681 = vmatmul.mubr.f32.gmra.mrb[94].mxu0 %v4570_v43 }
0x12b8   :  { %13343 = vmatprep.mubr.msk.f32.mxu0 %vm3075_vm0, %v4480_v14  ;;  %v18466_v26 = vpop.eup %18465 }
0x12b9   :  { %v4032_v10 = vadd.f32 1.0, %v18466_v26  ;;  %v18468_v62 = vpop.eup %18467 }
0x12ba   :  { %v4033_v47 = vadd.f32 1.0, %v18468_v62 }
0x12bb   :  { %4686 = vmatmul.mubr.f32.gmra.mrb[96].mxu0 %v4571_v56 }
0x12bf   :  { %v18470_v15 = vpop.eup %18469 }
0x137a   :  { %v4662_v31 = vpop.f32.mrb[86].mxu0 }
0x137b   :  { %v4663_v7 = vadd.f32 %v13337_v60, %v4662_v31  ;;  %v4664_v12 = vpop.f32.mrb[87].mxu0 }
0x137d   :  { %18471 = vtanh.f32 %v4663_v7 }
0x137e   :  { %v4667_v11 = vpop.f32.mrb[88].mxu0  ;;  %18473 = vpow2.f32 %v13312_v21 }
0x137f   :  { %v4668_v17 = vadd.f32 %v13337_v60, %v4667_v11  ;;  %v4669_v63 = vpop.f32.mrb[89].mxu0  ;;  %18475 = vrcp.f32 %v4030_v36 }
0x1381   :  { %18477 = vtanh.f32 %v4668_v17 }
0x1382   :  { %v4672_v37 = vpop.f32.mrb[90].mxu0  ;;  %18479 = vrcp.f32 %v4031_v50 }
0x1383   :  { %v4673_v53 = vadd.f32 %v13337_v60, %v4672_v37  ;;  %v4674_v54 = vpop.f32.mrb[91].mxu0 }
0x1385   :  { %18481 = vtanh.f32 %v4673_v53 }
0x1386   :  { %v4677_v57 = vpop.f32.mrb[92].mxu0  ;;  %18483 = vrcp.f32 %v4032_v10 }
0x1387   :  { %v18472_v14 = vpop.eup %18471  ;;  %v4678_v3 = vadd.f32 %v13337_v60, %v4677_v57  ;;  %v4679_v9 = vpop.f32.mrb[93].mxu0 }
0x1388   :  { %v4697_v13 = vmul.f32 %v18472_v14, %v18470_v15  ;;  %v18474_v39 = vpop.eup %18473 }
0x1389   :  { %18485 = vtanh.f32 %v4678_v3  ;;  %v18476_v20 = vpop.eup %18475  ;;  %v4034_v49 = vadd.f32 1.0, %v18474_v39  ;;  %v21221_v39 = vld [vmem:[%s24018_s11 + $0x18] sm:$0xff] }
0x138a   :  { %v4703_v38 = vsub.f32 0.0, %v4697_v13  ;;  %v4682_v51 = vpop.f32.mrb[94].mxu0  ;;  %18487 = vrcp.f32 %v4033_v47  ;;  %v21207_v47 = vld [vmem:[%s24018_s11 + $0x8] sm:$0xff]  ;;  %v21214_v13 = vld [vmem:[%s24018_s11 + $0x10] sm:$0xff] }
0x138b   :  { %v18478_v48 = vpop.eup %18477  ;;  %v4683_v61 = vadd.f32 %v13337_v60, %v4682_v51  ;;  %v4684_v18 = vpop.f32.mrb[95].mxu0  ;;  %v21242_v51 = vld [vmem:[%s24018_s11] sm:$0xff] }
0x138c   :  { %v4698_v4 = vmul.f32 %v18478_v48, %v18476_v20  ;;  %v18480_v45 = vpop.eup %18479  ;;  %v4709_v43 = vmul.f32 0.125, %v4703_v38  ;;  %v21228_v20 = vld [vmem:[%s24018_s11 + $0x20] sm:$0xff]  ;;  %v21235_v38 = vld [vmem:[%s24018_s11 + $0x28] sm:$0xff] }
0x138d   :  { %18489 = vtanh.f32 %v4683_v61 }
0x138e   :  { %v4704_v33 = vsub.f32 0.0, %v4698_v4  ;;  %v4687_v41 = vpop.f32.mrb[96].mxu0  ;;  %18491 = vrcp.f32 %v4034_v49  ;;  %v21181_v8 = vadd.f32 %v4709_v43, %v20662_v42 }
0x138f   :  { %v18482_v56 = vpop.eup %18481  ;;  %v4688_v30 = vadd.f32 %v13337_v60, %v4687_v41  ;;  %v4689_v27 = vpop.f32.mrb[97].mxu0 }
0x1390   :  { %v4710_v44 = vmul.f32 0.125, %v4704_v33  ;;  %v4699_v24 = vmul.f32 %v18482_v56, %v18480_v45  ;;  %v18484_v23 = vpop.eup %18483  ;;  %24247 = vst [vmem:[#allocation18_spill] sm:$0xff] %v21181_v8  ;;  %v21289_v56 = vld [vmem:[%s24018_s11 + $0x30] sm:$0xff]  ;;  %v21303_v27 = vld [vmem:[%s24018_s11 + $0x40] sm:$0xff] }
0x1391   :  { %18493 = vtanh.f32 %v4688_v30  ;;  %v21296_v30 = vld [vmem:[%s24018_s11 + $0x38] sm:$0xff] }
0x1392   :  { %v21184_v29 = vadd.f32 %v4710_v44, %v20658_v58  ;;  %v4705_v28 = vsub.f32 0.0, %v4699_v24  ;;  %v21310_v44 = vld [vmem:[%s24018_s11 + $0x48] sm:$0xff]  ;;  %v21317_v24 = vld [vmem:[%s24018_s11 + $0x50] sm:$0xff] }
0x1393   :  { %v18486_v31 = vpop.eup %18485 }
0x1394   :  { %24248 = vst [vmem:[#allocation19_spill] sm:$0xff] %v21184_v29  ;;  %v4700_v21 = vmul.f32 %v18486_v31, %v18484_v23  ;;  %v17093_v7 = vpack.c.bf16 %v21184_v29, %v21181_v8  ;;  %v18488_v12 = vpop.eup %18487  ;;  %v4711_v60 = vmul.f32 0.125, %v4705_v28  ;;  %v21324_v23 = vld [vmem:[%s24018_s11 + $0x58] sm:$0xff] }
0x1396   :  { %v4706_v36 = vsub.f32 0.0, %v4700_v21  ;;  %17094 = vmatprep.subr.bf16.mxu1 %v17093_v7  ;;  %v21189_v50 = vadd.f32 %v4711_v60, %v20664_v22 }
0x1397   :  { %v18490_v0 = vpop.eup %18489  ;;  %17096 = vmatpush3.bf16.msra.mxu1 %v17093_v7 }
0x1398   :  { %v4712_v11 = vmul.f32 0.125, %v4706_v36  ;;  %v4701_v17 = vmul.f32 %v18490_v0, %v18488_v12  ;;  %v18492_v63 = vpop.eup %18491  ;;  %24249 = vst [vmem:[#allocation20_spill] sm:$0xff] %v21189_v50 }
0x139a   :  { %v21192_v26 = vadd.f32 %v4712_v11, %v20660_v25  ;;  %v4707_v37 = vsub.f32 0.0, %v4701_v17 }
0x139b   :  { %v18494_v53 = vpop.eup %18493 }
0x139c   :  { %24250 = vst [vmem:[#allocation21_spill] sm:$0xff] %v21192_v26  ;;  %v4702_v54 = vmul.f32 %v18494_v53, %v18492_v63  ;;  %v17097_v10 = vpack.c.bf16 %v21192_v26, %v21189_v50  ;;  %v4713_v62 = vmul.f32 0.125, %v4707_v37 }
0x139e   :  { %v4708_v15 = vsub.f32 0.0, %v4702_v54  ;;  %17098 = vmatprep.subr.bf16.mxu1 %v17097_v10  ;;  %v21197_v14 = vadd.f32 %v4713_v62, %v20670_v6 }
0x139f   :  { %17100 = vmatpush3.bf16.msra.mxu1 %v17097_v10 }
0x13a0   :  { %v4714_v57 = vmul.f32 0.125, %v4708_v15  ;;  %24251 = vst [vmem:[#allocation22_spill] sm:$0xff] %v21197_v14 }
0x13a2   :  { %v21200_v3 = vadd.f32 %v4714_v57, %v20668_v46 }
0x13a4   :  { %24252 = vst [vmem:[#allocation23_spill] sm:$0xff] %v21200_v3  ;;  %v17101_v9 = vpack.c.bf16 %v21200_v3, %v21197_v14 }
0x13a6   :  { %17102 = vmatprep.subr.bf16.mxu1 %v17101_v9 }
0x13a7   :  { %17104 = vmatpush3.bf16.msra.mxu1 %v17101_v9 }
0x13aa   :  { %15275 = vmatmul.mubr.msk.f32.vlgmr.msra.gmra.mrb[72].mxu1 %vm3322_vm2, %v21207_v47 }
0x13ab   :  { %15277 = vmatprep.mubr.msk.f32.mxu1 %vm3322_vm2, %v21214_v13 }
0x13ae   :  { %15278 = vmatmul.mubr.msk.f32.gmra.mrb[74].mxu1 %vm3322_vm2, %v21221_v39 }
0x13af   :  { %15280 = vmatprep.mubr.msk.f32.mxu1 %vm3322_vm2, %v21228_v20 }
0x13b2   :  { %15281 = vmatmul.mubr.msk.f32.gmra.mrb[76].mxu1 %vm3322_vm2, %v21235_v38 }
0x13b3   :  { %15295 = vmatprep.mubr.msk.f32.mxu1 %vm3322_vm2, %v21242_v51 }
0x147d   :  { %v21246_v48 = vpop.f32.mrb[72].mxu1 }
0x147e   :  { %5133 = vrot.lane.b32.xlu0 %v21246_v48, %s18863_s1  ;;  %v21250_v61 = vpop.f32.mrb[73].mxu1 }
0x147f   :  { %v17105_v18 = vpack.c.bf16 %v21246_v48, %v21250_v61  ;;  %5131 = vrot.lane.b32.xlu1 %v21250_v61, %s18863_s1 }
0x1481   :  { %v21256_v49 = vpop.f32.mrb[74].mxu1  ;;  %17106 = vmatprep.subr.bf16.mxu1 %v17105_v18 }
0x1482   :  { %17108 = vmatpush3.bf16.msra.mxu1 %v17105_v18  ;;  %5137 = vrot.lane.b32.xlu0 %v21256_v49, %s18863_s1  ;;  %v21260_v4 = vpop.f32.mrb[75].mxu1 }
0x1483   :  { %v17109_v45 = vpack.c.bf16 %v21256_v49, %v21260_v4 }
0x1485   :  { %v21264_v43 = vpop.f32.mrb[76].mxu1  ;;  %17110 = vmatprep.subr.bf16.mxu1 %v17109_v45 }
0x1486   :  { %5135 = vrot.lane.b32.xlu0 %v21260_v4, %s18863_s1  ;;  %v21268_v33 = vpop.f32.mrb[77].mxu1  ;;  %17112 = vmatpush3.bf16.msra.mxu1 %v17109_v45 }
0x1487   :  { %v17113_v41 = vpack.c.bf16 %v21264_v43, %v21268_v33 }
0x1489   :  { %17114 = vmatprep.subr.bf16.mxu1 %v17113_v41 }
0x148a   :  { %5141 = vrot.lane.b32.xlu0 %v21264_v43, %s18863_s1  ;;  %17116 = vmatpush3.bf16.msra.mxu1 %v17113_v41 }
0x148b   :  { %17118 = vmatprep.subr.bf16.mxu1 %v17105_v18 }
0x148d   :  { %15296 = vmatmul.mubr.msk.f32.vlgmr.msra.gmra.mrb[78].mxu1 %vm3322_vm2, %v21207_v47 }
0x148e   :  { %5139 = vrot.lane.b32.xlu0 %v21268_v33, %s18863_s1  ;;  %17120 = vmatpush3.bf16.msra.mxu1 %v17105_v18 }
0x148f   :  { %17122 = vmatprep.subr.bf16.mxu1 %v17109_v45  ;;  %15298 = vmatprep.mubr.msk.f32.mxu1 %vm3322_vm2, %v21214_v13 }
0x1491   :  { %15299 = vmatmul.mubr.msk.f32.gmra.mrb[80].mxu1 %vm3322_vm2, %v21221_v39 }
0x1492   :  { %17124 = vmatpush3.bf16.msra.mxu1 %v17109_v45  ;;  %15301 = vmatprep.mubr.msk.f32.mxu1 %vm3322_vm2, %v21228_v20 }
0x1493   :  { %17126 = vmatprep.subr.bf16.mxu1 %v17113_v41 }
0x1495   :  { %15302 = vmatmul.mubr.msk.f32.gmra.mrb[82].mxu1 %vm3322_vm2, %v21235_v38 }
0x1496   :  { %17128 = vmatpush3.bf16.msra.mxu1 %v17113_v41  ;;  %15316 = vmatprep.mubr.msk.f32.mxu1 %vm3322_vm2, %v21289_v56 }
0x1499   :  { %15317 = vmatmul.mubr.msk.f32.vlgmr.msra.gmra.mrb[84].mxu1 %vm3322_vm2, %v21296_v30 }
0x149a   :  { %15319 = vmatprep.mubr.msk.f32.mxu1 %vm3322_vm2, %v21303_v27 }
0x149d   :  { %15320 = vmatmul.mubr.msk.f32.gmra.mrb[86].mxu1 %vm3322_vm2, %v21310_v44 }
0x149e   :  { %15322 = vmatprep.mubr.msk.f32.mxu1 %vm3322_vm2, %v21317_v24 }
0x14a1   :  { %15323 = vmatmul.mubr.msk.f32.gmra.mrb[88].mxu1 %vm3322_vm2, %v21324_v23 }
0x14a2   :  { %15337 = vmatprep.mubr.msk.f32.mxu1 %vm3322_vm2, %v21289_v56 }
0x1560   :  { %v15297_v28 = vpop.f32.mrb[78].mxu1 }
0x1561   :  { %v4912_v31 = vmul.f32 2.0, %v15297_v28  ;;  %v4882_v21 = vpop.f32.mrb[79].mxu1 }
0x1562   :  { %v4911_v7 = vmul.f32 2.0, %v4882_v21 }
0x1563   :  { %v4918_v12 = vsub.f32 %v4912_v31, %v21184_v29 }
0x1564   :  { %v4917_v60 = vsub.f32 %v4911_v7, %v21181_v8  ;;  %v15300_v36 = vpop.f32.mrb[80].mxu1 }
0x1565   :  { %v4914_v0 = vmul.f32 2.0, %v15300_v36  ;;  %5157 = vrot.lane.b32.xlu0 %v4918_v12, %s18864_s29  ;;  %v4892_v11 = vpop.f32.mrb[81].mxu1 }
0x1566   :  { %v4913_v17 = vmul.f32 2.0, %v4892_v11  ;;  %5155 = vrot.lane.b32.xlu1 %v4917_v60, %s18864_s29 }
0x1567   :  { %v4920_v63 = vsub.f32 %v4914_v0, %v21192_v26 }
0x1568   :  { %v4919_v37 = vsub.f32 %v4913_v17, %v21189_v50  ;;  %v15303_v53 = vpop.f32.mrb[82].mxu1 }
0x1569   :  { %5161 = vrot.lane.b32.xlu0 %v4920_v63, %s18864_s29  ;;  %v4902_v54 = vpop.f32.mrb[83].mxu1  ;;  %v4916_v10 = vmul.f32 2.0, %v15303_v53 }
0x156a   :  { %5159 = vrot.lane.b32.xlu1 %v4919_v37, %s18864_s29  ;;  %v4915_v62 = vmul.f32 2.0, %v4902_v54 }
0x156b   :  { %v4922_v18 = vsub.f32 %v4916_v10, %v21200_v3 }
0x156c   :  { %v15318_v15 = vpop.f32.mrb[84].mxu1  ;;  %v4921_v45 = vsub.f32 %v4915_v62, %v21197_v14 }
0x156d   :  { %5181 = vrot.lane.b32.xlu0 %v15318_v15, %s18865_s0  ;;  %v4989_v57 = vpop.f32.mrb[85].mxu1 }
0x156e   :  { %v17129_v9 = vpack.c.bf16 %v15318_v15, %v4989_v57  ;;  %5179 = vrot.lane.b32.xlu1 %v4989_v57, %s18865_s0 }
0x1570   :  { %v15321_v41 = vpop.f32.mrb[86].mxu1  ;;  %17130 = vmatprep.subr.bf16.mxu1 %v17129_v9 }
0x1571   :  { %5165 = vrot.lane.b32.xlu0 %v4922_v18, %s18864_s29  ;;  %v4999_v28 = vpop.f32.mrb[87].mxu1  ;;  %17132 = vmatpush3.bf16.msra.mxu1 %v17129_v9 }
0x1572   :  { %v17133_v31 = vpack.c.bf16 %v15321_v41, %v4999_v28  ;;  %5163 = vrot.lane.b32.xlu1 %v4921_v45, %s18864_s29 }
0x1574   :  { %v15324_v21 = vpop.f32.mrb[88].mxu1  ;;  %17134 = vmatprep.subr.bf16.mxu1 %v17133_v31 }
0x1575   :  { %5185 = vrot.lane.b32.xlu0 %v15321_v41, %s18865_s0  ;;  %v5009_v7 = vpop.f32.mrb[89].mxu1  ;;  %17136 = vmatpush3.bf16.msra.mxu1 %v17133_v31  ;;  %v5132_v41 = vpop.permute.xlu1 %5131 }
0x1576   :  { %v17137_v12 = vpack.c.bf16 %v15324_v21, %v5009_v7  ;;  %5183 = vrot.lane.b32.xlu1 %v4999_v28, %s18865_s0 }
0x1578   :  { %17138 = vmatprep.subr.bf16.mxu1 %v17137_v12 }
0x1579   :  { %5189 = vrot.lane.b32.xlu0 %v15324_v21, %s18865_s0  ;;  %17140 = vmatpush3.bf16.msra.mxu1 %v17137_v12 }
0x157a   :  { %5187 = vrot.lane.b32.xlu1 %v5009_v7, %s18865_s0 }
0x157c   :  { %15338 = vmatmul.mubr.msk.f32.vlgmr.msra.gmra.mrb[90].mxu1 %vm3322_vm2, %v21296_v30 }
0x157d   :  { %15340 = vmatprep.mubr.msk.f32.mxu1 %vm3322_vm2, %v21303_v27 }
0x1580   :  { %15341 = vmatmul.mubr.msk.f32.gmra.mrb[92].mxu1 %vm3322_vm2, %v21310_v44 }
0x1581   :  { %15343 = vmatprep.mubr.msk.f32.mxu1 %vm3322_vm2, %v21317_v24 }
0x1584   :  { %15344 = vmatmul.mubr.msk.f32.gmra.mrb[94].mxu1 %vm3322_vm2, %v21324_v23 }
0x1585   :  { %15373 = vmatprep.mubr.msk.f32.mxu1 %vm3322_vm2, %v21242_v51 }
0x15d8   :  { %v5156_v31 = vpop.permute.xlu1 %5155 }
0x15dc   :  { %v5160_v7 = vpop.permute.xlu1 %5159 }
0x164f   :  { %v15339_v60 = vpop.f32.mrb[90].mxu1 }
0x1650   :  { %v5114_v36 = vmul.f32 2.0, %v15339_v60  ;;  %v5084_v0 = vpop.f32.mrb[91].mxu1  ;;  %v5180_v60 = vpop.permute.xlu1 %5179 }
0x1651   :  { %v5113_v11 = vmul.f32 2.0, %v5084_v0 }
0x1652   :  { %v5120_v17 = vsub.f32 %v5114_v36, %v21246_v48 }
0x1653   :  { %v5119_v63 = vsub.f32 %v5113_v11, %v21250_v61  ;;  %v15342_v37 = vpop.f32.mrb[92].mxu1 }
0x1654   :  { %v5116_v53 = vmul.f32 2.0, %v15342_v37  ;;  %v5094_v54 = vpop.f32.mrb[93].mxu1  ;;  %5205 = vrot.lane.b32.xlu1 %v5120_v17, %s18866_s21  ;;  %v5164_v36 = vpop.permute.xlu1 %5163 }
0x1655   :  { %v5115_v10 = vmul.f32 2.0, %v5094_v54 }
0x1656   :  { %v5122_v62 = vsub.f32 %v5116_v53, %v21256_v49  ;;  %v5134_v49 = vpop.permute.xlu0 %5133  ;;  %v5221_v53 = vsel %vm3859_vm4, %v21181_v8, %v5132_v41 }
0x1657   :  { %v5121_v15 = vsub.f32 %v5115_v10, %v21260_v4  ;;  %v15345_v57 = vpop.f32.mrb[94].mxu1  ;;  %v5222_v54 = vsel %vm3859_vm4, %v21184_v29, %v5134_v49  ;;  %v5227_v10 = vsel %vm3866_vm5, %v5221_v53, %v5156_v31 }
0x1658   :  { %v5118_v9 = vmul.f32 2.0, %v15345_v57  ;;  %v5104_v18 = vpop.f32.mrb[95].mxu1  ;;  %5203 = vrot.lane.b32.xlu1 %v5119_v63, %s18866_s21  ;;  %v5184_v0 = vpop.permute.xlu1 %5183 }
0x1659   :  { %v5117_v45 = vmul.f32 2.0, %v5104_v18 }
0x165a   :  { %v5124_v48 = vsub.f32 %v5118_v9, %v21264_v43  ;;  %v5138_v4 = vpop.permute.xlu0 %5137 }
0x165b   :  { %v5123_v61 = vsub.f32 %v5117_v45, %v21268_v33  ;;  %v5224_v41 = vsel %vm3859_vm4, %v21192_v26, %v5138_v4 }
0x165c   :  { %5213 = vrot.lane.b32.xlu0 %v5124_v48, %s18866_s21  ;;  %5209 = vrot.lane.b32.xlu1 %v5122_v62, %s18866_s21  ;;  %v5188_v17 = vpop.permute.xlu1 %5187 }
0x165e   :  { %v5136_v28 = vpop.permute.xlu0 %5135 }
0x165f   :  { %v5223_v49 = vsel %vm3859_vm4, %v21189_v50, %v5136_v28 }
0x1660   :  { %5207 = vrot.lane.b32.xlu1 %v5121_v15, %s18866_s21  ;;  %v5233_v15 = vsel %vm3873_vm6, %v5227_v10, %v5180_v60  ;;  %v5229_v31 = vsel %vm3866_vm5, %v5223_v49, %v5160_v7 }
0x1662   :  { %v5142_v21 = vpop.permute.xlu0 %5141 }
0x1663   :  { %v5226_v4 = vsel %vm3859_vm4, %v21200_v3, %v5142_v21 }
0x1664   :  { %5211 = vrot.lane.b32.xlu1 %v5123_v61, %s18866_s21 }
0x1666   :  { %v5140_v12 = vpop.permute.xlu0 %5139 }
0x1667   :  { %v5225_v10 = vsel %vm3859_vm4, %v21197_v14, %v5140_v12 }
0x1668   :  { %v5231_v7 = vsel %vm3866_vm5, %v5225_v10, %v5164_v36  ;;  %v21413_v36 = vld [vmem:[%s24021_s13] ss:$0 sm:$0xff] }
0x166a   :  { %v5158_v43 = vpop.permute.xlu0 %5157 }
0x166b   :  { %v5228_v62 = vsel %vm3866_vm5, %v5222_v54, %v5158_v43 }
0x166e   :  { %v5162_v33 = vpop.permute.xlu0 %5161 }
0x166f   :  { %v5230_v43 = vsel %vm3866_vm5, %v5224_v41, %v5162_v33 }
0x1672   :  { %v5182_v11 = vpop.permute.xlu0 %5181 }
0x1673   :  { %v5234_v9 = vsel %vm3873_vm6, %v5228_v62, %v5182_v11  ;;  %v5235_v11 = vsel %vm3873_vm6, %v5229_v31, %v5184_v0  ;;  %v5237_v62 = vsel %vm3873_vm6, %v5231_v7, %v5188_v17 }
0x1676   :  { %v5166_v63 = vpop.permute.xlu0 %5165 }
0x1677   :  { %v5232_v0 = vsel %vm3866_vm5, %v5226_v4, %v5166_v63 }
0x167a   :  { %v5186_v18 = vpop.permute.xlu0 %5185 }
0x167e   :  { %v5190_v60 = vpop.permute.xlu0 %5189 }
0x16c6   :  { %v5206_v37 = vpop.permute.xlu1 %5205 }
0x16c7   :  { %v5240_v48 = vsel %vm3880_vm7, %v5234_v9, %v5206_v37  ;;  %v5236_v37 = vsel %vm3873_vm6, %v5230_v43, %v5186_v18 }
0x16ca   :  { %v5204_v57 = vpop.permute.xlu1 %5203 }
0x16cb   :  { %v5239_v45 = vsel %vm3880_vm7, %v5233_v15, %v5204_v57  ;;  %v5238_v57 = vsel %vm3873_vm6, %v5232_v0, %v5190_v60 }
0x16cc   :  { %15352 = vmatprep.mubr.msk.f32.mxu0 %vm3893_vm8, %v5239_v45 }
0x16cd   :  { %15353 = vmatmul.mubr.msk.f32.vlgmr.msra.gmra.mrb[98].mxu0 %vm3893_vm8, %v5240_v48 }
0x16ce   :  { %v5210_v61 = vpop.permute.xlu1 %5209  ;;  %v5214_v33 = vpop.permute.xlu0 %5213 }
0x16cf   :  { %v5242_v28 = vsel %vm3880_vm7, %v5236_v37, %v5210_v61  ;;  %v5244_v9 = vsel %vm3880_vm7, %v5238_v57, %v5214_v33 }
0x16d2   :  { %v5208_v53 = vpop.permute.xlu1 %5207 }
0x16d3   :  { %v5241_v54 = vsel %vm3880_vm7, %v5235_v11, %v5208_v53 }
0x16d4   :  { %15355 = vmatprep.mubr.msk.f32.mxu0 %vm3893_vm8, %v5241_v54 }
0x16d5   :  { %15356 = vmatmul.mubr.msk.f32.gmra.mrb[100].mxu0 %vm3893_vm8, %v5242_v28 }
0x16d6   :  { %v5212_v15 = vpop.permute.xlu1 %5211 }
0x16d7   :  { %v5243_v12 = vsel %vm3880_vm7, %v5237_v62, %v5212_v15 }
0x16d8   :  { %15358 = vmatprep.mubr.msk.f32.mxu0 %vm3893_vm8, %v5243_v12 }
0x16d9   :  { %15359 = vmatmul.mubr.msk.f32.gmra.mrb[102].mxu0 %vm3893_vm8, %v5244_v9 }
0x16da   :  { %15394 = vmatprep.mubr.msk.f32.mxu0 %vm3322_vm2, %v21242_v51 }
0x17a0   :  { %v15354_v21 = vpop.f32.mrb[98].mxu0 }
0x17a1   :  { %v21416_v17 = vadd.f32 %v21413_v36, %v15354_v21  ;;  %v5329_v63 = vpop.f32.mrb[99].mxu0 }
0x17a2   :  { %v21419_v18 = vadd.f32 %v21413_v36, %v5329_v63 }
0x17a3   :  { %18495 = vtanh.f32 %v21416_v17 }
0x17a4   :  { %18497 = vtanh.f32 %v21419_v18 }
0x17a8   :  { %v15357_v45 = vpop.f32.mrb[100].mxu0 }
0x17a9   :  { %v21424_v48 = vadd.f32 %v21413_v36, %v15357_v45  ;;  %v5339_v61 = vpop.f32.mrb[101].mxu0 }
0x17aa   :  { %v21427_v49 = vadd.f32 %v21413_v36, %v5339_v61 }
0x17ab   :  { %18499 = vtanh.f32 %v21424_v48 }
0x17ac   :  { %18501 = vtanh.f32 %v21427_v49  ;;  %v15360_v41 = vpop.f32.mrb[102].mxu0 }
0x17ad   :  { %v18496_v31 = vpop.eup %18495  ;;  %v21432_v60 = vadd.f32 %v21413_v36, %v15360_v41  ;;  %v5349_v43 = vpop.f32.mrb[103].mxu0 }
0x17ae   :  { %v18498_v11 = vpop.eup %18497  ;;  %v21435_v53 = vadd.f32 %v21413_v36, %v5349_v43  ;;  %5408 = vrot.lane.b32.xlu0 %v18496_v31, %s18862_s6 }
0x17af   :  { %18503 = vtanh.f32 %v21432_v60  ;;  %5406 = vrot.lane.b32.xlu1 %v18498_v11, %s18862_s6 }
0x17b0   :  { %18505 = vtanh.f32 %v21435_v53 }
0x17b5   :  { %v18500_v37 = vpop.eup %18499 }
0x17b6   :  { %v18502_v54 = vpop.eup %18501  ;;  %5412 = vrot.lane.b32.xlu0 %v18500_v37, %s18862_s6 }
0x17b7   :  { %5410 = vrot.lane.b32.xlu1 %v18502_v54, %s18862_s6 }
0x17b9   :  { %v18504_v10 = vpop.eup %18503 }
0x17ba   :  { %v18506_v28 = vpop.eup %18505  ;;  %5416 = vrot.lane.b32.xlu0 %v18504_v10, %s18862_s6 }
0x17bb   :  { %5414 = vrot.lane.b32.xlu1 %v18506_v28, %s18862_s6 }
0x1820   :  { %v21445_v4 = vpop.permute.xlu0 %5408 }
0x1821   :  { %v21447_v7 = vpop.permute.xlu1 %5406 }
0x1822   :  { %v17145_v33 = vpack.c.bf16 %v21445_v4, %v21447_v7 }
0x1824   :  { %17146 = vmatprep.subr.bf16.mxu1 %v17145_v33 }
0x1825   :  { %17148 = vmatpush3.bf16.msra.mxu1 %v17145_v33 }
0x1828   :  { %v21451_v0 = vpop.permute.xlu0 %5412 }
0x1829   :  { %v21453_v62 = vpop.permute.xlu1 %5410 }
0x182a   :  { %v17149_v15 = vpack.c.bf16 %v21451_v0, %v21453_v62 }
0x182c   :  { %v21457_v57 = vpop.permute.xlu0 %5416  ;;  %17150 = vmatprep.subr.bf16.mxu1 %v17149_v15 }
0x182d   :  { %17152 = vmatpush3.bf16.msra.mxu1 %v17149_v15  ;;  %v21459_v12 = vpop.permute.xlu1 %5414 }
0x182e   :  { %v17153_v9 = vpack.c.bf16 %v21457_v57, %v21459_v12 }
0x1830   :  { %17154 = vmatprep.subr.bf16.mxu1 %v17153_v9 }
0x1831   :  { %17156 = vmatpush3.bf16.msra.mxu1 %v17153_v9 }
0x1834   :  { %15374 = vmatmul.mubr.msk.f32.vlgmr.msra.gmra.mrb[96].mxu1 %vm3322_vm2, %v21207_v47 }
0x1835   :  { %15376 = vmatprep.mubr.msk.f32.mxu1 %vm3322_vm2, %v21214_v13 }
0x1838   :  { %15377 = vmatmul.mubr.msk.f32.gmra.mrb[98].mxu1 %vm3322_vm2, %v21221_v39 }
0x1839   :  { %15379 = vmatprep.mubr.msk.f32.mxu1 %vm3322_vm2, %v21228_v20 }
0x183c   :  { %15380 = vmatmul.mubr.msk.f32.gmra.mrb[100].mxu1 %vm3322_vm2, %v21235_v38 }
0x183d   :  { %15415 = vmatprep.mubr.msk.f32.mxu1 %vm3322_vm2, %v21289_v56 }
0x1907   :  { %v21475_v21 = vpop.f32.mrb[96].mxu1 }
0x1908   :  { %v21477_v63 = vpop.f32.mrb[97].mxu1 }
0x1909   :  { %v17943_v45 = vpack.i.bf16 %v21475_v21, %v21477_v63  ;;  %v17157_v61 = vpack.c.bf16 %v21475_v21, %v21477_v63 }
0x190b   :  { %17944 = vrot.lane.b32.xlu1 %v17943_v45, %s18867_s23  ;;  %v21484_v41 = vpop.f32.mrb[98].mxu1  ;;  %17158 = vmatprep.subr.bf16.mxu0 %v17157_v61 }
0x190c   :  { %17170 = vmatprep.subr.bf16.mxu1 %v17157_v61  ;;  %v21486_v31 = vpop.f32.mrb[99].mxu1  ;;  %17160 = vmatpush3.bf16.msra.mxu0 %v17157_v61 }
0x190d   :  { %v17161_v11 = vpack.c.bf16 %v21484_v41, %v21486_v31  ;;  %17172 = vmatpush3.bf16.msra.mxu1 %v17157_v61 }
0x190f   :  { %v21492_v37 = vpop.f32.mrb[100].mxu1  ;;  %17162 = vmatprep.subr.bf16.mxu0 %v17161_v11  ;;  %17174 = vmatprep.subr.bf16.mxu1 %v17161_v11 }
0x1910   :  { %v21494_v54 = vpop.f32.mrb[101].mxu1  ;;  %17164 = vmatpush3.bf16.msra.mxu0 %v17161_v11 }
0x1911   :  { %v17165_v10 = vpack.c.bf16 %v21492_v37, %v21494_v54  ;;  %17176 = vmatpush3.bf16.msra.mxu1 %v17161_v11 }
0x1913   :  { %17166 = vmatprep.subr.bf16.mxu0 %v17165_v10  ;;  %17178 = vmatprep.subr.bf16.mxu1 %v17165_v10 }
0x1914   :  { %17168 = vmatpush3.bf16.msra.mxu0 %v17165_v10 }
0x1915   :  { %17180 = vmatpush3.bf16.msra.mxu1 %v17165_v10 }
0x1916   :  { %17193 = vmatprep.subr.bf16.mxu1 %v24090_v1 }
0x1917   :  { %15395 = vmatmul.mubr.msk.f32.vlgmr.msra.gmra.mrb[104].mxu0 %vm3322_vm2, %v21207_v47 }
0x1918   :  { %15416 = vmatmul.mubr.msk.f32.vlgmr.msra.gmra.mrb[102].mxu1 %vm3322_vm2, %v21296_v30  ;;  %15397 = vmatprep.mubr.msk.f32.mxu0 %vm3322_vm2, %v21214_v13 }
0x1919   :  { %15418 = vmatprep.mubr.msk.f32.mxu1 %vm3322_vm2, %v21303_v27  ;;  %17195 = vmatpush1.bf16.msra.mxu1 %v21019_v59 }
0x191a   :  { %17196 = vmatprep.subr.bf16.mxu1 %v24090_v1 }
0x191b   :  { %15398 = vmatmul.mubr.msk.f32.gmra.mrb[106].mxu0 %vm3322_vm2, %v21221_v39 }
0x191c   :  { %15419 = vmatmul.mubr.msk.f32.gmra.mrb[104].mxu1 %vm3322_vm2, %v21310_v44  ;;  %15400 = vmatprep.mubr.msk.f32.mxu0 %vm3322_vm2, %v21228_v20 }
0x191d   :  { %15421 = vmatprep.mubr.msk.f32.mxu1 %vm3322_vm2, %v21317_v24  ;;  %17198 = vmatpush1.bf16.msra.mxu1 %v21030_v40 }
0x191e   :  { %17199 = vmatprep.subr.bf16.mxu1 %v24090_v1 }
0x191f   :  { %15401 = vmatmul.mubr.msk.f32.gmra.mrb[108].mxu0 %vm3322_vm2, %v21235_v38 }
0x1920   :  { %15422 = vmatmul.mubr.msk.f32.gmra.mrb[106].mxu1 %vm3322_vm2, %v21324_v23  ;;  %15436 = vmatprep.mubr.msk.f32.mxu0 %vm3322_vm2, %v21289_v56 }
0x1921   :  { %17201 = vmatpush1.bf16.msra.mxu1 %v21047_v32 }
0x1922   :  { %17202 = vmatprep.subr.bf16.mxu1 %v24090_v1 }
0x1925   :  { %17204 = vmatpush1.bf16.msra.mxu1 %v21062_v5 }
0x1926   :  { %17205 = vmatprep.subr.bf16.mxu1 %v24090_v1 }
0x1929   :  { %17207 = vmatpush1.bf16.msra.mxu1 %v21075_v34 }
0x192a   :  { %17208 = vmatprep.subr.bf16.mxu1 %v24090_v1 }
0x192d   :  { %17210 = vmatpush1.bf16.msra.mxu1 %v21085_v55 }
0x192e   :  { %17211 = vmatprep.subr.bf16.mxu1 %v24090_v1 }
0x1931   :  { %17213 = vmatpush1.bf16.msra.mxu1 %v21095_v19 }
0x1932   :  { %17214 = vmatprep.subr.bf16.mxu1 %v24090_v1 }
0x1935   :  { %17216 = vmatpush1.bf16.msra.mxu1 %v21105_v52 }
0x1936   :  { %17217 = vmatprep.subr.bf16.mxu1 %v24090_v1 }
0x1939   :  { %17219 = vmatpush1.bf16.msra.mxu1 %v21116_v16 }
0x193a   :  { %17220 = vmatprep.subr.bf16.mxu1 %v24090_v1 }
0x193d   :  { %17222 = vmatpush1.bf16.msra.mxu1 %v21126_v35 }
0x193e   :  { %17272 = vmatprep.subr.bf16.mxu1 %v20833_v2 }
0x19ea   :  { %v15396_v28 = vpop.f32.mrb[104].mxu0 }
0x19eb   :  { %v5615_v33 = vmul.f32 2.0, %v15396_v28  ;;  %v15417_v15 = vpop.f32.mrb[102].mxu1  ;;  %v5585_v9 = vpop.f32.mrb[105].mxu0 }
0x19ec   :  { %v5614_v45 = vmul.f32 2.0, %v5585_v9  ;;  %v5692_v61 = vpop.f32.mrb[103].mxu1 }
0x19ed   :  { %v5621_v11 = vsub.f32 %v5615_v33, %v21445_v4  ;;  %v17953_v10 = vpack.i.bf16 %v15417_v15, %v5692_v61  ;;  %v17181_v43 = vpack.c.bf16 %v15417_v15, %v5692_v61 }
0x19ee   :  { %v5620_v46 = vsub.f32 %v5614_v45, %v21447_v7  ;;  %v15399_v6 = vpop.f32.mrb[106].mxu0 }
0x19ef   :  { %17954 = vrot.lane.b32.xlu1 %v17953_v10, %s18868_s24  ;;  %v5617_v1 = vmul.f32 2.0, %v15399_v6  ;;  %v15420_v25 = vpop.f32.mrb[104].mxu1  ;;  %17182 = vmatprep.subr.bf16.mxu0 %v17181_v43  ;;  %v5595_v22 = vpop.f32.mrb[107].mxu0 }
0x19f0   :  { %v17948_v58 = vpack.i.bf16 %v5621_v11, %v5620_v46  ;;  %v5616_v42 = vmul.f32 2.0, %v5595_v22  ;;  %v5702_v28 = vpop.f32.mrb[105].mxu1  ;;  %17184 = vmatpush3.bf16.msra.mxu0 %v17181_v43  ;;  %v24253_v22 = vpack.i.bf16 %v21484_v41, %v21486_v31 }
0x19f1   :  { %v5623_v9 = vsub.f32 %v5617_v1, %v21451_v0  ;;  %v17963_v35 = vpack.i.bf16 %v15420_v25, %v5702_v28  ;;  %v17185_v16 = vpack.c.bf16 %v15420_v25, %v5702_v28 }
0x19f2   :  { %v5622_v33 = vsub.f32 %v5616_v42, %v21453_v62  ;;  %17949 = vrot.lane.b32.xlu0 %v17948_v58, %s18869_s25  ;;  %v15402_v15 = vpop.f32.mrb[108].mxu0 }
0x19f3   :  { %v15423_v45 = vpop.f32.mrb[106].mxu1  ;;  %17186 = vmatprep.subr.bf16.mxu0 %v17185_v16  ;;  %v5605_v61 = vpop.f32.mrb[109].mxu0  ;;  %v5619_v58 = vmul.f32 2.0, %v15402_v15 }
0x19f4   :  { %v17968_v6 = vpack.i.bf16 %v5623_v9, %v5622_v33  ;;  %v5712_v10 = vpop.f32.mrb[107].mxu1  ;;  %17188 = vmatpush3.bf16.msra.mxu0 %v17185_v16  ;;  %v5618_v25 = vmul.f32 2.0, %v5605_v61 }
0x19f5   :  { %v17189_v52 = vpack.c.bf16 %v15423_v45, %v5712_v10  ;;  %v5625_v46 = vsub.f32 %v5619_v58, %v21457_v57 }
0x19f6   :  { %17959 = vrot.lane.b32.xlu0 %v24253_v22, %s18867_s23  ;;  %17969 = vrot.lane.b32.xlu1 %v17968_v6, %s18869_s25  ;;  %v5624_v42 = vsub.f32 %v5618_v25, %v21459_v12 }
0x19f7   :  { %17190 = vmatprep.subr.bf16.mxu0 %v17189_v52 }
0x19f8   :  { %17192 = vmatpush3.bf16.msra.mxu0 %v17189_v52  ;;  %v17945_v52 = vpop.permute.xlu1 %17944 }
0x19f9   :  { %v17946_v16 = vunpack.i.l.bf16 %v17945_v52  ;;  %v17947_v9 = vunpack.i.h.bf16 %v17945_v52 }
0x19fa   :  { %17964 = vrot.lane.b32.xlu0 %v17963_v35, %s18868_s24  ;;  %5842 = vrot.lane.b32.xlu1 %v21494_v54, %s18867_s23 }
0x19fb   :  { %15437 = vmatmul.mubr.msk.f32.vlgmr.msra.gmra.mrb[110].mxu0 %vm3322_vm2, %v21296_v30  ;;  %v5900_v61 = vsel %vm3075_vm0, %v21447_v7, %v17946_v16  ;;  %v5901_v52 = vsel %vm3075_vm0, %v21445_v4, %v17947_v9 }
0x19fc   :  { %15439 = vmatprep.mubr.msk.f32.mxu0 %vm3322_vm2, %v21303_v27 }
0x19fe   :  { %5890 = vrot.lane.b32.xlu1 %v5712_v10, %s18868_s24  ;;  %5866 = vrot.lane.b32.xlu0 %v5624_v42, %s18869_s25 }
0x19ff   :  { %15440 = vmatmul.mubr.msk.f32.gmra.mrb[112].mxu0 %vm3322_vm2, %v21310_v44 }
0x1a00   :  { %15442 = vmatprep.mubr.msk.f32.mxu0 %vm3322_vm2, %v21317_v24 }
0x1a02   :  { %5868 = vrot.lane.b32.xlu1 %v5625_v46, %s18869_s25  ;;  %5844 = vrot.lane.b32.xlu0 %v21492_v37, %s18867_s23 }
0x1a03   :  { %15443 = vmatmul.mubr.msk.f32.gmra.mrb[114].mxu0 %vm3322_vm2, %v21324_v23 }
0x1a04   :  { %15457 = vmatprep.mubr.msk.f32.mxu0 %vm3322_vm2, %v21242_v51 }
0x1a06   :  { %5892 = vrot.lane.b32.xlu0 %v15423_v45, %s18868_s24 }
0x1a61   :  { %v17955_v11 = vpop.permute.xlu1 %17954 }
0x1a62   :  { %v17956_v45 = vunpack.i.l.bf16 %v17955_v11 }
0x1a64   :  { %v17950_v1 = vpop.permute.xlu0 %17949 }
0x1a65   :  { %v17951_v35 = vunpack.i.l.bf16 %v17950_v1  ;;  %v17952_v6 = vunpack.i.h.bf16 %v17950_v1  ;;  %v17957_v1 = vunpack.i.h.bf16 %v17955_v11 }
0x1a67   :  { %v5906_v25 = vsel %vm3174_vm1, %v5900_v61, %v17951_v35 }
0x1a68   :  { %v17960_v43 = vpop.permute.xlu0 %17959  ;;  %v17970_v58 = vpop.permute.xlu1 %17969  ;;  %v5912_v7 = vsel %vm4565_vm9, %v5906_v25, %v17956_v45 }
0x1a69   :  { %v17971_v4 = vunpack.i.l.bf16 %v17970_v58 }
0x1a6c   :  { %v17965_v19 = vpop.permute.xlu0 %17964 }
0x1a6d   :  { %v17967_v25 = vunpack.i.h.bf16 %v17965_v19 }
0x1a70   :  { %v5867_v61 = vpop.permute.xlu0 %5866 }
0x1ace   :  { %v15438_v28 = vpop.f32.mrb[110].mxu0 }
0x1acf   :  { %v5817_v33 = vmul.f32 2.0, %v15438_v28  ;;  %v5787_v15 = vpop.f32.mrb[111].mxu0  ;;  %v17961_v28 = vunpack.i.l.bf16 %v17960_v43 }
0x1ad0   :  { %v5816_v10 = vmul.f32 2.0, %v5787_v15  ;;  %v21593_v15 = vld [vmem:[%s24020_s12 + $0x10] sm:$0xf] }
0x1ad1   :  { %v5823_v22 = vsub.f32 %v5817_v33, %v21475_v21  ;;  %v5907_v21 = vsel %vm3174_vm1, %v5901_v52, %v17952_v6  ;;  %v5902_v11 = vsel %vm3075_vm0, %v21453_v62, %v17961_v28 }
0x1ad2   :  { %v5822_v42 = vsub.f32 %v5816_v10, %v21477_v63  ;;  %v15441_v46 = vpop.f32.mrb[112].mxu0  ;;  %v5913_v33 = vsel %vm4565_vm9, %v5907_v21, %v17957_v1  ;;  %v13375_v1 = vmul.f32 -1.442695, %v21419_v18 }
0x1ad3   :  { %v5819_v55 = vmul.f32 2.0, %v15441_v46  ;;  %v5797_v34 = vpop.f32.mrb[113].mxu0 }
0x1ad4   :  { %v5818_v5 = vmul.f32 2.0, %v5797_v34  ;;  %13405 = vmatprep.mubr.msk.f32.mxu1 %vm3075_vm0, %v5822_v42  ;;  %18507 = vpow2.f32 %v13375_v1 }
0x1ad5   :  { %v5825_v16 = vsub.f32 %v5819_v55, %v21484_v41  ;;  %6001 = vmatmul.mubr.f32.vlgmr.msra.gmra.mrb[108].mxu1 %v5912_v7  ;;  %v17962_v55 = vunpack.i.h.bf16 %v17960_v43  ;;  %v5843_v41 = vpop.permute.xlu1 %5842  ;;  %v5908_v43 = vsel %vm3174_vm1, %v5902_v11, %v17971_v4  ;;  %v13379_v4 = vmul.f32 -1.442695, %v21435_v53 }
0x1ad6   :  { %v5824_v63 = vsub.f32 %v5818_v5, %v21486_v31  ;;  %v15444_v35 = vpop.f32.mrb[114].mxu0  ;;  %13406 = vmatprep.mubr.msk.f32.mxu1 %vm3075_vm0, %v5823_v22  ;;  %17274 = vmatpush3.bf16.msra.mxu1 %v20833_v2  ;;  %v17966_v5 = vunpack.i.l.bf16 %v17965_v19  ;;  %v17972_v22 = vunpack.i.h.bf16 %v17970_v58  ;;  %v5904_v46 = vsel %vm3075_vm0, %v21459_v12, %v5843_v41 }
0x1ad7   :  { %v5821_v9 = vmul.f32 2.0, %v15444_v35  ;;  %v5807_v34 = vpop.f32.mrb[115].mxu0  ;;  %15533 = vmatprep.subr.msk.mxu1 %vm3912_vm3, %v21593_v15  ;;  %v5903_v62 = vsel %vm3075_vm0, %v21451_v0, %v17962_v55  ;;  %v5910_v52 = vsel %vm3174_vm1, %v5904_v46, %v5867_v61  ;;  %v13380_v55 = vmul.f32 -1.442695, %v21432_v60 }
0x1ad8   :  { %v5820_v31 = vmul.f32 2.0, %v5807_v34  ;;  %v5914_v45 = vsel %vm4565_vm9, %v5908_v43, %v17966_v5 }
0x1ad9   :  { %v5827_v6 = vsub.f32 %v5821_v9, %v21492_v37  ;;  %6006 = vmatmul.mubr.f32.gmra.mrb[110].mxu1 %v5913_v33  ;;  %v5891_v42 = vpop.permute.xlu1 %5890  ;;  %v5845_v37 = vpop.permute.xlu0 %5844 }
0x1ada   :  { %v5826_v10 = vsub.f32 %v5820_v31, %v21494_v54  ;;  %13407 = vmatprep.mubr.msk.f32.mxu1 %vm3075_vm0, %v5824_v63  ;;  %15534 = vmatpush3.msk.msra.mxu1 %vm3912_vm3, %v21593_v15  ;;  %v5909_v54 = vsel %vm3174_vm1, %v5903_v62, %v17972_v22  ;;  %v5905_v0 = vsel %vm3075_vm0, %v21457_v57, %v5845_v37  ;;  %v13377_v63 = vmul.f32 -1.442695, %v21427_v49 }
0x1adb   :  { %v5915_v58 = vsel %vm4565_vm9, %v5909_v54, %v17967_v25  ;;  %v5916_v28 = vsel %vm4565_vm9, %v5910_v52, %v5891_v42  ;;  %v13378_v57 = vmul.f32 -1.442695, %v21424_v48 }
0x1add   :  { %6011 = vmatmul.mubr.f32.gmra.mrb[112].mxu1 %v5914_v45  ;;  %v5869_v19 = vpop.permute.xlu1 %5868  ;;  %v5893_v7 = vpop.permute.xlu0 %5892 }
0x1ade   :  { %13408 = vmatprep.mubr.msk.f32.mxu1 %vm3075_vm0, %v5825_v16  ;;  %v5911_v21 = vsel %vm3174_vm1, %v5905_v0, %v5869_v19  ;;  %v13376_v16 = vmul.f32 -1.442695, %v21416_v17  ;;  %v18508_v35 = vpop.eup %18507  ;;  %v21630_v17 = vld [vmem:[%s24023_s15] ss:$0 sm:$0xff] }
0x1adf   :  { %v5917_v12 = vsel %vm4565_vm9, %v5911_v21, %v5893_v7  ;;  %v5376_v9 = vadd.f32 1.0, %v18508_v35 }
0x1ae0   :  { %18509 = vpow2.f32 %v13376_v16 }
0x1ae1   :  { %6016 = vmatmul.mubr.f32.gmra.mrb[114].mxu1 %v5915_v58  ;;  %18511 = vpow2.f32 %v13377_v63 }
0x1ae2   :  { %13409 = vmatprep.mubr.msk.f32.mxu1 %vm3075_vm0, %v5826_v10  ;;  %18513 = vpow2.f32 %v13378_v57 }
0x1ae3   :  { %18515 = vpow2.f32 %v13379_v4 }
0x1ae4   :  { %18517 = vrcp.f32 %v5376_v9 }
0x1ae5   :  { %6021 = vmatmul.mubr.f32.gmra.mrb[116].mxu1 %v5916_v28 }
0x1ae6   :  { %13410 = vmatprep.mubr.msk.f32.mxu1 %vm3075_vm0, %v5827_v6 }
0x1ae9   :  { %6026 = vmatmul.mubr.f32.gmra.mrb[118].mxu1 %v5917_v12 }
0x1aea   :  { %v18510_v34 = vpop.eup %18509 }
0x1aeb   :  { %v5377_v48 = vadd.f32 1.0, %v18510_v34  ;;  %v18512_v5 = vpop.eup %18511 }
0x1aec   :  { %v5378_v60 = vadd.f32 1.0, %v18512_v5  ;;  %v18514_v11 = vpop.eup %18513 }
0x1aed   :  { %v5379_v22 = vadd.f32 1.0, %v18514_v11  ;;  %v18516_v43 = vpop.eup %18515 }
0x1aee   :  { %v18518_v25 = vpop.eup %18517  ;;  %v5380_v54 = vadd.f32 1.0, %v18516_v43 }
0x1ba8   :  { %v6002_v33 = vpop.f32.mrb[108].mxu1 }
0x1ba9   :  { %v6003_v18 = vadd.f32 %v21630_v17, %v6002_v33  ;;  %v6004_v49 = vpop.f32.mrb[109].mxu1 }
0x1bab   :  { %18519 = vtanh.f32 %v6003_v18 }
0x1bac   :  { %v6007_v41 = vpop.f32.mrb[110].mxu1  ;;  %18521 = vpow2.f32 %v13380_v55 }
0x1bad   :  { %v6008_v53 = vadd.f32 %v21630_v17, %v6007_v41  ;;  %v6009_v31 = vpop.f32.mrb[111].mxu1  ;;  %18523 = vrcp.f32 %v5377_v48 }
0x1baf   :  { %18525 = vtanh.f32 %v6008_v53 }
0x1bb0   :  { %v6012_v61 = vpop.f32.mrb[112].mxu1  ;;  %18527 = vrcp.f32 %v5378_v60 }
0x1bb1   :  { %v6013_v6 = vadd.f32 %v21630_v17, %v6012_v61  ;;  %v6014_v10 = vpop.f32.mrb[113].mxu1 }
0x1bb3   :  { %18529 = vtanh.f32 %v6013_v6 }
0x1bb4   :  { %v6017_v45 = vpop.f32.mrb[114].mxu1  ;;  %18531 = vrcp.f32 %v5379_v22 }
0x1bb5   :  { %v18520_v62 = vpop.eup %18519  ;;  %v6018_v42 = vadd.f32 %v21630_v17, %v6017_v45  ;;  %v6019_v37 = vpop.f32.mrb[115].mxu1 }
0x1bb6   :  { %v6037_v46 = vmul.f32 %v18520_v62, %v18518_v25  ;;  %v18522_v58 = vpop.eup %18521 }
0x1bb7   :  { %18533 = vtanh.f32 %v6018_v42  ;;  %v18524_v52 = vpop.eup %18523  ;;  %v5381_v12 = vadd.f32 1.0, %v18522_v58 }
0x1bb8   :  { %v6043_v19 = vsub.f32 0.0, %v6037_v46  ;;  %v6022_v0 = vpop.f32.mrb[116].mxu1  ;;  %18535 = vrcp.f32 %v5380_v54 }
0x1bb9   :  { %v18526_v28 = vpop.eup %18525  ;;  %v6023_v7 = vadd.f32 %v21630_v17, %v6022_v0  ;;  %v6024_v21 = vpop.f32.mrb[117].mxu1 }
0x1bba   :  { %v6038_v1 = vmul.f32 %v18526_v28, %v18524_v52  ;;  %v18528_v16 = vpop.eup %18527  ;;  %v6049_v63 = vmul.f32 0.125, %v6043_v19 }
0x1bbb   :  { %18537 = vtanh.f32 %v6023_v7 }
0x1bbc   :  { %v6044_v57 = vsub.f32 0.0, %v6038_v1  ;;  %v6027_v35 = vpop.f32.mrb[118].mxu1  ;;  %18539 = vrcp.f32 %v5381_v12  ;;  %v21639_v49 = vadd.f32 %v6049_v63, %v21181_v8  ;;  %v21705_v1 = vld [vmem:[%s24018_s11 + $0x8] sm:$0xff]  ;;  %v21721_v63 = vld [vmem:[%s24018_s11 + $0x18] sm:$0xff] }
0x1bbd   :  { %v18530_v4 = vpop.eup %18529  ;;  %v6028_v9 = vadd.f32 %v21630_v17, %v6027_v35  ;;  %v6029_v34 = vpop.f32.mrb[119].mxu1  ;;  %v21735_v35 = vld [vmem:[%s24018_s11 + $0x28] sm:$0xff] }
0x1bbe   :  { %v6050_v33 = vmul.f32 0.125, %v6044_v57  ;;  %v6039_v55 = vmul.f32 %v18530_v4, %v18528_v16  ;;  %v18532_v18 = vpop.eup %18531  ;;  %24254 = vst [vmem:[#allocation24_spill] sm:$0xff] %v21639_v49  ;;  %v21714_v16 = vld [vmem:[%s24018_s11 + $0x10] sm:$0xff]  ;;  %v21728_v57 = vld [vmem:[%s24018_s11 + $0x20] sm:$0xff] }
0x1bbf   :  { %18541 = vtanh.f32 %v6028_v9  ;;  %v21754_v4 = vld [vmem:[%s24018_s11 + $0x30] sm:$0xff] }
0x1bc0   :  { %v21642_v48 = vadd.f32 %v6050_v33, %v21184_v29  ;;  %v6045_v5 = vsub.f32 0.0, %v6039_v55 }
0x1bc1   :  { %v18534_v41 = vpop.eup %18533 }
0x1bc2   :  { %24255 = vst [vmem:[#allocation25_spill] sm:$0xff] %v21642_v48  ;;  %v6040_v53 = vmul.f32 %v18534_v41, %v18532_v18  ;;  %v17223_v31 = vpack.c.bf16 %v21642_v48, %v21639_v49  ;;  %v18536_v60 = vpop.eup %18535  ;;  %v6051_v11 = vmul.f32 0.125, %v6045_v5 }
0x1bc4   :  { %v6046_v61 = vsub.f32 0.0, %v6040_v53  ;;  %17224 = vmatprep.subr.bf16.mxu0 %v17223_v31  ;;  %v21647_v25 = vadd.f32 %v6051_v11, %v21189_v50 }
0x1bc5   :  { %v18538_v6 = vpop.eup %18537  ;;  %17226 = vmatpush3.bf16.msra.mxu0 %v17223_v31 }
0x1bc6   :  { %v6052_v10 = vmul.f32 0.125, %v6046_v61  ;;  %v6041_v22 = vmul.f32 %v18538_v6, %v18536_v60  ;;  %v18540_v43 = vpop.eup %18539  ;;  %24256 = vst [vmem:[#allocation26_spill] sm:$0xff] %v21647_v25 }
0x1bc8   :  { %v21650_v45 = vadd.f32 %v6052_v10, %v21192_v26  ;;  %v6047_v62 = vsub.f32 0.0, %v6041_v22 }
0x1bc9   :  { %v18542_v42 = vpop.eup %18541 }
0x1bca   :  { %24257 = vst [vmem:[#allocation27_spill] sm:$0xff] %v21650_v45  ;;  %v6042_v37 = vmul.f32 %v18542_v42, %v18540_v43  ;;  %v17227_v54 = vpack.c.bf16 %v21650_v45, %v21647_v25  ;;  %v6053_v46 = vmul.f32 0.125, %v6047_v62 }
0x1bcc   :  { %v6048_v58 = vsub.f32 0.0, %v6042_v37  ;;  %17228 = vmatprep.subr.bf16.mxu0 %v17227_v54  ;;  %v21655_v19 = vadd.f32 %v6053_v46, %v21197_v14 }
0x1bcd   :  { %17230 = vmatpush3.bf16.msra.mxu0 %v17227_v54 }
0x1bce   :  { %v6054_v52 = vmul.f32 0.125, %v6048_v58  ;;  %24258 = vst [vmem:[#allocation28_spill] sm:$0xff] %v21655_v19  ;;  %v21779_v58 = vld [vmem:[%s24018_s11 + $0x38] sm:$0xff] }
0x1bd0   :  { %v21658_v0 = vadd.f32 %v6054_v52, %v21200_v3  ;;  %v21786_v52 = vld [vmem:[%s24018_s11 + $0x40] sm:$0xff] }
0x1bd2   :  { %24259 = vst [vmem:[#allocation29_spill] sm:$0xff] %v21658_v0  ;;  %v17231_v28 = vpack.c.bf16 %v21658_v0, %v21655_v19 }
0x1bd4   :  { %17232 = vmatprep.subr.bf16.mxu0 %v17231_v28 }
0x1bd5   :  { %17234 = vmatpush3.bf16.msra.mxu0 %v17231_v28  ;;  %v21793_v28 = vld [vmem:[%s24018_s11 + $0x48] sm:$0xff] }
0x1bd8   :  { %15458 = vmatmul.mubr.msk.f32.vlgmr.msra.gmra.mrb[116].mxu0 %vm3322_vm2, %v21207_v47 }
0x1bd9   :  { %15460 = vmatprep.mubr.msk.f32.mxu0 %vm3322_vm2, %v21214_v13 }
0x1bdc   :  { %15461 = vmatmul.mubr.msk.f32.gmra.mrb[118].mxu0 %vm3322_vm2, %v21221_v39 }
0x1bdd   :  { %15463 = vmatprep.mubr.msk.f32.mxu0 %vm3322_vm2, %v21228_v20 }
0x1be0   :  { %15464 = vmatmul.mubr.msk.f32.gmra.mrb[120].mxu0 %vm3322_vm2, %v21235_v38 }
0x1be1   :  { %15478 = vmatprep.mubr.msk.f32.mxu0 %vm3322_vm2, %v21242_v51 }
0x1cab   :  { %v21674_v7 = vpop.f32.mrb[116].mxu0 }
0x1cac   :  { %6473 = vrot.lane.b32.xlu0 %v21674_v7, %s18863_s1  ;;  %v21678_v47 = vpop.f32.mrb[117].mxu0 }
0x1cad   :  { %v17235_v13 = vpack.c.bf16 %v21674_v7, %v21678_v47  ;;  %6471 = vrot.lane.b32.xlu1 %v21678_v47, %s18863_s1 }
0x1caf   :  { %v21684_v39 = vpop.f32.mrb[118].mxu0  ;;  %17236 = vmatprep.subr.bf16.mxu0 %v17235_v13 }
0x1cb0   :  { %17238 = vmatpush3.bf16.msra.mxu0 %v17235_v13  ;;  %6477 = vrot.lane.b32.xlu0 %v21684_v39, %s18863_s1  ;;  %v21688_v20 = vpop.f32.mrb[119].mxu0 }
0x1cb1   :  { %v17239_v38 = vpack.c.bf16 %v21684_v39, %v21688_v20 }
0x1cb3   :  { %v21692_v51 = vpop.f32.mrb[120].mxu0  ;;  %17240 = vmatprep.subr.bf16.mxu0 %v17239_v38 }
0x1cb4   :  { %6475 = vrot.lane.b32.xlu0 %v21688_v20, %s18863_s1  ;;  %v21696_v21 = vpop.f32.mrb[121].mxu0  ;;  %17242 = vmatpush3.bf16.msra.mxu0 %v17239_v38 }
0x1cb5   :  { %v17243_v12 = vpack.c.bf16 %v21692_v51, %v21696_v21 }
0x1cb7   :  { %17244 = vmatprep.subr.bf16.mxu0 %v17243_v12 }
0x1cb8   :  { %6481 = vrot.lane.b32.xlu0 %v21692_v51, %s18863_s1  ;;  %17246 = vmatpush3.bf16.msra.mxu0 %v17243_v12 }
0x1cb9   :  { %17248 = vmatprep.subr.bf16.mxu0 %v17235_v13 }
0x1cbb   :  { %15479 = vmatmul.mubr.msk.f32.vlgmr.msra.gmra.mrb[122].mxu0 %vm3322_vm2, %v21705_v1 }
0x1cbc   :  { %6479 = vrot.lane.b32.xlu0 %v21696_v21, %s18863_s1  ;;  %17250 = vmatpush3.bf16.msra.mxu0 %v17235_v13  ;;  %v21800_v13 = vld [vmem:[%s24018_s11 + $0x50] sm:$0xff] }
0x1cbd   :  { %17252 = vmatprep.subr.bf16.mxu0 %v17239_v38  ;;  %15481 = vmatprep.mubr.msk.f32.mxu0 %vm3322_vm2, %v21714_v16 }
0x1cbf   :  { %15482 = vmatmul.mubr.msk.f32.gmra.mrb[124].mxu0 %vm3322_vm2, %v21721_v63 }
0x1cc0   :  { %17254 = vmatpush3.bf16.msra.mxu0 %v17239_v38  ;;  %15484 = vmatprep.mubr.msk.f32.mxu0 %vm3322_vm2, %v21728_v57  ;;  %v21807_v38 = vld [vmem:[%s24018_s11 + $0x58] sm:$0xff] }
0x1cc1   :  { %17256 = vmatprep.subr.bf16.mxu0 %v17243_v12 }
0x1cc3   :  { %15485 = vmatmul.mubr.msk.f32.gmra.mrb[126].mxu0 %vm3322_vm2, %v21735_v35 }
0x1cc4   :  { %17258 = vmatpush3.bf16.msra.mxu0 %v17243_v12  ;;  %15499 = vmatprep.mubr.msk.f32.mxu0 %vm3322_vm2, %v21289_v56  ;;  %v21814_v12 = vld [vmem:[%s24018_s11] sm:$0xff] }
0x1cc7   :  { %15500 = vmatmul.mubr.msk.f32.vlgmr.msra.gmra.mrb[128].mxu0 %vm3322_vm2, %v21296_v30 }
0x1cc8   :  { %15502 = vmatprep.mubr.msk.f32.mxu0 %vm3322_vm2, %v21303_v27 }
0x1ccb   :  { %15503 = vmatmul.mubr.msk.f32.gmra.mrb[130].mxu0 %vm3322_vm2, %v21310_v44 }
0x1ccc   :  { %15505 = vmatprep.mubr.msk.f32.mxu0 %vm3322_vm2, %v21317_v24 }
0x1ccf   :  { %15506 = vmatmul.mubr.msk.f32.gmra.mrb[132].mxu0 %vm3322_vm2, %v21324_v23 }
0x1cd0   :  { %15520 = vmatprep.mubr.msk.f32.mxu0 %vm3322_vm2, %v21754_v4 }
0x1d8e   :  { %v15480_v56 = vpop.f32.mrb[122].mxu0 }
0x1d8f   :  { %v6252_v30 = vmul.f32 2.0, %v15480_v56  ;;  %v6222_v27 = vpop.f32.mrb[123].mxu0 }
0x1d90   :  { %v6251_v9 = vmul.f32 2.0, %v6222_v27 }
0x1d91   :  { %v6258_v44 = vsub.f32 %v6252_v30, %v21642_v48 }
0x1d92   :  { %v6257_v34 = vsub.f32 %v6251_v9, %v21639_v49  ;;  %v15483_v24 = vpop.f32.mrb[124].mxu0 }
0x1d93   :  { %v6254_v33 = vmul.f32 2.0, %v15483_v24  ;;  %6497 = vrot.lane.b32.xlu0 %v6258_v44, %s18864_s29  ;;  %v6232_v23 = vpop.f32.mrb[125].mxu0 }
0x1d94   :  { %v6253_v55 = vmul.f32 2.0, %v6232_v23  ;;  %6495 = vrot.lane.b32.xlu1 %v6257_v34, %s18864_s29 }
0x1d95   :  { %v6260_v18 = vsub.f32 %v6254_v33, %v21650_v45 }
0x1d96   :  { %v6259_v5 = vsub.f32 %v6253_v55, %v21647_v25  ;;  %v15486_v41 = vpop.f32.mrb[126].mxu0 }
0x1d97   :  { %6501 = vrot.lane.b32.xlu0 %v6260_v18, %s18864_s29  ;;  %v6242_v53 = vpop.f32.mrb[127].mxu0  ;;  %v6256_v31 = vmul.f32 2.0, %v15486_v41 }
0x1d98   :  { %6499 = vrot.lane.b32.xlu1 %v6259_v5, %s18864_s29  ;;  %v6255_v60 = vmul.f32 2.0, %v6242_v53 }
0x1d99   :  { %v6262_v10 = vsub.f32 %v6256_v31, %v21658_v0 }
0x1d9a   :  { %v15501_v11 = vpop.f32.mrb[128].mxu0  ;;  %v6261_v22 = vsub.f32 %v6255_v60, %v21655_v19 }
0x1d9b   :  { %6521 = vrot.lane.b32.xlu0 %v15501_v11, %s18865_s0  ;;  %v6329_v61 = vpop.f32.mrb[129].mxu0 }
0x1d9c   :  { %v17259_v6 = vpack.c.bf16 %v15501_v11, %v6329_v61  ;;  %6519 = vrot.lane.b32.xlu1 %v6329_v61, %s18865_s0  ;;  %v6472_v11 = vpop.permute.xlu1 %6471 }
0x1d9e   :  { %v15504_v43 = vpop.f32.mrb[130].mxu0  ;;  %17260 = vmatprep.subr.bf16.mxu0 %v17259_v6 }
0x1d9f   :  { %6505 = vrot.lane.b32.xlu0 %v6262_v10, %s18864_s29  ;;  %v6339_v62 = vpop.f32.mrb[131].mxu0  ;;  %17262 = vmatpush3.bf16.msra.mxu0 %v17259_v6 }
0x1da0   :  { %v17263_v42 = vpack.c.bf16 %v15504_v43, %v6339_v62  ;;  %6503 = vrot.lane.b32.xlu1 %v6261_v22, %s18864_s29 }
0x1da2   :  { %v15507_v37 = vpop.f32.mrb[132].mxu0  ;;  %17264 = vmatprep.subr.bf16.mxu0 %v17263_v42 }
0x1da3   :  { %6525 = vrot.lane.b32.xlu0 %v15504_v43, %s18865_s0  ;;  %v6349_v54 = vpop.f32.mrb[133].mxu0  ;;  %17266 = vmatpush3.bf16.msra.mxu0 %v17263_v42 }
0x1da4   :  { %v17267_v46 = vpack.c.bf16 %v15507_v37, %v6349_v54  ;;  %6523 = vrot.lane.b32.xlu1 %v6339_v62, %s18865_s0 }
0x1da6   :  { %17268 = vmatprep.subr.bf16.mxu0 %v17267_v46 }
0x1da7   :  { %6529 = vrot.lane.b32.xlu0 %v15507_v37, %s18865_s0  ;;  %17270 = vmatpush3.bf16.msra.mxu0 %v17267_v46 }
0x1da8   :  { %6527 = vrot.lane.b32.xlu1 %v6349_v54, %s18865_s0 }
0x1daa   :  { %15521 = vmatmul.mubr.msk.f32.vlgmr.msra.gmra.mrb[134].mxu0 %vm3322_vm2, %v21779_v58 }
0x1dab   :  { %15523 = vmatprep.mubr.msk.f32.mxu0 %vm3322_vm2, %v21786_v52 }
0x1dae   :  { %15524 = vmatmul.mubr.msk.f32.gmra.mrb[136].mxu0 %vm3322_vm2, %v21793_v28 }
0x1daf   :  { %15526 = vmatprep.mubr.msk.f32.mxu0 %vm3322_vm2, %v21800_v13 }
0x1db2   :  { %15527 = vmatmul.mubr.msk.f32.gmra.mrb[138].mxu0 %vm3322_vm2, %v21807_v38 }
0x1db3   :  { %15556 = vmatprep.mubr.msk.f32.mxu0 %vm3322_vm2, %v21814_v12 }
0x1e06   :  { %v6496_v6 = vpop.permute.xlu1 %6495 }
0x1e0a   :  { %v6500_v22 = vpop.permute.xlu1 %6499 }
0x1e0e   :  { %v6520_v62 = vpop.permute.xlu1 %6519 }
0x1e12   :  { %v6504_v42 = vpop.permute.xlu1 %6503 }
0x1e16   :  { %v6524_v37 = vpop.permute.xlu1 %6523 }
0x1e1a   :  { %v6528_v46 = vpop.permute.xlu1 %6527 }
0x1e7d   :  { %v15522_v56 = vpop.f32.mrb[134].mxu0 }
0x1e7e   :  { %v6454_v30 = vmul.f32 2.0, %v15522_v56  ;;  %v6424_v27 = vpop.f32.mrb[135].mxu0 }
0x1e7f   :  { %v6453_v9 = vmul.f32 2.0, %v6424_v27  ;;  %v6561_v27 = vsel %vm3859_vm4, %v21639_v49, %v6472_v11 }
0x1e80   :  { %v6460_v44 = vsub.f32 %v6454_v30, %v21674_v7 }
0x1e81   :  { %v6459_v34 = vsub.f32 %v6453_v9, %v21678_v47  ;;  %v15525_v24 = vpop.f32.mrb[136].mxu0 }
0x1e82   :  { %v6456_v33 = vmul.f32 2.0, %v15525_v24  ;;  %v6434_v23 = vpop.f32.mrb[137].mxu0  ;;  %6545 = vrot.lane.b32.xlu1 %v6460_v44, %s18866_s21  ;;  %v6567_v44 = vsel %vm3866_vm5, %v6561_v27, %v6496_v6 }
0x1e83   :  { %v6455_v55 = vmul.f32 2.0, %v6434_v23  ;;  %v6573_v24 = vsel %vm3873_vm6, %v6567_v44, %v6520_v62 }
0x1e84   :  { %v6462_v18 = vsub.f32 %v6456_v33, %v21684_v39  ;;  %v6474_v39 = vpop.permute.xlu0 %6473 }
0x1e85   :  { %v6461_v5 = vsub.f32 %v6455_v55, %v21688_v20  ;;  %v15528_v41 = vpop.f32.mrb[138].mxu0  ;;  %v6562_v9 = vsel %vm3859_vm4, %v21642_v48, %v6474_v39 }
0x1e86   :  { %v6458_v53 = vmul.f32 2.0, %v15528_v41  ;;  %v6444_v31 = vpop.f32.mrb[139].mxu0  ;;  %6543 = vrot.lane.b32.xlu1 %v6459_v34, %s18866_s21 }
0x1e87   :  { %v6457_v60 = vmul.f32 2.0, %v6444_v31 }
0x1e88   :  { %v6464_v7 = vsub.f32 %v6458_v53, %v21692_v51  ;;  %v6478_v20 = vpop.permute.xlu0 %6477 }
0x1e89   :  { %v6463_v47 = vsub.f32 %v6457_v60, %v21696_v21  ;;  %v6564_v31 = vsel %vm3859_vm4, %v21650_v45, %v6478_v20 }
0x1e8a   :  { %6553 = vrot.lane.b32.xlu0 %v6464_v7, %s18866_s21  ;;  %6549 = vrot.lane.b32.xlu1 %v6462_v18, %s18866_s21 }
0x1e8c   :  { %v6476_v61 = vpop.permute.xlu0 %6475 }
0x1e8d   :  { %v6563_v53 = vsel %vm3859_vm4, %v21647_v25, %v6476_v61 }
0x1e8e   :  { %6547 = vrot.lane.b32.xlu1 %v6461_v5, %s18866_s21  ;;  %v6569_v60 = vsel %vm3866_vm5, %v6563_v53, %v6500_v22 }
0x1e8f   :  { %v6575_v39 = vsel %vm3873_vm6, %v6569_v60, %v6524_v37 }
0x1e90   :  { %v6482_v10 = vpop.permute.xlu0 %6481 }
0x1e91   :  { %v6566_v20 = vsel %vm3859_vm4, %v21658_v0, %v6482_v10 }
0x1e92   :  { %6551 = vrot.lane.b32.xlu1 %v6463_v47, %s18866_s21 }
0x1e94   :  { %v6480_v43 = vpop.permute.xlu0 %6479 }
0x1e98   :  { %v6498_v51 = vpop.permute.xlu0 %6497 }
0x1e99   :  { %v6568_v34 = vsel %vm3866_vm5, %v6562_v9, %v6498_v51  ;;  %v6565_v51 = vsel %vm3859_vm4, %v21655_v19, %v6480_v43 }
0x1e9a   :  { %v6571_v22 = vsel %vm3866_vm5, %v6565_v51, %v6504_v42 }
0x1e9c   :  { %v6502_v21 = vpop.permute.xlu0 %6501 }
0x1e9d   :  { %v6570_v47 = vsel %vm3866_vm5, %v6564_v31, %v6502_v21 }
0x1ea0   :  { %v6522_v54 = vpop.permute.xlu0 %6521 }
0x1ea1   :  { %v6574_v23 = vsel %vm3873_vm6, %v6568_v34, %v6522_v54  ;;  %v6577_v54 = vsel %vm3873_vm6, %v6571_v22, %v6528_v46  ;;  %v21874_v46 = vld [vmem:[%s24021_s13] ss:$0 sm:$0xff] }
0x1ea4   :  { %v6506_v56 = vpop.permute.xlu0 %6505 }
0x1ea5   :  { %v6572_v37 = vsel %vm3866_vm5, %v6566_v20, %v6506_v56 }
0x1ea8   :  { %v6526_v55 = vpop.permute.xlu0 %6525 }
0x1ea9   :  { %v6576_v6 = vsel %vm3873_vm6, %v6570_v47, %v6526_v55 }
0x1eac   :  { %v6530_v7 = vpop.permute.xlu0 %6529 }
0x1ead   :  { %v6578_v27 = vsel %vm3873_vm6, %v6572_v37, %v6530_v7 }
0x1ef4   :  { %v6546_v30 = vpop.permute.xlu1 %6545 }
0x1ef5   :  { %v6580_v5 = vsel %vm3880_vm7, %v6574_v23, %v6546_v30 }
0x1ef8   :  { %v6544_v33 = vpop.permute.xlu1 %6543 }
0x1ef9   :  { %v6579_v18 = vsel %vm3880_vm7, %v6573_v24, %v6544_v33 }
0x1efa   :  { %15535 = vmatprep.mubr.msk.f32.mxu1 %vm3893_vm8, %v6579_v18 }
0x1efb   :  { %15536 = vmatmul.mubr.msk.f32.vlgmr.msra.gmra.mrb[120].mxu1 %vm3893_vm8, %v6580_v5 }
0x1efc   :  { %v6550_v41 = vpop.permute.xlu1 %6549  ;;  %v6554_v21 = vpop.permute.xlu0 %6553 }
0x1efd   :  { %v6582_v61 = vsel %vm3880_vm7, %v6576_v6, %v6550_v41  ;;  %v6584_v9 = vsel %vm3880_vm7, %v6578_v27, %v6554_v21 }
0x1f00   :  { %v6548_v11 = vpop.permute.xlu1 %6547 }
0x1f01   :  { %v6581_v62 = vsel %vm3880_vm7, %v6575_v39, %v6548_v11 }
0x1f02   :  { %15538 = vmatprep.mubr.msk.f32.mxu1 %vm3893_vm8, %v6581_v62 }
0x1f03   :  { %15539 = vmatmul.mubr.msk.f32.gmra.mrb[122].mxu1 %vm3893_vm8, %v6582_v61 }
0x1f04   :  { %v6552_v30 = vpop.permute.xlu1 %6551 }
0x1f05   :  { %v6583_v43 = vsel %vm3880_vm7, %v6577_v54, %v6552_v30 }
0x1f06   :  { %15541 = vmatprep.mubr.msk.f32.mxu1 %vm3893_vm8, %v6583_v43 }
0x1f07   :  { %15542 = vmatmul.mubr.msk.f32.gmra.mrb[124].mxu1 %vm3893_vm8, %v6584_v9 }
0x1f08   :  { %15577 = vmatprep.mubr.msk.f32.mxu1 %vm3322_vm2, %v21814_v12 }
0x1fce   :  { %v15537_v10 = vpop.f32.mrb[120].mxu1 }
0x1fcf   :  { %v21869_v42 = vadd.f32 %v21413_v36, %v15537_v10  ;;  %v6669_v56 = vpop.f32.mrb[121].mxu1 }
0x1fd0   :  { %v21877_v44 = vadd.f32 %v21874_v46, %v6669_v56 }
0x1fd1   :  { %18543 = vtanh.f32 %v21869_v42 }
0x1fd2   :  { %18545 = vtanh.f32 %v21877_v44 }
0x1fd6   :  { %v15540_v34 = vpop.f32.mrb[122].mxu1 }
0x1fd7   :  { %v21882_v24 = vadd.f32 %v21874_v46, %v15540_v34  ;;  %v6679_v33 = vpop.f32.mrb[123].mxu1 }
0x1fd8   :  { %v21885_v36 = vadd.f32 %v21874_v46, %v6679_v33 }
0x1fd9   :  { %18547 = vtanh.f32 %v21882_v24 }
0x1fda   :  { %18549 = vtanh.f32 %v21885_v36  ;;  %v15543_v23 = vpop.f32.mrb[124].mxu1 }
0x1fdb   :  { %v18544_v55 = vpop.eup %18543  ;;  %v21890_v18 = vadd.f32 %v21874_v46, %v15543_v23  ;;  %v6689_v5 = vpop.f32.mrb[125].mxu1 }
0x1fdc   :  { %v18546_v41 = vpop.eup %18545  ;;  %v21893_v53 = vadd.f32 %v21874_v46, %v6689_v5  ;;  %6748 = vrot.lane.b32.xlu0 %v18544_v55, %s18862_s6  ;;  %v24260_v55 = vmov 0.0|0.0   ;;  %v24261_v5 = vld [vmem:[#allocation10_spill] sm:$0xff] }
0x1fdd   :  { %18551 = vtanh.f32 %v21890_v18  ;;  %6746 = vrot.lane.b32.xlu1 %v18546_v41, %s18862_s6  ;;  %v24262_v41 = vld [vmem:[#allocation8_spill] sm:$0xff] }
0x1fde   :  { %18553 = vtanh.f32 %v21893_v53 }
0x1fe3   :  { %v18548_v31 = vpop.eup %18547 }
0x1fe4   :  { %v18550_v60 = vpop.eup %18549  ;;  %6752 = vrot.lane.b32.xlu0 %v18548_v31, %s18862_s6  ;;  %v24263_v31 = vld [vmem:[#allocation11_spill] sm:$0xff] }
0x1fe5   :  { %6750 = vrot.lane.b32.xlu1 %v18550_v60, %s18862_s6  ;;  %v24264_v60 = vld [vmem:[#allocation13_spill] sm:$0xff] }
0x1fe7   :  { %v18552_v7 = vpop.eup %18551 }
0x1fe8   :  { %v18554_v47 = vpop.eup %18553  ;;  %6756 = vrot.lane.b32.xlu0 %v18552_v7, %s18862_s6  ;;  %v24265_v7 = vld [vmem:[#allocation12_spill] sm:$0xff] }
0x1fe9   :  { %6754 = vrot.lane.b32.xlu1 %v18554_v47, %s18862_s6  ;;  %v24266_v47 = vld [vmem:[#allocation16_spill] sm:$0xff] }
0x204e   :  { %v21903_v39 = vpop.permute.xlu0 %6748 }
0x204f   :  { %v21905_v11 = vpop.permute.xlu1 %6746 }
0x2050   :  { %v17275_v6 = vpack.c.bf16 %v21903_v39, %v21905_v11 }
0x2052   :  { %17276 = vmatprep.subr.bf16.mxu0 %v17275_v6 }
0x2053   :  { %17278 = vmatpush3.bf16.msra.mxu0 %v17275_v6  ;;  %v24267_v6 = vld [vmem:[#allocation17_spill] sm:$0xff] }
0x2056   :  { %v21909_v62 = vpop.permute.xlu0 %6752 }
0x2057   :  { %v21911_v51 = vpop.permute.xlu1 %6750 }
0x2058   :  { %v17279_v61 = vpack.c.bf16 %v21909_v62, %v21911_v51 }
0x205a   :  { %v21915_v20 = vpop.permute.xlu0 %6756  ;;  %17280 = vmatprep.subr.bf16.mxu0 %v17279_v61 }
0x205b   :  { %17282 = vmatpush3.bf16.msra.mxu0 %v17279_v61  ;;  %v21917_v22 = vpop.permute.xlu1 %6754 }
0x205c   :  { %v17283_v21 = vpack.c.bf16 %v21915_v20, %v21917_v22 }
0x205e   :  { %17284 = vmatprep.subr.bf16.mxu0 %v17283_v21 }
0x205f   :  { %17286 = vmatpush3.bf16.msra.mxu0 %v17283_v21 }
0x2062   :  { %15557 = vmatmul.mubr.msk.f32.vlgmr.msra.gmra.mrb[140].mxu0 %vm3322_vm2, %v21705_v1 }
0x2063   :  { %15559 = vmatprep.mubr.msk.f32.mxu0 %vm3322_vm2, %v21714_v16 }
0x2066   :  { %15560 = vmatmul.mubr.msk.f32.gmra.mrb[142].mxu0 %vm3322_vm2, %v21721_v63 }
0x2067   :  { %15562 = vmatprep.mubr.msk.f32.mxu0 %vm3322_vm2, %v21728_v57 }
0x206a   :  { %15563 = vmatmul.mubr.msk.f32.gmra.mrb[144].mxu0 %vm3322_vm2, %v21735_v35 }
0x206b   :  { %15598 = vmatprep.mubr.msk.f32.mxu0 %vm3322_vm2, %v21754_v4 }
0x2135   :  { %v21933_v37 = vpop.f32.mrb[140].mxu0 }
0x2136   :  { %v21935_v54 = vpop.f32.mrb[141].mxu0 }
0x2137   :  { %v17973_v30 = vpack.i.bf16 %v21933_v37, %v21935_v54  ;;  %v17287_v27 = vpack.c.bf16 %v21933_v37, %v21935_v54 }
0x2139   :  { %17974 = vrot.lane.b32.xlu1 %v17973_v30, %s18867_s23  ;;  %v21942_v43 = vpop.f32.mrb[142].mxu0  ;;  %17288 = vmatprep.subr.bf16.mxu1 %v17287_v27 }
0x213a   :  { %17300 = vmatprep.subr.bf16.mxu0 %v17287_v27  ;;  %v21944_v9 = vpop.f32.mrb[143].mxu0  ;;  %17290 = vmatpush3.bf16.msra.mxu1 %v17287_v27 }
0x213b   :  { %v17291_v56 = vpack.c.bf16 %v21942_v43, %v21944_v9  ;;  %17302 = vmatpush3.bf16.msra.mxu0 %v17287_v27 }
0x213d   :  { %v21950_v34 = vpop.f32.mrb[144].mxu0  ;;  %17292 = vmatprep.subr.bf16.mxu1 %v17291_v56  ;;  %17304 = vmatprep.subr.bf16.mxu0 %v17291_v56 }
0x213e   :  { %v21952_v33 = vpop.f32.mrb[145].mxu0  ;;  %17294 = vmatpush3.bf16.msra.mxu1 %v17291_v56 }
0x213f   :  { %v17295_v23 = vpack.c.bf16 %v21950_v34, %v21952_v33  ;;  %17306 = vmatpush3.bf16.msra.mxu0 %v17291_v56 }
0x2141   :  { %17296 = vmatprep.subr.bf16.mxu1 %v17295_v23  ;;  %17308 = vmatprep.subr.bf16.mxu0 %v17295_v23 }
0x2142   :  { %17298 = vmatpush3.bf16.msra.mxu1 %v17295_v23 }
0x2143   :  { %17310 = vmatpush3.bf16.msra.mxu0 %v17295_v23 }
0x2144   :  { %17323 = vmatprep.subr.bf16.mxu0 %v24260_v55 }
0x2145   :  { %15578 = vmatmul.mubr.msk.f32.vlgmr.msra.gmra.mrb[126].mxu1 %vm3322_vm2, %v21705_v1 }
0x2146   :  { %15599 = vmatmul.mubr.msk.f32.vlgmr.msra.gmra.mrb[146].mxu0 %vm3322_vm2, %v21779_v58  ;;  %15580 = vmatprep.mubr.msk.f32.mxu1 %vm3322_vm2, %v21714_v16 }
0x2147   :  { %15601 = vmatprep.mubr.msk.f32.mxu0 %vm3322_vm2, %v21786_v52  ;;  %17325 = vmatpush1.bf16.msra.mxu0 %v21019_v59 }
0x2148   :  { %17326 = vmatprep.subr.bf16.mxu0 %v24260_v55 }
0x2149   :  { %15581 = vmatmul.mubr.msk.f32.gmra.mrb[128].mxu1 %vm3322_vm2, %v21721_v63 }
0x214a   :  { %15602 = vmatmul.mubr.msk.f32.gmra.mrb[148].mxu0 %vm3322_vm2, %v21793_v28  ;;  %15583 = vmatprep.mubr.msk.f32.mxu1 %vm3322_vm2, %v21728_v57 }
0x214b   :  { %15604 = vmatprep.mubr.msk.f32.mxu0 %vm3322_vm2, %v21800_v13  ;;  %17328 = vmatpush1.bf16.msra.mxu0 %v21030_v40 }
0x214c   :  { %17329 = vmatprep.subr.bf16.mxu0 %v24260_v55 }
0x214d   :  { %15584 = vmatmul.mubr.msk.f32.gmra.mrb[130].mxu1 %vm3322_vm2, %v21735_v35 }
0x214e   :  { %15605 = vmatmul.mubr.msk.f32.gmra.mrb[150].mxu0 %vm3322_vm2, %v21807_v38  ;;  %15619 = vmatprep.mubr.msk.f32.mxu1 %vm3322_vm2, %v21754_v4 }
0x214f   :  { %17331 = vmatpush1.bf16.msra.mxu0 %v21047_v32 }
0x2150   :  { %17332 = vmatprep.subr.bf16.mxu0 %v24260_v55 }
0x2153   :  { %17334 = vmatpush1.bf16.msra.mxu0 %v24261_v5 }
0x2154   :  { %17335 = vmatprep.subr.bf16.mxu0 %v24260_v55 }
0x2157   :  { %17337 = vmatpush1.bf16.msra.mxu0 %v24262_v41 }
0x2158   :  { %17338 = vmatprep.subr.bf16.mxu0 %v24260_v55 }
0x215b   :  { %17340 = vmatpush1.bf16.msra.mxu0 %v24263_v31 }
0x215c   :  { %17341 = vmatprep.subr.bf16.mxu0 %v24260_v55 }
0x215f   :  { %17343 = vmatpush1.bf16.msra.mxu0 %v24264_v60 }
0x2160   :  { %17344 = vmatprep.subr.bf16.mxu0 %v24260_v55 }
0x2163   :  { %17346 = vmatpush1.bf16.msra.mxu0 %v24265_v7 }
0x2164   :  { %17347 = vmatprep.subr.bf16.mxu0 %v24260_v55 }
0x2167   :  { %17349 = vmatpush1.bf16.msra.mxu0 %v24266_v47 }
0x2168   :  { %17350 = vmatprep.subr.bf16.mxu0 %v24260_v55 }
0x216b   :  { %17352 = vmatpush1.bf16.msra.mxu0 %v24267_v6 }
0x216c   :  { %17402 = vmatprep.subr.bf16.mxu0 %v20833_v2 }
0x2218   :  { %v15579_v61 = vpop.f32.mrb[126].mxu1 }
0x2219   :  { %v6955_v21 = vmul.f32 2.0, %v15579_v61  ;;  %v15600_v30 = vpop.f32.mrb[146].mxu0  ;;  %v6925_v27 = vpop.f32.mrb[127].mxu1 }
0x221a   :  { %v6954_v56 = vmul.f32 2.0, %v6925_v27  ;;  %v7032_v23 = vpop.f32.mrb[147].mxu0 }
0x221b   :  { %v6961_v10 = vsub.f32 %v6955_v21, %v21903_v39  ;;  %v17983_v3 = vpack.i.bf16 %v15600_v30, %v7032_v23  ;;  %v17311_v14 = vpack.c.bf16 %v15600_v30, %v7032_v23 }
0x221c   :  { %v6960_v26 = vsub.f32 %v6954_v56, %v21905_v11  ;;  %v15582_v50 = vpop.f32.mrb[128].mxu1 }
0x221d   :  { %17984 = vrot.lane.b32.xlu1 %v17983_v3, %s18868_s24  ;;  %v6957_v29 = vmul.f32 2.0, %v15582_v50  ;;  %v15603_v8 = vpop.f32.mrb[148].mxu0  ;;  %17312 = vmatprep.subr.bf16.mxu1 %v17311_v14  ;;  %v6935_v6 = vpop.f32.mrb[129].mxu1 }
0x221e   :  { %v17978_v47 = vpack.i.bf16 %v6961_v10, %v6960_v26  ;;  %v6956_v7 = vmul.f32 2.0, %v6935_v6  ;;  %v7042_v61 = vpop.f32.mrb[149].mxu0  ;;  %17314 = vmatpush3.bf16.msra.mxu1 %v17311_v14  ;;  %v24268_v26 = vpack.i.bf16 %v21942_v43, %v21944_v9 }
0x221f   :  { %v6963_v27 = vsub.f32 %v6957_v29, %v21909_v62  ;;  %v17993_v60 = vpack.i.bf16 %v15603_v8, %v7042_v61  ;;  %v17315_v31 = vpack.c.bf16 %v15603_v8, %v7042_v61 }
0x2220   :  { %v6962_v21 = vsub.f32 %v6956_v7, %v21911_v51  ;;  %17979 = vrot.lane.b32.xlu0 %v17978_v47, %s18869_s25  ;;  %v15585_v30 = vpop.f32.mrb[130].mxu1 }
0x2221   :  { %v15606_v56 = vpop.f32.mrb[150].mxu0  ;;  %17316 = vmatprep.subr.bf16.mxu1 %v17315_v31  ;;  %v6945_v3 = vpop.f32.mrb[131].mxu1  ;;  %v6959_v29 = vmul.f32 2.0, %v15585_v30 }
0x2222   :  { %v17998_v50 = vpack.i.bf16 %v6963_v27, %v6962_v21  ;;  %v7052_v23 = vpop.f32.mrb[151].mxu0  ;;  %17318 = vmatpush3.bf16.msra.mxu1 %v17315_v31  ;;  %v6958_v8 = vmul.f32 2.0, %v6945_v3  ;;  %v17975_v31 = vpop.permute.xlu1 %17974 }
0x2223   :  { %v17319_v41 = vpack.c.bf16 %v15606_v56, %v7052_v23  ;;  %v6965_v10 = vsub.f32 %v6959_v29, %v21915_v20  ;;  %v17977_v27 = vunpack.i.h.bf16 %v17975_v31 }
0x2224   :  { %17989 = vrot.lane.b32.xlu0 %v24268_v26, %s18867_s23  ;;  %17999 = vrot.lane.b32.xlu1 %v17998_v50, %s18869_s25  ;;  %v6964_v14 = vsub.f32 %v6958_v8, %v21917_v22 }
0x2225   :  { %17320 = vmatprep.subr.bf16.mxu1 %v17319_v41 }
0x2226   :  { %17322 = vmatpush3.bf16.msra.mxu1 %v17319_v41 }
0x2228   :  { %17994 = vrot.lane.b32.xlu0 %v17993_v60, %s18868_s24  ;;  %7182 = vrot.lane.b32.xlu1 %v21952_v33, %s18867_s23  ;;  %v17976_v60 = vunpack.i.l.bf16 %v17975_v31  ;;  %v7241_v31 = vsel %vm3075_vm0, %v21903_v39, %v17977_v27 }
0x2229   :  { %15620 = vmatmul.mubr.msk.f32.vlgmr.msra.gmra.mrb[132].mxu1 %vm3322_vm2, %v21779_v58 }
0x222a   :  { %15622 = vmatprep.mubr.msk.f32.mxu1 %vm3322_vm2, %v21786_v52  ;;  %v7240_v3 = vsel %vm3075_vm0, %v21905_v11, %v17976_v60 }
0x222c   :  { %7230 = vrot.lane.b32.xlu1 %v7052_v23, %s18868_s24  ;;  %7206 = vrot.lane.b32.xlu0 %v6964_v14, %s18869_s25 }
0x222d   :  { %15623 = vmatmul.mubr.msk.f32.gmra.mrb[134].mxu1 %vm3322_vm2, %v21793_v28 }
0x222e   :  { %15625 = vmatprep.mubr.msk.f32.mxu1 %vm3322_vm2, %v21800_v13 }
0x2230   :  { %7208 = vrot.lane.b32.xlu1 %v6965_v10, %s18869_s25  ;;  %7184 = vrot.lane.b32.xlu0 %v21950_v34, %s18867_s23 }
0x2231   :  { %15626 = vmatmul.mubr.msk.f32.gmra.mrb[136].mxu1 %vm3322_vm2, %v21807_v38 }
0x2232   :  { %15640 = vmatprep.mubr.msk.f32.mxu1 %vm3322_vm2, %v21814_v12 }
0x2234   :  { %7232 = vrot.lane.b32.xlu0 %v15606_v56, %s18868_s24 }
0x228f   :  { %v17985_v6 = vpop.permute.xlu1 %17984 }
0x2290   :  { %v17986_v56 = vunpack.i.l.bf16 %v17985_v6 }
0x2292   :  { %v17980_v41 = vpop.permute.xlu0 %17979 }
0x2293   :  { %v17981_v7 = vunpack.i.l.bf16 %v17980_v41  ;;  %v17982_v50 = vunpack.i.h.bf16 %v17980_v41  ;;  %v17987_v41 = vunpack.i.h.bf16 %v17985_v6 }
0x2295   :  { %v7246_v8 = vsel %vm3174_vm1, %v7240_v3, %v17981_v7 }
0x2296   :  { %v17990_v47 = vpop.permute.xlu0 %17989  ;;  %v18000_v29 = vpop.permute.xlu1 %17999  ;;  %v7252_v11 = vsel %vm4565_vm9, %v7246_v8, %v17986_v56 }
0x2297   :  { %v18001_v39 = vunpack.i.l.bf16 %v18000_v29 }
0x229a   :  { %v17995_v5 = vpop.permute.xlu0 %17994  ;;  %v7183_v3 = vpop.permute.xlu1 %7182 }
0x229b   :  { %v17996_v6 = vunpack.i.l.bf16 %v17995_v5 }
0x22fc   :  { %v15621_v61 = vpop.f32.mrb[132].mxu1 }
0x22fd   :  { %v7157_v21 = vmul.f32 2.0, %v15621_v61  ;;  %v7127_v30 = vpop.f32.mrb[133].mxu1  ;;  %v17991_v61 = vunpack.i.l.bf16 %v17990_v47 }
0x22fe   :  { %v7156_v23 = vmul.f32 2.0, %v7127_v30  ;;  %v17992_v30 = vunpack.i.h.bf16 %v17990_v47 }
0x22ff   :  { %v7163_v26 = vsub.f32 %v7157_v21, %v21933_v37  ;;  %v7247_v37 = vsel %vm3174_vm1, %v7241_v31, %v17982_v50 }
0x2300   :  { %v7162_v14 = vsub.f32 %v7156_v23, %v21935_v54  ;;  %v15624_v10 = vpop.f32.mrb[134].mxu1  ;;  %v7253_v21 = vsel %vm4565_vm9, %v7247_v37, %v17987_v41  ;;  %v22058_v23 = vld [vmem:[%s24020_s12 + $0x10] sm:$0xf]  ;;  %v13442_v37 = vmul.f32 -1.442695, %v21877_v44 }
0x2301   :  { %v7159_v32 = vmul.f32 2.0, %v15624_v10  ;;  %v7137_v40 = vpop.f32.mrb[135].mxu1  ;;  %v13443_v41 = vmul.f32 -1.442695, %v21869_v42 }
0x2302   :  { %v7158_v59 = vmul.f32 2.0, %v7137_v40  ;;  %13472 = vmatprep.mubr.msk.f32.mxu0 %vm3075_vm0, %v7162_v14  ;;  %v7244_v14 = vsel %vm3075_vm0, %v21917_v22, %v7183_v3  ;;  %18555 = vpow2.f32 %v13442_v37 }
0x2303   :  { %v7165_v60 = vsub.f32 %v7159_v32, %v21942_v43  ;;  %7341 = vmatmul.mubr.f32.vlgmr.msra.gmra.mrb[152].mxu0 %v7252_v11  ;;  %v7207_v43 = vpop.permute.xlu0 %7206  ;;  %18557 = vpow2.f32 %v13443_v41 }
0x2304   :  { %v7164_v54 = vsub.f32 %v7158_v59, %v21944_v9  ;;  %v15627_v7 = vpop.f32.mrb[136].mxu1  ;;  %13473 = vmatprep.mubr.msk.f32.mxu0 %vm3075_vm0, %v7163_v26  ;;  %17404 = vmatpush3.bf16.msra.mxu0 %v20833_v2  ;;  %v7242_v59 = vsel %vm3075_vm0, %v21911_v51, %v17991_v61  ;;  %v17997_v51 = vunpack.i.h.bf16 %v17995_v5  ;;  %v7250_v10 = vsel %vm3174_vm1, %v7244_v14, %v7207_v43 }
0x2305   :  { %v7161_v27 = vmul.f32 2.0, %v15627_v7  ;;  %v7147_v40 = vpop.f32.mrb[137].mxu1  ;;  %15716 = vmatprep.subr.msk.mxu0 %vm3912_vm3, %v21593_v15  ;;  %v18002_v15 = vunpack.i.h.bf16 %v18000_v29  ;;  %v7248_v47 = vsel %vm3174_vm1, %v7242_v59, %v18001_v39  ;;  %v13446_v7 = vmul.f32 -1.442695, %v21893_v53 }
0x2306   :  { %v7160_v32 = vmul.f32 2.0, %v7147_v40  ;;  %v7254_v26 = vsel %vm4565_vm9, %v7248_v47, %v17996_v6 }
0x2307   :  { %v7167_v9 = vsub.f32 %v7161_v27, %v21950_v34  ;;  %7346 = vmatmul.mubr.f32.gmra.mrb[154].mxu0 %v7253_v21  ;;  %v7243_v34 = vsel %vm3075_vm0, %v21909_v62, %v17992_v30  ;;  %v7185_v8 = vpop.permute.xlu0 %7184  ;;  %v13447_v21 = vmul.f32 -1.442695, %v21890_v18 }
0x2308   :  { %v7166_v50 = vsub.f32 %v7160_v32, %v21952_v33  ;;  %13474 = vmatprep.mubr.msk.f32.mxu0 %vm3075_vm0, %v7164_v54  ;;  %15717 = vmatpush3.msk.msra.mxu0 %vm3912_vm3, %v22058_v23  ;;  %v7231_v33 = vpop.permute.xlu1 %7230  ;;  %v7249_v56 = vsel %vm3174_vm1, %v7243_v34, %v18002_v15  ;;  %v7245_v62 = vsel %vm3075_vm0, %v21915_v20, %v7185_v8  ;;  %v13445_v20 = vmul.f32 -1.442695, %v21882_v24  ;;  %v22089_v24 = vld [vmem:[%s24023_s15] ss:$0 sm:$0xff] }
0x2309   :  { %v7255_v29 = vsel %vm4565_vm9, %v7249_v56, %v17997_v51  ;;  %v7256_v31 = vsel %vm4565_vm9, %v7250_v10, %v7231_v33 }
0x230b   :  { %7351 = vmatmul.mubr.f32.gmra.mrb[156].mxu0 %v7254_v26  ;;  %v7233_v61 = vpop.permute.xlu0 %7232 }
0x230c   :  { %13475 = vmatprep.mubr.msk.f32.mxu0 %vm3075_vm0, %v7165_v60  ;;  %v7209_v5 = vpop.permute.xlu1 %7208  ;;  %v13444_v60 = vmul.f32 -1.442695, %v21885_v36  ;;  %v18556_v54 = vpop.eup %18555 }
0x230d   :  { %v7251_v11 = vsel %vm3174_vm1, %v7245_v62, %v7209_v5  ;;  %v6716_v39 = vadd.f32 1.0, %v18556_v54  ;;  %v18558_v27 = vpop.eup %18557 }
0x230e   :  { %v7257_v22 = vsel %vm4565_vm9, %v7251_v11, %v7233_v61  ;;  %18559 = vpow2.f32 %v13444_v60  ;;  %v6717_v30 = vadd.f32 1.0, %v18558_v27 }
0x230f   :  { %7356 = vmatmul.mubr.f32.gmra.mrb[158].mxu0 %v7255_v29  ;;  %18561 = vpow2.f32 %v13445_v20 }
0x2310   :  { %13476 = vmatprep.mubr.msk.f32.mxu0 %vm3075_vm0, %v7166_v50  ;;  %18563 = vpow2.f32 %v13446_v7 }
0x2311   :  { %18565 = vrcp.f32 %v6716_v39 }
0x2313   :  { %7361 = vmatmul.mubr.f32.gmra.mrb[160].mxu0 %v7256_v31 }
0x2314   :  { %13477 = vmatprep.mubr.msk.f32.mxu0 %vm3075_vm0, %v7167_v9 }
0x2317   :  { %7366 = vmatmul.mubr.f32.gmra.mrb[162].mxu0 %v7257_v22 }
0x2318   :  { %v18560_v6 = vpop.eup %18559 }
0x2319   :  { %v6718_v18 = vadd.f32 1.0, %v18560_v6  ;;  %v18562_v32 = vpop.eup %18561 }
0x231a   :  { %v6719_v9 = vadd.f32 1.0, %v18562_v32  ;;  %v18564_v50 = vpop.eup %18563 }
0x231b   :  { %v18566_v15 = vpop.eup %18565  ;;  %v6720_v33 = vadd.f32 1.0, %v18564_v50 }
0x23d6   :  { %v7342_v40 = vpop.f32.mrb[152].mxu0 }
0x23d7   :  { %v7343_v44 = vadd.f32 %v21630_v17, %v7342_v40  ;;  %v7344_v42 = vpop.f32.mrb[153].mxu0 }
0x23d9   :  { %18567 = vtanh.f32 %v7343_v44 }
0x23da   :  { %v7347_v36 = vpop.f32.mrb[154].mxu0  ;;  %18569 = vpow2.f32 %v13447_v21 }
0x23db   :  { %v7348_v53 = vadd.f32 %v22089_v24, %v7347_v36  ;;  %v7349_v3 = vpop.f32.mrb[155].mxu0  ;;  %18571 = vrcp.f32 %v6717_v30 }
0x23dd   :  { %18573 = vtanh.f32 %v7348_v53 }
0x23de   :  { %v7352_v17 = vpop.f32.mrb[156].mxu0  ;;  %18575 = vrcp.f32 %v6718_v18 }
0x23df   :  { %v7353_v59 = vadd.f32 %v22089_v24, %v7352_v17  ;;  %v7354_v43 = vpop.f32.mrb[157].mxu0 }
0x23e1   :  { %18577 = vtanh.f32 %v7353_v59 }
0x23e2   :  { %v7357_v47 = vpop.f32.mrb[158].mxu0  ;;  %18579 = vrcp.f32 %v6719_v9 }
0x23e3   :  { %v18568_v51 = vpop.eup %18567  ;;  %v7358_v26 = vadd.f32 %v22089_v24, %v7357_v47  ;;  %v7359_v34 = vpop.f32.mrb[159].mxu0 }
0x23e4   :  { %v7377_v8 = vmul.f32 %v18568_v51, %v18566_v15  ;;  %v18570_v56 = vpop.eup %18569 }
0x23e5   :  { %18581 = vtanh.f32 %v7358_v26  ;;  %v18572_v14 = vpop.eup %18571  ;;  %v6721_v61 = vadd.f32 1.0, %v18570_v56 }
0x23e6   :  { %v7383_v29 = vsub.f32 0.0, %v7377_v8  ;;  %v7362_v10 = vpop.f32.mrb[160].mxu0  ;;  %18583 = vrcp.f32 %v6720_v33 }
0x23e7   :  { %v18574_v5 = vpop.eup %18573  ;;  %v7363_v62 = vadd.f32 %v22089_v24, %v7362_v10  ;;  %v7364_v31 = vpop.f32.mrb[161].mxu0 }
0x23e8   :  { %v7378_v11 = vmul.f32 %v18574_v5, %v18572_v14  ;;  %v18576_v22 = vpop.eup %18575  ;;  %v7389_v37 = vmul.f32 0.125, %v7383_v29 }
0x23e9   :  { %18585 = vtanh.f32 %v7363_v62 }
0x23ea   :  { %v7384_v41 = vsub.f32 0.0, %v7378_v11  ;;  %v7367_v60 = vpop.f32.mrb[162].mxu0  ;;  %18587 = vrcp.f32 %v6721_v61  ;;  %v22097_v21 = vadd.f32 %v7389_v37, %v21639_v49 }
0x23eb   :  { %v18578_v20 = vpop.eup %18577  ;;  %v7368_v54 = vadd.f32 %v22089_v24, %v7367_v60  ;;  %v7369_v7 = vpop.f32.mrb[163].mxu0 }
0x23ec   :  { %v7390_v39 = vmul.f32 0.125, %v7384_v41  ;;  %v7379_v27 = vmul.f32 %v18578_v20, %v18576_v22  ;;  %v18580_v40 = vpop.eup %18579  ;;  %24269 = vst [vmem:[#allocation30_spill] sm:$0xff] %v22097_v21 }
0x23ed   :  { %18589 = vtanh.f32 %v7368_v54 }
0x23ee   :  { %v22100_v44 = vadd.f32 %v7390_v39, %v21642_v48  ;;  %v7385_v42 = vsub.f32 0.0, %v7379_v27 }
0x23ef   :  { %v18582_v30 = vpop.eup %18581 }
0x23f0   :  { %24270 = vst [vmem:[#allocation31_spill] sm:$0xff] %v22100_v44  ;;  %v7380_v6 = vmul.f32 %v18582_v30, %v18580_v40  ;;  %v17353_v36 = vpack.c.bf16 %v22100_v44, %v22097_v21  ;;  %v18584_v53 = vpop.eup %18583  ;;  %v7391_v3 = vmul.f32 0.125, %v7385_v42 }
0x23f2   :  { %v7386_v18 = vsub.f32 0.0, %v7380_v6  ;;  %17354 = vmatprep.subr.bf16.mxu1 %v17353_v36  ;;  %v22105_v9 = vadd.f32 %v7391_v3, %v21647_v25 }
0x23f3   :  { %v18586_v32 = vpop.eup %18585  ;;  %17356 = vmatpush3.bf16.msra.mxu1 %v17353_v36 }
0x23f4   :  { %v7392_v17 = vmul.f32 0.125, %v7386_v18  ;;  %v7381_v59 = vmul.f32 %v18586_v32, %v18584_v53  ;;  %v18588_v43 = vpop.eup %18587  ;;  %24271 = vst [vmem:[#allocation32_spill] sm:$0xff] %v22105_v9 }
0x23f6   :  { %v22108_v50 = vadd.f32 %v7392_v17, %v21650_v45  ;;  %v7387_v15 = vsub.f32 0.0, %v7381_v59 }
0x23f7   :  { %v18590_v47 = vpop.eup %18589 }
0x23f8   :  { %24272 = vst [vmem:[#allocation33_spill] sm:$0xff] %v22108_v50  ;;  %v7382_v51 = vmul.f32 %v18590_v47, %v18588_v43  ;;  %v17357_v26 = vpack.c.bf16 %v22108_v50, %v22105_v9  ;;  %v7393_v34 = vmul.f32 0.125, %v7387_v15 }
0x23fa   :  { %v7388_v33 = vsub.f32 0.0, %v7382_v51  ;;  %17358 = vmatprep.subr.bf16.mxu1 %v17357_v26  ;;  %v22113_v56 = vadd.f32 %v7393_v34, %v21655_v19 }
0x23fb   :  { %17360 = vmatpush3.bf16.msra.mxu1 %v17357_v26 }
0x23fc   :  { %v7394_v8 = vmul.f32 0.125, %v7388_v33  ;;  %24273 = vst [vmem:[#allocation34_spill] sm:$0xff] %v22113_v56 }
0x23fe   :  { %v22116_v14 = vadd.f32 %v7394_v8, %v21658_v0 }
0x2400   :  { %24274 = vst [vmem:[#allocation35_spill] sm:$0xff] %v22116_v14  ;;  %v17361_v29 = vpack.c.bf16 %v22116_v14, %v22113_v56 }
0x2402   :  { %17362 = vmatprep.subr.bf16.mxu1 %v17361_v29 }
0x2403   :  { %17364 = vmatpush3.bf16.msra.mxu1 %v17361_v29 }
0x2406   :  { %15641 = vmatmul.mubr.msk.f32.vlgmr.msra.gmra.mrb[138].mxu1 %vm3322_vm2, %v21705_v1 }
0x2407   :  { %15643 = vmatprep.mubr.msk.f32.mxu1 %vm3322_vm2, %v21714_v16 }
0x240a   :  { %15644 = vmatmul.mubr.msk.f32.gmra.mrb[140].mxu1 %vm3322_vm2, %v21721_v63 }
0x240b   :  { %15646 = vmatprep.mubr.msk.f32.mxu1 %vm3322_vm2, %v21728_v57 }
0x240e   :  { %15647 = vmatmul.mubr.msk.f32.gmra.mrb[142].mxu1 %vm3322_vm2, %v21735_v35 }
0x240f   :  { %15661 = vmatprep.mubr.msk.f32.mxu1 %vm3322_vm2, %v21814_v12 }
0x24d9   :  { %v22132_v10 = vpop.f32.mrb[138].mxu1 }
0x24da   :  { %7813 = vrot.lane.b32.xlu0 %v22132_v10, %s18863_s1  ;;  %v22136_v5 = vpop.f32.mrb[139].mxu1 }
0x24db   :  { %v17365_v62 = vpack.c.bf16 %v22132_v10, %v22136_v5  ;;  %7811 = vrot.lane.b32.xlu1 %v22136_v5, %s18863_s1 }
0x24dd   :  { %v22142_v31 = vpop.f32.mrb[140].mxu1  ;;  %17366 = vmatprep.subr.bf16.mxu1 %v17365_v62 }
0x24de   :  { %17368 = vmatpush3.bf16.msra.mxu1 %v17365_v62  ;;  %7817 = vrot.lane.b32.xlu0 %v22142_v31, %s18863_s1  ;;  %v22146_v61 = vpop.f32.mrb[141].mxu1 }
0x24df   :  { %v17369_v11 = vpack.c.bf16 %v22142_v31, %v22146_v61 }
0x24e1   :  { %v22150_v22 = vpop.f32.mrb[142].mxu1  ;;  %17370 = vmatprep.subr.bf16.mxu1 %v17369_v11 }
0x24e2   :  { %7815 = vrot.lane.b32.xlu0 %v22146_v61, %s18863_s1  ;;  %v22154_v37 = vpop.f32.mrb[143].mxu1  ;;  %17372 = vmatpush3.bf16.msra.mxu1 %v17369_v11 }
0x24e3   :  { %v17373_v41 = vpack.c.bf16 %v22150_v22, %v22154_v37 }
0x24e5   :  { %17374 = vmatprep.subr.bf16.mxu1 %v17373_v41 }
0x24e6   :  { %7821 = vrot.lane.b32.xlu0 %v22150_v22, %s18863_s1  ;;  %17376 = vmatpush3.bf16.msra.mxu1 %v17373_v41 }
0x24e7   :  { %17378 = vmatprep.subr.bf16.mxu1 %v17365_v62 }
0x24e9   :  { %15662 = vmatmul.mubr.msk.f32.vlgmr.msra.gmra.mrb[144].mxu1 %vm3322_vm2, %v21705_v1 }
0x24ea   :  { %7819 = vrot.lane.b32.xlu0 %v22154_v37, %s18863_s1  ;;  %17380 = vmatpush3.bf16.msra.mxu1 %v17365_v62 }
0x24eb   :  { %17382 = vmatprep.subr.bf16.mxu1 %v17369_v11  ;;  %15664 = vmatprep.mubr.msk.f32.mxu1 %vm3322_vm2, %v21714_v16 }
0x24ed   :  { %15665 = vmatmul.mubr.msk.f32.gmra.mrb[146].mxu1 %vm3322_vm2, %v21721_v63 }
0x24ee   :  { %17384 = vmatpush3.bf16.msra.mxu1 %v17369_v11  ;;  %15667 = vmatprep.mubr.msk.f32.mxu1 %vm3322_vm2, %v21728_v57 }
0x24ef   :  { %17386 = vmatprep.subr.bf16.mxu1 %v17373_v41 }
0x24f1   :  { %15668 = vmatmul.mubr.msk.f32.gmra.mrb[148].mxu1 %vm3322_vm2, %v21735_v35 }
0x24f2   :  { %17388 = vmatpush3.bf16.msra.mxu1 %v17373_v41  ;;  %15682 = vmatprep.mubr.msk.f32.mxu1 %vm3322_vm2, %v21754_v4 }
0x24f5   :  { %15683 = vmatmul.mubr.msk.f32.vlgmr.msra.gmra.mrb[150].mxu1 %vm3322_vm2, %v21779_v58 }
0x24f6   :  { %15685 = vmatprep.mubr.msk.f32.mxu1 %vm3322_vm2, %v21786_v52 }
0x24f9   :  { %15686 = vmatmul.mubr.msk.f32.gmra.mrb[152].mxu1 %vm3322_vm2, %v21793_v28 }
0x24fa   :  { %15688 = vmatprep.mubr.msk.f32.mxu1 %vm3322_vm2, %v21800_v13 }
0x24fd   :  { %15689 = vmatmul.mubr.msk.f32.gmra.mrb[154].mxu1 %vm3322_vm2, %v21807_v38 }
0x24fe   :  { %15703 = vmatprep.mubr.msk.f32.mxu1 %vm3322_vm2, %v21754_v4 }
0x25bc   :  { %v15663_v1 = vpop.f32.mrb[144].mxu1 }
0x25bd   :  { %v7592_v16 = vmul.f32 2.0, %v15663_v1  ;;  %v7562_v63 = vpop.f32.mrb[145].mxu1 }
0x25be   :  { %v7591_v57 = vmul.f32 2.0, %v7562_v63  ;;  %v7812_v63 = vpop.permute.xlu1 %7811 }
0x25bf   :  { %v7598_v35 = vsub.f32 %v7592_v16, %v22100_v44 }
0x25c0   :  { %v7597_v60 = vsub.f32 %v7591_v57, %v22097_v21  ;;  %v15666_v20 = vpop.f32.mrb[146].mxu1 }
0x25c1   :  { %v7594_v54 = vmul.f32 2.0, %v15666_v20  ;;  %7837 = vrot.lane.b32.xlu0 %v7598_v35, %s18864_s29  ;;  %v7572_v7 = vpop.f32.mrb[147].mxu1 }
0x25c2   :  { %v7593_v39 = vmul.f32 2.0, %v7572_v7  ;;  %7835 = vrot.lane.b32.xlu1 %v7597_v60, %s18864_s29 }
0x25c3   :  { %v7600_v27 = vsub.f32 %v7594_v54, %v22108_v50 }
0x25c4   :  { %v7599_v4 = vsub.f32 %v7593_v39, %v22105_v9  ;;  %v15669_v40 = vpop.f32.mrb[148].mxu1 }
0x25c5   :  { %7841 = vrot.lane.b32.xlu0 %v7600_v27, %s18864_s29  ;;  %v7582_v42 = vpop.f32.mrb[149].mxu1  ;;  %v7596_v30 = vmul.f32 2.0, %v15669_v40 }
0x25c6   :  { %7839 = vrot.lane.b32.xlu1 %v7599_v4, %s18864_s29  ;;  %v7595_v6 = vmul.f32 2.0, %v7582_v42 }
0x25c7   :  { %v7602_v18 = vsub.f32 %v7596_v30, %v22116_v14 }
0x25c8   :  { %v15684_v36 = vpop.f32.mrb[150].mxu1  ;;  %v7601_v32 = vsub.f32 %v7595_v6, %v22113_v56  ;;  %v7901_v6 = vsel %vm3859_vm4, %v22097_v21, %v7812_v63 }
0x25c9   :  { %7861 = vrot.lane.b32.xlu0 %v15684_v36, %s18865_s0  ;;  %v7669_v53 = vpop.f32.mrb[151].mxu1 }
0x25ca   :  { %v17389_v3 = vpack.c.bf16 %v15684_v36, %v7669_v53  ;;  %7859 = vrot.lane.b32.xlu1 %v7669_v53, %s18865_s0 }
0x25cc   :  { %v15687_v17 = vpop.f32.mrb[152].mxu1  ;;  %17390 = vmatprep.subr.bf16.mxu1 %v17389_v3 }
0x25cd   :  { %7845 = vrot.lane.b32.xlu0 %v7602_v18, %s18864_s29  ;;  %v7679_v59 = vpop.f32.mrb[153].mxu1  ;;  %17392 = vmatpush3.bf16.msra.mxu1 %v17389_v3 }
0x25ce   :  { %v17393_v43 = vpack.c.bf16 %v15687_v17, %v7679_v59  ;;  %7843 = vrot.lane.b32.xlu1 %v7601_v32, %s18864_s29 }
0x25d0   :  { %v15690_v15 = vpop.f32.mrb[154].mxu1  ;;  %17394 = vmatprep.subr.bf16.mxu1 %v17393_v43 }
0x25d1   :  { %7865 = vrot.lane.b32.xlu0 %v15687_v17, %s18865_s0  ;;  %v7689_v47 = vpop.f32.mrb[155].mxu1  ;;  %17396 = vmatpush3.bf16.msra.mxu1 %v17393_v43 }
0x25d2   :  { %v17397_v51 = vpack.c.bf16 %v15690_v15, %v7689_v47  ;;  %7863 = vrot.lane.b32.xlu1 %v7679_v59, %s18865_s0 }
0x25d4   :  { %17398 = vmatprep.subr.bf16.mxu1 %v17397_v51 }
0x25d5   :  { %7869 = vrot.lane.b32.xlu0 %v15690_v15, %s18865_s0  ;;  %17400 = vmatpush3.bf16.msra.mxu1 %v17397_v51 }
0x25d6   :  { %7867 = vrot.lane.b32.xlu1 %v7689_v47, %s18865_s0 }
0x25d8   :  { %15704 = vmatmul.mubr.msk.f32.vlgmr.msra.gmra.mrb[156].mxu1 %vm3322_vm2, %v21779_v58 }
0x25d9   :  { %15706 = vmatprep.mubr.msk.f32.mxu1 %vm3322_vm2, %v21786_v52 }
0x25dc   :  { %15707 = vmatmul.mubr.msk.f32.gmra.mrb[158].mxu1 %vm3322_vm2, %v21793_v28 }
0x25dd   :  { %15709 = vmatprep.mubr.msk.f32.mxu1 %vm3322_vm2, %v21800_v13 }
0x25e0   :  { %15710 = vmatmul.mubr.msk.f32.gmra.mrb[160].mxu1 %vm3322_vm2, %v21807_v38 }
0x25e1   :  { %15739 = vmatprep.mubr.msk.f32.mxu1 %vm3322_vm2, %v21814_v12 }
0x2634   :  { %v7836_v35 = vpop.permute.xlu1 %7835 }
0x2635   :  { %v7907_v53 = vsel %vm3866_vm5, %v7901_v6, %v7836_v35 }
0x2638   :  { %v7840_v20 = vpop.permute.xlu1 %7839 }
0x263c   :  { %v7860_v7 = vpop.permute.xlu1 %7859 }
0x263d   :  { %v7913_v18 = vsel %vm3873_vm6, %v7907_v53, %v7860_v7 }
0x2640   :  { %v7844_v39 = vpop.permute.xlu1 %7843 }
0x2644   :  { %v7864_v27 = vpop.permute.xlu1 %7863 }
0x2648   :  { %v7868_v40 = vpop.permute.xlu1 %7867 }
0x26ab   :  { %v15705_v26 = vpop.f32.mrb[156].mxu1 }
0x26ac   :  { %v7794_v34 = vmul.f32 2.0, %v15705_v26  ;;  %v7764_v33 = vpop.f32.mrb[157].mxu1 }
0x26ad   :  { %v7793_v8 = vmul.f32 2.0, %v7764_v33 }
0x26ae   :  { %v7800_v58 = vsub.f32 %v7794_v34, %v22132_v10 }
0x26af   :  { %v7799_v52 = vsub.f32 %v7793_v8, %v22136_v5  ;;  %v15708_v29 = vpop.f32.mrb[158].mxu1 }
0x26b0   :  { %v7796_v62 = vmul.f32 2.0, %v15708_v29  ;;  %v7774_v28 = vpop.f32.mrb[159].mxu1  ;;  %7885 = vrot.lane.b32.xlu1 %v7800_v58, %s18866_s21 }
0x26b1   :  { %v7795_v13 = vmul.f32 2.0, %v7774_v28 }
0x26b2   :  { %v7802_v11 = vsub.f32 %v7796_v62, %v22142_v31  ;;  %v7814_v31 = vpop.permute.xlu0 %7813 }
0x26b3   :  { %v7801_v38 = vsub.f32 %v7795_v13, %v22146_v61  ;;  %v15711_v41 = vpop.f32.mrb[160].mxu1  ;;  %v7902_v36 = vsel %vm3859_vm4, %v22100_v44, %v7814_v31 }
0x26b4   :  { %v7798_v12 = vmul.f32 2.0, %v15711_v41  ;;  %v7784_v1 = vpop.f32.mrb[161].mxu1  ;;  %7883 = vrot.lane.b32.xlu1 %v7799_v52, %s18866_s21 }
0x26b5   :  { %v7797_v16 = vmul.f32 2.0, %v7784_v1 }
0x26b6   :  { %v7804_v10 = vsub.f32 %v7798_v12, %v22150_v22  ;;  %v7818_v61 = vpop.permute.xlu0 %7817 }
0x26b7   :  { %v7803_v5 = vsub.f32 %v7797_v16, %v22154_v37  ;;  %v7904_v26 = vsel %vm3859_vm4, %v22108_v50, %v7818_v61  ;;  %v22267_v61 = vld [vmem:[%s24018_s11] sm:$0xff] }
0x26b8   :  { %7893 = vrot.lane.b32.xlu0 %v7804_v10, %s18866_s21  ;;  %7889 = vrot.lane.b32.xlu1 %v7802_v11, %s18866_s21 }
0x26ba   :  { %v7816_v57 = vpop.permute.xlu0 %7815 }
0x26bb   :  { %v7903_v51 = vsel %vm3859_vm4, %v22105_v9, %v7816_v57 }
0x26bc   :  { %7887 = vrot.lane.b32.xlu1 %v7801_v38, %s18866_s21  ;;  %v7909_v34 = vsel %vm3866_vm5, %v7903_v51, %v7840_v20 }
0x26bd   :  { %v7915_v58 = vsel %vm3873_vm6, %v7909_v34, %v7864_v27  ;;  %v22334_v34 = vld [vmem:[%s24018_s11 + $0x10] sm:$0xff] }
0x26be   :  { %v7822_v60 = vpop.permute.xlu0 %7821 }
0x26bf   :  { %v7906_v11 = vsel %vm3859_vm4, %v22116_v14, %v7822_v60 }
0x26c0   :  { %7891 = vrot.lane.b32.xlu1 %v7803_v5, %s18866_s21 }
0x26c2   :  { %v7820_v54 = vpop.permute.xlu0 %7819 }
0x26c3   :  { %v7905_v28 = vsel %vm3859_vm4, %v22113_v56, %v7820_v54  ;;  %v22282_v54 = vld [vmem:[%s24021_s13] ss:$0 sm:$0xff] }
0x26c4   :  { %v7911_v38 = vsel %vm3866_vm5, %v7905_v28, %v7844_v39 }
0x26c5   :  { %v7917_v1 = vsel %vm3873_vm6, %v7911_v38, %v7868_v40 }
0x26c6   :  { %v7838_v22 = vpop.permute.xlu0 %7837 }
0x26c7   :  { %v7908_v3 = vsel %vm3866_vm5, %v7902_v36, %v7838_v22 }
0x26ca   :  { %v7842_v37 = vpop.permute.xlu0 %7841 }
0x26cb   :  { %v7910_v8 = vsel %vm3866_vm5, %v7904_v26, %v7842_v37  ;;  %v22327_v26 = vld [vmem:[%s24018_s11 + $0x8] sm:$0xff] }
0x26ce   :  { %v7862_v4 = vpop.permute.xlu0 %7861 }
0x26cf   :  { %v7914_v17 = vsel %vm3873_vm6, %v7908_v3, %v7862_v4 }
0x26d2   :  { %v7846_v42 = vpop.permute.xlu0 %7845 }
0x26d3   :  { %v7912_v12 = vsel %vm3866_vm5, %v7906_v11, %v7846_v42 }
0x26d6   :  { %v7866_v59 = vpop.permute.xlu0 %7865 }
0x26d7   :  { %v7916_v29 = vsel %vm3873_vm6, %v7910_v8, %v7866_v59  ;;  %v22348_v8 = vld [vmem:[%s24018_s11 + $0x20] sm:$0xff] }
0x26da   :  { %v7870_v33 = vpop.permute.xlu0 %7869 }
0x26db   :  { %v7918_v10 = vsel %vm3873_vm6, %v7912_v12, %v7870_v33  ;;  %v22341_v33 = vld [vmem:[%s24018_s11 + $0x18] sm:$0xff] }
0x2722   :  { %v7886_v30 = vpop.permute.xlu1 %7885 }
0x2723   :  { %v7920_v15 = vsel %vm3880_vm7, %v7914_v17, %v7886_v30 }
0x2726   :  { %v7884_v32 = vpop.permute.xlu1 %7883 }
0x2727   :  { %v7919_v43 = vsel %vm3880_vm7, %v7913_v18, %v7884_v32 }
0x2728   :  { %15718 = vmatprep.mubr.msk.f32.mxu0 %vm3893_vm8, %v7919_v43 }
0x2729   :  { %15719 = vmatmul.mubr.msk.f32.vlgmr.msra.gmra.mrb[164].mxu0 %vm3893_vm8, %v7920_v15 }
0x272a   :  { %v7890_v47 = vpop.permute.xlu1 %7889  ;;  %v7894_v41 = vpop.permute.xlu0 %7893 }
0x272b   :  { %v7922_v13 = vsel %vm3880_vm7, %v7916_v29, %v7890_v47  ;;  %v7924_v31 = vsel %vm3880_vm7, %v7918_v10, %v7894_v41 }
0x272e   :  { %v7888_v52 = vpop.permute.xlu1 %7887 }
0x272f   :  { %v7921_v62 = vsel %vm3880_vm7, %v7915_v58, %v7888_v52  ;;  %v22355_v58 = vld [vmem:[%s24018_s11 + $0x28] sm:$0xff]  ;;  %v22362_v52 = vld [vmem:[%s24018_s11 + $0x30] sm:$0xff] }
0x2730   :  { %15721 = vmatprep.mubr.msk.f32.mxu0 %vm3893_vm8, %v7921_v62 }
0x2731   :  { %15722 = vmatmul.mubr.msk.f32.gmra.mrb[166].mxu0 %vm3893_vm8, %v7922_v13 }
0x2732   :  { %v7892_v16 = vpop.permute.xlu1 %7891 }
0x2733   :  { %v7923_v5 = vsel %vm3880_vm7, %v7917_v1, %v7892_v16 }
0x2734   :  { %15724 = vmatprep.mubr.msk.f32.mxu0 %vm3893_vm8, %v7923_v5  ;;  %v22395_v5 = vld [vmem:[%s24018_s11 + $0x38] sm:$0xff] }
0x2735   :  { %15725 = vmatmul.mubr.msk.f32.gmra.mrb[168].mxu0 %vm3893_vm8, %v7924_v31  ;;  %v22404_v31 = vld [vmem:[%s24018_s11 + $0x40] sm:$0xff] }
0x2736   :  { %15760 = vmatprep.mubr.msk.f32.mxu0 %vm3322_vm2, %v22267_v61 }
0x27fc   :  { %v15720_v63 = vpop.f32.mrb[164].mxu0 }
0x27fd   :  { %v22272_v57 = vadd.f32 %v21874_v46, %v15720_v63  ;;  %v8009_v35 = vpop.f32.mrb[165].mxu0  ;;  %v24275_v63 = vld [vmem:[#allocation9_spill] sm:$0xff] }
0x27fe   :  { %v22275_v60 = vadd.f32 %v21874_v46, %v8009_v35  ;;  %v22415_v35 = vld [vmem:[%s24018_s11 + $0x48] sm:$0xff] }
0x27ff   :  { %18591 = vtanh.f32 %v22272_v57 }
0x2800   :  { %18593 = vtanh.f32 %v22275_v60 }
0x2804   :  { %v15723_v20 = vpop.f32.mrb[166].mxu0 }
0x2805   :  { %v22285_v7 = vadd.f32 %v22282_v54, %v15723_v20  ;;  %v8019_v22 = vpop.f32.mrb[167].mxu0  ;;  %v22424_v20 = vld [vmem:[%s24018_s11 + $0x50] sm:$0xff] }
0x2806   :  { %v22288_v39 = vadd.f32 %v22282_v54, %v8019_v22  ;;  %v24276_v22 = vld [vmem:[#allocation5_spill] sm:$0xff] }
0x2807   :  { %18595 = vtanh.f32 %v22285_v7 }
0x2808   :  { %18597 = vtanh.f32 %v22288_v39  ;;  %v15726_v46 = vpop.f32.mrb[168].mxu0 }
0x2809   :  { %v18592_v37 = vpop.eup %18591  ;;  %v22293_v27 = vadd.f32 %v22282_v54, %v15726_v46  ;;  %v8029_v4 = vpop.f32.mrb[169].mxu0  ;;  %v22435_v46 = vld [vmem:[%s24018_s11 + $0x58] sm:$0xff] }
0x280a   :  { %v18594_v40 = vpop.eup %18593  ;;  %v22296_v42 = vadd.f32 %v22282_v54, %v8029_v4  ;;  %8088 = vrot.lane.b32.xlu0 %v18592_v37, %s18862_s6  ;;  %v24277_v37 = vld [vmem:[#allocation6_spill] sm:$0xff] }
0x280b   :  { %18599 = vtanh.f32 %v22293_v27  ;;  %8086 = vrot.lane.b32.xlu1 %v18594_v40, %s18862_s6  ;;  %v24278_v4 = vld [vmem:[#allocation10_spill] sm:$0xff]  ;;  %v24279_v40 = vld [vmem:[#allocation8_spill] sm:$0xff] }
0x280c   :  { %18601 = vtanh.f32 %v22296_v42 }
0x2811   :  { %v18596_v30 = vpop.eup %18595 }
0x2812   :  { %v18598_v6 = vpop.eup %18597  ;;  %8092 = vrot.lane.b32.xlu0 %v18596_v30, %s18862_s6  ;;  %v24280_v30 = vld [vmem:[#allocation11_spill] sm:$0xff] }
0x2813   :  { %8090 = vrot.lane.b32.xlu1 %v18598_v6, %s18862_s6  ;;  %v24281_v6 = vld [vmem:[#allocation13_spill] sm:$0xff] }
0x2815   :  { %v18600_v36 = vpop.eup %18599 }
0x2816   :  { %v18602_v53 = vpop.eup %18601  ;;  %8096 = vrot.lane.b32.xlu0 %v18600_v36, %s18862_s6  ;;  %v24282_v36 = vld [vmem:[#allocation12_spill] sm:$0xff] }
0x2817   :  { %8094 = vrot.lane.b32.xlu1 %v18602_v53, %s18862_s6  ;;  %v24283_v53 = vld [vmem:[#allocation16_spill] sm:$0xff] }
0x287c   :  { %v22306_v3 = vpop.permute.xlu0 %8088 }
0x287d   :  { %v22308_v18 = vpop.permute.xlu1 %8086 }
0x287e   :  { %v17405_v32 = vpack.c.bf16 %v22306_v3, %v22308_v18 }
0x2880   :  { %17406 = vmatprep.subr.bf16.mxu1 %v17405_v32 }
0x2881   :  { %17408 = vmatpush3.bf16.msra.mxu1 %v17405_v32  ;;  %v24284_v32 = vld [vmem:[#allocation17_spill] sm:$0xff] }
0x2884   :  { %v22312_v17 = vpop.permute.xlu0 %8092 }
0x2885   :  { %v22314_v59 = vpop.permute.xlu1 %8090 }
0x2886   :  { %v17409_v43 = vpack.c.bf16 %v22312_v17, %v22314_v59 }
0x2888   :  { %v22318_v15 = vpop.permute.xlu0 %8096  ;;  %17410 = vmatprep.subr.bf16.mxu1 %v17409_v43 }
0x2889   :  { %17412 = vmatpush3.bf16.msra.mxu1 %v17409_v43  ;;  %v22320_v47 = vpop.permute.xlu1 %8094 }
0x288a   :  { %v17413_v51 = vpack.c.bf16 %v22318_v15, %v22320_v47 }
0x288c   :  { %17414 = vmatprep.subr.bf16.mxu1 %v17413_v51 }
0x288d   :  { %17416 = vmatpush3.bf16.msra.mxu1 %v17413_v51 }
0x2890   :  { %15740 = vmatmul.mubr.msk.f32.vlgmr.msra.gmra.mrb[162].mxu1 %vm3322_vm2, %v22327_v26 }
0x2891   :  { %15742 = vmatprep.mubr.msk.f32.mxu1 %vm3322_vm2, %v22334_v34 }
0x2894   :  { %15743 = vmatmul.mubr.msk.f32.gmra.mrb[164].mxu1 %vm3322_vm2, %v22341_v33 }
0x2895   :  { %15745 = vmatprep.mubr.msk.f32.mxu1 %vm3322_vm2, %v22348_v8 }
0x2898   :  { %15746 = vmatmul.mubr.msk.f32.gmra.mrb[166].mxu1 %vm3322_vm2, %v22355_v58 }
0x2899   :  { %15781 = vmatprep.mubr.msk.f32.mxu1 %vm3322_vm2, %v22362_v52 }
0x2963   :  { %v22366_v29 = vpop.f32.mrb[162].mxu1 }
0x2964   :  { %v22368_v62 = vpop.f32.mrb[163].mxu1 }
0x2965   :  { %v18003_v28 = vpack.i.bf16 %v22366_v29, %v22368_v62  ;;  %v17417_v13 = vpack.c.bf16 %v22366_v29, %v22368_v62 }
0x2967   :  { %18004 = vrot.lane.b32.xlu1 %v18003_v28, %s18867_s23  ;;  %v22375_v11 = vpop.f32.mrb[164].mxu1  ;;  %17418 = vmatprep.subr.bf16.mxu0 %v17417_v13 }
0x2968   :  { %17430 = vmatprep.subr.bf16.mxu1 %v17417_v13  ;;  %v22377_v38 = vpop.f32.mrb[165].mxu1  ;;  %17420 = vmatpush3.bf16.msra.mxu0 %v17417_v13 }
0x2969   :  { %v17421_v12 = vpack.c.bf16 %v22375_v11, %v22377_v38  ;;  %17432 = vmatpush3.bf16.msra.mxu1 %v17417_v13 }
0x296b   :  { %v22383_v1 = vpop.f32.mrb[166].mxu1  ;;  %17422 = vmatprep.subr.bf16.mxu0 %v17421_v12  ;;  %17434 = vmatprep.subr.bf16.mxu1 %v17421_v12 }
0x296c   :  { %v22385_v16 = vpop.f32.mrb[167].mxu1  ;;  %17424 = vmatpush3.bf16.msra.mxu0 %v17421_v12 }
0x296d   :  { %v17425_v10 = vpack.c.bf16 %v22383_v1, %v22385_v16  ;;  %17436 = vmatpush3.bf16.msra.mxu1 %v17421_v12 }
0x296f   :  { %17426 = vmatprep.subr.bf16.mxu0 %v17425_v10  ;;  %17438 = vmatprep.subr.bf16.mxu1 %v17425_v10 }
0x2970   :  { %17428 = vmatpush3.bf16.msra.mxu0 %v17425_v10 }
0x2971   :  { %17440 = vmatpush3.bf16.msra.mxu1 %v17425_v10 }
0x2972   :  { %17453 = vmatprep.subr.bf16.mxu1 %v24260_v55 }
0x2973   :  { %15761 = vmatmul.mubr.msk.f32.vlgmr.msra.gmra.mrb[170].mxu0 %vm3322_vm2, %v22327_v26 }
0x2974   :  { %15782 = vmatmul.mubr.msk.f32.vlgmr.msra.gmra.mrb[168].mxu1 %vm3322_vm2, %v22395_v5  ;;  %15763 = vmatprep.mubr.msk.f32.mxu0 %vm3322_vm2, %v22334_v34 }
0x2975   :  { %15784 = vmatprep.mubr.msk.f32.mxu1 %vm3322_vm2, %v22404_v31  ;;  %17455 = vmatpush1.bf16.msra.mxu1 %v24275_v63 }
0x2976   :  { %17456 = vmatprep.subr.bf16.mxu1 %v24260_v55 }
0x2977   :  { %15764 = vmatmul.mubr.msk.f32.gmra.mrb[172].mxu0 %vm3322_vm2, %v22341_v33 }
0x2978   :  { %15785 = vmatmul.mubr.msk.f32.gmra.mrb[170].mxu1 %vm3322_vm2, %v22415_v35  ;;  %15766 = vmatprep.mubr.msk.f32.mxu0 %vm3322_vm2, %v22348_v8 }
0x2979   :  { %15787 = vmatprep.mubr.msk.f32.mxu1 %vm3322_vm2, %v22424_v20  ;;  %17458 = vmatpush1.bf16.msra.mxu1 %v24276_v22 }
0x297a   :  { %17459 = vmatprep.subr.bf16.mxu1 %v24260_v55 }
0x297b   :  { %15767 = vmatmul.mubr.msk.f32.gmra.mrb[174].mxu0 %vm3322_vm2, %v22355_v58 }
0x297c   :  { %15788 = vmatmul.mubr.msk.f32.gmra.mrb[172].mxu1 %vm3322_vm2, %v22435_v46  ;;  %15802 = vmatprep.mubr.msk.f32.mxu0 %vm3322_vm2, %v22362_v52 }
0x297d   :  { %17461 = vmatpush1.bf16.msra.mxu1 %v24277_v37 }
0x297e   :  { %17462 = vmatprep.subr.bf16.mxu1 %v24260_v55 }
0x2981   :  { %17464 = vmatpush1.bf16.msra.mxu1 %v24278_v4 }
0x2982   :  { %17465 = vmatprep.subr.bf16.mxu1 %v24260_v55 }
0x2985   :  { %17467 = vmatpush1.bf16.msra.mxu1 %v24279_v40 }
0x2986   :  { %17468 = vmatprep.subr.bf16.mxu1 %v24260_v55 }
0x2989   :  { %17470 = vmatpush1.bf16.msra.mxu1 %v24280_v30 }
0x298a   :  { %17471 = vmatprep.subr.bf16.mxu1 %v24260_v55 }
0x298d   :  { %17473 = vmatpush1.bf16.msra.mxu1 %v24281_v6 }
0x298e   :  { %17474 = vmatprep.subr.bf16.mxu1 %v24260_v55 }
0x2991   :  { %17476 = vmatpush1.bf16.msra.mxu1 %v24282_v36 }
0x2992   :  { %17477 = vmatprep.subr.bf16.mxu1 %v24260_v55 }
0x2995   :  { %17479 = vmatpush1.bf16.msra.mxu1 %v24283_v53 }
0x2996   :  { %17480 = vmatprep.subr.bf16.mxu1 %v24260_v55 }
0x2999   :  { %17482 = vmatpush1.bf16.msra.mxu1 %v24284_v32 }
0x299a   :  { %17532 = vmatprep.subr.bf16.mxu1 %v20833_v2 }
0x2a46   :  { %v15762_v43 = vpop.f32.mrb[170].mxu0 }
0x2a47   :  { %v8295_v51 = vmul.f32 2.0, %v15762_v43  ;;  %v15783_v28 = vpop.f32.mrb[168].mxu1  ;;  %v8265_v13 = vpop.f32.mrb[171].mxu0 }
0x2a48   :  { %v8294_v12 = vmul.f32 2.0, %v8265_v13  ;;  %v8372_v10 = vpop.f32.mrb[169].mxu1 }
0x2a49   :  { %v8301_v41 = vsub.f32 %v8295_v51, %v22306_v3  ;;  %v18013_v0 = vpack.i.bf16 %v15783_v28, %v8372_v10  ;;  %v17441_v19 = vpack.c.bf16 %v15783_v28, %v8372_v10 }
0x2a4a   :  { %v8300_v45 = vsub.f32 %v8294_v12, %v22308_v18  ;;  %v15765_v25 = vpop.f32.mrb[172].mxu0 }
0x2a4b   :  { %18014 = vrot.lane.b32.xlu1 %v18013_v0, %s18868_s24  ;;  %v8297_v48 = vmul.f32 2.0, %v15765_v25  ;;  %v15786_v49 = vpop.f32.mrb[170].mxu1  ;;  %17442 = vmatprep.subr.bf16.mxu0 %v17441_v19  ;;  %v8275_v32 = vpop.f32.mrb[173].mxu0 }
0x2a4c   :  { %v18008_v53 = vpack.i.bf16 %v8301_v41, %v8300_v45  ;;  %v8296_v36 = vmul.f32 2.0, %v8275_v32  ;;  %v8382_v43 = vpop.f32.mrb[171].mxu1  ;;  %17444 = vmatpush3.bf16.msra.mxu0 %v17441_v19  ;;  %v24285_v45 = vpack.i.bf16 %v22375_v11, %v22377_v38 }
0x2a4d   :  { %v8303_v13 = vsub.f32 %v8297_v48, %v22312_v17  ;;  %v18023_v6 = vpack.i.bf16 %v15786_v49, %v8382_v43  ;;  %v17445_v30 = vpack.c.bf16 %v15786_v49, %v8382_v43 }
0x2a4e   :  { %v8302_v51 = vsub.f32 %v8296_v36, %v22314_v59  ;;  %18009 = vrot.lane.b32.xlu0 %v18008_v53, %s18869_s25  ;;  %v15768_v28 = vpop.f32.mrb[174].mxu0 }
0x2a4f   :  { %v15789_v12 = vpop.f32.mrb[172].mxu1  ;;  %17446 = vmatprep.subr.bf16.mxu0 %v17445_v30  ;;  %v8285_v0 = vpop.f32.mrb[175].mxu0  ;;  %v8299_v48 = vmul.f32 2.0, %v15768_v28 }
0x2a50   :  { %v18028_v25 = vpack.i.bf16 %v8303_v13, %v8302_v51  ;;  %v8392_v10 = vpop.f32.mrb[173].mxu1  ;;  %17448 = vmatpush3.bf16.msra.mxu0 %v17445_v30  ;;  %v8298_v49 = vmul.f32 2.0, %v8285_v0  ;;  %v18005_v30 = vpop.permute.xlu1 %18004 }
0x2a51   :  { %v17449_v40 = vpack.c.bf16 %v15789_v12, %v8392_v10  ;;  %v8305_v41 = vsub.f32 %v8299_v48, %v22318_v15  ;;  %v18007_v13 = vunpack.i.h.bf16 %v18005_v30 }
0x2a52   :  { %18019 = vrot.lane.b32.xlu0 %v24285_v45, %s18867_s23  ;;  %18029 = vrot.lane.b32.xlu1 %v18028_v25, %s18869_s25  ;;  %v8304_v19 = vsub.f32 %v8298_v49, %v22320_v47 }
0x2a53   :  { %17450 = vmatprep.subr.bf16.mxu0 %v17449_v40 }
0x2a54   :  { %17452 = vmatpush3.bf16.msra.mxu0 %v17449_v40 }
0x2a56   :  { %18024 = vrot.lane.b32.xlu0 %v18023_v6, %s18868_s24  ;;  %8522 = vrot.lane.b32.xlu1 %v22385_v16, %s18867_s23  ;;  %v18006_v6 = vunpack.i.l.bf16 %v18005_v30  ;;  %v8581_v30 = vsel %vm3075_vm0, %v22306_v3, %v18007_v13 }
0x2a57   :  { %15803 = vmatmul.mubr.msk.f32.vlgmr.msra.gmra.mrb[176].mxu0 %vm3322_vm2, %v22395_v5 }
0x2a58   :  { %15805 = vmatprep.mubr.msk.f32.mxu0 %vm3322_vm2, %v22404_v31  ;;  %v8580_v0 = vsel %vm3075_vm0, %v22308_v18, %v18006_v6 }
0x2a5a   :  { %8570 = vrot.lane.b32.xlu1 %v8392_v10, %s18868_s24  ;;  %8546 = vrot.lane.b32.xlu0 %v8304_v19, %s18869_s25 }
0x2a5b   :  { %15806 = vmatmul.mubr.msk.f32.gmra.mrb[178].mxu0 %vm3322_vm2, %v22415_v35 }
0x2a5c   :  { %15808 = vmatprep.mubr.msk.f32.mxu0 %vm3322_vm2, %v22424_v20 }
0x2a5e   :  { %8548 = vrot.lane.b32.xlu1 %v8305_v41, %s18869_s25  ;;  %8524 = vrot.lane.b32.xlu0 %v22383_v1, %s18867_s23 }
0x2a5f   :  { %15809 = vmatmul.mubr.msk.f32.gmra.mrb[180].mxu0 %vm3322_vm2, %v22435_v46 }
0x2a60   :  { %15823 = vmatprep.mubr.msk.f32.mxu0 %vm3322_vm2, %v22267_v61 }
0x2a62   :  { %8572 = vrot.lane.b32.xlu0 %v15789_v12, %s18868_s24 }
0x2abd   :  { %v18015_v32 = vpop.permute.xlu1 %18014 }
0x2abe   :  { %v18016_v12 = vunpack.i.l.bf16 %v18015_v32 }
0x2ac0   :  { %v18010_v40 = vpop.permute.xlu0 %18009 }
0x2ac1   :  { %v18011_v36 = vunpack.i.l.bf16 %v18010_v40  ;;  %v18012_v25 = vunpack.i.h.bf16 %v18010_v40  ;;  %v18017_v40 = vunpack.i.h.bf16 %v18015_v32 }
0x2ac3   :  { %v8586_v49 = vsel %vm3174_vm1, %v8580_v0, %v18011_v36 }
0x2ac4   :  { %v18020_v53 = vpop.permute.xlu0 %18019  ;;  %v18030_v48 = vpop.permute.xlu1 %18029  ;;  %v8592_v18 = vsel %vm4565_vm9, %v8586_v49, %v18016_v12 }
0x2ac5   :  { %v18031_v3 = vunpack.i.l.bf16 %v18030_v48 }
0x2ac8   :  { %v18025_v4 = vpop.permute.xlu0 %18024  ;;  %v8523_v0 = vpop.permute.xlu1 %8522 }
0x2ac9   :  { %v18026_v32 = vunpack.i.l.bf16 %v18025_v4 }
0x2acc   :  { %v8571_v12 = vpop.permute.xlu1 %8570 }
0x2b2a   :  { %v15804_v43 = vpop.f32.mrb[176].mxu0 }
0x2b2b   :  { %v8497_v51 = vmul.f32 2.0, %v15804_v43  ;;  %v8467_v28 = vpop.f32.mrb[177].mxu0  ;;  %v18021_v43 = vunpack.i.l.bf16 %v18020_v53 }
0x2b2c   :  { %v8496_v10 = vmul.f32 2.0, %v8467_v28  ;;  %v18022_v28 = vunpack.i.h.bf16 %v18020_v53 }
0x2b2d   :  { %v8503_v45 = vsub.f32 %v8497_v51, %v22366_v29  ;;  %v8587_v29 = vsel %vm3174_vm1, %v8581_v30, %v18012_v25 }
0x2b2e   :  { %v8502_v19 = vsub.f32 %v8496_v10, %v22368_v62  ;;  %v15807_v41 = vpop.f32.mrb[178].mxu0  ;;  %v8593_v51 = vsel %vm4565_vm9, %v8587_v29, %v18017_v40  ;;  %v18032_v10 = vunpack.i.h.bf16 %v18030_v48  ;;  %v13510_v29 = vmul.f32 -1.442695, %v22272_v57 }
0x2b2f   :  { %v8499_v37 = vmul.f32 2.0, %v15807_v41  ;;  %v8477_v22 = vpop.f32.mrb[179].mxu0  ;;  %v13511_v40 = vmul.f32 -1.442695, %v22288_v39 }
0x2b30   :  { %v8498_v63 = vmul.f32 2.0, %v8477_v22  ;;  %13539 = vmatprep.mubr.msk.f32.mxu1 %vm3075_vm0, %v8502_v19  ;;  %v8584_v19 = vsel %vm3075_vm0, %v22320_v47, %v8523_v0 }
0x2b31   :  { %v8505_v6 = vsub.f32 %v8499_v37, %v22375_v11  ;;  %8681 = vmatmul.mubr.f32.vlgmr.msra.gmra.mrb[174].mxu1 %v8592_v18  ;;  %v13509_v18 = vmul.f32 -1.442695, %v22275_v60 }
0x2b32   :  { %v8504_v62 = vsub.f32 %v8498_v63, %v22377_v38  ;;  %v15810_v36 = vpop.f32.mrb[180].mxu0  ;;  %13540 = vmatprep.mubr.msk.f32.mxu1 %vm3075_vm0, %v8503_v45  ;;  %17534 = vmatpush3.bf16.msra.mxu1 %v20833_v2  ;;  %v8582_v38 = vsel %vm3075_vm0, %v22314_v59, %v18021_v43  ;;  %v8547_v63 = vpop.permute.xlu0 %8546  ;;  %v18027_v45 = vunpack.i.h.bf16 %v18025_v4  ;;  %v8583_v59 = vsel %vm3075_vm0, %v22312_v17, %v18022_v28 }
0x2b33   :  { %v8501_v13 = vmul.f32 2.0, %v15810_v36  ;;  %v8487_v22 = vpop.f32.mrb[181].mxu0  ;;  %15899 = vmatprep.subr.msk.mxu1 %vm3912_vm3, %v22058_v23  ;;  %v8588_v53 = vsel %vm3174_vm1, %v8582_v38, %v18031_v3  ;;  %v8590_v48 = vsel %vm3174_vm1, %v8584_v19, %v8547_v63  ;;  %v8549_v4 = vpop.permute.xlu1 %8548  ;;  %18603 = vpow2.f32 %v13509_v18 }
0x2b34   :  { %v8500_v11 = vmul.f32 2.0, %v8487_v22  ;;  %v8594_v49 = vsel %vm4565_vm9, %v8588_v53, %v18026_v32  ;;  %v8596_v41 = vsel %vm4565_vm9, %v8590_v48, %v8571_v12  ;;  %18605 = vpow2.f32 %v13510_v29 }
0x2b35   :  { %v8507_v37 = vsub.f32 %v8501_v13, %v22383_v1  ;;  %8686 = vmatmul.mubr.f32.gmra.mrb[176].mxu1 %v8593_v51  ;;  %18607 = vpow2.f32 %v13511_v40  ;;  %v13514_v22 = vmul.f32 -1.442695, %v22293_v27  ;;  %v22543_v27 = vld [vmem:[%s24023_s15] ss:$0 sm:$0xff] }
0x2b36   :  { %v8506_v25 = vsub.f32 %v8500_v11, %v22385_v16  ;;  %13541 = vmatprep.mubr.msk.f32.mxu1 %vm3075_vm0, %v8504_v62  ;;  %15900 = vmatpush3.msk.msra.mxu1 %vm3912_vm3, %v22058_v23  ;;  %v8525_v1 = vpop.permute.xlu0 %8524  ;;  %v8589_v16 = vsel %vm3174_vm1, %v8583_v59, %v18032_v10  ;;  %v13513_v62 = vmul.f32 -1.442695, %v22296_v42 }
0x2b37   :  { %v8595_v23 = vsel %vm4565_vm9, %v8589_v16, %v18027_v45  ;;  %v8585_v17 = vsel %vm3075_vm0, %v22318_v15, %v8525_v1  ;;  %v13512_v15 = vmul.f32 -1.442695, %v22285_v7 }
0x2b38   :  { %v8591_v43 = vsel %vm3174_vm1, %v8585_v17, %v8549_v4 }
0x2b39   :  { %8691 = vmatmul.mubr.f32.gmra.mrb[178].mxu1 %v8594_v49  ;;  %18609 = vpow2.f32 %v13512_v15 }
0x2b3a   :  { %13542 = vmatprep.mubr.msk.f32.mxu1 %vm3075_vm0, %v8505_v6  ;;  %v8573_v30 = vpop.permute.xlu0 %8572  ;;  %18611 = vpow2.f32 %v13513_v62 }
0x2b3b   :  { %v8597_v47 = vsel %vm4565_vm9, %v8591_v43, %v8573_v30 }
0x2b3d   :  { %8696 = vmatmul.mubr.f32.gmra.mrb[180].mxu1 %v8595_v23  ;;  %v18604_v6 = vpop.eup %18603 }
0x2b3e   :  { %13543 = vmatprep.mubr.msk.f32.mxu1 %vm3075_vm0, %v8506_v25  ;;  %v8056_v36 = vadd.f32 1.0, %v18604_v6  ;;  %v18606_v3 = vpop.eup %18605 }
0x2b3f   :  { %v8057_v51 = vadd.f32 1.0, %v18606_v3  ;;  %v18608_v28 = vpop.eup %18607 }
0x2b40   :  { %18613 = vrcp.f32 %v8056_v36  ;;  %v8058_v42 = vadd.f32 1.0, %v18608_v28 }
0x2b41   :  { %8701 = vmatmul.mubr.f32.gmra.mrb[182].mxu1 %v8596_v41 }
0x2b42   :  { %13544 = vmatprep.mubr.msk.f32.mxu1 %vm3075_vm0, %v8507_v37 }
0x2b43   :  { %v18610_v0 = vpop.eup %18609 }
0x2b44   :  { %v8059_v37 = vadd.f32 1.0, %v18610_v0  ;;  %v18612_v25 = vpop.eup %18611 }
0x2b45   :  { %8706 = vmatmul.mubr.f32.gmra.mrb[184].mxu1 %v8597_v47  ;;  %v8060_v59 = vadd.f32 1.0, %v18612_v25 }
0x2b4a   :  { %v18614_v10 = vpop.eup %18613 }
0x2c04   :  { %v8682_v13 = vpop.f32.mrb[174].mxu1 }
0x2c05   :  { %v8683_v60 = vadd.f32 %v22089_v24, %v8682_v13  ;;  %v8684_v57 = vpop.f32.mrb[175].mxu1 }
0x2c07   :  { %18615 = vtanh.f32 %v8683_v60 }
0x2c08   :  { %v8687_v39 = vpop.f32.mrb[176].mxu1  ;;  %18617 = vpow2.f32 %v13514_v22 }
0x2c09   :  { %v8688_v7 = vadd.f32 %v22089_v24, %v8687_v39  ;;  %v8689_v32 = vpop.f32.mrb[177].mxu1  ;;  %18619 = vrcp.f32 %v8057_v51 }
0x2c0b   :  { %18621 = vtanh.f32 %v8688_v7 }
0x2c0c   :  { %v8692_v11 = vpop.f32.mrb[178].mxu1  ;;  %18623 = vrcp.f32 %v8058_v42 }
0x2c0d   :  { %v8693_v38 = vadd.f32 %v22543_v27, %v8692_v11  ;;  %v8694_v63 = vpop.f32.mrb[179].mxu1 }
0x2c0f   :  { %18625 = vtanh.f32 %v8693_v38 }
0x2c10   :  { %v8697_v24 = vpop.f32.mrb[180].mxu1  ;;  %18627 = vrcp.f32 %v8059_v37 }
0x2c11   :  { %v18616_v53 = vpop.eup %18615  ;;  %v8698_v45 = vadd.f32 %v22543_v27, %v8697_v24  ;;  %v8699_v49 = vpop.f32.mrb[181].mxu1 }
0x2c12   :  { %v8717_v12 = vmul.f32 %v18616_v53, %v18614_v10  ;;  %v18618_v1 = vpop.eup %18617 }
0x2c13   :  { %18629 = vtanh.f32 %v8698_v45  ;;  %v18620_v16 = vpop.eup %18619  ;;  %v8061_v41 = vadd.f32 1.0, %v18618_v1 }
0x2c14   :  { %v8723_v19 = vsub.f32 0.0, %v8717_v12  ;;  %v8702_v23 = vpop.f32.mrb[182].mxu1  ;;  %18631 = vrcp.f32 %v8060_v59 }
0x2c15   :  { %v18622_v48 = vpop.eup %18621  ;;  %v8703_v4 = vadd.f32 %v22543_v27, %v8702_v23  ;;  %v8704_v17 = vpop.f32.mrb[183].mxu1 }
0x2c16   :  { %v8718_v30 = vmul.f32 %v18622_v48, %v18620_v16  ;;  %v18624_v43 = vpop.eup %18623  ;;  %v8729_v47 = vmul.f32 0.125, %v8723_v19 }
0x2c17   :  { %18633 = vtanh.f32 %v8703_v4 }
0x2c18   :  { %v8724_v18 = vsub.f32 0.0, %v8718_v30  ;;  %v8707_v29 = vpop.f32.mrb[184].mxu1  ;;  %18635 = vrcp.f32 %v8061_v41  ;;  %v22550_v13 = vadd.f32 %v8729_v47, %v22097_v21 }
0x2c19   :  { %v18626_v40 = vpop.eup %18625  ;;  %v8708_v15 = vadd.f32 %v22543_v27, %v8707_v29  ;;  %v8709_v6 = vpop.f32.mrb[185].mxu1 }
0x2c1a   :  { %v8730_v62 = vmul.f32 0.125, %v8724_v18  ;;  %v8719_v36 = vmul.f32 %v18626_v40, %v18624_v43  ;;  %v18628_v3 = vpop.eup %18627  ;;  %24286 = vst [vmem:[#allocation36_spill] sm:$0xff] %v22550_v13 }
0x2c1b   :  { %18637 = vtanh.f32 %v8708_v15 }
0x2c1c   :  { %v22553_v22 = vadd.f32 %v8730_v62, %v22100_v44  ;;  %v8725_v60 = vsub.f32 0.0, %v8719_v36 }
0x2c1d   :  { %v18630_v57 = vpop.eup %18629 }
0x2c1e   :  { %24287 = vst [vmem:[#allocation37_spill] sm:$0xff] %v22553_v22  ;;  %v8720_v51 = vmul.f32 %v18630_v57, %v18628_v3  ;;  %v17483_v28 = vpack.c.bf16 %v22553_v22, %v22550_v13  ;;  %v18632_v39 = vpop.eup %18631  ;;  %v8731_v7 = vmul.f32 0.125, %v8725_v60 }
0x2c20   :  { %v8726_v32 = vsub.f32 0.0, %v8720_v51  ;;  %17484 = vmatprep.subr.bf16.mxu0 %v17483_v28  ;;  %v22558_v63 = vadd.f32 %v8731_v7, %v22105_v9 }
0x2c21   :  { %v18634_v42 = vpop.eup %18633  ;;  %17486 = vmatpush3.bf16.msra.mxu0 %v17483_v28 }
0x2c22   :  { %v8732_v0 = vmul.f32 0.125, %v8726_v32  ;;  %v8721_v11 = vmul.f32 %v18634_v42, %v18632_v39  ;;  %v18636_v38 = vpop.eup %18635  ;;  %24288 = vst [vmem:[#allocation38_spill] sm:$0xff] %v22558_v63 }
0x2c24   :  { %v22561_v37 = vadd.f32 %v8732_v0, %v22108_v50  ;;  %v8727_v25 = vsub.f32 0.0, %v8721_v11 }
0x2c25   :  { %v18638_v10 = vpop.eup %18637 }
0x2c26   :  { %24289 = vst [vmem:[#allocation39_spill] sm:$0xff] %v22561_v37  ;;  %v8722_v24 = vmul.f32 %v18638_v10, %v18636_v38  ;;  %v17487_v53 = vpack.c.bf16 %v22561_v37, %v22558_v63  ;;  %v8733_v45 = vmul.f32 0.125, %v8727_v25 }
0x2c28   :  { %v8728_v49 = vsub.f32 0.0, %v8722_v24  ;;  %17488 = vmatprep.subr.bf16.mxu0 %v17487_v53  ;;  %v22566_v12 = vadd.f32 %v8733_v45, %v22113_v56 }
0x2c29   :  { %17490 = vmatpush3.bf16.msra.mxu0 %v17487_v53 }
0x2c2a   :  { %v8734_v59 = vmul.f32 0.125, %v8728_v49  ;;  %24290 = vst [vmem:[#allocation40_spill] sm:$0xff] %v22566_v12 }
0x2c2c   :  { %v22569_v1 = vadd.f32 %v8734_v59, %v22116_v14 }
0x2c2e   :  { %24291 = vst [vmem:[#allocation41_spill] sm:$0xff] %v22569_v1  ;;  %v17491_v16 = vpack.c.bf16 %v22569_v1, %v22566_v12 }
0x2c30   :  { %17492 = vmatprep.subr.bf16.mxu0 %v17491_v16 }
0x2c31   :  { %17494 = vmatpush3.bf16.msra.mxu0 %v17491_v16 }
0x2c34   :  { %15824 = vmatmul.mubr.msk.f32.vlgmr.msra.gmra.mrb[182].mxu0 %vm3322_vm2, %v22327_v26 }
0x2c35   :  { %15826 = vmatprep.mubr.msk.f32.mxu0 %vm3322_vm2, %v22334_v34 }
0x2c38   :  { %15827 = vmatmul.mubr.msk.f32.gmra.mrb[184].mxu0 %vm3322_vm2, %v22341_v33 }
0x2c39   :  { %15829 = vmatprep.mubr.msk.f32.mxu0 %vm3322_vm2, %v22348_v8 }
0x2c3c   :  { %15830 = vmatmul.mubr.msk.f32.gmra.mrb[186].mxu0 %vm3322_vm2, %v22355_v58 }
0x2c3d   :  { %15844 = vmatprep.mubr.msk.f32.mxu0 %vm3322_vm2, %v22267_v61 }
0x2d07   :  { %v22585_v19 = vpop.f32.mrb[182].mxu0 }
0x2d08   :  { %9153 = vrot.lane.b32.xlu0 %v22585_v19, %s18863_s1  ;;  %v22589_v23 = vpop.f32.mrb[183].mxu0 }
0x2d09   :  { %v17495_v48 = vpack.c.bf16 %v22585_v19, %v22589_v23  ;;  %9151 = vrot.lane.b32.xlu1 %v22589_v23, %s18863_s1 }
0x2d0b   :  { %v22595_v4 = vpop.f32.mrb[184].mxu0  ;;  %17496 = vmatprep.subr.bf16.mxu0 %v17495_v48 }
0x2d0c   :  { %17498 = vmatpush3.bf16.msra.mxu0 %v17495_v48  ;;  %9157 = vrot.lane.b32.xlu0 %v22595_v4, %s18863_s1  ;;  %v22599_v17 = vpop.f32.mrb[185].mxu0 }
0x2d0d   :  { %v17499_v41 = vpack.c.bf16 %v22595_v4, %v22599_v17 }
0x2d0f   :  { %v22603_v30 = vpop.f32.mrb[186].mxu0  ;;  %17500 = vmatprep.subr.bf16.mxu0 %v17499_v41 }
0x2d10   :  { %9155 = vrot.lane.b32.xlu0 %v22599_v17, %s18863_s1  ;;  %v22607_v43 = vpop.f32.mrb[187].mxu0  ;;  %17502 = vmatpush3.bf16.msra.mxu0 %v17499_v41 }
0x2d11   :  { %v17503_v47 = vpack.c.bf16 %v22603_v30, %v22607_v43 }
0x2d13   :  { %17504 = vmatprep.subr.bf16.mxu0 %v17503_v47 }
0x2d14   :  { %9161 = vrot.lane.b32.xlu0 %v22603_v30, %s18863_s1  ;;  %17506 = vmatpush3.bf16.msra.mxu0 %v17503_v47 }
0x2d15   :  { %17508 = vmatprep.subr.bf16.mxu0 %v17495_v48 }
0x2d17   :  { %15845 = vmatmul.mubr.msk.f32.vlgmr.msra.gmra.mrb[188].mxu0 %vm3322_vm2, %v22327_v26 }
0x2d18   :  { %9159 = vrot.lane.b32.xlu0 %v22607_v43, %s18863_s1  ;;  %17510 = vmatpush3.bf16.msra.mxu0 %v17495_v48 }
0x2d19   :  { %17512 = vmatprep.subr.bf16.mxu0 %v17499_v41  ;;  %15847 = vmatprep.mubr.msk.f32.mxu0 %vm3322_vm2, %v22334_v34 }
0x2d1b   :  { %15848 = vmatmul.mubr.msk.f32.gmra.mrb[190].mxu0 %vm3322_vm2, %v22341_v33 }
0x2d1c   :  { %17514 = vmatpush3.bf16.msra.mxu0 %v17499_v41  ;;  %15850 = vmatprep.mubr.msk.f32.mxu0 %vm3322_vm2, %v22348_v8 }
0x2d1d   :  { %17516 = vmatprep.subr.bf16.mxu0 %v17503_v47 }
0x2d1f   :  { %15851 = vmatmul.mubr.msk.f32.gmra.mrb[192].mxu0 %vm3322_vm2, %v22355_v58 }
0x2d20   :  { %17518 = vmatpush3.bf16.msra.mxu0 %v17503_v47  ;;  %15865 = vmatprep.mubr.msk.f32.mxu0 %vm3322_vm2, %v22362_v52 }
0x2d23   :  { %15866 = vmatmul.mubr.msk.f32.vlgmr.msra.gmra.mrb[194].mxu0 %vm3322_vm2, %v22395_v5 }
0x2d24   :  { %15868 = vmatprep.mubr.msk.f32.mxu0 %vm3322_vm2, %v22404_v31 }
0x2d27   :  { %15869 = vmatmul.mubr.msk.f32.gmra.mrb[196].mxu0 %vm3322_vm2, %v22415_v35 }
0x2d28   :  { %15871 = vmatprep.mubr.msk.f32.mxu0 %vm3322_vm2, %v22424_v20 }
0x2d2b   :  { %15872 = vmatmul.mubr.msk.f32.gmra.mrb[198].mxu0 %vm3322_vm2, %v22435_v46 }
0x2d2c   :  { %15886 = vmatprep.mubr.msk.f32.mxu0 %vm3322_vm2, %v22362_v52 }
0x2dea   :  { %v15846_v18 = vpop.f32.mrb[188].mxu0 }
0x2deb   :  { %v8932_v29 = vmul.f32 2.0, %v15846_v18  ;;  %v8902_v40 = vpop.f32.mrb[189].mxu0 }
0x2dec   :  { %v8931_v15 = vmul.f32 2.0, %v8902_v40 }
0x2ded   :  { %v8938_v6 = vsub.f32 %v8932_v29, %v22553_v22 }
0x2dee   :  { %v8937_v62 = vsub.f32 %v8931_v15, %v22550_v13  ;;  %v15849_v36 = vpop.f32.mrb[190].mxu0 }
0x2def   :  { %v8934_v3 = vmul.f32 2.0, %v15849_v36  ;;  %9177 = vrot.lane.b32.xlu0 %v8938_v6, %s18864_s29  ;;  %v8912_v60 = vpop.f32.mrb[191].mxu0 }
0x2df0   :  { %v8933_v57 = vmul.f32 2.0, %v8912_v60  ;;  %9175 = vrot.lane.b32.xlu1 %v8937_v62, %s18864_s29 }
0x2df1   :  { %v8940_v51 = vsub.f32 %v8934_v3, %v22561_v37 }
0x2df2   :  { %v8939_v28 = vsub.f32 %v8933_v57, %v22558_v63  ;;  %v15852_v39 = vpop.f32.mrb[192].mxu0 }
0x2df3   :  { %9181 = vrot.lane.b32.xlu0 %v8940_v51, %s18864_s29  ;;  %v8922_v7 = vpop.f32.mrb[193].mxu0  ;;  %v8936_v32 = vmul.f32 2.0, %v15852_v39 }
0x2df4   :  { %9179 = vrot.lane.b32.xlu1 %v8939_v28, %s18864_s29  ;;  %v8935_v42 = vmul.f32 2.0, %v8922_v7  ;;  %v9152_v7 = vpop.permute.xlu1 %9151 }
0x2df5   :  { %v8942_v25 = vsub.f32 %v8936_v32, %v22569_v1 }
0x2df6   :  { %v15867_v0 = vpop.f32.mrb[194].mxu0  ;;  %v8941_v10 = vsub.f32 %v8935_v42, %v22566_v12 }
0x2df7   :  { %9201 = vrot.lane.b32.xlu0 %v15867_v0, %s18865_s0  ;;  %v9009_v11 = vpop.f32.mrb[195].mxu0 }
0x2df8   :  { %v17519_v38 = vpack.c.bf16 %v15867_v0, %v9009_v11  ;;  %9199 = vrot.lane.b32.xlu1 %v9009_v11, %s18865_s0 }
0x2dfa   :  { %v15870_v24 = vpop.f32.mrb[196].mxu0  ;;  %17520 = vmatprep.subr.bf16.mxu0 %v17519_v38 }
0x2dfb   :  { %9185 = vrot.lane.b32.xlu0 %v8942_v25, %s18864_s29  ;;  %v9019_v53 = vpop.f32.mrb[197].mxu0  ;;  %17522 = vmatpush3.bf16.msra.mxu0 %v17519_v38 }
0x2dfc   :  { %v17523_v45 = vpack.c.bf16 %v15870_v24, %v9019_v53  ;;  %9183 = vrot.lane.b32.xlu1 %v8941_v10, %s18864_s29 }
0x2dfe   :  { %v15873_v49 = vpop.f32.mrb[198].mxu0  ;;  %17524 = vmatprep.subr.bf16.mxu0 %v17523_v45 }
0x2dff   :  { %9205 = vrot.lane.b32.xlu0 %v15870_v24, %s18865_s0  ;;  %v9029_v59 = vpop.f32.mrb[199].mxu0  ;;  %17526 = vmatpush3.bf16.msra.mxu0 %v17523_v45 }
0x2e00   :  { %v17527_v16 = vpack.c.bf16 %v15873_v49, %v9029_v59  ;;  %9203 = vrot.lane.b32.xlu1 %v9019_v53, %s18865_s0 }
0x2e02   :  { %17528 = vmatprep.subr.bf16.mxu0 %v17527_v16 }
0x2e03   :  { %9209 = vrot.lane.b32.xlu0 %v15873_v49, %s18865_s0  ;;  %17530 = vmatpush3.bf16.msra.mxu0 %v17527_v16  ;;  %v9241_v16 = vsel %vm3859_vm4, %v22550_v13, %v9152_v7 }
0x2e04   :  { %9207 = vrot.lane.b32.xlu1 %v9029_v59, %s18865_s0 }
0x2e06   :  { %15887 = vmatmul.mubr.msk.f32.vlgmr.msra.gmra.mrb[200].mxu0 %vm3322_vm2, %v22395_v5 }
0x2e07   :  { %15889 = vmatprep.mubr.msk.f32.mxu0 %vm3322_vm2, %v22404_v31 }
0x2e0a   :  { %15890 = vmatmul.mubr.msk.f32.gmra.mrb[202].mxu0 %vm3322_vm2, %v22415_v35 }
0x2e0b   :  { %15892 = vmatprep.mubr.msk.f32.mxu0 %vm3322_vm2, %v22424_v20 }
0x2e0e   :  { %15893 = vmatmul.mubr.msk.f32.gmra.mrb[204].mxu0 %vm3322_vm2, %v22435_v46 }
0x2e0f   :  { %15922 = vmatprep.mubr.msk.f32.mxu0 %vm3322_vm2, %v22267_v61 }
0x2e62   :  { %v9176_v42 = vpop.permute.xlu1 %9175 }
0x2e66   :  { %v9180_v11 = vpop.permute.xlu1 %9179 }
0x2e6a   :  { %v9200_v25 = vpop.permute.xlu1 %9199 }
0x2e6e   :  { %v9184_v10 = vpop.permute.xlu1 %9183 }
0x2e72   :  { %v9204_v24 = vpop.permute.xlu1 %9203 }
0x2e76   :  { %v9208_v45 = vpop.permute.xlu1 %9207 }
0x2ed9   :  { %v15888_v48 = vpop.f32.mrb[200].mxu0 }
0x2eda   :  { %v9134_v41 = vmul.f32 2.0, %v15888_v48  ;;  %v9104_v47 = vpop.f32.mrb[201].mxu0 }
0x2edb   :  { %v9133_v18 = vmul.f32 2.0, %v9104_v47 }
0x2edc   :  { %v9140_v29 = vsub.f32 %v9134_v41, %v22585_v19  ;;  %v9247_v41 = vsel %vm3866_vm5, %v9241_v16, %v9176_v42 }
0x2edd   :  { %v9139_v40 = vsub.f32 %v9133_v18, %v22589_v23  ;;  %v15891_v15 = vpop.f32.mrb[202].mxu0  ;;  %v9253_v18 = vsel %vm3873_vm6, %v9247_v41, %v9200_v25 }
0x2ede   :  { %v9136_v6 = vmul.f32 2.0, %v15891_v15  ;;  %v9114_v62 = vpop.f32.mrb[203].mxu0  ;;  %9225 = vrot.lane.b32.xlu1 %v9140_v29, %s18866_s21 }
0x2edf   :  { %v9135_v36 = vmul.f32 2.0, %v9114_v62 }
0x2ee0   :  { %v9142_v3 = vsub.f32 %v9136_v6, %v22595_v4  ;;  %v9154_v4 = vpop.permute.xlu0 %9153 }
0x2ee1   :  { %v9141_v60 = vsub.f32 %v9135_v36, %v22599_v17  ;;  %v15894_v57 = vpop.f32.mrb[204].mxu0  ;;  %v9242_v48 = vsel %vm3859_vm4, %v22553_v22, %v9154_v4 }
0x2ee2   :  { %v9138_v51 = vmul.f32 2.0, %v15894_v57  ;;  %v9124_v28 = vpop.f32.mrb[205].mxu0  ;;  %9223 = vrot.lane.b32.xlu1 %v9139_v40, %s18866_s21 }
0x2ee3   :  { %v9137_v39 = vmul.f32 2.0, %v9124_v28 }
0x2ee4   :  { %v9144_v19 = vsub.f32 %v9138_v51, %v22603_v30  ;;  %v9158_v17 = vpop.permute.xlu0 %9157 }
0x2ee5   :  { %v9143_v23 = vsub.f32 %v9137_v39, %v22607_v43 }
0x2ee6   :  { %9233 = vrot.lane.b32.xlu0 %v9144_v19, %s18866_s21  ;;  %9229 = vrot.lane.b32.xlu1 %v9142_v3, %s18866_s21 }
0x2ee8   :  { %v9156_v32 = vpop.permute.xlu0 %9155 }
0x2ee9   :  { %v9243_v3 = vsel %vm3859_vm4, %v22558_v63, %v9156_v32 }
0x2eea   :  { %9227 = vrot.lane.b32.xlu1 %v9141_v60, %s18866_s21  ;;  %v9244_v60 = vsel %vm3859_vm4, %v22561_v37, %v9158_v17  ;;  %v9249_v57 = vsel %vm3866_vm5, %v9243_v3, %v9180_v11 }
0x2eeb   :  { %v9255_v39 = vsel %vm3873_vm6, %v9249_v57, %v9204_v24 }
0x2eec   :  { %v9162_v0 = vpop.permute.xlu0 %9161 }
0x2eed   :  { %v9246_v17 = vsel %vm3859_vm4, %v22569_v1, %v9162_v0 }
0x2eee   :  { %9231 = vrot.lane.b32.xlu1 %v9143_v23, %s18866_s21 }
0x2ef0   :  { %v9160_v38 = vpop.permute.xlu0 %9159 }
0x2ef1   :  { %v9245_v7 = vsel %vm3859_vm4, %v22566_v12, %v9160_v38 }
0x2ef2   :  { %v9251_v42 = vsel %vm3866_vm5, %v9245_v7, %v9184_v10 }
0x2ef4   :  { %v9178_v30 = vpop.permute.xlu0 %9177 }
0x2ef5   :  { %v9248_v47 = vsel %vm3866_vm5, %v9242_v48, %v9178_v30  ;;  %v9257_v30 = vsel %vm3873_vm6, %v9251_v42, %v9208_v45 }
0x2ef8   :  { %v9182_v43 = vpop.permute.xlu0 %9181 }
0x2ef9   :  { %v9250_v28 = vsel %vm3866_vm5, %v9244_v60, %v9182_v43 }
0x2efc   :  { %v9202_v53 = vpop.permute.xlu0 %9201 }
0x2efd   :  { %v9254_v40 = vsel %vm3873_vm6, %v9248_v47, %v9202_v53 }
0x2f00   :  { %v9186_v49 = vpop.permute.xlu0 %9185 }
0x2f01   :  { %v9252_v25 = vsel %vm3866_vm5, %v9246_v17, %v9186_v49 }
0x2f04   :  { %v9206_v15 = vpop.permute.xlu0 %9205 }
0x2f05   :  { %v9256_v23 = vsel %vm3873_vm6, %v9250_v28, %v9206_v15 }
0x2f08   :  { %v9210_v51 = vpop.permute.xlu0 %9209 }
0x2f09   :  { %v9258_v24 = vsel %vm3873_vm6, %v9252_v25, %v9210_v51 }
0x2f50   :  { %v9226_v59 = vpop.permute.xlu1 %9225 }
0x2f51   :  { %v9260_v62 = vsel %vm3880_vm7, %v9254_v40, %v9226_v59 }
0x2f54   :  { %v9224_v29 = vpop.permute.xlu1 %9223 }
0x2f55   :  { %v9259_v6 = vsel %vm3880_vm7, %v9253_v18, %v9224_v29 }
0x2f56   :  { %15901 = vmatprep.mubr.msk.f32.mxu1 %vm3893_vm8, %v9259_v6 }
0x2f57   :  { %15902 = vmatmul.mubr.msk.f32.vlgmr.msra.gmra.mrb[186].mxu1 %vm3893_vm8, %v9260_v62 }
0x2f58   :  { %v9230_v36 = vpop.permute.xlu1 %9229  ;;  %v9234_v11 = vpop.permute.xlu0 %9233 }
0x2f59   :  { %v9262_v32 = vsel %vm3880_vm7, %v9256_v23, %v9230_v36  ;;  %v9264_v53 = vsel %vm3880_vm7, %v9258_v24, %v9234_v11  ;;  %v24292_v24 = vld [vmem:[#allocation9_spill] sm:$0xff] }
0x2f5c   :  { %v9228_v19 = vpop.permute.xlu1 %9227 }
0x2f5d   :  { %v9261_v4 = vsel %vm3880_vm7, %v9255_v39, %v9228_v19 }
0x2f5e   :  { %15904 = vmatprep.mubr.msk.f32.mxu1 %vm3893_vm8, %v9261_v4 }
0x2f5f   :  { %15905 = vmatmul.mubr.msk.f32.gmra.mrb[188].mxu1 %vm3893_vm8, %v9262_v32 }
0x2f60   :  { %v9232_v43 = vpop.permute.xlu1 %9231 }
0x2f61   :  { %v9263_v38 = vsel %vm3880_vm7, %v9257_v30, %v9232_v43  ;;  %v22811_v30 = vld [vmem:[%s24018_s11 + $0x8] sm:$0xff]  ;;  %v22820_v43 = vld [vmem:[%s24018_s11 + $0x10] sm:$0xff] }
0x2f62   :  { %15907 = vmatprep.mubr.msk.f32.mxu1 %vm3893_vm8, %v9263_v38  ;;  %v22831_v38 = vld [vmem:[%s24018_s11 + $0x18] sm:$0xff] }
0x2f63   :  { %15908 = vmatmul.mubr.msk.f32.gmra.mrb[190].mxu1 %vm3893_vm8, %v9264_v53  ;;  %v22851_v53 = vld [vmem:[%s24018_s11 + $0x28] sm:$0xff] }
0x2f64   :  { %15943 = vmatprep.mubr.msk.f32.mxu1 %vm3322_vm2, %v22267_v61  ;;  %v22733_v61 = vld [vmem:[%s24021_s13] ss:$0 sm:$0xff] }
0x302a   :  { %v15903_v0 = vpop.f32.mrb[186].mxu1 }
0x302b   :  { %v22720_v10 = vadd.f32 %v22282_v54, %v15903_v0  ;;  %v9349_v49 = vpop.f32.mrb[187].mxu1  ;;  %v24295_v0 = vld [vmem:[#allocation10_spill] sm:$0xff] }
0x302c   :  { %v22723_v45 = vadd.f32 %v22282_v54, %v9349_v49  ;;  %v24296_v49 = vld [vmem:[#allocation8_spill] sm:$0xff] }
0x302d   :  { %18639 = vtanh.f32 %v22720_v10 }
0x302e   :  { %18641 = vtanh.f32 %v22723_v45 }
0x3032   :  { %v15906_v59 = vpop.f32.mrb[188].mxu1 }
0x3033   :  { %v22728_v16 = vadd.f32 %v22282_v54, %v15906_v59  ;;  %v9359_v48 = vpop.f32.mrb[189].mxu1  ;;  %v24298_v59 = vld [vmem:[#allocation13_spill] sm:$0xff] }
0x3034   :  { %v22736_v41 = vadd.f32 %v22733_v61, %v9359_v48  ;;  %v24299_v48 = vld [vmem:[#allocation12_spill] sm:$0xff] }
0x3035   :  { %18643 = vtanh.f32 %v22728_v16 }
0x3036   :  { %18645 = vtanh.f32 %v22736_v41  ;;  %v15909_v47 = vpop.f32.mrb[190].mxu1 }
0x3037   :  { %v18640_v18 = vpop.eup %18639  ;;  %v22741_v29 = vadd.f32 %v22733_v61, %v15909_v47  ;;  %v9369_v54 = vpop.f32.mrb[191].mxu1  ;;  %v24300_v47 = vld [vmem:[#allocation16_spill] sm:$0xff] }
0x3038   :  { %v18642_v40 = vpop.eup %18641  ;;  %v22744_v15 = vadd.f32 %v22733_v61, %v9369_v54  ;;  %9428 = vrot.lane.b32.xlu0 %v18640_v18, %s18862_s6  ;;  %v24301_v18 = vld [vmem:[#allocation17_spill] sm:$0xff] }
0x3039   :  { %18647 = vtanh.f32 %v22741_v29  ;;  %9426 = vrot.lane.b32.xlu1 %v18642_v40, %s18862_s6 }
0x303a   :  { %18649 = vtanh.f32 %v22744_v15 }
0x303f   :  { %v18644_v6 = vpop.eup %18643 }
0x3040   :  { %v18646_v62 = vpop.eup %18645  ;;  %9432 = vrot.lane.b32.xlu0 %v18644_v6, %s18862_s6 }
0x3041   :  { %9430 = vrot.lane.b32.xlu1 %v18646_v62, %s18862_s6 }
0x3043   :  { %v18648_v36 = vpop.eup %18647 }
0x3044   :  { %v18650_v3 = vpop.eup %18649  ;;  %9436 = vrot.lane.b32.xlu0 %v18648_v36, %s18862_s6 }
0x3045   :  { %9434 = vrot.lane.b32.xlu1 %v18650_v3, %s18862_s6 }
0x30aa   :  { %v22754_v60 = vpop.permute.xlu0 %9428 }
0x30ab   :  { %v22756_v57 = vpop.permute.xlu1 %9426 }
0x30ac   :  { %v17535_v51 = vpack.c.bf16 %v22754_v60, %v22756_v57 }
0x30ae   :  { %17536 = vmatprep.subr.bf16.mxu0 %v17535_v51 }
0x30af   :  { %17538 = vmatpush3.bf16.msra.mxu0 %v17535_v51 }
0x30b2   :  { %v22760_v28 = vpop.permute.xlu0 %9432 }
0x30b3   :  { %v22762_v39 = vpop.permute.xlu1 %9430 }
0x30b4   :  { %v17539_v19 = vpack.c.bf16 %v22760_v28, %v22762_v39 }
0x30b6   :  { %v22766_v23 = vpop.permute.xlu0 %9436  ;;  %17540 = vmatprep.subr.bf16.mxu0 %v17539_v19 }
0x30b7   :  { %17542 = vmatpush3.bf16.msra.mxu0 %v17539_v19  ;;  %v22768_v4 = vpop.permute.xlu1 %9434 }
0x30b8   :  { %v17543_v7 = vpack.c.bf16 %v22766_v23, %v22768_v4 }
0x30ba   :  { %17544 = vmatprep.subr.bf16.mxu0 %v17543_v7 }
0x30bb   :  { %17546 = vmatpush3.bf16.msra.mxu0 %v17543_v7 }
0x30be   :  { %15923 = vmatmul.mubr.msk.f32.vlgmr.msra.gmra.mrb[206].mxu0 %vm3322_vm2, %v22327_v26 }
0x30bf   :  { %15925 = vmatprep.mubr.msk.f32.mxu0 %vm3322_vm2, %v22334_v34 }
0x30c2   :  { %15926 = vmatmul.mubr.msk.f32.gmra.mrb[208].mxu0 %vm3322_vm2, %v22341_v33 }
0x30c3   :  { %15928 = vmatprep.mubr.msk.f32.mxu0 %vm3322_vm2, %v22348_v8 }
0x30c6   :  { %15929 = vmatmul.mubr.msk.f32.gmra.mrb[210].mxu0 %vm3322_vm2, %v22355_v58 }
0x30c7   :  { %15964 = vmatprep.mubr.msk.f32.mxu0 %vm3322_vm2, %v22362_v52 }
0x3191   :  { %v22784_v32 = vpop.f32.mrb[206].mxu0 }
0x3192   :  { %v22786_v17 = vpop.f32.mrb[207].mxu0 }
0x3193   :  { %v18033_v26 = vpack.i.bf16 %v22784_v32, %v22786_v17  ;;  %v17547_v34 = vpack.c.bf16 %v22784_v32, %v22786_v17 }
0x3195   :  { %18034 = vrot.lane.b32.xlu1 %v18033_v26, %s18867_s23  ;;  %v22793_v33 = vpop.f32.mrb[208].mxu0  ;;  %17548 = vmatprep.subr.bf16.mxu1 %v17547_v34 }
0x3196   :  { %17560 = vmatprep.subr.bf16.mxu0 %v17547_v34  ;;  %v22795_v8 = vpop.f32.mrb[209].mxu0  ;;  %17550 = vmatpush3.bf16.msra.mxu1 %v17547_v34 }
0x3197   :  { %v17551_v52 = vpack.c.bf16 %v22793_v33, %v22795_v8  ;;  %17562 = vmatpush3.bf16.msra.mxu0 %v17547_v34 }
0x3199   :  { %v22801_v42 = vpop.f32.mrb[210].mxu0  ;;  %17552 = vmatprep.subr.bf16.mxu1 %v17551_v52  ;;  %17564 = vmatprep.subr.bf16.mxu0 %v17551_v52 }
0x319a   :  { %v22803_v11 = vpop.f32.mrb[211].mxu0  ;;  %17554 = vmatpush3.bf16.msra.mxu1 %v17551_v52 }
0x319b   :  { %v17555_v25 = vpack.c.bf16 %v22801_v42, %v22803_v11  ;;  %17566 = vmatpush3.bf16.msra.mxu0 %v17551_v52 }
0x319d   :  { %17556 = vmatprep.subr.bf16.mxu1 %v17555_v25  ;;  %17568 = vmatprep.subr.bf16.mxu0 %v17555_v25 }
0x319e   :  { %17558 = vmatpush3.bf16.msra.mxu1 %v17555_v25 }
0x319f   :  { %17570 = vmatpush3.bf16.msra.mxu0 %v17555_v25 }
0x31a0   :  { %17583 = vmatprep.subr.bf16.mxu0 %v24260_v55 }
0x31a1   :  { %15944 = vmatmul.mubr.msk.f32.vlgmr.msra.gmra.mrb[192].mxu1 %vm3322_vm2, %v22811_v30 }
0x31a2   :  { %15965 = vmatmul.mubr.msk.f32.vlgmr.msra.gmra.mrb[212].mxu0 %vm3322_vm2, %v22395_v5  ;;  %15946 = vmatprep.mubr.msk.f32.mxu1 %vm3322_vm2, %v22820_v43  ;;  %v22840_v5 = vld [vmem:[%s24018_s11 + $0x20] sm:$0xff] }
0x31a3   :  { %15967 = vmatprep.mubr.msk.f32.mxu0 %vm3322_vm2, %v22404_v31  ;;  %17585 = vmatpush1.bf16.msra.mxu0 %v24292_v24  ;;  %v24293_v31 = vld [vmem:[#allocation5_spill] sm:$0xff] }
0x31a4   :  { %17586 = vmatprep.subr.bf16.mxu0 %v24260_v55 }
0x31a5   :  { %15947 = vmatmul.mubr.msk.f32.gmra.mrb[194].mxu1 %vm3322_vm2, %v22831_v38 }
0x31a6   :  { %15968 = vmatmul.mubr.msk.f32.gmra.mrb[214].mxu0 %vm3322_vm2, %v22415_v35  ;;  %15949 = vmatprep.mubr.msk.f32.mxu1 %vm3322_vm2, %v22840_v5  ;;  %v22860_v35 = vld [vmem:[%s24018_s11 + $0x30] sm:$0xff] }
0x31a7   :  { %15970 = vmatprep.mubr.msk.f32.mxu0 %vm3322_vm2, %v22424_v20  ;;  %17588 = vmatpush1.bf16.msra.mxu0 %v24293_v31  ;;  %v24294_v20 = vld [vmem:[#allocation6_spill] sm:$0xff] }
0x31a8   :  { %17589 = vmatprep.subr.bf16.mxu0 %v24260_v55 }
0x31a9   :  { %15950 = vmatmul.mubr.msk.f32.gmra.mrb[196].mxu1 %vm3322_vm2, %v22851_v53 }
0x31aa   :  { %15971 = vmatmul.mubr.msk.f32.gmra.mrb[216].mxu0 %vm3322_vm2, %v22435_v46  ;;  %15985 = vmatprep.mubr.msk.f32.mxu1 %vm3322_vm2, %v22860_v35  ;;  %v24297_v46 = vld [vmem:[#allocation11_spill] sm:$0xff] }
0x31ab   :  { %17591 = vmatpush1.bf16.msra.mxu0 %v24294_v20 }
0x31ac   :  { %17592 = vmatprep.subr.bf16.mxu0 %v24260_v55 }
0x31af   :  { %17594 = vmatpush1.bf16.msra.mxu0 %v24295_v0 }
0x31b0   :  { %17595 = vmatprep.subr.bf16.mxu0 %v24260_v55 }
0x31b3   :  { %17597 = vmatpush1.bf16.msra.mxu0 %v24296_v49 }
0x31b4   :  { %17598 = vmatprep.subr.bf16.mxu0 %v24260_v55 }
0x31b7   :  { %17600 = vmatpush1.bf16.msra.mxu0 %v24297_v46 }
0x31b8   :  { %17601 = vmatprep.subr.bf16.mxu0 %v24260_v55 }
0x31bb   :  { %17603 = vmatpush1.bf16.msra.mxu0 %v24298_v59 }
0x31bc   :  { %17604 = vmatprep.subr.bf16.mxu0 %v24260_v55 }
0x31bf   :  { %17606 = vmatpush1.bf16.msra.mxu0 %v24299_v48 }
0x31c0   :  { %17607 = vmatprep.subr.bf16.mxu0 %v24260_v55 }
0x31c3   :  { %17609 = vmatpush1.bf16.msra.mxu0 %v24300_v47 }
0x31c4   :  { %17610 = vmatprep.subr.bf16.mxu0 %v24260_v55 }
0x31c7   :  { %17612 = vmatpush1.bf16.msra.mxu0 %v24301_v18 }
0x31c8   :  { %17662 = vmatprep.subr.bf16.mxu0 %v20833_v2 }
0x3274   :  { %v15945_v54 = vpop.f32.mrb[192].mxu1 }
0x3275   :  { %v9635_v40 = vmul.f32 2.0, %v15945_v54  ;;  %v15966_v6 = vpop.f32.mrb[212].mxu0  ;;  %v9605_v62 = vpop.f32.mrb[193].mxu1 }
0x3276   :  { %v9634_v36 = vmul.f32 2.0, %v9605_v62  ;;  %v9712_v3 = vpop.f32.mrb[213].mxu0 }
0x3277   :  { %v9641_v51 = vsub.f32 %v9635_v40, %v22754_v60  ;;  %v18043_v19 = vpack.i.bf16 %v15966_v6, %v9712_v3  ;;  %v17571_v7 = vpack.c.bf16 %v15966_v6, %v9712_v3 }
0x3278   :  { %v9640_v26 = vsub.f32 %v9634_v36, %v22756_v57  ;;  %v15948_v34 = vpop.f32.mrb[194].mxu1 }
0x3279   :  { %18044 = vrot.lane.b32.xlu1 %v18043_v19, %s18868_s24  ;;  %v9637_v52 = vmul.f32 2.0, %v15948_v34  ;;  %v15969_v25 = vpop.f32.mrb[214].mxu0  ;;  %17572 = vmatprep.subr.bf16.mxu1 %v17571_v7  ;;  %v9615_v58 = vpop.f32.mrb[195].mxu1 }
0x327a   :  { %v18038_v14 = vpack.i.bf16 %v9641_v51, %v9640_v26  ;;  %v9636_v56 = vmul.f32 2.0, %v9615_v58  ;;  %v9722_v54 = vpop.f32.mrb[215].mxu0  ;;  %17574 = vmatpush3.bf16.msra.mxu1 %v17571_v7  ;;  %v24302_v58 = vpack.i.bf16 %v22793_v33, %v22795_v8  ;;  %v22922_v26 = vld [vmem:[%s24018_s11 + $0x50] sm:$0xff] }
0x327b   :  { %v9643_v62 = vsub.f32 %v9637_v52, %v22760_v28  ;;  %v18053_v50 = vpack.i.bf16 %v15969_v25, %v9722_v54  ;;  %v17575_v9 = vpack.c.bf16 %v15969_v25, %v9722_v54  ;;  %v22932_v52 = vld [vmem:[%s24018_s11 + $0x58] sm:$0xff]  ;;  %v22939_v25 = vld [vmem:[%s24018_s11] sm:$0xff] }
0x327c   :  { %v9642_v40 = vsub.f32 %v9636_v56, %v22762_v39  ;;  %18039 = vrot.lane.b32.xlu0 %v18038_v14, %s18869_s25  ;;  %v15951_v6 = vpop.f32.mrb[196].mxu1 }
0x327d   :  { %v15972_v36 = vpop.f32.mrb[216].mxu0  ;;  %17576 = vmatprep.subr.bf16.mxu1 %v17575_v9  ;;  %v9625_v3 = vpop.f32.mrb[197].mxu1  ;;  %v9639_v56 = vmul.f32 2.0, %v15951_v6 }
0x327e   :  { %v18058_v19 = vpack.i.bf16 %v9643_v62, %v9642_v40  ;;  %v9732_v34 = vpop.f32.mrb[217].mxu0  ;;  %17578 = vmatpush3.bf16.msra.mxu1 %v17575_v9  ;;  %v9638_v51 = vmul.f32 2.0, %v9625_v3  ;;  %v22897_v9 = vld [vmem:[%s24018_s11 + $0x38] sm:$0xff]  ;;  %v18035_v62 = vpop.permute.xlu1 %18034 }
0x327f   :  { %v17579_v44 = vpack.c.bf16 %v15972_v36, %v9732_v34  ;;  %v9645_v7 = vsub.f32 %v9639_v56, %v22766_v23  ;;  %v18036_v40 = vunpack.i.l.bf16 %v18035_v62 }
0x3280   :  { %18049 = vrot.lane.b32.xlu0 %v24302_v58, %s18867_s23  ;;  %18059 = vrot.lane.b32.xlu1 %v18058_v19, %s18869_s25  ;;  %v9644_v14 = vsub.f32 %v9638_v51, %v22768_v4  ;;  %v18037_v58 = vunpack.i.h.bf16 %v18035_v62 }
0x3281   :  { %17580 = vmatprep.subr.bf16.mxu1 %v17579_v44 }
0x3282   :  { %17582 = vmatpush3.bf16.msra.mxu1 %v17579_v44  ;;  %v22905_v44 = vld [vmem:[%s24018_s11 + $0x40] sm:$0xff]  ;;  %v9921_v62 = vsel %vm3075_vm0, %v22754_v60, %v18037_v58 }
0x3284   :  { %18054 = vrot.lane.b32.xlu0 %v18053_v50, %s18868_s24  ;;  %9862 = vrot.lane.b32.xlu1 %v22803_v11, %s18867_s23  ;;  %v22914_v50 = vld [vmem:[%s24018_s11 + $0x48] sm:$0xff] }
0x3285   :  { %15986 = vmatmul.mubr.msk.f32.vlgmr.msra.gmra.mrb[198].mxu1 %vm3322_vm2, %v22897_v9 }
0x3286   :  { %15988 = vmatprep.mubr.msk.f32.mxu1 %vm3322_vm2, %v22905_v44 }
0x3288   :  { %9910 = vrot.lane.b32.xlu1 %v9732_v34, %s18868_s24  ;;  %9886 = vrot.lane.b32.xlu0 %v9644_v14, %s18869_s25  ;;  %v9920_v14 = vsel %vm3075_vm0, %v22756_v57, %v18036_v40 }
0x3289   :  { %15989 = vmatmul.mubr.msk.f32.gmra.mrb[200].mxu1 %vm3322_vm2, %v22914_v50 }
0x328a   :  { %15991 = vmatprep.mubr.msk.f32.mxu1 %vm3322_vm2, %v22922_v26 }
0x328c   :  { %9888 = vrot.lane.b32.xlu1 %v9645_v7, %s18869_s25  ;;  %9864 = vrot.lane.b32.xlu0 %v22801_v42, %s18867_s23 }
0x328d   :  { %15992 = vmatmul.mubr.msk.f32.gmra.mrb[202].mxu1 %vm3322_vm2, %v22932_v52 }
0x328e   :  { %16006 = vmatprep.mubr.msk.f32.mxu1 %vm3322_vm2, %v22939_v25 }
0x3290   :  { %9912 = vrot.lane.b32.xlu0 %v15972_v36, %s18868_s24 }
0x32eb   :  { %v18045_v19 = vpop.permute.xlu1 %18044 }
0x32ec   :  { %v18046_v36 = vunpack.i.l.bf16 %v18045_v19 }
0x32ee   :  { %v18040_v54 = vpop.permute.xlu0 %18039 }
0x32ef   :  { %v18041_v6 = vunpack.i.l.bf16 %v18040_v54  ;;  %v18042_v7 = vunpack.i.h.bf16 %v18040_v54  ;;  %v18047_v54 = vunpack.i.h.bf16 %v18045_v19 }
0x32f1   :  { %v9926_v47 = vsel %vm3174_vm1, %v9920_v14, %v18041_v6 }
0x32f2   :  { %v18050_v3 = vpop.permute.xlu0 %18049  ;;  %v18060_v48 = vpop.permute.xlu1 %18059  ;;  %v9932_v57 = vsel %vm4565_vm9, %v9926_v47, %v18046_v36  ;;  %v22962_v47 = vld [vmem:[%s24020_s12 + $0x10] sm:$0xf] }
0x32f3   :  { %v18061_v60 = vunpack.i.l.bf16 %v18060_v48 }
0x32f6   :  { %v18055_v49 = vpop.permute.xlu0 %18054 }
0x32fa   :  { %v9887_v6 = vpop.permute.xlu0 %9886 }
0x3358   :  { %v15987_v34 = vpop.f32.mrb[198].mxu1 }
0x3359   :  { %v9837_v51 = vmul.f32 2.0, %v15987_v34  ;;  %v9807_v56 = vpop.f32.mrb[199].mxu1  ;;  %v18051_v34 = vunpack.i.l.bf16 %v18050_v3 }
0x335a   :  { %v9836_v21 = vmul.f32 2.0, %v9807_v56  ;;  %v18057_v56 = vunpack.i.h.bf16 %v18055_v49 }
0x335b   :  { %v9843_v18 = vsub.f32 %v9837_v51, %v22784_v32  ;;  %v9927_v32 = vsel %vm3174_vm1, %v9921_v62, %v18042_v7  ;;  %v18062_v51 = vunpack.i.h.bf16 %v18060_v48 }
0x335c   :  { %v9842_v59 = vsub.f32 %v9836_v21, %v22786_v17  ;;  %v15990_v46 = vpop.f32.mrb[200].mxu1 }
0x335d   :  { %v9839_v0 = vmul.f32 2.0, %v15990_v46  ;;  %v9817_v20 = vpop.f32.mrb[201].mxu1 }
0x335e   :  { %v9838_v31 = vmul.f32 2.0, %v9817_v20  ;;  %13606 = vmatprep.mubr.msk.f32.mxu0 %vm3075_vm0, %v9842_v59  ;;  %v9933_v59 = vsel %vm4565_vm9, %v9927_v32, %v18047_v54  ;;  %v13576_v54 = vmul.f32 -1.442695, %v22723_v45 }
0x335f   :  { %v9845_v40 = vsub.f32 %v9839_v0, %v22793_v33  ;;  %10021 = vmatmul.mubr.f32.vlgmr.msra.gmra.mrb[218].mxu0 %v9932_v57  ;;  %v18052_v33 = vunpack.i.h.bf16 %v18050_v3 }
0x3360   :  { %v9844_v21 = vsub.f32 %v9838_v31, %v22795_v8  ;;  %v15993_v17 = vpop.f32.mrb[202].mxu1  ;;  %13607 = vmatprep.mubr.msk.f32.mxu0 %vm3075_vm0, %v9843_v18  ;;  %17664 = vmatpush3.bf16.msra.mxu0 %v20833_v2  ;;  %v18056_v8 = vunpack.i.l.bf16 %v18055_v49  ;;  %v9863_v31 = vpop.permute.xlu1 %9862  ;;  %v9922_v18 = vsel %vm3075_vm0, %v22762_v39, %v18051_v34  ;;  %18651 = vpow2.f32 %v13576_v54 }
0x3361   :  { %v9841_v46 = vmul.f32 2.0, %v15993_v17  ;;  %v9827_v20 = vpop.f32.mrb[203].mxu1  ;;  %16082 = vmatprep.subr.msk.mxu0 %vm3912_vm3, %v22962_v47  ;;  %v9928_v3 = vsel %vm3174_vm1, %v9922_v18, %v18061_v60  ;;  %v9923_v39 = vsel %vm3075_vm0, %v22760_v28, %v18052_v33  ;;  %v9924_v36 = vsel %vm3075_vm0, %v22768_v4, %v9863_v31 }
0x3362   :  { %v9840_v0 = vmul.f32 2.0, %v9827_v20  ;;  %v9934_v14 = vsel %vm4565_vm9, %v9928_v3, %v18056_v8  ;;  %v9930_v62 = vsel %vm3174_vm1, %v9924_v36, %v9887_v6  ;;  %v13580_v60 = vmul.f32 -1.442695, %v22744_v15 }
0x3363   :  { %v9847_v19 = vsub.f32 %v9841_v46, %v22801_v42  ;;  %10026 = vmatmul.mubr.f32.gmra.mrb[220].mxu0 %v9933_v59  ;;  %v9865_v42 = vpop.permute.xlu0 %9864  ;;  %v13581_v33 = vmul.f32 -1.442695, %v22741_v29 }
0x3364   :  { %v9846_v58 = vsub.f32 %v9840_v0, %v22803_v11  ;;  %13608 = vmatprep.mubr.msk.f32.mxu0 %vm3075_vm0, %v9844_v21  ;;  %16083 = vmatpush3.msk.msra.mxu0 %vm3912_vm3, %v22962_v47  ;;  %v9911_v7 = vpop.permute.xlu1 %9910  ;;  %v9929_v11 = vsel %vm3174_vm1, %v9923_v39, %v18062_v51  ;;  %v9925_v28 = vsel %vm3075_vm0, %v22766_v23, %v9865_v42  ;;  %v13578_v21 = vmul.f32 -1.442695, %v22736_v41  ;;  %v23002_v39 = vld [vmem:[%s24023_s15] ss:$0 sm:$0xff] }
0x3365   :  { %v9935_v48 = vsel %vm4565_vm9, %v9929_v11, %v18057_v56  ;;  %v9936_v34 = vsel %vm4565_vm9, %v9930_v62, %v9911_v7  ;;  %v13579_v23 = vmul.f32 -1.442695, %v22728_v16 }
0x3367   :  { %10031 = vmatmul.mubr.f32.gmra.mrb[222].mxu0 %v9934_v14  ;;  %v9913_v57 = vpop.permute.xlu0 %9912 }
0x3368   :  { %13609 = vmatprep.mubr.msk.f32.mxu0 %vm3075_vm0, %v9845_v40  ;;  %v9889_v49 = vpop.permute.xlu1 %9888  ;;  %v13577_v40 = vmul.f32 -1.442695, %v22720_v10 }
0x3369   :  { %v9931_v32 = vsel %vm3174_vm1, %v9925_v28, %v9889_v49 }
0x336a   :  { %v9937_v4 = vsel %vm4565_vm9, %v9931_v32, %v9913_v57  ;;  %18653 = vpow2.f32 %v13577_v40  ;;  %v18652_v17 = vpop.eup %18651 }
0x336b   :  { %10036 = vmatmul.mubr.f32.gmra.mrb[224].mxu0 %v9935_v48  ;;  %18655 = vpow2.f32 %v13578_v21  ;;  %v9396_v46 = vadd.f32 1.0, %v18652_v17 }
0x336c   :  { %13610 = vmatprep.mubr.msk.f32.mxu0 %vm3075_vm0, %v9846_v58  ;;  %18657 = vpow2.f32 %v13579_v23 }
0x336d   :  { %18659 = vpow2.f32 %v13580_v60 }
0x336e   :  { %18661 = vrcp.f32 %v9396_v46 }
0x336f   :  { %10041 = vmatmul.mubr.f32.gmra.mrb[226].mxu0 %v9936_v34 }
0x3370   :  { %13611 = vmatprep.mubr.msk.f32.mxu0 %vm3075_vm0, %v9847_v19 }
0x3373   :  { %10046 = vmatmul.mubr.f32.gmra.mrb[228].mxu0 %v9937_v4 }
0x3374   :  { %v18654_v20 = vpop.eup %18653 }
0x3375   :  { %v9397_v8 = vadd.f32 1.0, %v18654_v20  ;;  %v18656_v31 = vpop.eup %18655 }
0x3376   :  { %v9398_v15 = vadd.f32 1.0, %v18656_v31  ;;  %v18658_v18 = vpop.eup %18657 }
0x3377   :  { %v9399_v58 = vadd.f32 1.0, %v18658_v18  ;;  %v18660_v51 = vpop.eup %18659 }
0x3378   :  { %v18662_v3 = vpop.eup %18661  ;;  %v9400_v11 = vadd.f32 1.0, %v18660_v51 }
0x3432   :  { %v10022_v59 = vpop.f32.mrb[218].mxu0 }
0x3433   :  { %v10023_v45 = vadd.f32 %v22543_v27, %v10022_v59  ;;  %v10024_v10 = vpop.f32.mrb[219].mxu0 }
0x3435   :  { %18663 = vtanh.f32 %v10023_v45 }
0x3436   :  { %v10027_v41 = vpop.f32.mrb[220].mxu0  ;;  %18665 = vpow2.f32 %v13581_v33 }
0x3437   :  { %v10028_v16 = vadd.f32 %v22543_v27, %v10027_v41  ;;  %v10029_v0 = vpop.f32.mrb[221].mxu0  ;;  %18667 = vrcp.f32 %v9397_v8 }
0x3439   :  { %18669 = vtanh.f32 %v10028_v16 }
0x343a   :  { %v10032_v6 = vpop.f32.mrb[222].mxu0  ;;  %18671 = vrcp.f32 %v9398_v15 }
0x343b   :  { %v10033_v29 = vadd.f32 %v22543_v27, %v10032_v6  ;;  %v10034_v19 = vpop.f32.mrb[223].mxu0 }
0x343d   :  { %18673 = vtanh.f32 %v10033_v29 }
0x343e   :  { %v10037_v56 = vpop.f32.mrb[224].mxu0  ;;  %18675 = vrcp.f32 %v9399_v58 }
0x343f   :  { %v18664_v14 = vpop.eup %18663  ;;  %v10038_v7 = vadd.f32 %v23002_v39, %v10037_v56  ;;  %v10039_v42 = vpop.f32.mrb[225].mxu0 }
0x3440   :  { %v10057_v36 = vmul.f32 %v18664_v14, %v18662_v3  ;;  %v18666_v27 = vpop.eup %18665 }
0x3441   :  { %18677 = vtanh.f32 %v10038_v7  ;;  %v18668_v48 = vpop.eup %18667  ;;  %v9401_v32 = vadd.f32 1.0, %v18666_v27 }
0x3442   :  { %v10063_v62 = vsub.f32 0.0, %v10057_v36  ;;  %v10042_v49 = vpop.f32.mrb[226].mxu0  ;;  %18679 = vrcp.f32 %v9400_v11 }
0x3443   :  { %v18670_v28 = vpop.eup %18669  ;;  %v10043_v34 = vadd.f32 %v23002_v39, %v10042_v49  ;;  %v10044_v57 = vpop.f32.mrb[227].mxu0 }
0x3444   :  { %v10058_v4 = vmul.f32 %v18670_v28, %v18668_v48  ;;  %v18672_v54 = vpop.eup %18671  ;;  %v10069_v40 = vmul.f32 0.125, %v10063_v62 }
0x3445   :  { %18681 = vtanh.f32 %v10043_v34 }
0x3446   :  { %v10064_v21 = vsub.f32 0.0, %v10058_v4  ;;  %v10047_v23 = vpop.f32.mrb[228].mxu0  ;;  %18683 = vrcp.f32 %v9401_v32  ;;  %v23008_v45 = vadd.f32 %v10069_v40, %v22550_v13 }
0x3447   :  { %v18674_v17 = vpop.eup %18673  ;;  %v10048_v60 = vadd.f32 %v23002_v39, %v10047_v23  ;;  %v10049_v46 = vpop.f32.mrb[229].mxu0 }
0x3448   :  { %v10070_v20 = vmul.f32 0.125, %v10064_v21  ;;  %v10059_v59 = vmul.f32 %v18674_v17, %v18672_v54  ;;  %v18676_v33 = vpop.eup %18675 }
0x3449   :  { %18685 = vtanh.f32 %v10048_v60 }
0x344a   :  { %v23011_v10 = vadd.f32 %v10070_v20, %v22553_v22  ;;  %v10065_v8 = vsub.f32 0.0, %v10059_v59 }
0x344b   :  { %v18678_v31 = vpop.eup %18677 }
0x344c   :  { %v10060_v41 = vmul.f32 %v18678_v31, %v18676_v33  ;;  %v17613_v16 = vpack.c.bf16 %v23011_v10, %v23008_v45  ;;  %v18680_v0 = vpop.eup %18679  ;;  %v10071_v15 = vmul.f32 0.125, %v10065_v8 }
0x344e   :  { %v10066_v18 = vsub.f32 0.0, %v10060_v41  ;;  %17614 = vmatprep.subr.bf16.mxu1 %v17613_v16  ;;  %v23016_v51 = vadd.f32 %v10071_v15, %v22558_v63 }
0x344f   :  { %v18682_v6 = vpop.eup %18681  ;;  %17616 = vmatpush3.bf16.msra.mxu1 %v17613_v16 }
0x3450   :  { %v10072_v29 = vmul.f32 0.125, %v10066_v18  ;;  %v10061_v19 = vmul.f32 %v18682_v6, %v18680_v0  ;;  %v18684_v58 = vpop.eup %18683 }
0x3452   :  { %v23019_v3 = vadd.f32 %v10072_v29, %v22561_v37  ;;  %v10067_v56 = vsub.f32 0.0, %v10061_v19 }
0x3453   :  { %v18686_v14 = vpop.eup %18685 }
0x3454   :  { %v10062_v7 = vmul.f32 %v18686_v14, %v18684_v58  ;;  %v17617_v42 = vpack.c.bf16 %v23019_v3, %v23016_v51  ;;  %v10073_v11 = vmul.f32 0.125, %v10067_v56 }
0x3456   :  { %v10068_v36 = vsub.f32 0.0, %v10062_v7  ;;  %17618 = vmatprep.subr.bf16.mxu1 %v17617_v42  ;;  %v23024_v48 = vadd.f32 %v10073_v11, %v22566_v12 }
0x3457   :  { %17620 = vmatpush3.bf16.msra.mxu1 %v17617_v42 }
0x3458   :  { %v10074_v27 = vmul.f32 0.125, %v10068_v36 }
0x345a   :  { %v23027_v62 = vadd.f32 %v10074_v27, %v22569_v1 }
0x345c   :  { %v17621_v49 = vpack.c.bf16 %v23027_v62, %v23024_v48 }
0x345e   :  { %17622 = vmatprep.subr.bf16.mxu1 %v17621_v49 }
0x345f   :  { %17624 = vmatpush3.bf16.msra.mxu1 %v17621_v49 }
0x3462   :  { %16007 = vmatmul.mubr.msk.f32.vlgmr.msra.gmra.mrb[204].mxu1 %vm3322_vm2, %v22811_v30 }
0x3463   :  { %16009 = vmatprep.mubr.msk.f32.mxu1 %vm3322_vm2, %v22820_v43 }
0x3466   :  { %16010 = vmatmul.mubr.msk.f32.gmra.mrb[206].mxu1 %vm3322_vm2, %v22831_v38 }
0x3467   :  { %16012 = vmatprep.mubr.msk.f32.mxu1 %vm3322_vm2, %v22840_v5 }
0x346a   :  { %16013 = vmatmul.mubr.msk.f32.gmra.mrb[208].mxu1 %vm3322_vm2, %v22851_v53 }
0x346b   :  { %16027 = vmatprep.mubr.msk.f32.mxu1 %vm3322_vm2, %v22939_v25 }
0x3535   :  { %v23043_v28 = vpop.f32.mrb[204].mxu1 }
0x3536   :  { %10493 = vrot.lane.b32.xlu0 %v23043_v28, %s18863_s1  ;;  %v23047_v34 = vpop.f32.mrb[205].mxu1 }
0x3537   :  { %v17625_v57 = vpack.c.bf16 %v23043_v28, %v23047_v34  ;;  %10491 = vrot.lane.b32.xlu1 %v23047_v34, %s18863_s1 }
0x3539   :  { %v23053_v32 = vpop.f32.mrb[206].mxu1  ;;  %17626 = vmatprep.subr.bf16.mxu1 %v17625_v57 }
0x353a   :  { %17628 = vmatpush3.bf16.msra.mxu1 %v17625_v57  ;;  %10497 = vrot.lane.b32.xlu0 %v23053_v32, %s18863_s1  ;;  %v23057_v4 = vpop.f32.mrb[207].mxu1 }
0x353b   :  { %v17629_v54 = vpack.c.bf16 %v23053_v32, %v23057_v4 }
0x353d   :  { %v23061_v40 = vpop.f32.mrb[208].mxu1  ;;  %17630 = vmatprep.subr.bf16.mxu1 %v17629_v54 }
0x353e   :  { %10495 = vrot.lane.b32.xlu0 %v23057_v4, %s18863_s1  ;;  %v23065_v21 = vpop.f32.mrb[209].mxu1  ;;  %17632 = vmatpush3.bf16.msra.mxu1 %v17629_v54 }
0x353f   :  { %v17633_v23 = vpack.c.bf16 %v23061_v40, %v23065_v21 }
0x3541   :  { %17634 = vmatprep.subr.bf16.mxu1 %v17633_v23 }
0x3542   :  { %10501 = vrot.lane.b32.xlu0 %v23061_v40, %s18863_s1  ;;  %17636 = vmatpush3.bf16.msra.mxu1 %v17633_v23 }
0x3543   :  { %17638 = vmatprep.subr.bf16.mxu1 %v17625_v57 }
0x3545   :  { %16028 = vmatmul.mubr.msk.f32.vlgmr.msra.gmra.mrb[210].mxu1 %vm3322_vm2, %v22811_v30 }
0x3546   :  { %10499 = vrot.lane.b32.xlu0 %v23065_v21, %s18863_s1  ;;  %17640 = vmatpush3.bf16.msra.mxu1 %v17625_v57 }
0x3547   :  { %17642 = vmatprep.subr.bf16.mxu1 %v17629_v54  ;;  %16030 = vmatprep.mubr.msk.f32.mxu1 %vm3322_vm2, %v22820_v43 }
0x3549   :  { %16031 = vmatmul.mubr.msk.f32.gmra.mrb[212].mxu1 %vm3322_vm2, %v22831_v38 }
0x354a   :  { %17644 = vmatpush3.bf16.msra.mxu1 %v17629_v54  ;;  %16033 = vmatprep.mubr.msk.f32.mxu1 %vm3322_vm2, %v22840_v5 }
0x354b   :  { %17646 = vmatprep.subr.bf16.mxu1 %v17633_v23 }
0x354d   :  { %16034 = vmatmul.mubr.msk.f32.gmra.mrb[214].mxu1 %vm3322_vm2, %v22851_v53 }
0x354e   :  { %17648 = vmatpush3.bf16.msra.mxu1 %v17633_v23  ;;  %16048 = vmatprep.mubr.msk.f32.mxu1 %vm3322_vm2, %v22860_v35 }
0x3551   :  { %16049 = vmatmul.mubr.msk.f32.vlgmr.msra.gmra.mrb[216].mxu1 %vm3322_vm2, %v22897_v9 }
0x3552   :  { %16051 = vmatprep.mubr.msk.f32.mxu1 %vm3322_vm2, %v22905_v44 }
0x3555   :  { %16052 = vmatmul.mubr.msk.f32.gmra.mrb[218].mxu1 %vm3322_vm2, %v22914_v50 }
0x3556   :  { %16054 = vmatprep.mubr.msk.f32.mxu1 %vm3322_vm2, %v22922_v26 }
0x3559   :  { %16055 = vmatmul.mubr.msk.f32.gmra.mrb[220].mxu1 %vm3322_vm2, %v22932_v52 }
0x355a   :  { %16069 = vmatprep.mubr.msk.f32.mxu1 %vm3322_vm2, %v22860_v35 }
0x3618   :  { %v16029_v17 = vpop.f32.mrb[210].mxu1 }
0x3619   :  { %v10272_v60 = vmul.f32 2.0, %v16029_v17  ;;  %v10242_v46 = vpop.f32.mrb[211].mxu1 }
0x361a   :  { %v10271_v20 = vmul.f32 2.0, %v10242_v46 }
0x361b   :  { %v10278_v59 = vsub.f32 %v10272_v60, %v23011_v10 }
0x361c   :  { %v10277_v33 = vsub.f32 %v10271_v20, %v23008_v45  ;;  %v16032_v8 = vpop.f32.mrb[212].mxu1 }
0x361d   :  { %v10274_v31 = vmul.f32 2.0, %v16032_v8  ;;  %10517 = vrot.lane.b32.xlu0 %v10278_v59, %s18864_s29  ;;  %v10252_v41 = vpop.f32.mrb[213].mxu1 }
0x361e   :  { %v10273_v16 = vmul.f32 2.0, %v10252_v41  ;;  %10515 = vrot.lane.b32.xlu1 %v10277_v33, %s18864_s29 }
0x361f   :  { %v10280_v0 = vsub.f32 %v10274_v31, %v23019_v3 }
0x3620   :  { %v10279_v15 = vsub.f32 %v10273_v16, %v23016_v51  ;;  %v16035_v18 = vpop.f32.mrb[214].mxu1 }
0x3621   :  { %10521 = vrot.lane.b32.xlu0 %v10280_v0, %s18864_s29  ;;  %v10262_v6 = vpop.f32.mrb[215].mxu1  ;;  %v10276_v29 = vmul.f32 2.0, %v16035_v18 }
0x3622   :  { %10519 = vrot.lane.b32.xlu1 %v10279_v15, %s18864_s29  ;;  %v10275_v19 = vmul.f32 2.0, %v10262_v6 }
0x3623   :  { %v10282_v7 = vsub.f32 %v10276_v29, %v23027_v62 }
0x3624   :  { %v16050_v58 = vpop.f32.mrb[216].mxu1  ;;  %v10281_v42 = vsub.f32 %v10275_v19, %v23024_v48  ;;  %v10492_v19 = vpop.permute.xlu1 %10491 }
0x3625   :  { %10541 = vrot.lane.b32.xlu0 %v16050_v58, %s18865_s0  ;;  %v10349_v56 = vpop.f32.mrb[217].mxu1 }
0x3626   :  { %v17649_v14 = vpack.c.bf16 %v16050_v58, %v10349_v56  ;;  %10539 = vrot.lane.b32.xlu1 %v10349_v56, %s18865_s0 }
0x3628   :  { %v16053_v11 = vpop.f32.mrb[218].mxu1  ;;  %17650 = vmatprep.subr.bf16.mxu1 %v17649_v14 }
0x3629   :  { %10525 = vrot.lane.b32.xlu0 %v10282_v7, %s18864_s29  ;;  %v10359_v36 = vpop.f32.mrb[219].mxu1  ;;  %17652 = vmatpush3.bf16.msra.mxu1 %v17649_v14 }
0x362a   :  { %v17653_v27 = vpack.c.bf16 %v16053_v11, %v10359_v36  ;;  %10523 = vrot.lane.b32.xlu1 %v10281_v42, %s18864_s29 }
0x362c   :  { %v16056_v49 = vpop.f32.mrb[220].mxu1  ;;  %17654 = vmatprep.subr.bf16.mxu1 %v17653_v27 }
0x362d   :  { %10545 = vrot.lane.b32.xlu0 %v16053_v11, %s18865_s0  ;;  %v10369_v57 = vpop.f32.mrb[221].mxu1  ;;  %17656 = vmatpush3.bf16.msra.mxu1 %v17653_v27 }
0x362e   :  { %v17657_v54 = vpack.c.bf16 %v16056_v49, %v10369_v57  ;;  %10543 = vrot.lane.b32.xlu1 %v10359_v36, %s18865_s0 }
0x3630   :  { %17658 = vmatprep.subr.bf16.mxu1 %v17657_v54 }
0x3631   :  { %10549 = vrot.lane.b32.xlu0 %v16056_v49, %s18865_s0  ;;  %17660 = vmatpush3.bf16.msra.mxu1 %v17657_v54 }
0x3632   :  { %10547 = vrot.lane.b32.xlu1 %v10369_v57, %s18865_s0 }
0x3634   :  { %16070 = vmatmul.mubr.msk.f32.vlgmr.msra.gmra.mrb[222].mxu1 %vm3322_vm2, %v22897_v9 }
0x3635   :  { %16072 = vmatprep.mubr.msk.f32.mxu1 %vm3322_vm2, %v22905_v44 }
0x3638   :  { %16073 = vmatmul.mubr.msk.f32.gmra.mrb[224].mxu1 %vm3322_vm2, %v22914_v50 }
0x3639   :  { %16075 = vmatprep.mubr.msk.f32.mxu1 %vm3322_vm2, %v22922_v26 }
0x363c   :  { %16076 = vmatmul.mubr.msk.f32.gmra.mrb[226].mxu1 %vm3322_vm2, %v22932_v52 }
0x363d   :  { %16105 = vmatprep.mubr.msk.f32.mxu1 %vm3322_vm2, %v22939_v25 }
0x3690   :  { %v10516_v56 = vpop.permute.xlu1 %10515 }
0x3694   :  { %v10520_v7 = vpop.permute.xlu1 %10519 }
0x3698   :  { %v10540_v11 = vpop.permute.xlu1 %10539 }
0x369c   :  { %v10524_v36 = vpop.permute.xlu1 %10523 }
0x36a0   :  { %v10544_v27 = vpop.permute.xlu1 %10543 }
0x36a4   :  { %v10548_v57 = vpop.permute.xlu1 %10547 }
0x3707   :  { %v16071_v23 = vpop.f32.mrb[222].mxu1 }
0x3708   :  { %v10474_v17 = vmul.f32 2.0, %v16071_v23  ;;  %v10444_v60 = vpop.f32.mrb[223].mxu1 }
0x3709   :  { %v10473_v46 = vmul.f32 2.0, %v10444_v60 }
0x370a   :  { %v10480_v20 = vsub.f32 %v10474_v17, %v23043_v28  ;;  %v10581_v17 = vsel %vm3859_vm4, %v23008_v45, %v10492_v19 }
0x370b   :  { %v10479_v59 = vsub.f32 %v10473_v46, %v23047_v34  ;;  %v16074_v33 = vpop.f32.mrb[224].mxu1  ;;  %v10587_v46 = vsel %vm3866_vm5, %v10581_v17, %v10516_v56 }
0x370c   :  { %v10476_v8 = vmul.f32 2.0, %v16074_v33  ;;  %v10454_v31 = vpop.f32.mrb[225].mxu1  ;;  %10565 = vrot.lane.b32.xlu1 %v10480_v20, %s18866_s21 }
0x370d   :  { %v10475_v41 = vmul.f32 2.0, %v10454_v31 }
0x370e   :  { %v10482_v16 = vsub.f32 %v10476_v8, %v23053_v32  ;;  %v10494_v32 = vpop.permute.xlu0 %10493 }
0x370f   :  { %v10481_v0 = vsub.f32 %v10475_v41, %v23057_v4  ;;  %v16077_v15 = vpop.f32.mrb[226].mxu1  ;;  %v10582_v60 = vsel %vm3859_vm4, %v23011_v10, %v10494_v32 }
0x3710   :  { %v10478_v18 = vmul.f32 2.0, %v16077_v15  ;;  %v10464_v6 = vpop.f32.mrb[227].mxu1  ;;  %10563 = vrot.lane.b32.xlu1 %v10479_v59, %s18866_s21  ;;  %v10593_v59 = vsel %vm3873_vm6, %v10587_v46, %v10540_v11 }
0x3711   :  { %v10477_v29 = vmul.f32 2.0, %v10464_v6 }
0x3712   :  { %v10484_v28 = vsub.f32 %v10478_v18, %v23061_v40  ;;  %v10498_v4 = vpop.permute.xlu0 %10497 }
0x3713   :  { %v10483_v34 = vsub.f32 %v10477_v29, %v23065_v21  ;;  %v10584_v18 = vsel %vm3859_vm4, %v23019_v3, %v10498_v4 }
0x3714   :  { %10573 = vrot.lane.b32.xlu0 %v10484_v28, %s18866_s21  ;;  %10569 = vrot.lane.b32.xlu1 %v10482_v16, %s18866_s21 }
0x3716   :  { %v10496_v58 = vpop.permute.xlu0 %10495 }
0x3717   :  { %v10583_v15 = vsel %vm3859_vm4, %v23016_v51, %v10496_v58 }
0x3718   :  { %10567 = vrot.lane.b32.xlu1 %v10481_v0, %s18866_s21  ;;  %v10589_v6 = vsel %vm3866_vm5, %v10583_v15, %v10520_v7 }
0x371a   :  { %v10502_v14 = vpop.permute.xlu0 %10501 }
0x371b   :  { %v10586_v4 = vsel %vm3859_vm4, %v23027_v62, %v10502_v14 }
0x371c   :  { %10571 = vrot.lane.b32.xlu1 %v10483_v34, %s18866_s21  ;;  %v10595_v34 = vsel %vm3873_vm6, %v10589_v6, %v10544_v27 }
0x371e   :  { %v10500_v42 = vpop.permute.xlu0 %10499 }
0x371f   :  { %v10585_v11 = vsel %vm3859_vm4, %v23024_v48, %v10500_v42 }
0x3720   :  { %v10591_v7 = vsel %vm3866_vm5, %v10585_v11, %v10524_v36 }
0x3721   :  { %v10597_v27 = vsel %vm3873_vm6, %v10591_v7, %v10548_v57 }
0x3722   :  { %v10518_v40 = vpop.permute.xlu0 %10517 }
0x3723   :  { %v10588_v20 = vsel %vm3866_vm5, %v10582_v60, %v10518_v40 }
0x3726   :  { %v10522_v21 = vpop.permute.xlu0 %10521 }
0x3727   :  { %v10590_v28 = vsel %vm3866_vm5, %v10584_v18, %v10522_v21 }
0x372a   :  { %v10542_v49 = vpop.permute.xlu0 %10541 }
0x372b   :  { %v10594_v8 = vsel %vm3873_vm6, %v10588_v20, %v10542_v49 }
0x372e   :  { %v10526_v54 = vpop.permute.xlu0 %10525 }
0x372f   :  { %v10592_v21 = vsel %vm3866_vm5, %v10586_v4, %v10526_v54 }
0x3732   :  { %v10546_v31 = vpop.permute.xlu0 %10545 }
0x3733   :  { %v10596_v19 = vsel %vm3873_vm6, %v10590_v28, %v10546_v31  ;;  %v23196_v31 = vld [vmem:[%s24021_s13] ss:$0 sm:$0xff] }
0x3736   :  { %v10550_v29 = vpop.permute.xlu0 %10549 }
0x377e   :  { %v10566_v23 = vpop.permute.xlu1 %10565 }
0x377f   :  { %v10600_v16 = vsel %vm3880_vm7, %v10594_v8, %v10566_v23  ;;  %v10598_v23 = vsel %vm3873_vm6, %v10592_v21, %v10550_v29 }
0x3782   :  { %v10564_v33 = vpop.permute.xlu1 %10563 }
0x3783   :  { %v10599_v41 = vsel %vm3880_vm7, %v10593_v59, %v10564_v33 }
0x3784   :  { %16084 = vmatprep.mubr.msk.f32.mxu0 %vm3893_vm8, %v10599_v41 }
0x3785   :  { %16085 = vmatmul.mubr.msk.f32.vlgmr.msra.gmra.mrb[230].mxu0 %vm3893_vm8, %v10600_v16 }
0x3786   :  { %v10570_v0 = vpop.permute.xlu1 %10569  ;;  %v10574_v40 = vpop.permute.xlu0 %10573 }
0x3787   :  { %v10602_v58 = vsel %vm3880_vm7, %v10596_v19, %v10570_v0  ;;  %v10604_v17 = vsel %vm3880_vm7, %v10598_v23, %v10574_v40 }
0x378a   :  { %v10568_v32 = vpop.permute.xlu1 %10567 }
0x378b   :  { %v10601_v56 = vsel %vm3880_vm7, %v10595_v34, %v10568_v32 }
0x378c   :  { %16087 = vmatprep.mubr.msk.f32.mxu0 %vm3893_vm8, %v10601_v56 }
0x378d   :  { %16088 = vmatmul.mubr.msk.f32.gmra.mrb[232].mxu0 %vm3893_vm8, %v10602_v58 }
0x378e   :  { %v10572_v49 = vpop.permute.xlu1 %10571 }
0x378f   :  { %v10603_v42 = vsel %vm3880_vm7, %v10597_v27, %v10572_v49 }
0x3790   :  { %16090 = vmatprep.mubr.msk.f32.mxu0 %vm3893_vm8, %v10603_v42 }
0x3791   :  { %16091 = vmatmul.mubr.msk.f32.gmra.mrb[234].mxu0 %vm3893_vm8, %v10604_v17 }
0x3792   :  { %16126 = vmatprep.mubr.msk.f32.mxu0 %vm3322_vm2, %v22939_v25 }
0x3858   :  { %v16086_v14 = vpop.f32.mrb[230].mxu0 }
0x3859   :  { %v23178_v36 = vadd.f32 %v22733_v61, %v16086_v14  ;;  %v10689_v54 = vpop.f32.mrb[231].mxu0 }
0x385a   :  { %v23181_v57 = vadd.f32 %v22733_v61, %v10689_v54 }
0x385b   :  { %18687 = vtanh.f32 %v23178_v36 }
0x385c   :  { %18689 = vtanh.f32 %v23181_v57 }
0x3860   :  { %v16089_v60 = vpop.f32.mrb[232].mxu0 }
0x3861   :  { %v23186_v46 = vadd.f32 %v22733_v61, %v16089_v60  ;;  %v10699_v20 = vpop.f32.mrb[233].mxu0 }
0x3862   :  { %v23189_v59 = vadd.f32 %v22733_v61, %v10699_v20 }
0x3863   :  { %18691 = vtanh.f32 %v23186_v46 }
0x3864   :  { %18693 = vtanh.f32 %v23189_v59  ;;  %v16092_v33 = vpop.f32.mrb[234].mxu0 }
0x3865   :  { %v18688_v8 = vpop.eup %18687  ;;  %v23199_v41 = vadd.f32 %v23196_v31, %v16092_v33  ;;  %v10709_v16 = vpop.f32.mrb[235].mxu0  ;;  %v24307_v33 = vld [vmem:[#allocation11_spill] sm:$0xff] }
0x3866   :  { %v18690_v0 = vpop.eup %18689  ;;  %v23202_v15 = vadd.f32 %v23196_v31, %v10709_v16  ;;  %10768 = vrot.lane.b32.xlu0 %v18688_v8, %s18862_s6  ;;  %v24310_v8 = vld [vmem:[#allocation16_spill] sm:$0xff]  ;;  %v24311_v16 = vld [vmem:[#allocation17_spill] sm:$0xff] }
0x3867   :  { %18695 = vtanh.f32 %v23199_v41  ;;  %10766 = vrot.lane.b32.xlu1 %v18690_v0, %s18862_s6 }
0x3868   :  { %18697 = vtanh.f32 %v23202_v15 }
0x386d   :  { %v18692_v61 = vpop.eup %18691 }
0x386e   :  { %v18694_v18 = vpop.eup %18693  ;;  %10772 = vrot.lane.b32.xlu0 %v18692_v61, %s18862_s6 }
0x386f   :  { %10770 = vrot.lane.b32.xlu1 %v18694_v18, %s18862_s6 }
0x3871   :  { %v18696_v6 = vpop.eup %18695 }
0x3872   :  { %v18698_v29 = vpop.eup %18697  ;;  %10776 = vrot.lane.b32.xlu0 %v18696_v6, %s18862_s6 }
0x3873   :  { %10774 = vrot.lane.b32.xlu1 %v18698_v29, %s18862_s6 }
0x38d8   :  { %v23212_v28 = vpop.permute.xlu0 %10768 }
0x38d9   :  { %v23214_v34 = vpop.permute.xlu1 %10766 }
0x38da   :  { %v17665_v32 = vpack.c.bf16 %v23212_v28, %v23214_v34 }
0x38dc   :  { %17666 = vmatprep.subr.bf16.mxu1 %v17665_v32 }
0x38dd   :  { %17668 = vmatpush3.bf16.msra.mxu1 %v17665_v32 }
0x38e0   :  { %v23218_v19 = vpop.permute.xlu0 %10772 }
0x38e1   :  { %v23220_v56 = vpop.permute.xlu1 %10770 }
0x38e2   :  { %v17669_v11 = vpack.c.bf16 %v23218_v19, %v23220_v56 }
0x38e4   :  { %v23224_v58 = vpop.permute.xlu0 %10776  ;;  %17670 = vmatprep.subr.bf16.mxu1 %v17669_v11 }
0x38e5   :  { %17672 = vmatpush3.bf16.msra.mxu1 %v17669_v11  ;;  %v23226_v4 = vpop.permute.xlu1 %10774 }
0x38e6   :  { %v17673_v7 = vpack.c.bf16 %v23224_v58, %v23226_v4 }
0x38e8   :  { %17674 = vmatprep.subr.bf16.mxu1 %v17673_v7 }
0x38e9   :  { %17676 = vmatpush3.bf16.msra.mxu1 %v17673_v7 }
0x38ec   :  { %16106 = vmatmul.mubr.msk.f32.vlgmr.msra.gmra.mrb[228].mxu1 %vm3322_vm2, %v22811_v30 }
0x38ed   :  { %16108 = vmatprep.mubr.msk.f32.mxu1 %vm3322_vm2, %v22820_v43 }
0x38f0   :  { %16109 = vmatmul.mubr.msk.f32.gmra.mrb[230].mxu1 %vm3322_vm2, %v22831_v38 }
0x38f1   :  { %16111 = vmatprep.mubr.msk.f32.mxu1 %vm3322_vm2, %v22840_v5 }
0x38f4   :  { %16112 = vmatmul.mubr.msk.f32.gmra.mrb[232].mxu1 %vm3322_vm2, %v22851_v53 }
0x38f5   :  { %16147 = vmatprep.mubr.msk.f32.mxu1 %vm3322_vm2, %v22860_v35 }
0x39bf   :  { %v23242_v40 = vpop.f32.mrb[228].mxu1 }
0x39c0   :  { %v23244_v21 = vpop.f32.mrb[229].mxu1 }
0x39c1   :  { %v18063_v27 = vpack.i.bf16 %v23242_v40, %v23244_v21  ;;  %v17677_v49 = vpack.c.bf16 %v23242_v40, %v23244_v21 }
0x39c3   :  { %18064 = vrot.lane.b32.xlu1 %v18063_v27, %s18867_s23  ;;  %v23251_v23 = vpop.f32.mrb[230].mxu1  ;;  %17678 = vmatprep.subr.bf16.mxu0 %v17677_v49 }
0x39c4   :  { %17690 = vmatprep.subr.bf16.mxu1 %v17677_v49  ;;  %v23253_v42 = vpop.f32.mrb[231].mxu1  ;;  %17680 = vmatpush3.bf16.msra.mxu0 %v17677_v49 }
0x39c5   :  { %v17681_v14 = vpack.c.bf16 %v23251_v23, %v23253_v42  ;;  %17692 = vmatpush3.bf16.msra.mxu1 %v17677_v49 }
0x39c7   :  { %v23259_v54 = vpop.f32.mrb[232].mxu1  ;;  %17682 = vmatprep.subr.bf16.mxu0 %v17681_v14  ;;  %17694 = vmatprep.subr.bf16.mxu1 %v17681_v14 }
0x39c8   :  { %v23261_v60 = vpop.f32.mrb[233].mxu1  ;;  %17684 = vmatpush3.bf16.msra.mxu0 %v17681_v14 }
0x39c9   :  { %v17685_v20 = vpack.c.bf16 %v23259_v54, %v23261_v60  ;;  %17696 = vmatpush3.bf16.msra.mxu1 %v17681_v14 }
0x39cb   :  { %17686 = vmatprep.subr.bf16.mxu0 %v17685_v20  ;;  %17698 = vmatprep.subr.bf16.mxu1 %v17685_v20 }
0x39cc   :  { %17688 = vmatpush3.bf16.msra.mxu0 %v17685_v20 }
0x39cd   :  { %17700 = vmatpush3.bf16.msra.mxu1 %v17685_v20 }
0x39ce   :  { %17713 = vmatprep.subr.bf16.mxu1 %v24260_v55 }
0x39cf   :  { %16127 = vmatmul.mubr.msk.f32.vlgmr.msra.gmra.mrb[236].mxu0 %vm3322_vm2, %v22811_v30  ;;  %v24303_v30 = vld [vmem:[#allocation5_spill] sm:$0xff] }
0x39d0   :  { %16148 = vmatmul.mubr.msk.f32.vlgmr.msra.gmra.mrb[234].mxu1 %vm3322_vm2, %v22897_v9  ;;  %16129 = vmatprep.mubr.msk.f32.mxu0 %vm3322_vm2, %v22820_v43  ;;  %v24304_v43 = vld [vmem:[#allocation6_spill] sm:$0xff] }
0x39d1   :  { %16150 = vmatprep.mubr.msk.f32.mxu1 %vm3322_vm2, %v22905_v44  ;;  %17715 = vmatpush1.bf16.msra.mxu1 %v24292_v24 }
0x39d2   :  { %17716 = vmatprep.subr.bf16.mxu1 %v24260_v55 }
0x39d3   :  { %16130 = vmatmul.mubr.msk.f32.gmra.mrb[238].mxu0 %vm3322_vm2, %v22831_v38  ;;  %v24305_v38 = vld [vmem:[#allocation10_spill] sm:$0xff] }
0x39d4   :  { %16151 = vmatmul.mubr.msk.f32.gmra.mrb[236].mxu1 %vm3322_vm2, %v22914_v50  ;;  %16132 = vmatprep.mubr.msk.f32.mxu0 %vm3322_vm2, %v22840_v5  ;;  %v24306_v5 = vld [vmem:[#allocation8_spill] sm:$0xff] }
0x39d5   :  { %16153 = vmatprep.mubr.msk.f32.mxu1 %vm3322_vm2, %v22922_v26  ;;  %17718 = vmatpush1.bf16.msra.mxu1 %v24303_v30 }
0x39d6   :  { %17719 = vmatprep.subr.bf16.mxu1 %v24260_v55 }
0x39d7   :  { %16133 = vmatmul.mubr.msk.f32.gmra.mrb[240].mxu0 %vm3322_vm2, %v22851_v53  ;;  %v24308_v53 = vld [vmem:[#allocation13_spill] sm:$0xff] }
0x39d8   :  { %16154 = vmatmul.mubr.msk.f32.gmra.mrb[238].mxu1 %vm3322_vm2, %v22932_v52  ;;  %16168 = vmatprep.mubr.msk.f32.mxu0 %vm3322_vm2, %v22860_v35  ;;  %v24309_v35 = vld [vmem:[#allocation12_spill] sm:$0xff] }
0x39d9   :  { %17721 = vmatpush1.bf16.msra.mxu1 %v24304_v43 }
0x39da   :  { %17722 = vmatprep.subr.bf16.mxu1 %v24260_v55 }
0x39dd   :  { %17724 = vmatpush1.bf16.msra.mxu1 %v24305_v38 }
0x39de   :  { %17725 = vmatprep.subr.bf16.mxu1 %v24260_v55 }
0x39e1   :  { %17727 = vmatpush1.bf16.msra.mxu1 %v24306_v5 }
0x39e2   :  { %17728 = vmatprep.subr.bf16.mxu1 %v24260_v55 }
0x39e5   :  { %17730 = vmatpush1.bf16.msra.mxu1 %v24307_v33 }
0x39e6   :  { %17731 = vmatprep.subr.bf16.mxu1 %v24260_v55 }
0x39e9   :  { %17733 = vmatpush1.bf16.msra.mxu1 %v24308_v53 }
0x39ea   :  { %17734 = vmatprep.subr.bf16.mxu1 %v24260_v55 }
0x39ed   :  { %17736 = vmatpush1.bf16.msra.mxu1 %v24309_v35 }
0x39ee   :  { %17737 = vmatprep.subr.bf16.mxu1 %v24260_v55 }
0x39f1   :  { %17739 = vmatpush1.bf16.msra.mxu1 %v24310_v8 }
0x39f2   :  { %17740 = vmatprep.subr.bf16.mxu1 %v24260_v55 }
0x39f5   :  { %17742 = vmatpush1.bf16.msra.mxu1 %v24311_v16 }
0x39f6   :  { %17792 = vmatprep.subr.bf16.mxu1 %v20833_v2 }
0x3aa2   :  { %v16128_v0 = vpop.f32.mrb[236].mxu0 }
0x3aa3   :  { %v10975_v61 = vmul.f32 2.0, %v16128_v0  ;;  %v16149_v18 = vpop.f32.mrb[234].mxu1  ;;  %v10945_v6 = vpop.f32.mrb[237].mxu0 }
0x3aa4   :  { %v10974_v29 = vmul.f32 2.0, %v10945_v6  ;;  %v11052_v32 = vpop.f32.mrb[235].mxu1 }
0x3aa5   :  { %v10981_v11 = vsub.f32 %v10975_v61, %v23212_v28  ;;  %v18073_v7 = vpack.i.bf16 %v16149_v18, %v11052_v32  ;;  %v17701_v27 = vpack.c.bf16 %v16149_v18, %v11052_v32 }
0x3aa6   :  { %v10980_v49 = vsub.f32 %v10974_v29, %v23214_v34  ;;  %v16131_v14 = vpop.f32.mrb[238].mxu0 }
0x3aa7   :  { %18074 = vrot.lane.b32.xlu1 %v18073_v7, %s18868_s24  ;;  %v10977_v20 = vmul.f32 2.0, %v16131_v14  ;;  %v16152_v17 = vpop.f32.mrb[236].mxu1  ;;  %17702 = vmatprep.subr.bf16.mxu0 %v17701_v27  ;;  %v10955_v1 = vpop.f32.mrb[239].mxu0 }
0x3aa8   :  { %v18068_v12 = vpack.i.bf16 %v10981_v11, %v10980_v49  ;;  %v10976_v37 = vmul.f32 2.0, %v10955_v1  ;;  %v11062_v0 = vpop.f32.mrb[237].mxu1  ;;  %17704 = vmatpush3.bf16.msra.mxu0 %v17701_v27  ;;  %v24312_v1 = vpack.i.bf16 %v23251_v23, %v23253_v42 }
0x3aa9   :  { %v10983_v6 = vsub.f32 %v10977_v20, %v23218_v19  ;;  %v18083_v63 = vpack.i.bf16 %v16152_v17, %v11062_v0  ;;  %v17705_v22 = vpack.c.bf16 %v16152_v17, %v11062_v0 }
0x3aaa   :  { %v10982_v61 = vsub.f32 %v10976_v37, %v23220_v56  ;;  %18069 = vrot.lane.b32.xlu0 %v18068_v12, %s18869_s25  ;;  %v16134_v18 = vpop.f32.mrb[240].mxu0  ;;  %v18065_v12 = vpop.permute.xlu1 %18064 }
0x3aab   :  { %v16155_v29 = vpop.f32.mrb[238].mxu1  ;;  %17706 = vmatprep.subr.bf16.mxu0 %v17705_v22  ;;  %v10965_v32 = vpop.f32.mrb[241].mxu0  ;;  %v18067_v27 = vunpack.i.h.bf16 %v18065_v12 }
0x3aac   :  { %v18088_v7 = vpack.i.bf16 %v10983_v6, %v10982_v61  ;;  %v11072_v14 = vpop.f32.mrb[239].mxu1  ;;  %17708 = vmatpush3.bf16.msra.mxu0 %v17705_v22  ;;  %v10978_v17 = vmul.f32 2.0, %v10965_v32  ;;  %v10979_v22 = vmul.f32 2.0, %v16134_v18 }
0x3aad   :  { %v17709_v13 = vpack.c.bf16 %v16155_v29, %v11072_v14 }
0x3aae   :  { %18079 = vrot.lane.b32.xlu0 %v24312_v1, %s18867_s23  ;;  %18089 = vrot.lane.b32.xlu1 %v18088_v7, %s18869_s25  ;;  %v10984_v37 = vsub.f32 %v10978_v17, %v23226_v4 }
0x3aaf   :  { %17710 = vmatprep.subr.bf16.mxu0 %v17709_v13 }
0x3ab0   :  { %17712 = vmatpush3.bf16.msra.mxu0 %v17709_v13  ;;  %v10985_v13 = vsub.f32 %v10979_v22, %v23224_v58  ;;  %v11261_v22 = vsel %vm3075_vm0, %v23212_v28, %v18067_v27 }
0x3ab2   :  { %18084 = vrot.lane.b32.xlu0 %v18083_v63, %s18868_s24  ;;  %11202 = vrot.lane.b32.xlu1 %v23261_v60, %s18867_s23 }
0x3ab3   :  { %16169 = vmatmul.mubr.msk.f32.vlgmr.msra.gmra.mrb[242].mxu0 %vm3322_vm2, %v22897_v9  ;;  %v18066_v9 = vunpack.i.l.bf16 %v18065_v12 }
0x3ab4   :  { %16171 = vmatprep.mubr.msk.f32.mxu0 %vm3322_vm2, %v22905_v44 }
0x3ab5   :  { %v11260_v0 = vsel %vm3075_vm0, %v23214_v34, %v18066_v9 }
0x3ab6   :  { %11250 = vrot.lane.b32.xlu1 %v11072_v14, %s18868_s24  ;;  %11226 = vrot.lane.b32.xlu0 %v10984_v37, %s18869_s25 }
0x3ab7   :  { %16172 = vmatmul.mubr.msk.f32.gmra.mrb[244].mxu0 %vm3322_vm2, %v22914_v50 }
0x3ab8   :  { %16174 = vmatprep.mubr.msk.f32.mxu0 %vm3322_vm2, %v22922_v26 }
0x3aba   :  { %11228 = vrot.lane.b32.xlu1 %v10985_v13, %s18869_s25  ;;  %11204 = vrot.lane.b32.xlu0 %v23259_v54, %s18867_s23 }
0x3abb   :  { %16175 = vmatmul.mubr.msk.f32.gmra.mrb[246].mxu0 %vm3322_vm2, %v22932_v52 }
0x3abc   :  { %16189 = vmatprep.mubr.msk.f32.mxu0 %vm3322_vm2, %v22939_v25 }
0x3abe   :  { %11252 = vrot.lane.b32.xlu0 %v16155_v29, %s18868_s24 }
0x3b19   :  { %v18075_v11 = vpop.permute.xlu1 %18074 }
0x3b1a   :  { %v18076_v18 = vunpack.i.l.bf16 %v18075_v11 }
0x3b1c   :  { %v18070_v63 = vpop.permute.xlu0 %18069 }
0x3b1d   :  { %v18071_v44 = vunpack.i.l.bf16 %v18070_v63  ;;  %v18072_v6 = vunpack.i.h.bf16 %v18070_v63 }
0x3b1f   :  { %v11266_v61 = vsel %vm3174_vm1, %v11260_v0, %v18071_v44  ;;  %v11267_v63 = vsel %vm3174_vm1, %v11261_v22, %v18072_v6 }
0x3b20   :  { %v18080_v50 = vpop.permute.xlu0 %18079  ;;  %v18090_v29 = vpop.permute.xlu1 %18089  ;;  %v11272_v34 = vsel %vm4565_vm9, %v11266_v61, %v18076_v18 }
0x3b21   :  { %v18081_v37 = vunpack.i.l.bf16 %v18080_v50  ;;  %v18091_v28 = vunpack.i.l.bf16 %v18090_v29 }
0x3b24   :  { %v18085_v14 = vpop.permute.xlu0 %18084 }
0x3b25   :  { %v18087_v61 = vunpack.i.h.bf16 %v18085_v14 }
0x3b28   :  { %v11227_v0 = vpop.permute.xlu0 %11226 }
0x3b86   :  { %v16170_v26 = vpop.f32.mrb[242].mxu0 }
0x3b87   :  { %v11177_v49 = vmul.f32 2.0, %v16170_v26  ;;  %v11147_v20 = vpop.f32.mrb[243].mxu0 }
0x3b88   :  { %v11176_v52 = vmul.f32 2.0, %v11147_v20  ;;  %v11203_v20 = vpop.permute.xlu1 %11202 }
0x3b89   :  { %v11183_v25 = vsub.f32 %v11177_v49, %v23242_v40  ;;  %v18077_v40 = vunpack.i.h.bf16 %v18075_v11  ;;  %v18082_v49 = vunpack.i.h.bf16 %v18080_v50  ;;  %v18086_v11 = vunpack.i.l.bf16 %v18085_v14 }
0x3b8a   :  { %v11182_v32 = vsub.f32 %v11176_v52, %v23244_v21  ;;  %v16173_v7 = vpop.f32.mrb[244].mxu0  ;;  %v18843_v52 = vld [vmem:[%s24020_s12 + $0x10] sm:$0xf] }
0x3b8b   :  { %v11179_v1 = vmul.f32 2.0, %v16173_v7  ;;  %v11157_v17 = vpop.f32.mrb[245].mxu0  ;;  %v11273_v27 = vsel %vm4565_vm9, %v11267_v63, %v18077_v40  ;;  %v13647_v40 = vmul.f32 -1.442695, %v23202_v15 }
0x3b8c   :  { %v11178_v13 = vmul.f32 2.0, %v11157_v17  ;;  %13673 = vmatprep.mubr.msk.f32.mxu1 %vm3075_vm0, %v11182_v32  ;;  %v11264_v32 = vsel %vm3075_vm0, %v23226_v4, %v11203_v20 }
0x3b8d   :  { %v11185_v12 = vsub.f32 %v11179_v1, %v23251_v23  ;;  %11361 = vmatmul.mubr.f32.vlgmr.msra.gmra.mrb[240].mxu1 %v11272_v34  ;;  %v11270_v7 = vsel %vm3174_vm1, %v11264_v32, %v11227_v0  ;;  %v13645_v34 = vmul.f32 -1.442695, %v23189_v59  ;;  %v18844_v32 = vld [vmem:[%s24023_s15] ss:$0 sm:$0xff] }
0x3b8e   :  { %v11184_v21 = vsub.f32 %v11178_v13, %v23253_v42  ;;  %v16176_v9 = vpop.f32.mrb[246].mxu0  ;;  %13674 = vmatprep.mubr.msk.f32.mxu1 %vm3075_vm0, %v11183_v25  ;;  %17794 = vmatpush3.bf16.msra.mxu1 %v20833_v2  ;;  %v11262_v42 = vsel %vm3075_vm0, %v23220_v56, %v18081_v37  ;;  %v11251_v25 = vpop.permute.xlu1 %11250  ;;  %v13643_v37 = vmul.f32 -1.442695, %v23181_v57  ;;  %v13644_v13 = vmul.f32 -1.442695, %v23178_v36 }
0x3b8f   :  { %v11181_v44 = vmul.f32 2.0, %v16176_v9  ;;  %v11167_v26 = vpop.f32.mrb[247].mxu0  ;;  %16265 = vmatprep.subr.msk.mxu1 %vm3912_vm3, %v22962_v47  ;;  %v18092_v47 = vunpack.i.h.bf16 %v18090_v29  ;;  %v11268_v50 = vsel %vm3174_vm1, %v11262_v42, %v18091_v28  ;;  %v11276_v1 = vsel %vm4565_vm9, %v11270_v7, %v11251_v25 }
0x3b90   :  { %v11180_v23 = vmul.f32 2.0, %v11167_v26  ;;  %v11274_v56 = vsel %vm4565_vm9, %v11268_v50, %v18086_v11  ;;  %18699 = vpow2.f32 %v13643_v37  ;;  %v13648_v28 = vmul.f32 -1.442695, %v23199_v41 }
0x3b91   :  { %v11187_v6 = vsub.f32 %v11181_v44, %v23259_v54  ;;  %11366 = vmatmul.mubr.f32.gmra.mrb[242].mxu1 %v11273_v27  ;;  %v11263_v54 = vsel %vm3075_vm0, %v23218_v19, %v18082_v49  ;;  %18701 = vpow2.f32 %v13644_v13 }
0x3b92   :  { %v11186_v2 = vsub.f32 %v11180_v23, %v23261_v60  ;;  %13675 = vmatprep.mubr.msk.f32.mxu1 %vm3075_vm0, %v11184_v21  ;;  %16266 = vmatpush3.msk.msra.mxu1 %vm3912_vm3, %v18843_v52  ;;  %v11205_v60 = vpop.permute.xlu0 %11204  ;;  %v11269_v18 = vsel %vm3174_vm1, %v11263_v54, %v18092_v47  ;;  %v11229_v14 = vpop.permute.xlu1 %11228  ;;  %18703 = vpow2.f32 %v13645_v34 }
0x3b93   :  { %v11275_v29 = vsel %vm4565_vm9, %v11269_v18, %v18087_v61  ;;  %v11265_v19 = vsel %vm3075_vm0, %v23224_v58, %v11205_v60  ;;  %v13646_v58 = vmul.f32 -1.442695, %v23186_v46 }
0x3b94   :  { %v11271_v22 = vsel %vm3174_vm1, %v11265_v19, %v11229_v14 }
0x3b95   :  { %11371 = vmatmul.mubr.f32.gmra.mrb[244].mxu1 %v11274_v56  ;;  %18705 = vpow2.f32 %v13646_v58 }
0x3b96   :  { %13676 = vmatprep.mubr.msk.f32.mxu1 %vm3075_vm0, %v11185_v12  ;;  %v11253_v17 = vpop.permute.xlu0 %11252  ;;  %18707 = vpow2.f32 %v13647_v40 }
0x3b97   :  { %v11277_v4 = vsel %vm4565_vm9, %v11271_v22, %v11253_v17 }
0x3b99   :  { %11376 = vmatmul.mubr.f32.gmra.mrb[246].mxu1 %v11275_v29 }
0x3b9a   :  { %13677 = vmatprep.mubr.msk.f32.mxu1 %vm3075_vm0, %v11186_v2  ;;  %v18700_v63 = vpop.eup %18699 }
0x3b9b   :  { %v10736_v12 = vadd.f32 1.0, %v18700_v63  ;;  %v18702_v21 = vpop.eup %18701 }
0x3b9c   :  { %v10737_v44 = vadd.f32 1.0, %v18702_v21  ;;  %v18704_v26 = vpop.eup %18703 }
0x3b9d   :  { %11381 = vmatmul.mubr.f32.gmra.mrb[248].mxu1 %v11276_v1  ;;  %18709 = vrcp.f32 %v10736_v12  ;;  %v10738_v15 = vadd.f32 1.0, %v18704_v26 }
0x3b9e   :  { %13678 = vmatprep.mubr.msk.f32.mxu1 %vm3075_vm0, %v11187_v6 }
0x3b9f   :  { %v18706_v49 = vpop.eup %18705 }
0x3ba0   :  { %v10739_v23 = vadd.f32 1.0, %v18706_v49  ;;  %v18708_v42 = vpop.eup %18707 }
0x3ba1   :  { %11386 = vmatmul.mubr.f32.gmra.mrb[250].mxu1 %v11277_v4  ;;  %v10740_v50 = vadd.f32 1.0, %v18708_v42 }
0x3ba7   :  { %v18710_v0 = vpop.eup %18709 }
0x3c60   :  { %v11362_v9 = vpop.f32.mrb[240].mxu1 }
0x3c61   :  { %v11363_v57 = vadd.f32 %v23002_v39, %v11362_v9  ;;  %v11364_v36 = vpop.f32.mrb[241].mxu1 }
0x3c63   :  { %18711 = vtanh.f32 %v11363_v57 }
0x3c64   :  { %v11367_v59 = vpop.f32.mrb[242].mxu1  ;;  %18713 = vpow2.f32 %v13648_v28 }
0x3c65   :  { %v11368_v46 = vadd.f32 %v23002_v39, %v11367_v59  ;;  %v11369_v27 = vpop.f32.mrb[243].mxu1  ;;  %18715 = vrcp.f32 %v10737_v44 }
0x3c67   :  { %18717 = vtanh.f32 %v11368_v46 }
0x3c68   :  { %v11372_v11 = vpop.f32.mrb[244].mxu1  ;;  %18719 = vrcp.f32 %v10738_v15 }
0x3c69   :  { %v11373_v41 = vadd.f32 %v23002_v39, %v11372_v11  ;;  %v11374_v20 = vpop.f32.mrb[245].mxu1 }
0x3c6b   :  { %18721 = vtanh.f32 %v11373_v41 }
0x3c6c   :  { %v11377_v6 = vpop.f32.mrb[246].mxu1  ;;  %18723 = vrcp.f32 %v10739_v23 }
0x3c6d   :  { %v18712_v2 = vpop.eup %18711  ;;  %v11378_v52 = vadd.f32 %v23002_v39, %v11377_v6  ;;  %v11379_v47 = vpop.f32.mrb[247].mxu1 }
0x3c6e   :  { %v11397_v61 = vmul.f32 %v18712_v2, %v18710_v0  ;;  %v18714_v56 = vpop.eup %18713 }
0x3c6f   :  { %18725 = vtanh.f32 %v11378_v52  ;;  %v18716_v54 = vpop.eup %18715  ;;  %v10741_v14 = vadd.f32 1.0, %v18714_v56  ;;  %v23432_v56 = vld [vmem:[%s24018_s11 + $0x10] sm:$0xff] }
0x3c70   :  { %v11403_v25 = vsub.f32 0.0, %v11397_v61  ;;  %v11382_v60 = vpop.f32.mrb[248].mxu1  ;;  %18727 = vrcp.f32 %v10740_v50  ;;  %v23425_v61 = vld [vmem:[%s24018_s11 + $0x8] sm:$0xff] }
0x3c71   :  { %v18718_v18 = vpop.eup %18717  ;;  %v11383_v29 = vadd.f32 %v18844_v32, %v11382_v60  ;;  %v11384_v7 = vpop.f32.mrb[249].mxu1  ;;  %v23453_v60 = vld [vmem:[%s24018_s11 + $0x28] sm:$0xff] }
0x3c72   :  { %v11398_v19 = vmul.f32 %v18718_v18, %v18716_v54  ;;  %v18720_v39 = vpop.eup %18719  ;;  %v11409_v1 = vmul.f32 0.125, %v11403_v25  ;;  %v23439_v54 = vld [vmem:[%s24018_s11 + $0x18] sm:$0xff]  ;;  %v23446_v25 = vld [vmem:[%s24018_s11 + $0x20] sm:$0xff] }
0x3c73   :  { %18729 = vtanh.f32 %v11383_v29  ;;  %v23460_v18 = vld [vmem:[%s24018_s11] sm:$0xff] }
0x3c74   :  { %v11404_v17 = vsub.f32 0.0, %v11398_v19  ;;  %v11387_v22 = vpop.f32.mrb[250].mxu1  ;;  %18731 = vrcp.f32 %v10741_v14  ;;  %v23399_v40 = vadd.f32 %v11409_v1, %v23008_v45 }
0x3c75   :  { %v18722_v4 = vpop.eup %18721  ;;  %v11388_v37 = vadd.f32 %v18844_v32, %v11387_v22  ;;  %v11389_v13 = vpop.f32.mrb[251].mxu1 }
0x3c76   :  { %v11410_v34 = vmul.f32 0.125, %v11404_v17  ;;  %v11399_v58 = vmul.f32 %v18722_v4, %v18720_v39  ;;  %v18724_v63 = vpop.eup %18723  ;;  %v23507_v4 = vld [vmem:[%s24018_s11 + $0x30] sm:$0xff]  ;;  %v23521_v13 = vld [vmem:[%s24018_s11 + $0x40] sm:$0xff] }
0x3c77   :  { %18733 = vtanh.f32 %v11388_v37  ;;  %v23514_v37 = vld [vmem:[%s24018_s11 + $0x38] sm:$0xff] }
0x3c78   :  { %v23402_v12 = vadd.f32 %v11410_v34, %v23011_v10  ;;  %v11405_v21 = vsub.f32 0.0, %v11399_v58  ;;  %v23528_v34 = vld [vmem:[%s24018_s11 + $0x48] sm:$0xff]  ;;  %v23535_v58 = vld [vmem:[%s24018_s11 + $0x50] sm:$0xff] }
0x3c79   :  { %v18726_v9 = vpop.eup %18725 }
0x3c7a   :  { %v11400_v28 = vmul.f32 %v18726_v9, %v18724_v63  ;;  %v17743_v57 = vpack.c.bf16 %v23402_v12, %v23399_v40  ;;  %v18728_v36 = vpop.eup %18727  ;;  %v11411_v44 = vmul.f32 0.125, %v11405_v21  ;;  %v23542_v63 = vld [vmem:[%s24018_s11 + $0x58] sm:$0xff] }
0x3c7c   :  { %v11406_v26 = vsub.f32 0.0, %v11400_v28  ;;  %17744 = vmatprep.subr.bf16.mxu0 %v17743_v57  ;;  %v23407_v49 = vadd.f32 %v11411_v44, %v23016_v51 }
0x3c7d   :  { %v18730_v59 = vpop.eup %18729  ;;  %17746 = vmatpush3.bf16.msra.mxu0 %v17743_v57 }
0x3c7e   :  { %v11412_v46 = vmul.f32 0.125, %v11406_v26  ;;  %v11401_v27 = vmul.f32 %v18730_v59, %v18728_v36  ;;  %v18732_v15 = vpop.eup %18731 }
0x3c80   :  { %v23410_v11 = vadd.f32 %v11412_v46, %v23019_v3  ;;  %v11407_v41 = vsub.f32 0.0, %v11401_v27 }
0x3c81   :  { %v18734_v20 = vpop.eup %18733 }
0x3c82   :  { %v11402_v23 = vmul.f32 %v18734_v20, %v18732_v15  ;;  %v17747_v42 = vpack.c.bf16 %v23410_v11, %v23407_v49  ;;  %v11413_v0 = vmul.f32 0.125, %v11407_v41 }
0x3c84   :  { %v11408_v6 = vsub.f32 0.0, %v11402_v23  ;;  %17748 = vmatprep.subr.bf16.mxu0 %v17747_v42  ;;  %v23415_v52 = vadd.f32 %v11413_v0, %v23024_v48 }
0x3c85   :  { %17750 = vmatpush3.bf16.msra.mxu0 %v17747_v42 }
0x3c86   :  { %v11414_v2 = vmul.f32 0.125, %v11408_v6 }
0x3c88   :  { %v23418_v47 = vadd.f32 %v11414_v2, %v23027_v62 }
0x3c8a   :  { %v17751_v50 = vpack.c.bf16 %v23418_v47, %v23415_v52 }
0x3c8c   :  { %17752 = vmatprep.subr.bf16.mxu0 %v17751_v50 }
0x3c8d   :  { %17754 = vmatpush3.bf16.msra.mxu0 %v17751_v50 }
0x3c90   :  { %16190 = vmatmul.mubr.msk.f32.vlgmr.msra.gmra.mrb[248].mxu0 %vm3322_vm2, %v23425_v61 }
0x3c91   :  { %16192 = vmatprep.mubr.msk.f32.mxu0 %vm3322_vm2, %v23432_v56 }
0x3c94   :  { %16193 = vmatmul.mubr.msk.f32.gmra.mrb[250].mxu0 %vm3322_vm2, %v23439_v54 }
0x3c95   :  { %16195 = vmatprep.mubr.msk.f32.mxu0 %vm3322_vm2, %v23446_v25 }
0x3c98   :  { %16196 = vmatmul.mubr.msk.f32.gmra.mrb[252].mxu0 %vm3322_vm2, %v23453_v60 }
0x3c99   :  { %16210 = vmatprep.mubr.msk.f32.mxu0 %vm3322_vm2, %v23460_v18 }
0x3d63   :  { %v23464_v32 = vpop.f32.mrb[248].mxu0 }
0x3d64   :  { %11833 = vrot.lane.b32.xlu0 %v23464_v32, %s18863_s1  ;;  %v23468_v29 = vpop.f32.mrb[249].mxu0 }
0x3d65   :  { %v17755_v7 = vpack.c.bf16 %v23464_v32, %v23468_v29  ;;  %11831 = vrot.lane.b32.xlu1 %v23468_v29, %s18863_s1 }
0x3d67   :  { %v23474_v14 = vpop.f32.mrb[250].mxu0  ;;  %17756 = vmatprep.subr.bf16.mxu0 %v17755_v7 }
0x3d68   :  { %17758 = vmatpush3.bf16.msra.mxu0 %v17755_v7  ;;  %11837 = vrot.lane.b32.xlu0 %v23474_v14, %s18863_s1  ;;  %v23478_v19 = vpop.f32.mrb[251].mxu0 }
0x3d69   :  { %v17759_v39 = vpack.c.bf16 %v23474_v14, %v23478_v19 }
0x3d6b   :  { %v23482_v1 = vpop.f32.mrb[252].mxu0  ;;  %17760 = vmatprep.subr.bf16.mxu0 %v17759_v39 }
0x3d6c   :  { %11835 = vrot.lane.b32.xlu0 %v23478_v19, %s18863_s1  ;;  %v23486_v17 = vpop.f32.mrb[253].mxu0  ;;  %17762 = vmatpush3.bf16.msra.mxu0 %v17759_v39 }
0x3d6d   :  { %v17763_v22 = vpack.c.bf16 %v23482_v1, %v23486_v17 }
0x3d6f   :  { %17764 = vmatprep.subr.bf16.mxu0 %v17763_v22 }
0x3d70   :  { %11841 = vrot.lane.b32.xlu0 %v23482_v1, %s18863_s1  ;;  %17766 = vmatpush3.bf16.msra.mxu0 %v17763_v22 }
0x3d71   :  { %17768 = vmatprep.subr.bf16.mxu0 %v17755_v7 }
0x3d73   :  { %16211 = vmatmul.mubr.msk.f32.vlgmr.msra.gmra.mrb[254].mxu0 %vm3322_vm2, %v23425_v61 }
0x3d74   :  { %11839 = vrot.lane.b32.xlu0 %v23486_v17, %s18863_s1  ;;  %17770 = vmatpush3.bf16.msra.mxu0 %v17755_v7 }
0x3d75   :  { %17772 = vmatprep.subr.bf16.mxu0 %v17759_v39  ;;  %16213 = vmatprep.mubr.msk.f32.mxu0 %vm3322_vm2, %v23432_v56 }
0x3d77   :  { %16214 = vmatmul.mubr.msk.f32.gmra.mrb[0].mxu0 %vm3322_vm2, %v23439_v54 }
0x3d78   :  { %17774 = vmatpush3.bf16.msra.mxu0 %v17759_v39  ;;  %16216 = vmatprep.mubr.msk.f32.mxu0 %vm3322_vm2, %v23446_v25 }
0x3d79   :  { %17776 = vmatprep.subr.bf16.mxu0 %v17763_v22 }
0x3d7b   :  { %16217 = vmatmul.mubr.msk.f32.gmra.mrb[2].mxu0 %vm3322_vm2, %v23453_v60 }
0x3d7c   :  { %17778 = vmatpush3.bf16.msra.mxu0 %v17763_v22  ;;  %16231 = vmatprep.mubr.msk.f32.mxu0 %vm3322_vm2, %v23507_v4 }
0x3d7f   :  { %16232 = vmatmul.mubr.msk.f32.vlgmr.msra.gmra.mrb[4].mxu0 %vm3322_vm2, %v23514_v37 }
0x3d80   :  { %16234 = vmatprep.mubr.msk.f32.mxu0 %vm3322_vm2, %v23521_v13 }
0x3d83   :  { %16235 = vmatmul.mubr.msk.f32.gmra.mrb[6].mxu0 %vm3322_vm2, %v23528_v34 }
0x3d84   :  { %16237 = vmatprep.mubr.msk.f32.mxu0 %vm3322_vm2, %v23535_v58 }
0x3d87   :  { %16238 = vmatmul.mubr.msk.f32.gmra.mrb[8].mxu0 %vm3322_vm2, %v23542_v63 }
0x3d88   :  { %16252 = vmatprep.mubr.msk.f32.mxu0 %vm3322_vm2, %v23507_v4 }
0x3e46   :  { %v16212_v21 = vpop.f32.mrb[254].mxu0 }
0x3e47   :  { %v11612_v9 = vmul.f32 2.0, %v16212_v21  ;;  %v11582_v28 = vpop.f32.mrb[255].mxu0 }
0x3e48   :  { %v11611_v57 = vmul.f32 2.0, %v11582_v28 }
0x3e49   :  { %v11618_v36 = vsub.f32 %v11612_v9, %v23402_v12 }
0x3e4a   :  { %v11617_v44 = vsub.f32 %v11611_v57, %v23399_v40  ;;  %v16215_v26 = vpop.f32.mrb[0].mxu0 }
0x3e4b   :  { %v11614_v59 = vmul.f32 2.0, %v16215_v26  ;;  %11857 = vrot.lane.b32.xlu0 %v11618_v36, %s18864_s29  ;;  %v11592_v46 = vpop.f32.mrb[1].mxu0 }
0x3e4c   :  { %v11613_v27 = vmul.f32 2.0, %v11592_v46  ;;  %11855 = vrot.lane.b32.xlu1 %v11617_v44, %s18864_s29 }
0x3e4d   :  { %v11620_v15 = vsub.f32 %v11614_v59, %v23410_v11 }
0x3e4e   :  { %v11619_v41 = vsub.f32 %v11613_v27, %v23407_v49  ;;  %v16218_v20 = vpop.f32.mrb[2].mxu0 }
0x3e4f   :  { %11861 = vrot.lane.b32.xlu0 %v11620_v15, %s18864_s29  ;;  %v11602_v23 = vpop.f32.mrb[3].mxu0  ;;  %v11616_v42 = vmul.f32 2.0, %v16218_v20 }
0x3e50   :  { %11859 = vrot.lane.b32.xlu1 %v11619_v41, %s18864_s29  ;;  %v11615_v0 = vmul.f32 2.0, %v11602_v23 }
0x3e51   :  { %v11622_v7 = vsub.f32 %v11616_v42, %v23418_v47 }
0x3e52   :  { %v16233_v6 = vpop.f32.mrb[4].mxu0  ;;  %v11621_v39 = vsub.f32 %v11615_v0, %v23415_v52 }
0x3e53   :  { %11881 = vrot.lane.b32.xlu0 %v16233_v6, %s18865_s0  ;;  %v11689_v2 = vpop.f32.mrb[5].mxu0 }
0x3e54   :  { %v17779_v50 = vpack.c.bf16 %v16233_v6, %v11689_v2  ;;  %11879 = vrot.lane.b32.xlu1 %v11689_v2, %s18865_s0 }
0x3e56   :  { %v16236_v22 = vpop.f32.mrb[6].mxu0  ;;  %17780 = vmatprep.subr.bf16.mxu0 %v17779_v50 }
0x3e57   :  { %11865 = vrot.lane.b32.xlu0 %v11622_v7, %s18864_s29  ;;  %v11699_v21 = vpop.f32.mrb[7].mxu0  ;;  %17782 = vmatpush3.bf16.msra.mxu0 %v17779_v50 }
0x3e58   :  { %v17783_v9 = vpack.c.bf16 %v16236_v22, %v11699_v21  ;;  %11863 = vrot.lane.b32.xlu1 %v11621_v39, %s18864_s29 }
0x3e5a   :  { %v16239_v28 = vpop.f32.mrb[8].mxu0  ;;  %17784 = vmatprep.subr.bf16.mxu0 %v17783_v9 }
0x3e5b   :  { %11885 = vrot.lane.b32.xlu0 %v16236_v22, %s18865_s0  ;;  %v11709_v57 = vpop.f32.mrb[9].mxu0  ;;  %17786 = vmatpush3.bf16.msra.mxu0 %v17783_v9  ;;  %v11832_v22 = vpop.permute.xlu1 %11831 }
0x3e5c   :  { %v17787_v36 = vpack.c.bf16 %v16239_v28, %v11709_v57  ;;  %11883 = vrot.lane.b32.xlu1 %v11699_v21, %s18865_s0 }
0x3e5e   :  { %17788 = vmatprep.subr.bf16.mxu0 %v17787_v36 }
0x3e5f   :  { %11889 = vrot.lane.b32.xlu0 %v16239_v28, %s18865_s0  ;;  %17790 = vmatpush3.bf16.msra.mxu0 %v17787_v36 }
0x3e60   :  { %11887 = vrot.lane.b32.xlu1 %v11709_v57, %s18865_s0 }
0x3e62   :  { %16253 = vmatmul.mubr.msk.f32.vlgmr.msra.gmra.mrb[10].mxu0 %vm3322_vm2, %v23514_v37 }
0x3e63   :  { %16255 = vmatprep.mubr.msk.f32.mxu0 %vm3322_vm2, %v23521_v13 }
0x3e66   :  { %16256 = vmatmul.mubr.msk.f32.gmra.mrb[12].mxu0 %vm3322_vm2, %v23528_v34 }
0x3e67   :  { %16258 = vmatprep.mubr.msk.f32.mxu0 %vm3322_vm2, %v23535_v58 }
0x3e6a   :  { %16259 = vmatmul.mubr.msk.f32.gmra.mrb[14].mxu0 %vm3322_vm2, %v23542_v63 }
0x3e6b   :  { %16288 = vmatprep.mubr.msk.f32.mxu0 %vm3322_vm2, %v23460_v18 }
0x3ebe   :  { %v11856_v9 = vpop.permute.xlu1 %11855 }
0x3ec2   :  { %v11860_v57 = vpop.permute.xlu1 %11859 }
0x3f35   :  { %v16254_v44 = vpop.f32.mrb[10].mxu0 }
0x3f36   :  { %v11814_v26 = vmul.f32 2.0, %v16254_v44  ;;  %v11784_v59 = vpop.f32.mrb[11].mxu0  ;;  %v11880_v44 = vpop.permute.xlu1 %11879 }
0x3f37   :  { %v11813_v46 = vmul.f32 2.0, %v11784_v59 }
0x3f38   :  { %v11820_v27 = vsub.f32 %v11814_v26, %v23464_v32 }
0x3f39   :  { %v11819_v15 = vsub.f32 %v11813_v46, %v23468_v29  ;;  %v16257_v41 = vpop.f32.mrb[12].mxu0 }
0x3f3a   :  { %v11816_v20 = vmul.f32 2.0, %v16257_v41  ;;  %v11794_v23 = vpop.f32.mrb[13].mxu0  ;;  %11905 = vrot.lane.b32.xlu1 %v11820_v27, %s18866_s21  ;;  %v11864_v26 = vpop.permute.xlu1 %11863 }
0x3f3b   :  { %v11815_v42 = vmul.f32 2.0, %v11794_v23 }
0x3f3c   :  { %v11822_v0 = vsub.f32 %v11816_v20, %v23474_v14  ;;  %v11834_v14 = vpop.permute.xlu0 %11833  ;;  %v11921_v20 = vsel %vm3859_vm4, %v23399_v40, %v11832_v22 }
0x3f3d   :  { %v11821_v6 = vsub.f32 %v11815_v42, %v23478_v19  ;;  %v16260_v2 = vpop.f32.mrb[14].mxu0  ;;  %v11922_v23 = vsel %vm3859_vm4, %v23402_v12, %v11834_v14  ;;  %v11927_v42 = vsel %vm3866_vm5, %v11921_v20, %v11856_v9 }
0x3f3e   :  { %v11818_v50 = vmul.f32 2.0, %v16260_v2  ;;  %v11804_v7 = vpop.f32.mrb[15].mxu0  ;;  %11903 = vrot.lane.b32.xlu1 %v11819_v15, %s18866_s21  ;;  %v11884_v59 = vpop.permute.xlu1 %11883 }
0x3f3f   :  { %v11817_v39 = vmul.f32 2.0, %v11804_v7 }
0x3f40   :  { %v11824_v32 = vsub.f32 %v11818_v50, %v23482_v1  ;;  %v11838_v19 = vpop.permute.xlu0 %11837 }
0x3f41   :  { %v11823_v29 = vsub.f32 %v11817_v39, %v23486_v17  ;;  %v11924_v22 = vsel %vm3859_vm4, %v23410_v11, %v11838_v19 }
0x3f42   :  { %11913 = vrot.lane.b32.xlu0 %v11824_v32, %s18866_s21  ;;  %11909 = vrot.lane.b32.xlu1 %v11822_v0, %s18866_s21  ;;  %v11888_v27 = vpop.permute.xlu1 %11887 }
0x3f44   :  { %v11836_v21 = vpop.permute.xlu0 %11835 }
0x3f45   :  { %v11923_v14 = vsel %vm3859_vm4, %v23407_v49, %v11836_v21 }
0x3f46   :  { %11907 = vrot.lane.b32.xlu1 %v11821_v6, %s18866_s21  ;;  %v11933_v6 = vsel %vm3873_vm6, %v11927_v42, %v11880_v44  ;;  %v11929_v9 = vsel %vm3866_vm5, %v11923_v14, %v11860_v57 }
0x3f48   :  { %v11842_v28 = vpop.permute.xlu0 %11841 }
0x3f49   :  { %v11926_v19 = vsel %vm3859_vm4, %v23418_v47, %v11842_v28 }
0x3f4a   :  { %11911 = vrot.lane.b32.xlu1 %v11823_v29, %s18866_s21 }
0x3f4c   :  { %v11840_v36 = vpop.permute.xlu0 %11839 }
0x3f4d   :  { %v11925_v42 = vsel %vm3859_vm4, %v23415_v52, %v11840_v36 }
0x3f4e   :  { %v11931_v57 = vsel %vm3866_vm5, %v11925_v42, %v11864_v26 }
0x3f50   :  { %v11858_v1 = vpop.permute.xlu0 %11857 }
0x3f51   :  { %v11928_v0 = vsel %vm3866_vm5, %v11922_v23, %v11858_v1 }
0x3f54   :  { %v11862_v17 = vpop.permute.xlu0 %11861 }
0x3f55   :  { %v11930_v1 = vsel %vm3866_vm5, %v11924_v22, %v11862_v17 }
0x3f58   :  { %v11882_v46 = vpop.permute.xlu0 %11881 }
0x3f59   :  { %v11934_v50 = vsel %vm3873_vm6, %v11928_v0, %v11882_v46  ;;  %v11935_v46 = vsel %vm3873_vm6, %v11929_v9, %v11884_v59  ;;  %v11937_v0 = vsel %vm3873_vm6, %v11931_v57, %v11888_v27 }
0x3f5c   :  { %v11866_v15 = vpop.permute.xlu0 %11865 }
0x3f5d   :  { %v11932_v59 = vsel %vm3866_vm5, %v11926_v19, %v11866_v15 }
0x3f60   :  { %v11886_v7 = vpop.permute.xlu0 %11885 }
0x3f64   :  { %v11890_v44 = vpop.permute.xlu0 %11889 }
0x3fac   :  { %v11906_v41 = vpop.permute.xlu1 %11905 }
0x3fad   :  { %v11940_v32 = vsel %vm3880_vm7, %v11934_v50, %v11906_v41  ;;  %v11936_v41 = vsel %vm3873_vm6, %v11930_v1, %v11886_v7  ;;  %v18857_v1 = vld [vmem:[%s24021_s13] ss:$0 sm:$0xff]  ;;  %s18871_s13 = smov 20  }
0x3fb0   :  { %v11904_v2 = vpop.permute.xlu1 %11903 }
0x3fb1   :  { %v11939_v39 = vsel %vm3880_vm7, %v11933_v6, %v11904_v2  ;;  %v11938_v2 = vsel %vm3873_vm6, %v11932_v59, %v11890_v44 }
0x3fb2   :  { %16267 = vmatprep.mubr.msk.f32.mxu1 %vm3893_vm8, %v11939_v39 }
0x3fb3   :  { %16268 = vmatmul.mubr.msk.f32.vlgmr.msra.gmra.mrb[252].mxu1 %vm3893_vm8, %v11940_v32 }
0x3fb4   :  { %v11910_v29 = vpop.permute.xlu1 %11909  ;;  %v11914_v17 = vpop.permute.xlu0 %11913 }
0x3fb5   :  { %v11942_v21 = vsel %vm3880_vm7, %v11936_v41, %v11910_v29  ;;  %v11944_v50 = vsel %vm3880_vm7, %v11938_v2, %v11914_v17 }
0x3fb8   :  { %v11908_v20 = vpop.permute.xlu1 %11907 }
0x3fb9   :  { %v11941_v23 = vsel %vm3880_vm7, %v11935_v46, %v11908_v20 }
0x3fba   :  { %16270 = vmatprep.mubr.msk.f32.mxu1 %vm3893_vm8, %v11941_v23 }
0x3fbb   :  { %16271 = vmatmul.mubr.msk.f32.gmra.mrb[254].mxu1 %vm3893_vm8, %v11942_v21 }
0x3fbc   :  { %v11912_v6 = vpop.permute.xlu1 %11911 }
0x3fbd   :  { %v11943_v36 = vsel %vm3880_vm7, %v11937_v0, %v11912_v6 }
0x3fbe   :  { %16273 = vmatprep.mubr.msk.f32.mxu1 %vm3893_vm8, %v11943_v36 }
0x3fbf   :  { %16274 = vmatmul.mubr.msk.f32.gmra.mrb[0].mxu1 %vm3893_vm8, %v11944_v50 }
0x3fc0   :  { %16309 = vmatprep.mubr.msk.f32.mxu1 %vm3322_vm2, %v23460_v18 }
0x4086   :  { %v16269_v28 = vpop.f32.mrb[252].mxu1 }
0x4087   :  { %v23629_v26 = vadd.f32 %v23196_v31, %v16269_v28  ;;  %v12029_v15 = vpop.f32.mrb[253].mxu1 }
0x4088   :  { %v23632_v27 = vadd.f32 %v23196_v31, %v12029_v15 }
0x4089   :  { %18735 = vtanh.f32 %v23629_v26 }
0x408a   :  { %18737 = vtanh.f32 %v23632_v27 }
0x408e   :  { %v16272_v7 = vpop.f32.mrb[254].mxu1 }
0x408f   :  { %v23637_v39 = vadd.f32 %v23196_v31, %v16272_v7  ;;  %v12039_v32 = vpop.f32.mrb[255].mxu1 }
0x4090   :  { %v23640_v29 = vadd.f32 %v23196_v31, %v12039_v32 }
0x4091   :  { %18739 = vtanh.f32 %v23637_v39 }
0x4092   :  { %18741 = vtanh.f32 %v23640_v29  ;;  %v16275_v18 = vpop.f32.mrb[0].mxu1 }
0x4093   :  { %v18736_v14 = vpop.eup %18735  ;;  %v23645_v22 = vadd.f32 %v23196_v31, %v16275_v18  ;;  %v12049_v9 = vpop.f32.mrb[1].mxu1 }
0x4094   :  { %v18738_v44 = vpop.eup %18737  ;;  %v23650_v46 = vadd.f32 %v18857_v1, %v12049_v9  ;;  %12108 = vrot.lane.b32.xlu0 %v18736_v14, %s18862_s6 }
0x4095   :  { %18743 = vtanh.f32 %v23645_v22  ;;  %12106 = vrot.lane.b32.xlu1 %v18738_v44, %s18862_s6 }
0x4096   :  { %18745 = vtanh.f32 %v23650_v46 }
0x409b   :  { %v18740_v20 = vpop.eup %18739 }
0x409c   :  { %v18742_v41 = vpop.eup %18741  ;;  %12112 = vrot.lane.b32.xlu0 %v18740_v20, %s18862_s6 }
0x409d   :  { %12110 = vrot.lane.b32.xlu1 %v18742_v41, %s18862_s6 }
0x409f   :  { %v18744_v31 = vpop.eup %18743 }
0x40a0   :  { %v18746_v23 = vpop.eup %18745  ;;  %12116 = vrot.lane.b32.xlu0 %v18744_v31, %s18862_s6 }
0x40a1   :  { %12114 = vrot.lane.b32.xlu1 %v18746_v23, %s18862_s6  ;;  %s18872_s6 = smov 24  }
0x4106   :  { %v23660_v42 = vpop.permute.xlu0 %12108 }
0x4107   :  { %v23662_v21 = vpop.permute.xlu1 %12106 }
0x4108   :  { %v17795_v19 = vpack.c.bf16 %v23660_v42, %v23662_v21 }
0x410a   :  { %17796 = vmatprep.subr.bf16.mxu0 %v17795_v19 }
0x410b   :  { %17798 = vmatpush3.bf16.msra.mxu0 %v17795_v19 }
0x410e   :  { %v23666_v57 = vpop.permute.xlu0 %12112 }
0x410f   :  { %v23668_v17 = vpop.permute.xlu1 %12110 }
0x4110   :  { %v17799_v59 = vpack.c.bf16 %v23666_v57, %v23668_v17 }
0x4112   :  { %v23672_v0 = vpop.permute.xlu0 %12116  ;;  %17800 = vmatprep.subr.bf16.mxu0 %v17799_v59 }
0x4113   :  { %17802 = vmatpush3.bf16.msra.mxu0 %v17799_v59  ;;  %v23674_v6 = vpop.permute.xlu1 %12114 }
0x4114   :  { %v17803_v2 = vpack.c.bf16 %v23672_v0, %v23674_v6 }
0x4116   :  { %17804 = vmatprep.subr.bf16.mxu0 %v17803_v2 }
0x4117   :  { %17806 = vmatpush3.bf16.msra.mxu0 %v17803_v2 }
0x411a   :  { %16289 = vmatmul.mubr.msk.f32.vlgmr.msra.gmra.mrb[16].mxu0 %vm3322_vm2, %v23425_v61 }
0x411b   :  { %16291 = vmatprep.mubr.msk.f32.mxu0 %vm3322_vm2, %v23432_v56 }
0x411e   :  { %16292 = vmatmul.mubr.msk.f32.gmra.mrb[18].mxu0 %vm3322_vm2, %v23439_v54 }
0x411f   :  { %16294 = vmatprep.mubr.msk.f32.mxu0 %vm3322_vm2, %v23446_v25 }
0x4122   :  { %16295 = vmatmul.mubr.msk.f32.gmra.mrb[20].mxu0 %vm3322_vm2, %v23453_v60 }
0x4123   :  { %16330 = vmatprep.mubr.msk.f32.mxu0 %vm3322_vm2, %v23507_v4 }
0x41ed   :  { %v23690_v36 = vpop.f32.mrb[16].mxu0 }
0x41ee   :  { %v23692_v50 = vpop.f32.mrb[17].mxu0 }
0x41ef   :  { %v18093_v28 = vpack.i.bf16 %v23690_v36, %v23692_v50  ;;  %v17807_v15 = vpack.c.bf16 %v23690_v36, %v23692_v50 }
0x41f1   :  { %18094 = vrot.lane.b32.xlu1 %v18093_v28, %s18867_s23  ;;  %v23699_v7 = vpop.f32.mrb[18].mxu0  ;;  %17808 = vmatprep.subr.bf16.mxu1 %v17807_v15 }
0x41f2   :  { %17820 = vmatprep.subr.bf16.mxu0 %v17807_v15  ;;  %v23701_v32 = vpop.f32.mrb[19].mxu0  ;;  %17810 = vmatpush3.bf16.msra.mxu1 %v17807_v15 }
0x41f3   :  { %v18108_v18 = vpack.i.bf16 %v23699_v7, %v23701_v32  ;;  %v17811_v14 = vpack.c.bf16 %v23699_v7, %v23701_v32  ;;  %17822 = vmatpush3.bf16.msra.mxu0 %v17807_v15 }
0x41f5   :  { %v23707_v9 = vpop.f32.mrb[20].mxu0  ;;  %17812 = vmatprep.subr.bf16.mxu1 %v17811_v14  ;;  %17824 = vmatprep.subr.bf16.mxu0 %v17811_v14 }
0x41f6   :  { %v23709_v44 = vpop.f32.mrb[21].mxu0  ;;  %17814 = vmatpush3.bf16.msra.mxu1 %v17811_v14 }
0x41f7   :  { %v17815_v1 = vpack.c.bf16 %v23707_v9, %v23709_v44  ;;  %17826 = vmatpush3.bf16.msra.mxu0 %v17811_v14 }
0x41f9   :  { %17816 = vmatprep.subr.bf16.mxu1 %v17815_v1  ;;  %17828 = vmatprep.subr.bf16.mxu0 %v17815_v1 }
0x41fa   :  { %17818 = vmatpush3.bf16.msra.mxu1 %v17815_v1 }
0x41fb   :  { %17830 = vmatpush3.bf16.msra.mxu0 %v17815_v1 }
0x41fc   :  { %17843 = vmatprep.subr.bf16.mxu0 %v24260_v55 }
0x41fd   :  { %16310 = vmatmul.mubr.msk.f32.vlgmr.msra.gmra.mrb[2].mxu1 %vm3322_vm2, %v23425_v61 }
0x41fe   :  { %16331 = vmatmul.mubr.msk.f32.vlgmr.msra.gmra.mrb[22].mxu0 %vm3322_vm2, %v23514_v37  ;;  %16312 = vmatprep.mubr.msk.f32.mxu1 %vm3322_vm2, %v23432_v56 }
0x41ff   :  { %16333 = vmatprep.mubr.msk.f32.mxu0 %vm3322_vm2, %v23521_v13  ;;  %17845 = vmatpush1.bf16.msra.mxu0 %v24292_v24 }
0x4200   :  { %17846 = vmatprep.subr.bf16.mxu0 %v24260_v55 }
0x4201   :  { %16313 = vmatmul.mubr.msk.f32.gmra.mrb[4].mxu1 %vm3322_vm2, %v23439_v54 }
0x4202   :  { %16334 = vmatmul.mubr.msk.f32.gmra.mrb[24].mxu0 %vm3322_vm2, %v23528_v34  ;;  %16315 = vmatprep.mubr.msk.f32.mxu1 %vm3322_vm2, %v23446_v25 }
0x4203   :  { %16336 = vmatprep.mubr.msk.f32.mxu0 %vm3322_vm2, %v23535_v58  ;;  %17848 = vmatpush1.bf16.msra.mxu0 %v24303_v30 }
0x4204   :  { %17849 = vmatprep.subr.bf16.mxu0 %v24260_v55 }
0x4205   :  { %16316 = vmatmul.mubr.msk.f32.gmra.mrb[6].mxu1 %vm3322_vm2, %v23453_v60 }
0x4206   :  { %16337 = vmatmul.mubr.msk.f32.gmra.mrb[26].mxu0 %vm3322_vm2, %v23542_v63  ;;  %16351 = vmatprep.mubr.msk.f32.mxu1 %vm3322_vm2, %v23507_v4 }
0x4207   :  { %17851 = vmatpush1.bf16.msra.mxu0 %v24304_v43 }
0x4208   :  { %17852 = vmatprep.subr.bf16.mxu0 %v24260_v55 }
0x420b   :  { %17854 = vmatpush1.bf16.msra.mxu0 %v24305_v38 }
0x420c   :  { %17855 = vmatprep.subr.bf16.mxu0 %v24260_v55 }
0x420f   :  { %17857 = vmatpush1.bf16.msra.mxu0 %v24306_v5 }
0x4210   :  { %17858 = vmatprep.subr.bf16.mxu0 %v24260_v55 }
0x4213   :  { %17860 = vmatpush1.bf16.msra.mxu0 %v24307_v33 }
0x4214   :  { %17861 = vmatprep.subr.bf16.mxu0 %v24260_v55 }
0x4217   :  { %17863 = vmatpush1.bf16.msra.mxu0 %v24308_v53 }
0x4218   :  { %17864 = vmatprep.subr.bf16.mxu0 %v24260_v55 }
0x421b   :  { %17866 = vmatpush1.bf16.msra.mxu0 %v24309_v35 }
0x421c   :  { %17867 = vmatprep.subr.bf16.mxu0 %v24260_v55 }
0x421f   :  { %17869 = vmatpush1.bf16.msra.mxu0 %v24310_v8 }
0x4220   :  { %17870 = vmatprep.subr.bf16.mxu0 %v24260_v55 }
0x4223   :  { %17872 = vmatpush1.bf16.msra.mxu0 %v24311_v16 }
0x42d0   :  { %v16311_v24 = vpop.f32.mrb[2].mxu1 }
0x42d1   :  { %v12315_v30 = vmul.f32 2.0, %v16311_v24  ;;  %v16332_v43 = vpop.f32.mrb[22].mxu0  ;;  %v12285_v38 = vpop.f32.mrb[3].mxu1 }
0x42d2   :  { %v12314_v5 = vmul.f32 2.0, %v12285_v38  ;;  %v12392_v33 = vpop.f32.mrb[23].mxu0  ;;  %v24318_v38 = vld [vmem:[#allocation36_spill] sm:$0xff] }
0x42d3   :  { %v12321_v53 = vsub.f32 %v12315_v30, %v23660_v42  ;;  %v18103_v61 = vpack.i.bf16 %v16332_v43, %v12392_v33  ;;  %v17831_v56 = vpack.c.bf16 %v16332_v43, %v12392_v33  ;;  %v24317_v43 = vld [vmem:[#allocation25_spill] sm:$0xff]  ;;  %v24321_v33 = vld [vmem:[#allocation20_spill] sm:$0xff] }
0x42d4   :  { %v12320_v35 = vsub.f32 %v12314_v5, %v23662_v21  ;;  %v16314_v54 = vpop.f32.mrb[4].mxu1  ;;  %v24320_v5 = vld [vmem:[#allocation37_spill] sm:$0xff] }
0x42d5   :  { %18104 = vrot.lane.b32.xlu1 %v18103_v61, %s18868_s24  ;;  %v12317_v8 = vmul.f32 2.0, %v16314_v54  ;;  %v16335_v25 = vpop.f32.mrb[24].mxu0  ;;  %17832 = vmatprep.subr.bf16.mxu1 %v17831_v56  ;;  %v12295_v55 = vpop.f32.mrb[5].mxu1  ;;  %v24323_v61 = vld [vmem:[#allocation26_spill] sm:$0xff]  ;;  %v24328_v54 = vld [vmem:[#allocation39_spill] sm:$0xff] }
0x42d6   :  { %v18098_v16 = vpack.i.bf16 %v12321_v53, %v12320_v35  ;;  %v12316_v60 = vmul.f32 2.0, %v12295_v55  ;;  %v12402_v4 = vpop.f32.mrb[25].mxu0  ;;  %17834 = vmatpush3.bf16.msra.mxu1 %v17831_v56  ;;  %v24322_v53 = vld [vmem:[#allocation21_spill] sm:$0xff]  ;;  %v24324_v56 = vld [vmem:[#allocation27_spill] sm:$0xff]  ;;  %v24325_v35 = vld [vmem:[#allocation32_spill] sm:$0xff] }
0x42d7   :  { %v12323_v20 = vsub.f32 %v12317_v8, %v23666_v57  ;;  %v18113_v41 = vpack.i.bf16 %v16335_v25, %v12402_v4  ;;  %v17835_v31 = vpack.c.bf16 %v16335_v25, %v12402_v4  ;;  %v24329_v8 = vld [vmem:[#allocation22_spill] sm:$0xff]  ;;  %v24330_v25 = vld [vmem:[#allocation23_spill] sm:$0xff]  ;;  %v24331_v55 = vld [vmem:[#allocation28_spill] sm:$0xff] }
0x42d8   :  { %v12322_v23 = vsub.f32 %v12316_v60, %v23668_v17  ;;  %18099 = vrot.lane.b32.xlu0 %v18098_v16, %s18869_s25  ;;  %v16317_v19 = vpop.f32.mrb[6].mxu1  ;;  %v24332_v16 = vld [vmem:[#allocation29_spill] sm:$0xff]  ;;  %v24333_v60 = vld [vmem:[#allocation34_spill] sm:$0xff]  ;;  %v24334_v4 = vld [vmem:[#allocation35_spill] sm:$0xff] }
0x42d9   :  { %v16338_v59 = vpop.f32.mrb[26].mxu0  ;;  %17836 = vmatprep.subr.bf16.mxu1 %v17835_v31  ;;  %v12305_v2 = vpop.f32.mrb[7].mxu1  ;;  %v12319_v24 = vmul.f32 2.0, %v16317_v19 }
0x42da   :  { %v18118_v28 = vpack.i.bf16 %v12323_v20, %v12322_v23  ;;  %v12412_v15 = vpop.f32.mrb[27].mxu0  ;;  %17838 = vmatpush3.bf16.msra.mxu1 %v17835_v31  ;;  %v12318_v1 = vmul.f32 2.0, %v12305_v2 }
0x42db   :  { %v17839_v14 = vpack.c.bf16 %v16338_v59, %v12412_v15 }
0x42dc   :  { %18109 = vrot.lane.b32.xlu0 %v18108_v18, %s18867_s23  ;;  %18119 = vrot.lane.b32.xlu1 %v18118_v28, %s18869_s25  ;;  %v12324_v30 = vsub.f32 %v12318_v1, %v23674_v6  ;;  %v12325_v18 = vsub.f32 %v12319_v24, %v23672_v0 }
0x42dd   :  { %17840 = vmatprep.subr.bf16.mxu1 %v17839_v14 }
0x42de   :  { %17842 = vmatpush3.bf16.msra.mxu1 %v17839_v14 }
0x42e0   :  { %18114 = vrot.lane.b32.xlu0 %v18113_v41, %s18868_s24  ;;  %12542 = vrot.lane.b32.xlu1 %v23709_v44, %s18867_s23  ;;  %v18095_v41 = vpop.permute.xlu1 %18094 }
0x42e1   :  { %16352 = vmatmul.mubr.msk.f32.vlgmr.msra.gmra.mrb[8].mxu1 %vm3322_vm2, %v23514_v37  ;;  %v24313_v37 = vld [vmem:[#allocation18_spill] sm:$0xff]  ;;  %v18096_v31 = vunpack.i.l.bf16 %v18095_v41  ;;  %v18097_v28 = vunpack.i.h.bf16 %v18095_v41 }
0x42e2   :  { %16354 = vmatprep.mubr.msk.f32.mxu1 %vm3322_vm2, %v23521_v13  ;;  %v24314_v13 = vld [vmem:[#allocation24_spill] sm:$0xff] }
0x42e4   :  { %12590 = vrot.lane.b32.xlu1 %v12412_v15, %s18868_s24  ;;  %12566 = vrot.lane.b32.xlu0 %v12324_v30, %s18869_s25 }
0x42e5   :  { %16355 = vmatmul.mubr.msk.f32.gmra.mrb[10].mxu1 %vm3322_vm2, %v23528_v34  ;;  %v24315_v34 = vld [vmem:[#allocation19_spill] sm:$0xff] }
0x42e6   :  { %16357 = vmatprep.mubr.msk.f32.mxu1 %vm3322_vm2, %v23535_v58  ;;  %v24316_v58 = vld [vmem:[#allocation30_spill] sm:$0xff] }
0x42e8   :  { %12568 = vrot.lane.b32.xlu1 %v12325_v18, %s18869_s25  ;;  %12544 = vrot.lane.b32.xlu0 %v23707_v9, %s18867_s23 }
0x42e9   :  { %16358 = vmatmul.mubr.msk.f32.gmra.mrb[12].mxu1 %vm3322_vm2, %v23542_v63  ;;  %v24319_v63 = vld [vmem:[#allocation31_spill] sm:$0xff] }
0x42ec   :  { %12767 = vrot.lane.b32.xlu1 %v24313_v37, %s18863_s1  ;;  %12592 = vrot.lane.b32.xlu0 %v16338_v59, %s18868_s24 }
0x42f0   :  { %12791 = vrot.lane.b32.xlu1 %v24314_v13, %s18864_s29  ;;  %12769 = vrot.lane.b32.xlu0 %v24315_v34, %s18863_s1 }
0x42f4   :  { %12815 = vrot.lane.b32.xlu1 %v24316_v58, %s18865_s0  ;;  %12793 = vrot.lane.b32.xlu0 %v24317_v43, %s18864_s29  ;;  %v12601_v58 = vsel %vm3075_vm0, %v23660_v42, %v18097_v28 }
0x42f8   :  { %12839 = vrot.lane.b32.xlu1 %v24318_v38, %s18866_s21  ;;  %12817 = vrot.lane.b32.xlu0 %v24319_v63, %s18865_s0 }
0x42fc   :  { %12841 = vrot.lane.b32.xlu1 %v24320_v5, %s18866_s21  ;;  %12771 = vrot.lane.b32.xlu0 %v24321_v33, %s18863_s1 }
0x4300   :  { %12773 = vrot.lane.b32.xlu1 %v24322_v53, %s18863_s1  ;;  %12863 = vrot.lane.b32.xlu0 %v23008_v45, %s18871_s13  ;;  %v24326_v45 = vld [vmem:[#allocation33_spill] sm:$0xff] }
0x4304   :  { %12865 = vrot.lane.b32.xlu1 %v23011_v10, %s18871_s13  ;;  %12795 = vrot.lane.b32.xlu0 %v24323_v61, %s18864_s29  ;;  %v24327_v10 = vld [vmem:[#allocation38_spill] sm:$0xff] }
0x4308   :  { %12797 = vrot.lane.b32.xlu1 %v24324_v56, %s18864_s29  ;;  %12887 = vrot.lane.b32.xlu0 %v23399_v40, %s18872_s6 }
0x430c   :  { %12889 = vrot.lane.b32.xlu1 %v23402_v12, %s18872_s6  ;;  %12819 = vrot.lane.b32.xlu0 %v24325_v35, %s18865_s0 }
0x4310   :  { %12821 = vrot.lane.b32.xlu1 %v24326_v45, %s18865_s0  ;;  %12843 = vrot.lane.b32.xlu0 %v24327_v10, %s18866_s21 }
0x4314   :  { %12845 = vrot.lane.b32.xlu1 %v24328_v54, %s18866_s21  ;;  %12775 = vrot.lane.b32.xlu0 %v24329_v8, %s18863_s1 }
0x4318   :  { %12777 = vrot.lane.b32.xlu1 %v24330_v25, %s18863_s1  ;;  %12867 = vrot.lane.b32.xlu0 %v23016_v51, %s18871_s13  ;;  %v24335_v51 = vld [vmem:[#allocation40_spill] sm:$0xff] }
0x431c   :  { %12869 = vrot.lane.b32.xlu1 %v23019_v3, %s18871_s13  ;;  %12799 = vrot.lane.b32.xlu0 %v24331_v55, %s18864_s29  ;;  %v24336_v3 = vld [vmem:[#allocation41_spill] sm:$0xff] }
0x4320   :  { %12801 = vrot.lane.b32.xlu1 %v24332_v16, %s18864_s29  ;;  %12891 = vrot.lane.b32.xlu0 %v23407_v49, %s18872_s6 }
0x4324   :  { %12893 = vrot.lane.b32.xlu1 %v23410_v11, %s18872_s6  ;;  %12823 = vrot.lane.b32.xlu0 %v24333_v60, %s18865_s0 }
0x4328   :  { %12825 = vrot.lane.b32.xlu1 %v24334_v4, %s18865_s0  ;;  %12847 = vrot.lane.b32.xlu0 %v24335_v51, %s18866_s21 }
0x432c   :  { %12871 = vrot.lane.b32.xlu1 %v23024_v48, %s18871_s13  ;;  %12849 = vrot.lane.b32.xlu0 %v24336_v3, %s18866_s21  ;;  %v12600_v48 = vsel %vm3075_vm0, %v23662_v21, %v18096_v31 }
0x4330   :  { %12895 = vrot.lane.b32.xlu1 %v23415_v52, %s18872_s6  ;;  %12873 = vrot.lane.b32.xlu0 %v23027_v62, %s18871_s13 }
0x4347   :  { %v18105_v59 = vpop.permute.xlu1 %18104 }
0x4348   :  { %v18106_v62 = vunpack.i.l.bf16 %v18105_v59 }
0x434a   :  { %v18100_v20 = vpop.permute.xlu0 %18099 }
0x434b   :  { %v18101_v23 = vunpack.i.l.bf16 %v18100_v20  ;;  %v18102_v1 = vunpack.i.h.bf16 %v18100_v20 }
0x434d   :  { %v12606_v30 = vsel %vm3174_vm1, %v12600_v48, %v18101_v23  ;;  %v12607_v5 = vsel %vm3174_vm1, %v12601_v58, %v18102_v1  ;;  %v12974_v48 = vld [vmem:[%s24024_s17 + $0x8] sm:$0xff] }
0x434e   :  { %v18110_v19 = vpop.permute.xlu0 %18109  ;;  %v18120_v37 = vpop.permute.xlu1 %18119  ;;  %v12612_v21 = vsel %vm4565_vm9, %v12606_v30, %v18106_v62  ;;  %v13712_v30 = vmul.f32 -1.442695, %v23640_v29 }
0x434f   :  { %v18111_v33 = vunpack.i.l.bf16 %v18110_v19  ;;  %v18121_v42 = vunpack.i.l.bf16 %v18120_v37  ;;  %v18112_v54 = vunpack.i.h.bf16 %v18110_v19  ;;  %v18122_v4 = vunpack.i.h.bf16 %v18120_v37 }
0x4350   :  { %v13714_v37 = vmul.f32 -1.442695, %v23650_v46 }
0x4351   :  { %v12602_v8 = vsel %vm3075_vm0, %v23668_v17, %v18111_v33  ;;  %v12603_v3 = vsel %vm3075_vm0, %v23666_v57, %v18112_v54 }
0x4352   :  { %v18115_v43 = vpop.permute.xlu0 %18114  ;;  %v12543_v55 = vpop.permute.xlu1 %12542  ;;  %v12608_v51 = vsel %vm3174_vm1, %v12602_v8, %v18121_v42 }
0x4353   :  { %v18116_v25 = vunpack.i.l.bf16 %v18115_v43  ;;  %v18117_v20 = vunpack.i.h.bf16 %v18115_v43  ;;  %v13715_v43 = vmul.f32 -1.442695, %v23645_v22 }
0x4355   :  { %v12614_v17 = vsel %vm4565_vm9, %v12608_v51, %v18116_v25 }
0x4356   :  { %v12567_v60 = vpop.permute.xlu0 %12566  ;;  %v12591_v41 = vpop.permute.xlu1 %12590 }
0x435a   :  { %v12545_v31 = vpop.permute.xlu0 %12544 }
0x435e   :  { %v12593_v28 = vpop.permute.xlu0 %12592 }
0x43b4   :  { %v16353_v2 = vpop.f32.mrb[8].mxu1 }
0x43b5   :  { %v12517_v15 = vmul.f32 2.0, %v16353_v2  ;;  %v12487_v14 = vpop.f32.mrb[9].mxu1  ;;  %v12605_v2 = vsel %vm3075_vm0, %v23672_v0, %v12545_v31  ;;  %v13710_v0 = vmul.f32 -1.442695, %v23632_v27 }
0x43b6   :  { %v12516_v24 = vmul.f32 2.0, %v12487_v14  ;;  %v12973_v14 = vld [vmem:[%s24024_s17] sm:$0xff] }
0x43b7   :  { %v12523_v18 = vsub.f32 %v12517_v15, %v23690_v36  ;;  %v18107_v36 = vunpack.i.h.bf16 %v18105_v59  ;;  %v12569_v59 = vpop.permute.xlu1 %12568  ;;  %v17873_v1 = vpack.c.bf16 %v12974_v48, %v12973_v14  ;;  %18747 = vpow2.f32 %v13710_v0 }
0x43b8   :  { %v12522_v13 = vsub.f32 %v12516_v24, %v23692_v50  ;;  %v16356_v34 = vpop.f32.mrb[10].mxu1  ;;  %v12611_v15 = vsel %vm3174_vm1, %v12605_v2, %v12569_v59  ;;  %v13711_v24 = vmul.f32 -1.442695, %v23629_v26  ;;  %v18858_v26 = vld [vmem:[%s24023_s15] ss:$0 sm:$0xff] }
0x43b9   :  { %v12519_v38 = vmul.f32 2.0, %v16356_v34  ;;  %v12497_v63 = vpop.f32.mrb[11].mxu1  ;;  %v12613_v10 = vsel %vm4565_vm9, %v12607_v5, %v18107_v36  ;;  %17874 = vmatprep.subr.bf16.mxu1 %v17873_v1  ;;  %v12976_v36 = vld [vmem:[%s24024_s17 + $0x18] sm:$0xff] }
0x43ba   :  { %v12518_v53 = vmul.f32 2.0, %v12497_v63  ;;  %13740 = vmatprep.mubr.msk.f32.mxu0 %vm3075_vm0, %v12522_v13  ;;  %17876 = vmatpush3.bf16.msra.mxu1 %v17873_v1  ;;  %18749 = vpow2.f32 %v13711_v24 }
0x43bb   :  { %v12525_v61 = vsub.f32 %v12519_v38, %v23699_v7  ;;  %12701 = vmatmul.mubr.f32.vlgmr.msra.gmra.mrb[28].mxu0 %v12612_v21  ;;  %18751 = vpow2.f32 %v13712_v30 }
0x43bc   :  { %v12524_v50 = vsub.f32 %v12518_v53, %v23701_v32  ;;  %v16359_v56 = vpop.f32.mrb[12].mxu1  ;;  %13741 = vmatprep.mubr.msk.f32.mxu0 %vm3075_vm0, %v12523_v18  ;;  %v13713_v18 = vmul.f32 -1.442695, %v23637_v39  ;;  %v12975_v53 = vld [vmem:[%s24024_s17 + $0x10] sm:$0xff]  ;;  %s18873_s17 = smov 28  }
0x43bd   :  { %v12521_v35 = vmul.f32 2.0, %v16359_v56  ;;  %v12507_v45 = vpop.f32.mrb[13].mxu1  ;;  %v17877_v56 = vpack.c.bf16 %v12976_v36, %v12975_v53 }
0x43be   :  { %v12520_v16 = vmul.f32 2.0, %v12507_v45  ;;  %18753 = vpow2.f32 %v13713_v18 }
0x43bf   :  { %v12527_v7 = vsub.f32 %v12521_v35, %v23707_v9  ;;  %12706 = vmatmul.mubr.f32.gmra.mrb[30].mxu0 %v12613_v10  ;;  %v12609_v9 = vsel %vm3174_vm1, %v12603_v3, %v18122_v4  ;;  %18755 = vpow2.f32 %v13714_v37  ;;  %17878 = vmatprep.subr.bf16.mxu1 %v17877_v56 }
0x43c0   :  { %v12526_v32 = vsub.f32 %v12520_v16, %v23709_v44  ;;  %13742 = vmatprep.mubr.msk.f32.mxu0 %vm3075_vm0, %v12524_v50  ;;  %v12604_v44 = vsel %vm3075_vm0, %v23674_v6, %v12543_v55  ;;  %v12615_v23 = vsel %vm4565_vm9, %v12609_v9, %v18117_v20  ;;  %v12617_v6 = vsel %vm4565_vm9, %v12611_v15, %v12593_v28 }
0x43c1   :  { %v12610_v19 = vsel %vm3174_vm1, %v12604_v44, %v12567_v60  ;;  %v18748_v62 = vpop.eup %18747  ;;  %17880 = vmatpush3.bf16.msra.mxu1 %v17877_v56 }
0x43c2   :  { %v12616_v57 = vsel %vm4565_vm9, %v12610_v19, %v12591_v41  ;;  %v12076_v13 = vadd.f32 1.0, %v18748_v62 }
0x43c3   :  { %12711 = vmatmul.mubr.f32.gmra.mrb[32].mxu0 %v12614_v17 }
0x43c4   :  { %13743 = vmatprep.mubr.msk.f32.mxu0 %vm3075_vm0, %v12525_v61  ;;  %v18750_v34 = vpop.eup %18749  ;;  %18757 = vrcp.f32 %v12076_v13 }
0x43c5   :  { %v12077_v29 = vadd.f32 1.0, %v18750_v34  ;;  %v18752_v39 = vpop.eup %18751 }
0x43c6   :  { %v12078_v21 = vadd.f32 1.0, %v18752_v39 }
0x43c7   :  { %12716 = vmatmul.mubr.f32.gmra.mrb[34].mxu0 %v12615_v23 }
0x43c8   :  { %13744 = vmatprep.mubr.msk.f32.mxu0 %vm3075_vm0, %v12526_v32  ;;  %v18754_v33 = vpop.eup %18753 }
0x43c9   :  { %v12079_v42 = vadd.f32 1.0, %v18754_v33  ;;  %v18756_v35 = vpop.eup %18755 }
0x43ca   :  { %v12080_v55 = vadd.f32 1.0, %v18756_v35 }
0x43cb   :  { %12721 = vmatmul.mubr.f32.gmra.mrb[36].mxu0 %v12616_v57 }
0x43cc   :  { %13745 = vmatprep.mubr.msk.f32.mxu0 %vm3075_vm0, %v12527_v7 }
0x43ce   :  { %v18758_v45 = vpop.eup %18757 }
0x43cf   :  { %12726 = vmatmul.mubr.f32.gmra.mrb[38].mxu0 %v12617_v6 }
0x448e   :  { %v12702_v58 = vpop.f32.mrb[28].mxu0 }
0x448f   :  { %v12703_v27 = vadd.f32 %v18858_v26, %v12702_v58  ;;  %v12704_v38 = vpop.f32.mrb[29].mxu0 }
0x4491   :  { %18759 = vtanh.f32 %v12703_v27 }
0x4492   :  { %v12707_v63 = vpop.f32.mrb[30].mxu0  ;;  %18761 = vpow2.f32 %v13715_v43 }
0x4493   :  { %v12708_v5 = vadd.f32 %v18858_v26, %v12707_v63  ;;  %v12709_v46 = vpop.f32.mrb[31].mxu0  ;;  %18763 = vrcp.f32 %v12077_v29 }
0x4495   :  { %18765 = vtanh.f32 %v12708_v5 }
0x4496   :  { %v12712_v22 = vpop.f32.mrb[32].mxu0  ;;  %18767 = vrcp.f32 %v12078_v21 }
0x4497   :  { %v12713_v61 = vadd.f32 %v18858_v26, %v12712_v22  ;;  %v12714_v50 = vpop.f32.mrb[33].mxu0 }
0x4499   :  { %18769 = vtanh.f32 %v12713_v61 }
0x449a   :  { %v12717_v10 = vpop.f32.mrb[34].mxu0  ;;  %18771 = vrcp.f32 %v12079_v42 }
0x449b   :  { %v18760_v54 = vpop.eup %18759  ;;  %v12718_v8 = vadd.f32 %v18858_v26, %v12717_v10  ;;  %v12719_v25 = vpop.f32.mrb[35].mxu0 }
0x449c   :  { %v12737_v16 = vmul.f32 %v18760_v54, %v18758_v45  ;;  %v18762_v60 = vpop.eup %18761 }
0x449d   :  { %18773 = vtanh.f32 %v12718_v8  ;;  %v18764_v7 = vpop.eup %18763  ;;  %v12081_v17 = vadd.f32 1.0, %v18762_v60 }
0x449e   :  { %v12722_v32 = vpop.f32.mrb[36].mxu0  ;;  %v12743_v4 = vsub.f32 0.0, %v12737_v16  ;;  %18775 = vrcp.f32 %v12080_v55 }
0x449f   :  { %v18766_v51 = vpop.eup %18765  ;;  %v12723_v3 = vadd.f32 %v18858_v26, %v12722_v32  ;;  %v12724_v20 = vpop.f32.mrb[37].mxu0 }
0x44a0   :  { %v12749_v41 = vmul.f32 0.125, %v12743_v4  ;;  %v12738_v9 = vmul.f32 %v18766_v51, %v18764_v7  ;;  %v18768_v31 = vpop.eup %18767 }
0x44a1   :  { %18777 = vtanh.f32 %v12723_v3 }
0x44a2   :  { %v12727_v44 = vpop.f32.mrb[38].mxu0  ;;  %v12755_v23 = vadd.f32 %v12749_v41, %v23399_v40  ;;  %v12744_v19 = vsub.f32 0.0, %v12738_v9  ;;  %18779 = vrcp.f32 %v12081_v17 }
0x44a3   :  { %v18770_v57 = vpop.eup %18769  ;;  %v12728_v59 = vadd.f32 %v18858_v26, %v12727_v44  ;;  %v12729_v2 = vpop.f32.mrb[39].mxu0 }
0x44a4   :  { %12911 = vrot.lane.b32.xlu0 %v12755_v23, %s18873_s17  ;;  %v12750_v28 = vmul.f32 0.125, %v12744_v19  ;;  %v12739_v15 = vmul.f32 %v18770_v57, %v18768_v31  ;;  %v18772_v6 = vpop.eup %18771  ;;  %v12768_v26 = vpop.permute.xlu1 %12767  ;;  %v24337_v31 = vld [vmem:[#allocation15_spill] sm:$0xff]  ;;  %v24338_v2 = vld [vmem:[#allocation14_spill] sm:$0xff] }
0x44a5   :  { %18781 = vtanh.f32 %v12728_v59  ;;  %v12929_v44 = vsel %vm3859_vm4, %v24337_v31, %v12768_v26  ;;  %v24340_v26 = vld [vmem:[#allocation2_spill] sm:$0xff] }
0x44a6   :  { %v12756_v14 = vadd.f32 %v12750_v28, %v23402_v12  ;;  %v12745_v48 = vsub.f32 0.0, %v12739_v15 }
0x44a7   :  { %v18774_v1 = vpop.eup %18773 }
0x44a8   :  { %12913 = vrot.lane.b32.xlu1 %v12756_v14, %s18873_s17  ;;  %v12751_v0 = vmul.f32 0.125, %v12745_v48  ;;  %v12740_v40 = vmul.f32 %v18774_v1, %v18772_v6  ;;  %v18776_v24 = vpop.eup %18775  ;;  %v12792_v5 = vpop.permute.xlu1 %12791 }
0x44a9   :  { %v12935_v23 = vsel %vm3866_vm5, %v12929_v44, %v12792_v5 }
0x44aa   :  { %v12757_v30 = vadd.f32 %v12751_v0, %v23407_v49  ;;  %v12746_v18 = vsub.f32 0.0, %v12740_v40  ;;  %v12770_v49 = vpop.permute.xlu0 %12769 }
0x44ab   :  { %v18778_v62 = vpop.eup %18777  ;;  %v12930_v28 = vsel %vm3859_vm4, %v24338_v2, %v12770_v49 }
0x44ac   :  { %12915 = vrot.lane.b32.xlu0 %v12757_v30, %s18873_s17  ;;  %v12752_v37 = vmul.f32 0.125, %v12746_v18  ;;  %v12741_v13 = vmul.f32 %v18778_v62, %v18776_v24  ;;  %v18780_v34 = vpop.eup %18779  ;;  %v12816_v21 = vpop.permute.xlu1 %12815  ;;  %v24339_v30 = vld [vmem:[#allocation7_spill] sm:$0xff] }
0x44ad   :  { %v12941_v57 = vsel %vm3873_vm6, %v12935_v23, %v12816_v21 }
0x44ae   :  { %v12758_v58 = vadd.f32 %v12752_v37, %v23410_v11  ;;  %v12747_v43 = vsub.f32 0.0, %v12741_v13  ;;  %v12794_v46 = vpop.permute.xlu0 %12793 }
0x44af   :  { %v18782_v12 = vpop.eup %18781  ;;  %v12936_v6 = vsel %vm3866_vm5, %v12930_v28, %v12794_v46  ;;  %v24341_v46 = vld [vmem:[#allocation4_spill] sm:$0xff] }
0x44b0   :  { %12917 = vrot.lane.b32.xlu1 %v12758_v58, %s18873_s17  ;;  %12897 = vrot.lane.b32.xlu0 %v23418_v47, %s18872_s6  ;;  %v12753_v27 = vmul.f32 0.125, %v12747_v43  ;;  %v12742_v38 = vmul.f32 %v18782_v12, %v18780_v34  ;;  %v12840_v22 = vpop.permute.xlu1 %12839 }
0x44b1   :  { %v12947_v59 = vsel %vm3880_vm7, %v12941_v57, %v12840_v22  ;;  %v13092_v57 = vld [vmem:[%s24025_s16 + $0x10] sm:$0xff] }
0x44b2   :  { %v12759_v29 = vadd.f32 %v12753_v27, %v23415_v52  ;;  %v12748_v39 = vsub.f32 0.0, %v12742_v38  ;;  %v12818_v33 = vpop.permute.xlu0 %12817 }
0x44b3   :  { %v12942_v0 = vsel %vm3873_vm6, %v12936_v6, %v12818_v33 }
0x44b4   :  { %12919 = vrot.lane.b32.xlu1 %v12759_v29, %s18873_s17  ;;  %v12754_v63 = vmul.f32 0.125, %v12748_v39  ;;  %v12842_v36 = vpop.permute.xlu1 %12841 }
0x44b5   :  { %v12948_v24 = vsel %vm3880_vm7, %v12942_v0, %v12842_v36 }
0x44b6   :  { %v12760_v11 = vadd.f32 %v12754_v63, %v23418_v47  ;;  %v12772_v53 = vpop.permute.xlu0 %12771 }
0x44b7   :  { %v12931_v18 = vsel %vm3859_vm4, %v24339_v30, %v12772_v53 }
0x44b8   :  { %12921 = vrot.lane.b32.xlu0 %v12760_v11, %s18873_s17  ;;  %v12774_v50 = vpop.permute.xlu1 %12773 }
0x44b9   :  { %v12932_v27 = vsel %vm3859_vm4, %v24340_v26, %v12774_v50 }
0x44ba   :  { %v12864_v61 = vpop.permute.xlu0 %12863 }
0x44bb   :  { %v12953_v15 = vsel %vm3893_vm8, %v12947_v59, %v12864_v61  ;;  %v13093_v59 = vld [vmem:[%s24025_s16 + $0x18] sm:$0xff] }
0x44bc   :  { %v12866_v42 = vpop.permute.xlu1 %12865 }
0x44bd   :  { %v12954_v62 = vsel %vm3893_vm8, %v12948_v24, %v12866_v42  ;;  %v24342_v42 = vld [vmem:[#allocation3_spill] sm:$0xff] }
0x44be   :  { %v12796_v56 = vpop.permute.xlu0 %12795 }
0x44bf   :  { %v12937_v37 = vsel %vm3866_vm5, %v12931_v18, %v12796_v56 }
0x44c0   :  { %v12798_v35 = vpop.permute.xlu1 %12797 }
0x44c1   :  { %v12938_v49 = vsel %vm3866_vm5, %v12932_v27, %v12798_v35 }
0x44c2   :  { %v12888_v52 = vpop.permute.xlu0 %12887 }
0x44c3   :  { %v12960_v14 = vsel %vm12959_vm10, %v12953_v15, %v12888_v52 }
0x44c4   :  { %v12890_v10 = vpop.permute.xlu1 %12889 }
0x44c5   :  { %v12961_v13 = vsel %vm12959_vm10, %v12954_v62, %v12890_v10 }
0x44c6   :  { %v12820_v45 = vpop.permute.xlu0 %12819 }
0x44c7   :  { %v12943_v58 = vsel %vm3873_vm6, %v12937_v37, %v12820_v45 }
0x44c8   :  { %v12822_v8 = vpop.permute.xlu1 %12821 }
0x44c9   :  { %v12944_v63 = vsel %vm3873_vm6, %v12938_v49, %v12822_v8 }
0x44ca   :  { %v12844_v54 = vpop.permute.xlu0 %12843 }
0x44cb   :  { %v12949_v12 = vsel %vm3880_vm7, %v12943_v58, %v12844_v54 }
0x44cc   :  { %v12846_v47 = vpop.permute.xlu1 %12845 }
0x44cd   :  { %v12950_v11 = vsel %vm3880_vm7, %v12944_v63, %v12846_v47 }
0x44ce   :  { %v12776_v25 = vpop.permute.xlu0 %12775 }
0x44cf   :  { %v12933_v21 = vsel %vm3859_vm4, %v24341_v46, %v12776_v25 }
0x44d0   :  { %v12778_v16 = vpop.permute.xlu1 %12777 }
0x44d1   :  { %v12934_v52 = vsel %vm3859_vm4, %v24342_v42, %v12778_v16 }
0x44d2   :  { %v12868_v55 = vpop.permute.xlu0 %12867 }
0x44d3   :  { %v12955_v38 = vsel %vm3893_vm8, %v12949_v12, %v12868_v55 }
0x44d4   :  { %v12870_v7 = vpop.permute.xlu1 %12869 }
0x44d5   :  { %v12956_v33 = vsel %vm3893_vm8, %v12950_v11, %v12870_v7 }
0x44d6   :  { %v12800_v60 = vpop.permute.xlu0 %12799 }
0x44d7   :  { %v12939_v22 = vsel %vm3866_vm5, %v12933_v21, %v12800_v60 }
0x44d8   :  { %v12802_v4 = vpop.permute.xlu1 %12801 }
0x44d9   :  { %v12940_v45 = vsel %vm3866_vm5, %v12934_v52, %v12802_v4  ;;  %v13090_v4 = vld [vmem:[%s24025_s16] sm:$0xff] }
0x44da   :  { %v12892_v32 = vpop.permute.xlu0 %12891 }
0x44db   :  { %v12962_v29 = vsel %vm12959_vm10, %v12955_v38, %v12892_v32 }
0x44dc   :  { %v12894_v3 = vpop.permute.xlu1 %12893 }
0x44dd   :  { %v12963_v53 = vsel %vm12959_vm10, %v12956_v33, %v12894_v3 }
0x44de   :  { %v12824_v51 = vpop.permute.xlu0 %12823 }
0x44df   :  { %v12945_v61 = vsel %vm3873_vm6, %v12939_v22, %v12824_v51 }
0x44e0   :  { %v12826_v17 = vpop.permute.xlu1 %12825 }
0x44e1   :  { %v12946_v25 = vsel %vm3873_vm6, %v12940_v45, %v12826_v17 }
0x44e2   :  { %v12848_v20 = vpop.permute.xlu0 %12847 }
0x44e3   :  { %v12951_v56 = vsel %vm3880_vm7, %v12945_v61, %v12848_v20 }
0x44e4   :  { %v12872_v9 = vpop.permute.xlu1 %12871 }
0x44e5   :  { %v12957_v35 = vsel %vm3893_vm8, %v12951_v56, %v12872_v9 }
0x44e6   :  { %v12850_v41 = vpop.permute.xlu0 %12849 }
0x44e7   :  { %v12952_v55 = vsel %vm3880_vm7, %v12946_v25, %v12850_v41 }
0x44e8   :  { %v12896_v48 = vpop.permute.xlu1 %12895 }
0x44e9   :  { %v12964_v10 = vsel %vm12959_vm10, %v12957_v35, %v12896_v48 }
0x44ea   :  { %v12874_v19 = vpop.permute.xlu0 %12873 }
0x44eb   :  { %v12958_v60 = vsel %vm3893_vm8, %v12952_v55, %v12874_v19  ;;  %v13091_v19 = vld [vmem:[%s24025_s16 + $0x8] sm:$0xff] }
0x4516   :  { %v12912_v1 = vpop.permute.xlu0 %12911 }
0x4517   :  { %v12967_v40 = vsel %vm12966_vm11, %v12960_v14, %v12912_v1 }
0x4518   :  { %16368 = vmatprep.mubr.msk.f32.mxu1 %vm3075_vm0, %v12967_v40 }
0x451a   :  { %v12914_v34 = vpop.permute.xlu1 %12913 }
0x451b   :  { %v12968_v43 = vsel %vm12966_vm11, %v12961_v13, %v12914_v34 }
0x451c   :  { %16369 = vmatmul.mubr.msk.f32.vlgmr.msra.gmra.mrb[14].mxu1 %vm3075_vm0, %v12968_v43 }
0x451e   :  { %v12916_v39 = vpop.permute.xlu0 %12915 }
0x451f   :  { %v12969_v5 = vsel %vm12966_vm11, %v12962_v29, %v12916_v39 }
0x4520   :  { %16371 = vmatprep.mubr.msk.f32.mxu1 %vm3075_vm0, %v12969_v5 }
0x4522   :  { %v12918_v36 = vpop.permute.xlu1 %12917  ;;  %v12898_v54 = vpop.permute.xlu0 %12897 }
0x4523   :  { %v12970_v50 = vsel %vm12966_vm11, %v12963_v53, %v12918_v36  ;;  %v12965_v16 = vsel %vm12959_vm10, %v12958_v60, %v12898_v54 }
0x4524   :  { %16372 = vmatmul.mubr.msk.f32.gmra.mrb[16].mxu1 %vm3075_vm0, %v12970_v50 }
0x4526   :  { %v12920_v8 = vpop.permute.xlu1 %12919 }
0x4527   :  { %v12971_v47 = vsel %vm12966_vm11, %v12964_v10, %v12920_v8 }
0x4528   :  { %16374 = vmatprep.mubr.msk.f32.mxu1 %vm3075_vm0, %v12971_v47 }
0x452a   :  { %v12922_v7 = vpop.permute.xlu0 %12921 }
0x452b   :  { %v12972_v32 = vsel %vm12966_vm11, %v12965_v16, %v12922_v7 }
0x452c   :  { %16375 = vmatmul.mubr.msk.f32.gmra.mrb[18].mxu1 %vm3075_vm0, %v12972_v32 }
0x452d   :  { %16389 = vmatprep.mubr.msk.f32.mxu1 %vm3322_vm2, %v13090_v4 }
0x45ef   :  { %v16370_v51 = vpop.f32.mrb[14].mxu1 }
0x45f0   :  { %v13061_v3 = vpop.f32.mrb[15].mxu1 }
0x45f1   :  { %v17881_v20 = vpack.c.bf16 %v16370_v51, %v13061_v3 }
0x45f3   :  { %17882 = vmatprep.subr.bf16.mxu1 %v17881_v20 }
0x45f4   :  { %17884 = vmatpush3.bf16.msra.mxu1 %v17881_v20 }
0x45f7   :  { %v16373_v17 = vpop.f32.mrb[16].mxu1 }
0x45f8   :  { %v13071_v41 = vpop.f32.mrb[17].mxu1 }
0x45f9   :  { %v17885_v9 = vpack.c.bf16 %v16373_v17, %v13071_v41 }
0x45fb   :  { %17886 = vmatprep.subr.bf16.mxu1 %v17885_v9 }
0x45fc   :  { %17888 = vmatpush3.bf16.msra.mxu1 %v17885_v9 }
0x45ff   :  { %v16376_v31 = vpop.f32.mrb[18].mxu1 }
0x4600   :  { %v13081_v44 = vpop.f32.mrb[19].mxu1 }
0x4601   :  { %v17889_v23 = vpack.c.bf16 %v16376_v31, %v13081_v44 }
0x4603   :  { %17890 = vmatprep.subr.bf16.mxu1 %v17889_v23 }
0x4604   :  { %17892 = vmatpush3.bf16.msra.mxu1 %v17889_v23 }
0x4607   :  { %16390 = vmatmul.mubr.msk.f32.vlgmr.msra.gmra.mrb[20].mxu1 %vm3322_vm2, %v13091_v19 }
0x4608   :  { %16392 = vmatprep.mubr.msk.f32.mxu1 %vm3322_vm2, %v13092_v57 }
0x460b   :  { %16393 = vmatmul.mubr.msk.f32.gmra.mrb[22].mxu1 %vm3322_vm2, %v13093_v59 }
0x46da   :  { %v16391_v2 = vpop.f32.mrb[20].mxu1 }
0x46db   :  { %13192 = vst.msk [vmem:[%s24026_s18 + $0x8] sm:$0xff] %vm3866_vm5, %v16391_v2  ;;  %v13172_v28 = vpop.f32.mrb[21].mxu1 }
0x46dc   :  { %13191 = vst.msk [vmem:[%s24026_s18] sm:$0xff] %vm3866_vm5, %v13172_v28 }
0x46de   :  { %v16394_v15 = vpop.f32.mrb[22].mxu1 }
0x46df   :  { %13194 = vst.msk [vmem:[%s24026_s18 + $0x18] sm:$0xff] %vm3866_vm5, %v16394_v15  ;;  %v13182_v6 = vpop.f32.mrb[23].mxu1 }
0x46e0   :  { %13193 = vst.msk [vmem:[%s24026_s18 + $0x10] sm:$0xff] %vm3866_vm5, %v13182_v6 }

</bundles_post_ra>
